<compile_context>
chip_gen: v6e
topology: v6e:2x2x1
jax: 0.10.0
libtpu: 0.0.40
codegen_flags: <defaults>
</compile_context>

<pallas_src>
import functools
import math

import jax
import jax.numpy as jnp
from jax.experimental import pallas as pl
from jax.experimental.pallas import tpu as pltpu


_LN_EPS = 1e-5
_VMEM_LIMIT = 64 * 1024 * 1024


# ----------------------------------------------------------------------------
# In-kernel helpers (traced inside the fused kernels)
# ----------------------------------------------------------------------------
def _mha(q, k, v, prefs, num_heads):
    """Multi-head attention on one batch element.

    q: (Nq, C) f32, k/v: (Nk, C) f32.
    prefs = (wq, bq, wk, bk, wv, bv, wo, bo) refs with head-split weights:
      wq/wk/wv: (H, C, d) bf16, bq/bk/bv: (H, 1, d) f32,
      wo: (H, d, C) bf16, bo: (1, C) f32.
    Returns (Nq, C) f32.
    """
    wq_ref, bq_ref, wk_ref, bk_ref, wv_ref, bv_ref, wo_ref, bo_ref = prefs
    d = wq_ref.shape[2]
    c_out = wo_ref.shape[2]
    scale = 1.0 / math.sqrt(d)

    q_b = q.astype(jnp.bfloat16)
    k_b = k.astype(jnp.bfloat16)
    v_b = v.astype(jnp.bfloat16)

    acc = jnp.zeros((q.shape[0], c_out), jnp.float32)
    for h in range(num_heads):  # static unroll; num_heads is small
        # Per-head projections with pre-split weights (no lane slicing of activations).
        qh = jnp.dot(q_b, wq_ref[h], preferred_element_type=jnp.float32) + bq_ref[h]
        kh = jnp.dot(k_b, wk_ref[h], preferred_element_type=jnp.float32) + bk_ref[h]
        vh = jnp.dot(v_b, wv_ref[h], preferred_element_type=jnp.float32) + bv_ref[h]

        # (Nq, Nk) logits: q @ k^T on the MXU (contraction on dim 1 of both).
        s = jax.lax.dot_general(
            qh.astype(jnp.bfloat16), kh.astype(jnp.bfloat16),
            (((1,), (1,)), ((), ())),
            preferred_element_type=jnp.float32) * scale

        # Softmax in f32; denom via approx reciprocal on the EUP.
        s = s - jnp.max(s, axis=-1, keepdims=True)
        p = jnp.exp(s)
        p = p * pl.reciprocal(jnp.sum(p, axis=-1, keepdims=True), approx=True)

        oh = jnp.dot(p.astype(jnp.bfloat16), vh.astype(jnp.bfloat16),
                     preferred_element_type=jnp.float32)            # (Nq, d)
        # Head-merge folded into the output projection: accumulate through Wo[h].
        acc = acc + jnp.dot(oh.astype(jnp.bfloat16), wo_ref[h],
                            preferred_element_type=jnp.float32)      # (Nq, C)
    return acc + bo_ref[...]


def _layernorm(x, w_ref, b_ref):
    mean = jnp.mean(x, axis=-1, keepdims=True)
    xc = x - mean
    var = jnp.mean(xc * xc, axis=-1, keepdims=True)
    y = xc * jax.lax.rsqrt(var + _LN_EPS)
    return y * w_ref[...] + b_ref[...]


def _mlp(x, w1_ref, b1_ref, w2_ref, b2_ref):
    h = jnp.dot(x.astype(jnp.bfloat16), w1_ref[...],
                preferred_element_type=jnp.float32) + b1_ref[...]
    h = jnp.maximum(h, 0.0)  # ReLU
    return jnp.dot(h.astype(jnp.bfloat16), w2_ref[...],
                   preferred_element_type=jnp.float32) + b2_ref[...]


# ----------------------------------------------------------------------------
# Fused kernels
# ----------------------------------------------------------------------------
def _two_way_block_kernel(*refs, num_heads, skip_first_layer_pe):
    """One full TwoWayAttentionBlock for a single batch element, fully in VMEM."""
    q_ref, k_ref, qpe_ref, kpe_ref = refs[0:4]
    sa = refs[4:12]
    t2i = refs[12:20]
    w1_ref, b1_ref, w2_ref, b2_ref = refs[20:24]
    i2t = refs[24:32]
    n1w, n1b, n2w, n2b, n3w, n3b, n4w, n4b = refs[32:40]
    q_out_ref, k_out_ref = refs[40:42]

    queries = q_ref[0].astype(jnp.float32)   # (Nq, C)
    keys = k_ref[0].astype(jnp.float32)      # (Nk, C)
    qpe = qpe_ref[0].astype(jnp.float32)
    kpe = kpe_ref[0].astype(jnp.float32)

    # (1) self attention on the sparse tokens (+ residual, except first layer).
    if skip_first_layer_pe:
        queries = _mha(queries, queries, queries, sa, num_heads)
    else:
        q = queries + qpe
        queries = queries + _mha(q, q, queries, sa, num_heads)
    queries = _layernorm(queries, n1w, n1b)

    # (2) cross attention, tokens -> image.
    q = queries + qpe
    k = keys + kpe
    queries = queries + _mha(q, k, keys, t2i, num_heads)
    queries = _layernorm(queries, n2w, n2b)

    # (3) MLP on the sparse tokens.
    queries = queries + _mlp(queries, w1_ref, b1_ref, w2_ref, b2_ref)
    queries = _layernorm(queries, n3w, n3b)

    # (4) cross attention, image -> tokens.
    q = queries + qpe
    k = keys + kpe
    keys = keys + _mha(k, q, queries, i2t, num_heads)
    keys = _layernorm(keys, n4w, n4b)

    q_out_ref[0] = queries.astype(q_out_ref.dtype)
    k_out_ref[0] = keys.astype(k_out_ref.dtype)


def _final_attn_kernel(*refs, num_heads):
    """Final token->image attention + final LayerNorm, fused."""
    q_ref, k_ref, qpe_ref, kpe_ref = refs[0:4]
    fa = refs[4:12]
    nfw, nfb = refs[12:14]
    q_out_ref = refs[14]

    queries = q_ref[0].astype(jnp.float32)
    keys = k_ref[0].astype(jnp.float32)
    q = queries + qpe_ref[0].astype(jnp.float32)
    k = keys + kpe_ref[0].astype(jnp.float32)
    queries = queries + _mha(q, k, keys, fa, num_heads)
    queries = _layernorm(queries, nfw, nfb)
    q_out_ref[0] = queries.astype(q_out_ref.dtype)


# ----------------------------------------------------------------------------
# pallas_call wrappers
# ----------------------------------------------------------------------------
def _batched_spec(n, c):
    return pl.BlockSpec((1, n, c), lambda b: (b, 0, 0))


def _full_spec(shape):
    ndim = len(shape)
    return pl.BlockSpec(shape, lambda b, _n=ndim: (0,) * _n)


def _attn_param_list(p):
    return [p["wq"], p["bq"], p["wk"], p["bk"], p["wv"], p["bv"], p["wo"], p["bo"]]


def fused_two_way_block(queries, keys, query_pe, key_pe, lp, num_heads,
                        skip_first_layer_pe):
    B, Nq, C = queries.shape
    Nk = keys.shape[1]

    param_arrays = (
        _attn_param_list(lp["self_attn"]) + _attn_param_list(lp["cross_t2i"])
        + [lp["mlp"]["w1"], lp["mlp"]["b1"], lp["mlp"]["w2"], lp["mlp"]["b2"]]
        + _attn_param_list(lp["cross_i2t"])
        + [lp["norm1"]["w"], lp["norm1"]["b"], lp["norm2"]["w"], lp["norm2"]["b"],
           lp["norm3"]["w"], lp["norm3"]["b"], lp["norm4"]["w"], lp["norm4"]["b"]]
    )

    in_specs = ([_batched_spec(Nq, C), _batched_spec(Nk, C),
                 _batched_spec(Nq, C), _batched_spec(Nk, C)]
                + [_full_spec(a.shape) for a in param_arrays])

    return pl.pallas_call(
        functools.partial(_two_way_block_kernel, num_heads=num_heads,
                          skip_first_layer_pe=skip_first_layer_pe),
        out_shape=(jax.ShapeDtypeStruct((B, Nq, C), queries.dtype),
                   jax.ShapeDtypeStruct((B, Nk, C), keys.dtype)),
        grid=(B,),
        in_specs=in_specs,
        out_specs=(_batched_spec(Nq, C), _batched_spec(Nk, C)),
        compiler_params=pltpu.CompilerParams(
            dimension_semantics=("parallel",),
            vmem_limit_bytes=_VMEM_LIMIT),
    )(queries, keys, query_pe, key_pe, *param_arrays)


def fused_final_attn(queries, keys, query_pe, key_pe, attn_p, norm_p, num_heads):
    B, Nq, C = queries.shape
    Nk = keys.shape[1]

    param_arrays = _attn_param_list(attn_p) + [norm_p["w"], norm_p["b"]]
    in_specs = ([_batched_spec(Nq, C), _batched_spec(Nk, C),
                 _batched_spec(Nq, C), _batched_spec(Nk, C)]
                + [_full_spec(a.shape) for a in param_arrays])

    return pl.pallas_call(
        functools.partial(_final_attn_kernel, num_heads=num_heads),
        out_shape=jax.ShapeDtypeStruct((B, Nq, C), queries.dtype),
        grid=(B,),
        in_specs=in_specs,
        out_specs=_batched_spec(Nq, C),
        compiler_params=pltpu.CompilerParams(
            dimension_semantics=("parallel",),
            vmem_limit_bytes=_VMEM_LIMIT),
    )(queries, keys, query_pe, key_pe, *param_arrays)


# ----------------------------------------------------------------------------
# Parameter construction (deterministic, synthetic; PyTorch-like (in, out) layout)
# ----------------------------------------------------------------------------
def _init_linear(key, fan_in, fan_out):
    kw, kb = jax.random.split(key)
    w = jax.random.normal(kw, (fan_in, fan_out), jnp.float32) * 0.02
    b = jax.random.normal(kb, (1, fan_out), jnp.float32) * 0.02
    return w, b


def _init_attention(key, embedding_dim, downsample_rate):
    internal_dim = embedding_dim // downsample_rate
    keys = jax.random.split(key, 4)
    wq, bq = _init_linear(keys[0], embedding_dim, internal_dim)
    wk, bk = _init_linear(keys[1], embedding_dim, internal_dim)
    wv, bv = _init_linear(keys[2], embedding_dim, internal_dim)
    wo, bo = _init_linear(keys[3], internal_dim, embedding_dim)
    return dict(wq=wq, bq=bq, wk=wk, bk=bk, wv=wv, bv=bv, wo=wo, bo=bo)


def _init_layernorm(embedding_dim):
    return dict(w=jnp.ones((1, embedding_dim), jnp.float32),
                b=jnp.zeros((1, embedding_dim), jnp.float32))


def _init_mlp(key, embedding_dim, mlp_dim):
    k1, k2 = jax.random.split(key)
    w1, b1 = _init_linear(k1, embedding_dim, mlp_dim)
    w2, b2 = _init_linear(k2, mlp_dim, embedding_dim)
    return dict(w1=w1, b1=b1, w2=w2, b2=b2)


def init_two_way_transformer(key, depth, embedding_dim, mlp_dim,
                             attention_downsample_rate=2):
    layers = []
    for _ in range(depth):
        key, k0, k1, k2, k3 = jax.random.split(key, 5)
        layers.append(dict(
            self_attn=_init_attention(k0, embedding_dim, 1),
            cross_t2i=_init_attention(k1, embedding_dim, attention_downsample_rate),
            mlp=_init_mlp(k2, embedding_dim, mlp_dim),
            cross_i2t=_init_attention(k3, embedding_dim, attention_downsample_rate),
            norm1=_init_layernorm(embedding_dim),
            norm2=_init_layernorm(embedding_dim),
            norm3=_init_layernorm(embedding_dim),
            norm4=_init_layernorm(embedding_dim),
        ))
    key, kf = jax.random.split(key)
    return dict(
        layers=layers,
        final_attn=_init_attention(kf, embedding_dim, attention_downsample_rate),
        norm_final=_init_layernorm(embedding_dim),
    )


# Head-split + bf16 preparation (done ONCE, outside the hot path).
def _prepare_attention(p, num_heads):
    emb, internal = p["wq"].shape
    d = internal // num_heads

    def split_in(w):    # (C, H*d) -> (H, C, d), bf16 for the MXU
        return w.reshape(emb, num_heads, d).transpose(1, 0, 2).astype(jnp.bfloat16)

    def split_bias(b):  # (1, H*d) -> (H, 1, d), keep f32
        return b.reshape(num_heads, 1, d)

    return dict(
        wq=split_in(p["wq"]), bq=split_bias(p["bq"]),
        wk=split_in(p["wk"]), bk=split_bias(p["bk"]),
        wv=split_in(p["wv"]), bv=split_bias(p["bv"]),
        wo=p["wo"].reshape(num_heads, d, emb).astype(jnp.bfloat16),  # (H, d, C)
        bo=p["bo"],
    )


def _prepare_mlp(p):
    return dict(w1=p["w1"].astype(jnp.bfloat16), b1=p["b1"],
                w2=p["w2"].astype(jnp.bfloat16), b2=p["b2"])


def prepare_params(params, num_heads):
    layers = []
    for lp in params["layers"]:
        layers.append(dict(
            self_attn=_prepare_attention(lp["self_attn"], num_heads),
            cross_t2i=_prepare_attention(lp["cross_t2i"], num_heads),
            mlp=_prepare_mlp(lp["mlp"]),
            cross_i2t=_prepare_attention(lp["cross_i2t"], num_heads),
            norm1=lp["norm1"], norm2=lp["norm2"],
            norm3=lp["norm3"], norm4=lp["norm4"],
        ))
    return dict(layers=layers,
                final_attn=_prepare_attention(params["final_attn"], num_heads),
                norm_final=params["norm_final"])


# ----------------------------------------------------------------------------
# Forward pass (one fused pallas_call per layer + one for the final attention)
# ----------------------------------------------------------------------------
def two_way_transformer(image_embedding, image_pe, point_embedding, params,
                        num_heads):
    bs, c, h, w = image_embedding.shape
    # NCHW -> (B, H*W, C)   (== .flatten(2).permute(0, 2, 1))
    image_embedding = image_embedding.reshape(bs, c, h * w).transpose(0, 2, 1)
    image_pe = image_pe.reshape(bs, c, h * w).transpose(0, 2, 1)

    queries = point_embedding
    keys = image_embedding

    for i, lp in enumerate(params["layers"]):
        queries, keys = fused_two_way_block(
            queries, keys, point_embedding, image_pe, lp, num_heads,
            skip_first_layer_pe=(i == 0))

    queries = fused_final_attn(queries, keys, point_embedding, image_pe,
                               params["final_attn"], params["norm_final"],
                               num_heads)
    return queries, keys


# ----------------------------------------------------------------------------
# Demo
# ----------------------------------------------------------------------------
if __name__ == "__main__":
    depth = 2
    embedding_dim = 32
    num_heads = 2
    mlp_dim = 64
    B, H, W = 2, 8, 8
    n_points = 8

    key = jax.random.PRNGKey(0)
    k_img, k_pe, k_pts, k_params = jax.random.split(key, 4)

    image_embedding = jax.random.normal(k_img, (B, embedding_dim, H, W), jnp.float32)
    image_pe = jax.random.normal(k_pe, (B, embedding_dim, H, W), jnp.float32)
    point_embedding = jax.random.normal(k_pts, (B, n_points, embedding_dim), jnp.float32)

    raw_params = init_two_way_transformer(k_params, depth, embedding_dim, mlp_dim,
                                          attention_downsample_rate=2)
    params = prepare_params(raw_params, num_heads)  # head-split bf16 weights, once

    fwd = jax.jit(functools.partial(two_way_transformer, num_heads=num_heads))
    queries_out, keys_out = fwd(image_embedding, image_pe, point_embedding, params)
    jax.block_until_ready((queries_out, keys_out))

    assert queries_out.shape == (B, n_points, embedding_dim)
    assert keys_out.shape == (B, H * W, embedding_dim)
    assert jnp.all(jnp.isfinite(queries_out)) and jnp.all(jnp.isfinite(keys_out))
    print("KERNEL_OK")
</pallas_src>

<mosaic_0001>
module attributes {stable_mosaic.version = 11 : i64} {
  func.func @_two_way_block_kernel(%arg0: i32, %arg1: memref<1x8x32xf32, #tpu.memory_space<vmem>>, %arg2: memref<1x64x32xf32, #tpu.memory_space<vmem>>, %arg3: memref<1x8x32xf32, #tpu.memory_space<vmem>>, %arg4: memref<1x64x32xf32, #tpu.memory_space<vmem>>, %arg5: memref<2x32x16xbf16, #tpu.memory_space<vmem>>, %arg6: memref<2x1x16xf32, #tpu.memory_space<vmem>>, %arg7: memref<2x32x16xbf16, #tpu.memory_space<vmem>>, %arg8: memref<2x1x16xf32, #tpu.memory_space<vmem>>, %arg9: memref<2x32x16xbf16, #tpu.memory_space<vmem>>, %arg10: memref<2x1x16xf32, #tpu.memory_space<vmem>>, %arg11: memref<2x16x32xbf16, #tpu.memory_space<vmem>>, %arg12: memref<1x32xf32, #tpu.memory_space<vmem>>, %arg13: memref<2x32x8xbf16, #tpu.memory_space<vmem>>, %arg14: memref<2x1x8xf32, #tpu.memory_space<vmem>>, %arg15: memref<2x32x8xbf16, #tpu.memory_space<vmem>>, %arg16: memref<2x1x8xf32, #tpu.memory_space<vmem>>, %arg17: memref<2x32x8xbf16, #tpu.memory_space<vmem>>, %arg18: memref<2x1x8xf32, #tpu.memory_space<vmem>>, %arg19: memref<2x8x32xbf16, #tpu.memory_space<vmem>>, %arg20: memref<1x32xf32, #tpu.memory_space<vmem>>, %arg21: memref<32x64xbf16, #tpu.memory_space<vmem>>, %arg22: memref<1x64xf32, #tpu.memory_space<vmem>>, %arg23: memref<64x32xbf16, #tpu.memory_space<vmem>>, %arg24: memref<1x32xf32, #tpu.memory_space<vmem>>, %arg25: memref<2x32x8xbf16, #tpu.memory_space<vmem>>, %arg26: memref<2x1x8xf32, #tpu.memory_space<vmem>>, %arg27: memref<2x32x8xbf16, #tpu.memory_space<vmem>>, %arg28: memref<2x1x8xf32, #tpu.memory_space<vmem>>, %arg29: memref<2x32x8xbf16, #tpu.memory_space<vmem>>, %arg30: memref<2x1x8xf32, #tpu.memory_space<vmem>>, %arg31: memref<2x8x32xbf16, #tpu.memory_space<vmem>>, %arg32: memref<1x32xf32, #tpu.memory_space<vmem>>, %arg33: memref<1x32xf32, #tpu.memory_space<vmem>>, %arg34: memref<1x32xf32, #tpu.memory_space<vmem>>, %arg35: memref<1x32xf32, #tpu.memory_space<vmem>>, %arg36: memref<1x32xf32, #tpu.memory_space<vmem>>, %arg37: memref<1x32xf32, #tpu.memory_space<vmem>>, %arg38: memref<1x32xf32, #tpu.memory_space<vmem>>, %arg39: memref<1x32xf32, #tpu.memory_space<vmem>>, %arg40: memref<1x32xf32, #tpu.memory_space<vmem>>, %arg41: memref<1x8x32xf32, #tpu.memory_space<vmem>>, %arg42: memref<1x64x32xf32, #tpu.memory_space<vmem>>) attributes {dimension_semantics = [#tpu.dimension_semantics<parallel>], iteration_bounds = array<i64: 2>, scalar_prefetch = 0 : i64, scratch_operands = 0 : i64, tpu.core_type = #tpu.core_type<tc>, window_params = [{transform_indices = @transform_0, window_bounds = array<i64: 1, 8, 32>}, {transform_indices = @transform_1, window_bounds = array<i64: 1, 64, 32>}, {transform_indices = @transform_2, window_bounds = array<i64: 1, 8, 32>}, {transform_indices = @transform_3, window_bounds = array<i64: 1, 64, 32>}, {pipeline_mode = #tpu.pipeline_mode<synchronous>, transform_indices = @transform_4, window_bounds = array<i64: 2, 32, 16>}, {pipeline_mode = #tpu.pipeline_mode<synchronous>, transform_indices = @transform_5, window_bounds = array<i64: 2, 1, 16>}, {pipeline_mode = #tpu.pipeline_mode<synchronous>, transform_indices = @transform_6, window_bounds = array<i64: 2, 32, 16>}, {pipeline_mode = #tpu.pipeline_mode<synchronous>, transform_indices = @transform_7, window_bounds = array<i64: 2, 1, 16>}, {pipeline_mode = #tpu.pipeline_mode<synchronous>, transform_indices = @transform_8, window_bounds = array<i64: 2, 32, 16>}, {pipeline_mode = #tpu.pipeline_mode<synchronous>, transform_indices = @transform_9, window_bounds = array<i64: 2, 1, 16>}, {pipeline_mode = #tpu.pipeline_mode<synchronous>, transform_indices = @transform_10, window_bounds = array<i64: 2, 16, 32>}, {pipeline_mode = #tpu.pipeline_mode<synchronous>, transform_indices = @transform_11, window_bounds = array<i64: 1, 32>}, {pipeline_mode = #tpu.pipeline_mode<synchronous>, transform_indices = @transform_12, window_bounds = array<i64: 2, 32, 8>}, {pipeline_mode = #tpu.pipeline_mode<synchronous>, transform_indices = @transform_13, window_bounds = array<i64: 2, 1, 8>}, {pipeline_mode = #tpu.pipeline_mode<synchronous>, transform_indices = @transform_14, window_bounds = array<i64: 2, 32, 8>}, {pipeline_mode = #tpu.pipeline_mode<synchronous>, transform_indices = @transform_15, window_bounds = array<i64: 2, 1, 8>}, {pipeline_mode = #tpu.pipeline_mode<synchronous>, transform_indices = @transform_16, window_bounds = array<i64: 2, 32, 8>}, {pipeline_mode = #tpu.pipeline_mode<synchronous>, transform_indices = @transform_17, window_bounds = array<i64: 2, 1, 8>}, {pipeline_mode = #tpu.pipeline_mode<synchronous>, transform_indices = @transform_18, window_bounds = array<i64: 2, 8, 32>}, {pipeline_mode = #tpu.pipeline_mode<synchronous>, transform_indices = @transform_19, window_bounds = array<i64: 1, 32>}, {pipeline_mode = #tpu.pipeline_mode<synchronous>, transform_indices = @transform_20, window_bounds = array<i64: 32, 64>}, {pipeline_mode = #tpu.pipeline_mode<synchronous>, transform_indices = @transform_21, window_bounds = array<i64: 1, 64>}, {pipeline_mode = #tpu.pipeline_mode<synchronous>, transform_indices = @transform_22, window_bounds = array<i64: 64, 32>}, {pipeline_mode = #tpu.pipeline_mode<synchronous>, transform_indices = @transform_23, window_bounds = array<i64: 1, 32>}, {pipeline_mode = #tpu.pipeline_mode<synchronous>, transform_indices = @transform_24, window_bounds = array<i64: 2, 32, 8>}, {pipeline_mode = #tpu.pipeline_mode<synchronous>, transform_indices = @transform_25, window_bounds = array<i64: 2, 1, 8>}, {pipeline_mode = #tpu.pipeline_mode<synchronous>, transform_indices = @transform_26, window_bounds = array<i64: 2, 32, 8>}, {pipeline_mode = #tpu.pipeline_mode<synchronous>, transform_indices = @transform_27, window_bounds = array<i64: 2, 1, 8>}, {pipeline_mode = #tpu.pipeline_mode<synchronous>, transform_indices = @transform_28, window_bounds = array<i64: 2, 32, 8>}, {pipeline_mode = #tpu.pipeline_mode<synchronous>, transform_indices = @transform_29, window_bounds = array<i64: 2, 1, 8>}, {pipeline_mode = #tpu.pipeline_mode<synchronous>, transform_indices = @transform_30, window_bounds = array<i64: 2, 8, 32>}, {pipeline_mode = #tpu.pipeline_mode<synchronous>, transform_indices = @transform_31, window_bounds = array<i64: 1, 32>}, {pipeline_mode = #tpu.pipeline_mode<synchronous>, transform_indices = @transform_32, window_bounds = array<i64: 1, 32>}, {pipeline_mode = #tpu.pipeline_mode<synchronous>, transform_indices = @transform_33, window_bounds = array<i64: 1, 32>}, {pipeline_mode = #tpu.pipeline_mode<synchronous>, transform_indices = @transform_34, window_bounds = array<i64: 1, 32>}, {pipeline_mode = #tpu.pipeline_mode<synchronous>, transform_indices = @transform_35, window_bounds = array<i64: 1, 32>}, {pipeline_mode = #tpu.pipeline_mode<synchronous>, transform_indices = @transform_36, window_bounds = array<i64: 1, 32>}, {pipeline_mode = #tpu.pipeline_mode<synchronous>, transform_indices = @transform_37, window_bounds = array<i64: 1, 32>}, {pipeline_mode = #tpu.pipeline_mode<synchronous>, transform_indices = @transform_38, window_bounds = array<i64: 1, 32>}, {pipeline_mode = #tpu.pipeline_mode<synchronous>, transform_indices = @transform_39, window_bounds = array<i64: 1, 32>}, {transform_indices = @transform_40, window_bounds = array<i64: 1, 8, 32>}, {transform_indices = @transform_41, window_bounds = array<i64: 1, 64, 32>}]} {
    %c0 = arith.constant 0 : index
    %c0_0 = arith.constant 0 : index
    %c0_1 = arith.constant 0 : index
    %0 = vector.load %arg1[%c0, %c0_0, %c0_1] : memref<1x8x32xf32, #tpu.memory_space<vmem>>, vector<1x8x32xf32>
    %1 = vector.shape_cast %0 : vector<1x8x32xf32> to vector<8x32xf32>
    %c0_2 = arith.constant 0 : index
    %c0_3 = arith.constant 0 : index
    %c0_4 = arith.constant 0 : index
    %2 = vector.load %arg2[%c0_2, %c0_3, %c0_4] : memref<1x64x32xf32, #tpu.memory_space<vmem>>, vector<1x64x32xf32>
    %3 = vector.shape_cast %2 : vector<1x64x32xf32> to vector<64x32xf32>
    %c0_5 = arith.constant 0 : index
    %c0_6 = arith.constant 0 : index
    %c0_7 = arith.constant 0 : index
    %4 = vector.load %arg3[%c0_5, %c0_6, %c0_7] : memref<1x8x32xf32, #tpu.memory_space<vmem>>, vector<1x8x32xf32>
    %5 = vector.shape_cast %4 : vector<1x8x32xf32> to vector<8x32xf32>
    %c0_8 = arith.constant 0 : index
    %c0_9 = arith.constant 0 : index
    %c0_10 = arith.constant 0 : index
    %6 = vector.load %arg4[%c0_8, %c0_9, %c0_10] : memref<1x64x32xf32, #tpu.memory_space<vmem>>, vector<1x64x32xf32>
    %7 = vector.shape_cast %6 : vector<1x64x32xf32> to vector<64x32xf32>
    %8 = arith.truncf %1 : vector<8x32xf32> to vector<8x32xbf16>
    %9 = arith.truncf %1 : vector<8x32xf32> to vector<8x32xbf16>
    %10 = arith.truncf %1 : vector<8x32xf32> to vector<8x32xbf16>
    %cst = arith.constant 0.000000e+00 : f32
    %11 = vector.broadcast %cst : f32 to vector<8x32xf32>
    %c0_11 = arith.constant 0 : index
    %c0_12 = arith.constant 0 : index
    %c0_13 = arith.constant 0 : index
    %12 = vector.load %arg5[%c0_11, %c0_12, %c0_13] : memref<2x32x16xbf16, #tpu.memory_space<vmem>>, vector<1x32x16xbf16>
    %13 = vector.shape_cast %12 : vector<1x32x16xbf16> to vector<32x16xbf16>
    %cst_14 = arith.constant dense<0.000000e+00> : vector<8x16xf32>
    %14 = tpu.matmul %8, %13, %cst_14 {dimension_numbers = #tpu.dot_dimension_numbers<[1], [0], [0], [1], [0, 0, 1, 1], [], []>} : vector<8x32xbf16>, vector<32x16xbf16>, vector<8x16xf32> -> vector<8x16xf32>
    %c0_15 = arith.constant 0 : index
    %c0_16 = arith.constant 0 : index
    %c0_17 = arith.constant 0 : index
    %15 = vector.load %arg6[%c0_15, %c0_16, %c0_17] : memref<2x1x16xf32, #tpu.memory_space<vmem>>, vector<1x1x16xf32>
    %16 = vector.shape_cast %15 : vector<1x1x16xf32> to vector<1x16xf32>
    %17 = vector.broadcast %16 : vector<1x16xf32> to vector<8x16xf32>
    %18 = arith.addf %14, %17 : vector<8x16xf32>
    %c0_18 = arith.constant 0 : index
    %c0_19 = arith.constant 0 : index
    %c0_20 = arith.constant 0 : index
    %19 = vector.load %arg7[%c0_18, %c0_19, %c0_20] : memref<2x32x16xbf16, #tpu.memory_space<vmem>>, vector<1x32x16xbf16>
    %20 = vector.shape_cast %19 : vector<1x32x16xbf16> to vector<32x16xbf16>
    %cst_21 = arith.constant dense<0.000000e+00> : vector<8x16xf32>
    %21 = tpu.matmul %9, %20, %cst_21 {dimension_numbers = #tpu.dot_dimension_numbers<[1], [0], [0], [1], [0, 0, 1, 1], [], []>} : vector<8x32xbf16>, vector<32x16xbf16>, vector<8x16xf32> -> vector<8x16xf32>
    %c0_22 = arith.constant 0 : index
    %c0_23 = arith.constant 0 : index
    %c0_24 = arith.constant 0 : index
    %22 = vector.load %arg8[%c0_22, %c0_23, %c0_24] : memref<2x1x16xf32, #tpu.memory_space<vmem>>, vector<1x1x16xf32>
    %23 = vector.shape_cast %22 : vector<1x1x16xf32> to vector<1x16xf32>
    %24 = vector.broadcast %23 : vector<1x16xf32> to vector<8x16xf32>
    %25 = arith.addf %21, %24 : vector<8x16xf32>
    %c0_25 = arith.constant 0 : index
    %c0_26 = arith.constant 0 : index
    %c0_27 = arith.constant 0 : index
    %26 = vector.load %arg9[%c0_25, %c0_26, %c0_27] : memref<2x32x16xbf16, #tpu.memory_space<vmem>>, vector<1x32x16xbf16>
    %27 = vector.shape_cast %26 : vector<1x32x16xbf16> to vector<32x16xbf16>
    %cst_28 = arith.constant dense<0.000000e+00> : vector<8x16xf32>
    %28 = tpu.matmul %10, %27, %cst_28 {dimension_numbers = #tpu.dot_dimension_numbers<[1], [0], [0], [1], [0, 0, 1, 1], [], []>} : vector<8x32xbf16>, vector<32x16xbf16>, vector<8x16xf32> -> vector<8x16xf32>
    %c0_29 = arith.constant 0 : index
    %c0_30 = arith.constant 0 : index
    %c0_31 = arith.constant 0 : index
    %29 = vector.load %arg10[%c0_29, %c0_30, %c0_31] : memref<2x1x16xf32, #tpu.memory_space<vmem>>, vector<1x1x16xf32>
    %30 = vector.shape_cast %29 : vector<1x1x16xf32> to vector<1x16xf32>
    %31 = vector.broadcast %30 : vector<1x16xf32> to vector<8x16xf32>
    %32 = arith.addf %28, %31 : vector<8x16xf32>
    %33 = arith.truncf %18 : vector<8x16xf32> to vector<8x16xbf16>
    %34 = arith.truncf %25 : vector<8x16xf32> to vector<8x16xbf16>
    %cst_32 = arith.constant dense<0.000000e+00> : vector<8x8xf32>
    %35 = tpu.matmul %33, %34, %cst_32 {dimension_numbers = #tpu.dot_dimension_numbers<[1], [1], [0], [0], [0, 0, 1, 0], [], []>} : vector<8x16xbf16>, vector<8x16xbf16>, vector<8x8xf32> -> vector<8x8xf32>
    %cst_33 = arith.constant 2.500000e-01 : f32
    %36 = vector.broadcast %cst_33 : f32 to vector<8x8xf32>
    %37 = arith.mulf %35, %36 : vector<8x8xf32>
    %cst_34 = arith.constant dense<0xFF800000> : vector<8xf32>
    %38 = vector.multi_reduction <maximumf>, %37, %cst_34 [1] : vector<8x8xf32> to vector<8xf32>
    %39 = vector.shape_cast %38 : vector<8xf32> to vector<8x1xf32>
    %40 = vector.broadcast %39 : vector<8x1xf32> to vector<8x8xf32>
    %41 = arith.subf %37, %40 : vector<8x8xf32>
    %42 = math.exp %41 : vector<8x8xf32>
    %cst_35 = arith.constant dense<0.000000e+00> : vector<8xf32>
    %43 = vector.multi_reduction <add>, %42, %cst_35 [1] : vector<8x8xf32> to vector<8xf32>
    %44 = vector.shape_cast %43 : vector<8xf32> to vector<8x1xf32>
    %45 = tpu.reciprocal %44 {approx = true} : vector<8x1xf32> -> vector<8x1xf32>
    %46 = vector.broadcast %45 : vector<8x1xf32> to vector<8x8xf32>
    %47 = arith.mulf %42, %46 : vector<8x8xf32>
    %48 = arith.truncf %47 : vector<8x8xf32> to vector<8x8xbf16>
    %49 = arith.truncf %32 : vector<8x16xf32> to vector<8x16xbf16>
    %cst_36 = arith.constant dense<0.000000e+00> : vector<8x16xf32>
    %50 = tpu.matmul %48, %49, %cst_36 {dimension_numbers = #tpu.dot_dimension_numbers<[1], [0], [0], [1], [0, 0, 1, 1], [], []>} : vector<8x8xbf16>, vector<8x16xbf16>, vector<8x16xf32> -> vector<8x16xf32>
    %51 = arith.truncf %50 : vector<8x16xf32> to vector<8x16xbf16>
    %c0_37 = arith.constant 0 : index
    %c0_38 = arith.constant 0 : index
    %c0_39 = arith.constant 0 : index
    %52 = vector.load %arg11[%c0_37, %c0_38, %c0_39] : memref<2x16x32xbf16, #tpu.memory_space<vmem>>, vector<1x16x32xbf16>
    %53 = vector.shape_cast %52 : vector<1x16x32xbf16> to vector<16x32xbf16>
    %cst_40 = arith.constant dense<0.000000e+00> : vector<8x32xf32>
    %54 = tpu.matmul %51, %53, %cst_40 {dimension_numbers = #tpu.dot_dimension_numbers<[1], [0], [0], [1], [0, 0, 1, 1], [], []>} : vector<8x16xbf16>, vector<16x32xbf16>, vector<8x32xf32> -> vector<8x32xf32>
    %55 = arith.addf %11, %54 : vector<8x32xf32>
    %c1 = arith.constant 1 : index
    %c0_41 = arith.constant 0 : index
    %c0_42 = arith.constant 0 : index
    %56 = vector.load %arg5[%c1, %c0_41, %c0_42] : memref<2x32x16xbf16, #tpu.memory_space<vmem>>, vector<1x32x16xbf16>
    %57 = vector.shape_cast %56 : vector<1x32x16xbf16> to vector<32x16xbf16>
    %cst_43 = arith.constant dense<0.000000e+00> : vector<8x16xf32>
    %58 = tpu.matmul %8, %57, %cst_43 {dimension_numbers = #tpu.dot_dimension_numbers<[1], [0], [0], [1], [0, 0, 1, 1], [], []>} : vector<8x32xbf16>, vector<32x16xbf16>, vector<8x16xf32> -> vector<8x16xf32>
    %c1_44 = arith.constant 1 : index
    %c0_45 = arith.constant 0 : index
    %c0_46 = arith.constant 0 : index
    %59 = vector.load %arg6[%c1_44, %c0_45, %c0_46] : memref<2x1x16xf32, #tpu.memory_space<vmem>>, vector<1x1x16xf32>
    %60 = vector.shape_cast %59 : vector<1x1x16xf32> to vector<1x16xf32>
    %61 = vector.broadcast %60 : vector<1x16xf32> to vector<8x16xf32>
    %62 = arith.addf %58, %61 : vector<8x16xf32>
    %c1_47 = arith.constant 1 : index
    %c0_48 = arith.constant 0 : index
    %c0_49 = arith.constant 0 : index
    %63 = vector.load %arg7[%c1_47, %c0_48, %c0_49] : memref<2x32x16xbf16, #tpu.memory_space<vmem>>, vector<1x32x16xbf16>
    %64 = vector.shape_cast %63 : vector<1x32x16xbf16> to vector<32x16xbf16>
    %cst_50 = arith.constant dense<0.000000e+00> : vector<8x16xf32>
    %65 = tpu.matmul %9, %64, %cst_50 {dimension_numbers = #tpu.dot_dimension_numbers<[1], [0], [0], [1], [0, 0, 1, 1], [], []>} : vector<8x32xbf16>, vector<32x16xbf16>, vector<8x16xf32> -> vector<8x16xf32>
    %c1_51 = arith.constant 1 : index
    %c0_52 = arith.constant 0 : index
    %c0_53 = arith.constant 0 : index
    %66 = vector.load %arg8[%c1_51, %c0_52, %c0_53] : memref<2x1x16xf32, #tpu.memory_space<vmem>>, vector<1x1x16xf32>
    %67 = vector.shape_cast %66 : vector<1x1x16xf32> to vector<1x16xf32>
    %68 = vector.broadcast %67 : vector<1x16xf32> to vector<8x16xf32>
    %69 = arith.addf %65, %68 : vector<8x16xf32>
    %c1_54 = arith.constant 1 : index
    %c0_55 = arith.constant 0 : index
    %c0_56 = arith.constant 0 : index
    %70 = vector.load %arg9[%c1_54, %c0_55, %c0_56] : memref<2x32x16xbf16, #tpu.memory_space<vmem>>, vector<1x32x16xbf16>
    %71 = vector.shape_cast %70 : vector<1x32x16xbf16> to vector<32x16xbf16>
    %cst_57 = arith.constant dense<0.000000e+00> : vector<8x16xf32>
    %72 = tpu.matmul %10, %71, %cst_57 {dimension_numbers = #tpu.dot_dimension_numbers<[1], [0], [0], [1], [0, 0, 1, 1], [], []>} : vector<8x32xbf16>, vector<32x16xbf16>, vector<8x16xf32> -> vector<8x16xf32>
    %c1_58 = arith.constant 1 : index
    %c0_59 = arith.constant 0 : index
    %c0_60 = arith.constant 0 : index
    %73 = vector.load %arg10[%c1_58, %c0_59, %c0_60] : memref<2x1x16xf32, #tpu.memory_space<vmem>>, vector<1x1x16xf32>
    %74 = vector.shape_cast %73 : vector<1x1x16xf32> to vector<1x16xf32>
    %75 = vector.broadcast %74 : vector<1x16xf32> to vector<8x16xf32>
    %76 = arith.addf %72, %75 : vector<8x16xf32>
    %77 = arith.truncf %62 : vector<8x16xf32> to vector<8x16xbf16>
    %78 = arith.truncf %69 : vector<8x16xf32> to vector<8x16xbf16>
    %cst_61 = arith.constant dense<0.000000e+00> : vector<8x8xf32>
    %79 = tpu.matmul %77, %78, %cst_61 {dimension_numbers = #tpu.dot_dimension_numbers<[1], [1], [0], [0], [0, 0, 1, 0], [], []>} : vector<8x16xbf16>, vector<8x16xbf16>, vector<8x8xf32> -> vector<8x8xf32>
    %cst_62 = arith.constant 2.500000e-01 : f32
    %80 = vector.broadcast %cst_62 : f32 to vector<8x8xf32>
    %81 = arith.mulf %79, %80 : vector<8x8xf32>
    %cst_63 = arith.constant dense<0xFF800000> : vector<8xf32>
    %82 = vector.multi_reduction <maximumf>, %81, %cst_63 [1] : vector<8x8xf32> to vector<8xf32>
    %83 = vector.shape_cast %82 : vector<8xf32> to vector<8x1xf32>
    %84 = vector.broadcast %83 : vector<8x1xf32> to vector<8x8xf32>
    %85 = arith.subf %81, %84 : vector<8x8xf32>
    %86 = math.exp %85 : vector<8x8xf32>
    %cst_64 = arith.constant dense<0.000000e+00> : vector<8xf32>
    %87 = vector.multi_reduction <add>, %86, %cst_64 [1] : vector<8x8xf32> to vector<8xf32>
    %88 = vector.shape_cast %87 : vector<8xf32> to vector<8x1xf32>
    %89 = tpu.reciprocal %88 {approx = true} : vector<8x1xf32> -> vector<8x1xf32>
    %90 = vector.broadcast %89 : vector<8x1xf32> to vector<8x8xf32>
    %91 = arith.mulf %86, %90 : vector<8x8xf32>
    %92 = arith.truncf %91 : vector<8x8xf32> to vector<8x8xbf16>
    %93 = arith.truncf %76 : vector<8x16xf32> to vector<8x16xbf16>
    %cst_65 = arith.constant dense<0.000000e+00> : vector<8x16xf32>
    %94 = tpu.matmul %92, %93, %cst_65 {dimension_numbers = #tpu.dot_dimension_numbers<[1], [0], [0], [1], [0, 0, 1, 1], [], []>} : vector<8x8xbf16>, vector<8x16xbf16>, vector<8x16xf32> -> vector<8x16xf32>
    %95 = arith.truncf %94 : vector<8x16xf32> to vector<8x16xbf16>
    %c1_66 = arith.constant 1 : index
    %c0_67 = arith.constant 0 : index
    %c0_68 = arith.constant 0 : index
    %96 = vector.load %arg11[%c1_66, %c0_67, %c0_68] : memref<2x16x32xbf16, #tpu.memory_space<vmem>>, vector<1x16x32xbf16>
    %97 = vector.shape_cast %96 : vector<1x16x32xbf16> to vector<16x32xbf16>
    %cst_69 = arith.constant dense<0.000000e+00> : vector<8x32xf32>
    %98 = tpu.matmul %95, %97, %cst_69 {dimension_numbers = #tpu.dot_dimension_numbers<[1], [0], [0], [1], [0, 0, 1, 1], [], []>} : vector<8x16xbf16>, vector<16x32xbf16>, vector<8x32xf32> -> vector<8x32xf32>
    %99 = arith.addf %55, %98 : vector<8x32xf32>
    %c0_70 = arith.constant 0 : index
    %c0_71 = arith.constant 0 : index
    %100 = vector.load %arg12[%c0_70, %c0_71] : memref<1x32xf32, #tpu.memory_space<vmem>>, vector<1x32xf32>
    %101 = vector.broadcast %100 : vector<1x32xf32> to vector<8x32xf32>
    %102 = arith.addf %99, %101 : vector<8x32xf32>
    %cst_72 = arith.constant dense<0.000000e+00> : vector<8xf32>
    %103 = vector.multi_reduction <add>, %102, %cst_72 [1] : vector<8x32xf32> to vector<8xf32>
    %104 = vector.shape_cast %103 : vector<8xf32> to vector<8x1xf32>
    %cst_73 = arith.constant 3.200000e+01 : f32
    %105 = vector.broadcast %cst_73 : f32 to vector<8x1xf32>
    %106 = arith.divf %104, %105 : vector<8x1xf32>
    %107 = vector.broadcast %106 : vector<8x1xf32> to vector<8x32xf32>
    %108 = arith.subf %102, %107 : vector<8x32xf32>
    %109 = arith.mulf %108, %108 : vector<8x32xf32>
    %cst_74 = arith.constant dense<0.000000e+00> : vector<8xf32>
    %110 = vector.multi_reduction <add>, %109, %cst_74 [1] : vector<8x32xf32> to vector<8xf32>
    %111 = vector.shape_cast %110 : vector<8xf32> to vector<8x1xf32>
    %cst_75 = arith.constant 3.200000e+01 : f32
    %112 = vector.broadcast %cst_75 : f32 to vector<8x1xf32>
    %113 = arith.divf %111, %112 : vector<8x1xf32>
    %cst_76 = arith.constant 9.99999974E-6 : f32
    %114 = vector.broadcast %cst_76 : f32 to vector<8x1xf32>
    %115 = arith.addf %113, %114 : vector<8x1xf32>
    %116 = math.rsqrt %115 : vector<8x1xf32>
    %117 = vector.broadcast %116 : vector<8x1xf32> to vector<8x32xf32>
    %118 = arith.mulf %108, %117 : vector<8x32xf32>
    %c0_77 = arith.constant 0 : index
    %c0_78 = arith.constant 0 : index
    %119 = vector.load %arg33[%c0_77, %c0_78] : memref<1x32xf32, #tpu.memory_space<vmem>>, vector<1x32xf32>
    %120 = vector.broadcast %119 : vector<1x32xf32> to vector<8x32xf32>
    %121 = arith.mulf %118, %120 : vector<8x32xf32>
    %c0_79 = arith.constant 0 : index
    %c0_80 = arith.constant 0 : index
    %122 = vector.load %arg34[%c0_79, %c0_80] : memref<1x32xf32, #tpu.memory_space<vmem>>, vector<1x32xf32>
    %123 = vector.broadcast %122 : vector<1x32xf32> to vector<8x32xf32>
    %124 = arith.addf %121, %123 : vector<8x32xf32>
    %125 = arith.addf %124, %5 : vector<8x32xf32>
    %126 = arith.addf %3, %7 : vector<64x32xf32>
    %127 = arith.truncf %125 : vector<8x32xf32> to vector<8x32xbf16>
    %128 = arith.truncf %126 : vector<64x32xf32> to vector<64x32xbf16>
    %129 = arith.truncf %3 : vector<64x32xf32> to vector<64x32xbf16>
    %cst_81 = arith.constant 0.000000e+00 : f32
    %130 = vector.broadcast %cst_81 : f32 to vector<8x32xf32>
    %c0_82 = arith.constant 0 : index
    %c0_83 = arith.constant 0 : index
    %c0_84 = arith.constant 0 : index
    %131 = vector.load %arg13[%c0_82, %c0_83, %c0_84] : memref<2x32x8xbf16, #tpu.memory_space<vmem>>, vector<1x32x8xbf16>
    %132 = vector.shape_cast %131 : vector<1x32x8xbf16> to vector<32x8xbf16>
    %cst_85 = arith.constant dense<0.000000e+00> : vector<8x8xf32>
    %133 = tpu.matmul %127, %132, %cst_85 {dimension_numbers = #tpu.dot_dimension_numbers<[1], [0], [0], [1], [0, 0, 1, 1], [], []>} : vector<8x32xbf16>, vector<32x8xbf16>, vector<8x8xf32> -> vector<8x8xf32>
    %c0_86 = arith.constant 0 : index
    %c0_87 = arith.constant 0 : index
    %c0_88 = arith.constant 0 : index
    %134 = vector.load %arg14[%c0_86, %c0_87, %c0_88] : memref<2x1x8xf32, #tpu.memory_space<vmem>>, vector<1x1x8xf32>
    %135 = vector.shape_cast %134 : vector<1x1x8xf32> to vector<1x8xf32>
    %136 = vector.broadcast %135 : vector<1x8xf32> to vector<8x8xf32>
    %137 = arith.addf %133, %136 : vector<8x8xf32>
    %c0_89 = arith.constant 0 : index
    %c0_90 = arith.constant 0 : index
    %c0_91 = arith.constant 0 : index
    %138 = vector.load %arg15[%c0_89, %c0_90, %c0_91] : memref<2x32x8xbf16, #tpu.memory_space<vmem>>, vector<1x32x8xbf16>
    %139 = vector.shape_cast %138 : vector<1x32x8xbf16> to vector<32x8xbf16>
    %cst_92 = arith.constant dense<0.000000e+00> : vector<64x8xf32>
    %140 = tpu.matmul %128, %139, %cst_92 {dimension_numbers = #tpu.dot_dimension_numbers<[1], [0], [0], [1], [0, 0, 1, 1], [], []>} : vector<64x32xbf16>, vector<32x8xbf16>, vector<64x8xf32> -> vector<64x8xf32>
    %c0_93 = arith.constant 0 : index
    %c0_94 = arith.constant 0 : index
    %c0_95 = arith.constant 0 : index
    %141 = vector.load %arg16[%c0_93, %c0_94, %c0_95] : memref<2x1x8xf32, #tpu.memory_space<vmem>>, vector<1x1x8xf32>
    %142 = vector.shape_cast %141 : vector<1x1x8xf32> to vector<1x8xf32>
    %143 = vector.broadcast %142 : vector<1x8xf32> to vector<64x8xf32>
    %144 = arith.addf %140, %143 : vector<64x8xf32>
    %c0_96 = arith.constant 0 : index
    %c0_97 = arith.constant 0 : index
    %c0_98 = arith.constant 0 : index
    %145 = vector.load %arg17[%c0_96, %c0_97, %c0_98] : memref<2x32x8xbf16, #tpu.memory_space<vmem>>, vector<1x32x8xbf16>
    %146 = vector.shape_cast %145 : vector<1x32x8xbf16> to vector<32x8xbf16>
    %cst_99 = arith.constant dense<0.000000e+00> : vector<64x8xf32>
    %147 = tpu.matmul %129, %146, %cst_99 {dimension_numbers = #tpu.dot_dimension_numbers<[1], [0], [0], [1], [0, 0, 1, 1], [], []>} : vector<64x32xbf16>, vector<32x8xbf16>, vector<64x8xf32> -> vector<64x8xf32>
    %c0_100 = arith.constant 0 : index
    %c0_101 = arith.constant 0 : index
    %c0_102 = arith.constant 0 : index
    %148 = vector.load %arg18[%c0_100, %c0_101, %c0_102] : memref<2x1x8xf32, #tpu.memory_space<vmem>>, vector<1x1x8xf32>
    %149 = vector.shape_cast %148 : vector<1x1x8xf32> to vector<1x8xf32>
    %150 = vector.broadcast %149 : vector<1x8xf32> to vector<64x8xf32>
    %151 = arith.addf %147, %150 : vector<64x8xf32>
    %152 = arith.truncf %137 : vector<8x8xf32> to vector<8x8xbf16>
    %153 = arith.truncf %144 : vector<64x8xf32> to vector<64x8xbf16>
    %cst_103 = arith.constant dense<0.000000e+00> : vector<8x64xf32>
    %154 = tpu.matmul %152, %153, %cst_103 {dimension_numbers = #tpu.dot_dimension_numbers<[1], [1], [0], [0], [0, 0, 1, 0], [], []>} : vector<8x8xbf16>, vector<64x8xbf16>, vector<8x64xf32> -> vector<8x64xf32>
    %cst_104 = arith.constant 0.353553385 : f32
    %155 = vector.broadcast %cst_104 : f32 to vector<8x64xf32>
    %156 = arith.mulf %154, %155 : vector<8x64xf32>
    %cst_105 = arith.constant dense<0xFF800000> : vector<8xf32>
    %157 = vector.multi_reduction <maximumf>, %156, %cst_105 [1] : vector<8x64xf32> to vector<8xf32>
    %158 = vector.shape_cast %157 : vector<8xf32> to vector<8x1xf32>
    %159 = vector.broadcast %158 : vector<8x1xf32> to vector<8x64xf32>
    %160 = arith.subf %156, %159 : vector<8x64xf32>
    %161 = math.exp %160 : vector<8x64xf32>
    %cst_106 = arith.constant dense<0.000000e+00> : vector<8xf32>
    %162 = vector.multi_reduction <add>, %161, %cst_106 [1] : vector<8x64xf32> to vector<8xf32>
    %163 = vector.shape_cast %162 : vector<8xf32> to vector<8x1xf32>
    %164 = tpu.reciprocal %163 {approx = true} : vector<8x1xf32> -> vector<8x1xf32>
    %165 = vector.broadcast %164 : vector<8x1xf32> to vector<8x64xf32>
    %166 = arith.mulf %161, %165 : vector<8x64xf32>
    %167 = arith.truncf %166 : vector<8x64xf32> to vector<8x64xbf16>
    %168 = arith.truncf %151 : vector<64x8xf32> to vector<64x8xbf16>
    %cst_107 = arith.constant dense<0.000000e+00> : vector<8x8xf32>
    %169 = tpu.matmul %167, %168, %cst_107 {dimension_numbers = #tpu.dot_dimension_numbers<[1], [0], [0], [1], [0, 0, 1, 1], [], []>} : vector<8x64xbf16>, vector<64x8xbf16>, vector<8x8xf32> -> vector<8x8xf32>
    %170 = arith.truncf %169 : vector<8x8xf32> to vector<8x8xbf16>
    %c0_108 = arith.constant 0 : index
    %c0_109 = arith.constant 0 : index
    %c0_110 = arith.constant 0 : index
    %171 = vector.load %arg19[%c0_108, %c0_109, %c0_110] : memref<2x8x32xbf16, #tpu.memory_space<vmem>>, vector<1x8x32xbf16>
    %172 = vector.shape_cast %171 : vector<1x8x32xbf16> to vector<8x32xbf16>
    %cst_111 = arith.constant dense<0.000000e+00> : vector<8x32xf32>
    %173 = tpu.matmul %170, %172, %cst_111 {dimension_numbers = #tpu.dot_dimension_numbers<[1], [0], [0], [1], [0, 0, 1, 1], [], []>} : vector<8x8xbf16>, vector<8x32xbf16>, vector<8x32xf32> -> vector<8x32xf32>
    %174 = arith.addf %130, %173 : vector<8x32xf32>
    %c1_112 = arith.constant 1 : index
    %c0_113 = arith.constant 0 : index
    %c0_114 = arith.constant 0 : index
    %175 = vector.load %arg13[%c1_112, %c0_113, %c0_114] : memref<2x32x8xbf16, #tpu.memory_space<vmem>>, vector<1x32x8xbf16>
    %176 = vector.shape_cast %175 : vector<1x32x8xbf16> to vector<32x8xbf16>
    %cst_115 = arith.constant dense<0.000000e+00> : vector<8x8xf32>
    %177 = tpu.matmul %127, %176, %cst_115 {dimension_numbers = #tpu.dot_dimension_numbers<[1], [0], [0], [1], [0, 0, 1, 1], [], []>} : vector<8x32xbf16>, vector<32x8xbf16>, vector<8x8xf32> -> vector<8x8xf32>
    %c1_116 = arith.constant 1 : index
    %c0_117 = arith.constant 0 : index
    %c0_118 = arith.constant 0 : index
    %178 = vector.load %arg14[%c1_116, %c0_117, %c0_118] : memref<2x1x8xf32, #tpu.memory_space<vmem>>, vector<1x1x8xf32>
    %179 = vector.shape_cast %178 : vector<1x1x8xf32> to vector<1x8xf32>
    %180 = vector.broadcast %179 : vector<1x8xf32> to vector<8x8xf32>
    %181 = arith.addf %177, %180 : vector<8x8xf32>
    %c1_119 = arith.constant 1 : index
    %c0_120 = arith.constant 0 : index
    %c0_121 = arith.constant 0 : index
    %182 = vector.load %arg15[%c1_119, %c0_120, %c0_121] : memref<2x32x8xbf16, #tpu.memory_space<vmem>>, vector<1x32x8xbf16>
    %183 = vector.shape_cast %182 : vector<1x32x8xbf16> to vector<32x8xbf16>
    %cst_122 = arith.constant dense<0.000000e+00> : vector<64x8xf32>
    %184 = tpu.matmul %128, %183, %cst_122 {dimension_numbers = #tpu.dot_dimension_numbers<[1], [0], [0], [1], [0, 0, 1, 1], [], []>} : vector<64x32xbf16>, vector<32x8xbf16>, vector<64x8xf32> -> vector<64x8xf32>
    %c1_123 = arith.constant 1 : index
    %c0_124 = arith.constant 0 : index
    %c0_125 = arith.constant 0 : index
    %185 = vector.load %arg16[%c1_123, %c0_124, %c0_125] : memref<2x1x8xf32, #tpu.memory_space<vmem>>, vector<1x1x8xf32>
    %186 = vector.shape_cast %185 : vector<1x1x8xf32> to vector<1x8xf32>
    %187 = vector.broadcast %186 : vector<1x8xf32> to vector<64x8xf32>
    %188 = arith.addf %184, %187 : vector<64x8xf32>
    %c1_126 = arith.constant 1 : index
    %c0_127 = arith.constant 0 : index
    %c0_128 = arith.constant 0 : index
    %189 = vector.load %arg17[%c1_126, %c0_127, %c0_128] : memref<2x32x8xbf16, #tpu.memory_space<vmem>>, vector<1x32x8xbf16>
    %190 = vector.shape_cast %189 : vector<1x32x8xbf16> to vector<32x8xbf16>
    %cst_129 = arith.constant dense<0.000000e+00> : vector<64x8xf32>
    %191 = tpu.matmul %129, %190, %cst_129 {dimension_numbers = #tpu.dot_dimension_numbers<[1], [0], [0], [1], [0, 0, 1, 1], [], []>} : vector<64x32xbf16>, vector<32x8xbf16>, vector<64x8xf32> -> vector<64x8xf32>
    %c1_130 = arith.constant 1 : index
    %c0_131 = arith.constant 0 : index
    %c0_132 = arith.constant 0 : index
    %192 = vector.load %arg18[%c1_130, %c0_131, %c0_132] : memref<2x1x8xf32, #tpu.memory_space<vmem>>, vector<1x1x8xf32>
    %193 = vector.shape_cast %192 : vector<1x1x8xf32> to vector<1x8xf32>
    %194 = vector.broadcast %193 : vector<1x8xf32> to vector<64x8xf32>
    %195 = arith.addf %191, %194 : vector<64x8xf32>
    %196 = arith.truncf %181 : vector<8x8xf32> to vector<8x8xbf16>
    %197 = arith.truncf %188 : vector<64x8xf32> to vector<64x8xbf16>
    %cst_133 = arith.constant dense<0.000000e+00> : vector<8x64xf32>
    %198 = tpu.matmul %196, %197, %cst_133 {dimension_numbers = #tpu.dot_dimension_numbers<[1], [1], [0], [0], [0, 0, 1, 0], [], []>} : vector<8x8xbf16>, vector<64x8xbf16>, vector<8x64xf32> -> vector<8x64xf32>
    %cst_134 = arith.constant 0.353553385 : f32
    %199 = vector.broadcast %cst_134 : f32 to vector<8x64xf32>
    %200 = arith.mulf %198, %199 : vector<8x64xf32>
    %cst_135 = arith.constant dense<0xFF800000> : vector<8xf32>
    %201 = vector.multi_reduction <maximumf>, %200, %cst_135 [1] : vector<8x64xf32> to vector<8xf32>
    %202 = vector.shape_cast %201 : vector<8xf32> to vector<8x1xf32>
    %203 = vector.broadcast %202 : vector<8x1xf32> to vector<8x64xf32>
    %204 = arith.subf %200, %203 : vector<8x64xf32>
    %205 = math.exp %204 : vector<8x64xf32>
    %cst_136 = arith.constant dense<0.000000e+00> : vector<8xf32>
    %206 = vector.multi_reduction <add>, %205, %cst_136 [1] : vector<8x64xf32> to vector<8xf32>
    %207 = vector.shape_cast %206 : vector<8xf32> to vector<8x1xf32>
    %208 = tpu.reciprocal %207 {approx = true} : vector<8x1xf32> -> vector<8x1xf32>
    %209 = vector.broadcast %208 : vector<8x1xf32> to vector<8x64xf32>
    %210 = arith.mulf %205, %209 : vector<8x64xf32>
    %211 = arith.truncf %210 : vector<8x64xf32> to vector<8x64xbf16>
    %212 = arith.truncf %195 : vector<64x8xf32> to vector<64x8xbf16>
    %cst_137 = arith.constant dense<0.000000e+00> : vector<8x8xf32>
    %213 = tpu.matmul %211, %212, %cst_137 {dimension_numbers = #tpu.dot_dimension_numbers<[1], [0], [0], [1], [0, 0, 1, 1], [], []>} : vector<8x64xbf16>, vector<64x8xbf16>, vector<8x8xf32> -> vector<8x8xf32>
    %214 = arith.truncf %213 : vector<8x8xf32> to vector<8x8xbf16>
    %c1_138 = arith.constant 1 : index
    %c0_139 = arith.constant 0 : index
    %c0_140 = arith.constant 0 : index
    %215 = vector.load %arg19[%c1_138, %c0_139, %c0_140] : memref<2x8x32xbf16, #tpu.memory_space<vmem>>, vector<1x8x32xbf16>
    %216 = vector.shape_cast %215 : vector<1x8x32xbf16> to vector<8x32xbf16>
    %cst_141 = arith.constant dense<0.000000e+00> : vector<8x32xf32>
    %217 = tpu.matmul %214, %216, %cst_141 {dimension_numbers = #tpu.dot_dimension_numbers<[1], [0], [0], [1], [0, 0, 1, 1], [], []>} : vector<8x8xbf16>, vector<8x32xbf16>, vector<8x32xf32> -> vector<8x32xf32>
    %218 = arith.addf %174, %217 : vector<8x32xf32>
    %c0_142 = arith.constant 0 : index
    %c0_143 = arith.constant 0 : index
    %219 = vector.load %arg20[%c0_142, %c0_143] : memref<1x32xf32, #tpu.memory_space<vmem>>, vector<1x32xf32>
    %220 = vector.broadcast %219 : vector<1x32xf32> to vector<8x32xf32>
    %221 = arith.addf %218, %220 : vector<8x32xf32>
    %222 = arith.addf %124, %221 : vector<8x32xf32>
    %cst_144 = arith.constant dense<0.000000e+00> : vector<8xf32>
    %223 = vector.multi_reduction <add>, %222, %cst_144 [1] : vector<8x32xf32> to vector<8xf32>
    %224 = vector.shape_cast %223 : vector<8xf32> to vector<8x1xf32>
    %cst_145 = arith.constant 3.200000e+01 : f32
    %225 = vector.broadcast %cst_145 : f32 to vector<8x1xf32>
    %226 = arith.divf %224, %225 : vector<8x1xf32>
    %227 = vector.broadcast %226 : vector<8x1xf32> to vector<8x32xf32>
    %228 = arith.subf %222, %227 : vector<8x32xf32>
    %229 = arith.mulf %228, %228 : vector<8x32xf32>
    %cst_146 = arith.constant dense<0.000000e+00> : vector<8xf32>
    %230 = vector.multi_reduction <add>, %229, %cst_146 [1] : vector<8x32xf32> to vector<8xf32>
    %231 = vector.shape_cast %230 : vector<8xf32> to vector<8x1xf32>
    %cst_147 = arith.constant 3.200000e+01 : f32
    %232 = vector.broadcast %cst_147 : f32 to vector<8x1xf32>
    %233 = arith.divf %231, %232 : vector<8x1xf32>
    %cst_148 = arith.constant 9.99999974E-6 : f32
    %234 = vector.broadcast %cst_148 : f32 to vector<8x1xf32>
    %235 = arith.addf %233, %234 : vector<8x1xf32>
    %236 = math.rsqrt %235 : vector<8x1xf32>
    %237 = vector.broadcast %236 : vector<8x1xf32> to vector<8x32xf32>
    %238 = arith.mulf %228, %237 : vector<8x32xf32>
    %c0_149 = arith.constant 0 : index
    %c0_150 = arith.constant 0 : index
    %239 = vector.load %arg35[%c0_149, %c0_150] : memref<1x32xf32, #tpu.memory_space<vmem>>, vector<1x32xf32>
    %240 = vector.broadcast %239 : vector<1x32xf32> to vector<8x32xf32>
    %241 = arith.mulf %238, %240 : vector<8x32xf32>
    %c0_151 = arith.constant 0 : index
    %c0_152 = arith.constant 0 : index
    %242 = vector.load %arg36[%c0_151, %c0_152] : memref<1x32xf32, #tpu.memory_space<vmem>>, vector<1x32xf32>
    %243 = vector.broadcast %242 : vector<1x32xf32> to vector<8x32xf32>
    %244 = arith.addf %241, %243 : vector<8x32xf32>
    %245 = arith.truncf %244 : vector<8x32xf32> to vector<8x32xbf16>
    %c0_153 = arith.constant 0 : index
    %c0_154 = arith.constant 0 : index
    %246 = vector.load %arg21[%c0_153, %c0_154] : memref<32x64xbf16, #tpu.memory_space<vmem>>, vector<32x64xbf16>
    %cst_155 = arith.constant dense<0.000000e+00> : vector<8x64xf32>
    %247 = tpu.matmul %245, %246, %cst_155 {dimension_numbers = #tpu.dot_dimension_numbers<[1], [0], [0], [1], [0, 0, 1, 1], [], []>} : vector<8x32xbf16>, vector<32x64xbf16>, vector<8x64xf32> -> vector<8x64xf32>
    %c0_156 = arith.constant 0 : index
    %c0_157 = arith.constant 0 : index
    %248 = vector.load %arg22[%c0_156, %c0_157] : memref<1x64xf32, #tpu.memory_space<vmem>>, vector<1x64xf32>
    %249 = vector.broadcast %248 : vector<1x64xf32> to vector<8x64xf32>
    %250 = arith.addf %247, %249 : vector<8x64xf32>
    %cst_158 = arith.constant 0.000000e+00 : f32
    %251 = vector.broadcast %cst_158 : f32 to vector<8x64xf32>
    %252 = arith.maximumf %250, %251 : vector<8x64xf32>
    %253 = arith.truncf %252 : vector<8x64xf32> to vector<8x64xbf16>
    %c0_159 = arith.constant 0 : index
    %c0_160 = arith.constant 0 : index
    %254 = vector.load %arg23[%c0_159, %c0_160] : memref<64x32xbf16, #tpu.memory_space<vmem>>, vector<64x32xbf16>
    %cst_161 = arith.constant dense<0.000000e+00> : vector<8x32xf32>
    %255 = tpu.matmul %253, %254, %cst_161 {dimension_numbers = #tpu.dot_dimension_numbers<[1], [0], [0], [1], [0, 0, 1, 1], [], []>} : vector<8x64xbf16>, vector<64x32xbf16>, vector<8x32xf32> -> vector<8x32xf32>
    %c0_162 = arith.constant 0 : index
    %c0_163 = arith.constant 0 : index
    %256 = vector.load %arg24[%c0_162, %c0_163] : memref<1x32xf32, #tpu.memory_space<vmem>>, vector<1x32xf32>
    %257 = vector.broadcast %256 : vector<1x32xf32> to vector<8x32xf32>
    %258 = arith.addf %255, %257 : vector<8x32xf32>
    %259 = arith.addf %244, %258 : vector<8x32xf32>
    %cst_164 = arith.constant dense<0.000000e+00> : vector<8xf32>
    %260 = vector.multi_reduction <add>, %259, %cst_164 [1] : vector<8x32xf32> to vector<8xf32>
    %261 = vector.shape_cast %260 : vector<8xf32> to vector<8x1xf32>
    %cst_165 = arith.constant 3.200000e+01 : f32
    %262 = vector.broadcast %cst_165 : f32 to vector<8x1xf32>
    %263 = arith.divf %261, %262 : vector<8x1xf32>
    %264 = vector.broadcast %263 : vector<8x1xf32> to vector<8x32xf32>
    %265 = arith.subf %259, %264 : vector<8x32xf32>
    %266 = arith.mulf %265, %265 : vector<8x32xf32>
    %cst_166 = arith.constant dense<0.000000e+00> : vector<8xf32>
    %267 = vector.multi_reduction <add>, %266, %cst_166 [1] : vector<8x32xf32> to vector<8xf32>
    %268 = vector.shape_cast %267 : vector<8xf32> to vector<8x1xf32>
    %cst_167 = arith.constant 3.200000e+01 : f32
    %269 = vector.broadcast %cst_167 : f32 to vector<8x1xf32>
    %270 = arith.divf %268, %269 : vector<8x1xf32>
    %cst_168 = arith.constant 9.99999974E-6 : f32
    %271 = vector.broadcast %cst_168 : f32 to vector<8x1xf32>
    %272 = arith.addf %270, %271 : vector<8x1xf32>
    %273 = math.rsqrt %272 : vector<8x1xf32>
    %274 = vector.broadcast %273 : vector<8x1xf32> to vector<8x32xf32>
    %275 = arith.mulf %265, %274 : vector<8x32xf32>
    %c0_169 = arith.constant 0 : index
    %c0_170 = arith.constant 0 : index
    %276 = vector.load %arg37[%c0_169, %c0_170] : memref<1x32xf32, #tpu.memory_space<vmem>>, vector<1x32xf32>
    %277 = vector.broadcast %276 : vector<1x32xf32> to vector<8x32xf32>
    %278 = arith.mulf %275, %277 : vector<8x32xf32>
    %c0_171 = arith.constant 0 : index
    %c0_172 = arith.constant 0 : index
    %279 = vector.load %arg38[%c0_171, %c0_172] : memref<1x32xf32, #tpu.memory_space<vmem>>, vector<1x32xf32>
    %280 = vector.broadcast %279 : vector<1x32xf32> to vector<8x32xf32>
    %281 = arith.addf %278, %280 : vector<8x32xf32>
    %282 = arith.addf %281, %5 : vector<8x32xf32>
    %283 = arith.addf %3, %7 : vector<64x32xf32>
    %284 = arith.truncf %283 : vector<64x32xf32> to vector<64x32xbf16>
    %285 = arith.truncf %282 : vector<8x32xf32> to vector<8x32xbf16>
    %286 = arith.truncf %281 : vector<8x32xf32> to vector<8x32xbf16>
    %cst_173 = arith.constant 0.000000e+00 : f32
    %287 = vector.broadcast %cst_173 : f32 to vector<64x32xf32>
    %c0_174 = arith.constant 0 : index
    %c0_175 = arith.constant 0 : index
    %c0_176 = arith.constant 0 : index
    %288 = vector.load %arg25[%c0_174, %c0_175, %c0_176] : memref<2x32x8xbf16, #tpu.memory_space<vmem>>, vector<1x32x8xbf16>
    %289 = vector.shape_cast %288 : vector<1x32x8xbf16> to vector<32x8xbf16>
    %cst_177 = arith.constant dense<0.000000e+00> : vector<64x8xf32>
    %290 = tpu.matmul %284, %289, %cst_177 {dimension_numbers = #tpu.dot_dimension_numbers<[1], [0], [0], [1], [0, 0, 1, 1], [], []>} : vector<64x32xbf16>, vector<32x8xbf16>, vector<64x8xf32> -> vector<64x8xf32>
    %c0_178 = arith.constant 0 : index
    %c0_179 = arith.constant 0 : index
    %c0_180 = arith.constant 0 : index
    %291 = vector.load %arg26[%c0_178, %c0_179, %c0_180] : memref<2x1x8xf32, #tpu.memory_space<vmem>>, vector<1x1x8xf32>
    %292 = vector.shape_cast %291 : vector<1x1x8xf32> to vector<1x8xf32>
    %293 = vector.broadcast %292 : vector<1x8xf32> to vector<64x8xf32>
    %294 = arith.addf %290, %293 : vector<64x8xf32>
    %c0_181 = arith.constant 0 : index
    %c0_182 = arith.constant 0 : index
    %c0_183 = arith.constant 0 : index
    %295 = vector.load %arg27[%c0_181, %c0_182, %c0_183] : memref<2x32x8xbf16, #tpu.memory_space<vmem>>, vector<1x32x8xbf16>
    %296 = vector.shape_cast %295 : vector<1x32x8xbf16> to vector<32x8xbf16>
    %cst_184 = arith.constant dense<0.000000e+00> : vector<8x8xf32>
    %297 = tpu.matmul %285, %296, %cst_184 {dimension_numbers = #tpu.dot_dimension_numbers<[1], [0], [0], [1], [0, 0, 1, 1], [], []>} : vector<8x32xbf16>, vector<32x8xbf16>, vector<8x8xf32> -> vector<8x8xf32>
    %c0_185 = arith.constant 0 : index
    %c0_186 = arith.constant 0 : index
    %c0_187 = arith.constant 0 : index
    %298 = vector.load %arg28[%c0_185, %c0_186, %c0_187] : memref<2x1x8xf32, #tpu.memory_space<vmem>>, vector<1x1x8xf32>
    %299 = vector.shape_cast %298 : vector<1x1x8xf32> to vector<1x8xf32>
    %300 = vector.broadcast %299 : vector<1x8xf32> to vector<8x8xf32>
    %301 = arith.addf %297, %300 : vector<8x8xf32>
    %c0_188 = arith.constant 0 : index
    %c0_189 = arith.constant 0 : index
    %c0_190 = arith.constant 0 : index
    %302 = vector.load %arg29[%c0_188, %c0_189, %c0_190] : memref<2x32x8xbf16, #tpu.memory_space<vmem>>, vector<1x32x8xbf16>
    %303 = vector.shape_cast %302 : vector<1x32x8xbf16> to vector<32x8xbf16>
    %cst_191 = arith.constant dense<0.000000e+00> : vector<8x8xf32>
    %304 = tpu.matmul %286, %303, %cst_191 {dimension_numbers = #tpu.dot_dimension_numbers<[1], [0], [0], [1], [0, 0, 1, 1], [], []>} : vector<8x32xbf16>, vector<32x8xbf16>, vector<8x8xf32> -> vector<8x8xf32>
    %c0_192 = arith.constant 0 : index
    %c0_193 = arith.constant 0 : index
    %c0_194 = arith.constant 0 : index
    %305 = vector.load %arg30[%c0_192, %c0_193, %c0_194] : memref<2x1x8xf32, #tpu.memory_space<vmem>>, vector<1x1x8xf32>
    %306 = vector.shape_cast %305 : vector<1x1x8xf32> to vector<1x8xf32>
    %307 = vector.broadcast %306 : vector<1x8xf32> to vector<8x8xf32>
    %308 = arith.addf %304, %307 : vector<8x8xf32>
    %309 = arith.truncf %294 : vector<64x8xf32> to vector<64x8xbf16>
    %310 = arith.truncf %301 : vector<8x8xf32> to vector<8x8xbf16>
    %cst_195 = arith.constant dense<0.000000e+00> : vector<64x8xf32>
    %311 = tpu.matmul %309, %310, %cst_195 {dimension_numbers = #tpu.dot_dimension_numbers<[1], [1], [0], [0], [0, 0, 1, 0], [], []>} : vector<64x8xbf16>, vector<8x8xbf16>, vector<64x8xf32> -> vector<64x8xf32>
    %cst_196 = arith.constant 0.353553385 : f32
    %312 = vector.broadcast %cst_196 : f32 to vector<64x8xf32>
    %313 = arith.mulf %311, %312 : vector<64x8xf32>
    %cst_197 = arith.constant dense<0xFF800000> : vector<64xf32>
    %314 = vector.multi_reduction <maximumf>, %313, %cst_197 [1] : vector<64x8xf32> to vector<64xf32>
    %315 = vector.shape_cast %314 : vector<64xf32> to vector<64x1xf32>
    %316 = vector.broadcast %315 : vector<64x1xf32> to vector<64x8xf32>
    %317 = arith.subf %313, %316 : vector<64x8xf32>
    %318 = math.exp %317 : vector<64x8xf32>
    %cst_198 = arith.constant dense<0.000000e+00> : vector<64xf32>
    %319 = vector.multi_reduction <add>, %318, %cst_198 [1] : vector<64x8xf32> to vector<64xf32>
    %320 = vector.shape_cast %319 : vector<64xf32> to vector<64x1xf32>
    %321 = tpu.reciprocal %320 {approx = true} : vector<64x1xf32> -> vector<64x1xf32>
    %322 = vector.broadcast %321 : vector<64x1xf32> to vector<64x8xf32>
    %323 = arith.mulf %318, %322 : vector<64x8xf32>
    %324 = arith.truncf %323 : vector<64x8xf32> to vector<64x8xbf16>
    %325 = arith.truncf %308 : vector<8x8xf32> to vector<8x8xbf16>
    %cst_199 = arith.constant dense<0.000000e+00> : vector<64x8xf32>
    %326 = tpu.matmul %324, %325, %cst_199 {dimension_numbers = #tpu.dot_dimension_numbers<[1], [0], [0], [1], [0, 0, 1, 1], [], []>} : vector<64x8xbf16>, vector<8x8xbf16>, vector<64x8xf32> -> vector<64x8xf32>
    %327 = arith.truncf %326 : vector<64x8xf32> to vector<64x8xbf16>
    %c0_200 = arith.constant 0 : index
    %c0_201 = arith.constant 0 : index
    %c0_202 = arith.constant 0 : index
    %328 = vector.load %arg31[%c0_200, %c0_201, %c0_202] : memref<2x8x32xbf16, #tpu.memory_space<vmem>>, vector<1x8x32xbf16>
    %329 = vector.shape_cast %328 : vector<1x8x32xbf16> to vector<8x32xbf16>
    %cst_203 = arith.constant dense<0.000000e+00> : vector<64x32xf32>
    %330 = tpu.matmul %327, %329, %cst_203 {dimension_numbers = #tpu.dot_dimension_numbers<[1], [0], [0], [1], [0, 0, 1, 1], [], []>} : vector<64x8xbf16>, vector<8x32xbf16>, vector<64x32xf32> -> vector<64x32xf32>
    %331 = arith.addf %287, %330 : vector<64x32xf32>
    %c1_204 = arith.constant 1 : index
    %c0_205 = arith.constant 0 : index
    %c0_206 = arith.constant 0 : index
    %332 = vector.load %arg25[%c1_204, %c0_205, %c0_206] : memref<2x32x8xbf16, #tpu.memory_space<vmem>>, vector<1x32x8xbf16>
    %333 = vector.shape_cast %332 : vector<1x32x8xbf16> to vector<32x8xbf16>
    %cst_207 = arith.constant dense<0.000000e+00> : vector<64x8xf32>
    %334 = tpu.matmul %284, %333, %cst_207 {dimension_numbers = #tpu.dot_dimension_numbers<[1], [0], [0], [1], [0, 0, 1, 1], [], []>} : vector<64x32xbf16>, vector<32x8xbf16>, vector<64x8xf32> -> vector<64x8xf32>
    %c1_208 = arith.constant 1 : index
    %c0_209 = arith.constant 0 : index
    %c0_210 = arith.constant 0 : index
    %335 = vector.load %arg26[%c1_208, %c0_209, %c0_210] : memref<2x1x8xf32, #tpu.memory_space<vmem>>, vector<1x1x8xf32>
    %336 = vector.shape_cast %335 : vector<1x1x8xf32> to vector<1x8xf32>
    %337 = vector.broadcast %336 : vector<1x8xf32> to vector<64x8xf32>
    %338 = arith.addf %334, %337 : vector<64x8xf32>
    %c1_211 = arith.constant 1 : index
    %c0_212 = arith.constant 0 : index
    %c0_213 = arith.constant 0 : index
    %339 = vector.load %arg27[%c1_211, %c0_212, %c0_213] : memref<2x32x8xbf16, #tpu.memory_space<vmem>>, vector<1x32x8xbf16>
    %340 = vector.shape_cast %339 : vector<1x32x8xbf16> to vector<32x8xbf16>
    %cst_214 = arith.constant dense<0.000000e+00> : vector<8x8xf32>
    %341 = tpu.matmul %285, %340, %cst_214 {dimension_numbers = #tpu.dot_dimension_numbers<[1], [0], [0], [1], [0, 0, 1, 1], [], []>} : vector<8x32xbf16>, vector<32x8xbf16>, vector<8x8xf32> -> vector<8x8xf32>
    %c1_215 = arith.constant 1 : index
    %c0_216 = arith.constant 0 : index
    %c0_217 = arith.constant 0 : index
    %342 = vector.load %arg28[%c1_215, %c0_216, %c0_217] : memref<2x1x8xf32, #tpu.memory_space<vmem>>, vector<1x1x8xf32>
    %343 = vector.shape_cast %342 : vector<1x1x8xf32> to vector<1x8xf32>
    %344 = vector.broadcast %343 : vector<1x8xf32> to vector<8x8xf32>
    %345 = arith.addf %341, %344 : vector<8x8xf32>
    %c1_218 = arith.constant 1 : index
    %c0_219 = arith.constant 0 : index
    %c0_220 = arith.constant 0 : index
    %346 = vector.load %arg29[%c1_218, %c0_219, %c0_220] : memref<2x32x8xbf16, #tpu.memory_space<vmem>>, vector<1x32x8xbf16>
    %347 = vector.shape_cast %346 : vector<1x32x8xbf16> to vector<32x8xbf16>
    %cst_221 = arith.constant dense<0.000000e+00> : vector<8x8xf32>
    %348 = tpu.matmul %286, %347, %cst_221 {dimension_numbers = #tpu.dot_dimension_numbers<[1], [0], [0], [1], [0, 0, 1, 1], [], []>} : vector<8x32xbf16>, vector<32x8xbf16>, vector<8x8xf32> -> vector<8x8xf32>
    %c1_222 = arith.constant 1 : index
    %c0_223 = arith.constant 0 : index
    %c0_224 = arith.constant 0 : index
    %349 = vector.load %arg30[%c1_222, %c0_223, %c0_224] : memref<2x1x8xf32, #tpu.memory_space<vmem>>, vector<1x1x8xf32>
    %350 = vector.shape_cast %349 : vector<1x1x8xf32> to vector<1x8xf32>
    %351 = vector.broadcast %350 : vector<1x8xf32> to vector<8x8xf32>
    %352 = arith.addf %348, %351 : vector<8x8xf32>
    %353 = arith.truncf %338 : vector<64x8xf32> to vector<64x8xbf16>
    %354 = arith.truncf %345 : vector<8x8xf32> to vector<8x8xbf16>
    %cst_225 = arith.constant dense<0.000000e+00> : vector<64x8xf32>
    %355 = tpu.matmul %353, %354, %cst_225 {dimension_numbers = #tpu.dot_dimension_numbers<[1], [1], [0], [0], [0, 0, 1, 0], [], []>} : vector<64x8xbf16>, vector<8x8xbf16>, vector<64x8xf32> -> vector<64x8xf32>
    %cst_226 = arith.constant 0.353553385 : f32
    %356 = vector.broadcast %cst_226 : f32 to vector<64x8xf32>
    %357 = arith.mulf %355, %356 : vector<64x8xf32>
    %cst_227 = arith.constant dense<0xFF800000> : vector<64xf32>
    %358 = vector.multi_reduction <maximumf>, %357, %cst_227 [1] : vector<64x8xf32> to vector<64xf32>
    %359 = vector.shape_cast %358 : vector<64xf32> to vector<64x1xf32>
    %360 = vector.broadcast %359 : vector<64x1xf32> to vector<64x8xf32>
    %361 = arith.subf %357, %360 : vector<64x8xf32>
    %362 = math.exp %361 : vector<64x8xf32>
    %cst_228 = arith.constant dense<0.000000e+00> : vector<64xf32>
    %363 = vector.multi_reduction <add>, %362, %cst_228 [1] : vector<64x8xf32> to vector<64xf32>
    %364 = vector.shape_cast %363 : vector<64xf32> to vector<64x1xf32>
    %365 = tpu.reciprocal %364 {approx = true} : vector<64x1xf32> -> vector<64x1xf32>
    %366 = vector.broadcast %365 : vector<64x1xf32> to vector<64x8xf32>
    %367 = arith.mulf %362, %366 : vector<64x8xf32>
    %368 = arith.truncf %367 : vector<64x8xf32> to vector<64x8xbf16>
    %369 = arith.truncf %352 : vector<8x8xf32> to vector<8x8xbf16>
    %cst_229 = arith.constant dense<0.000000e+00> : vector<64x8xf32>
    %370 = tpu.matmul %368, %369, %cst_229 {dimension_numbers = #tpu.dot_dimension_numbers<[1], [0], [0], [1], [0, 0, 1, 1], [], []>} : vector<64x8xbf16>, vector<8x8xbf16>, vector<64x8xf32> -> vector<64x8xf32>
    %371 = arith.truncf %370 : vector<64x8xf32> to vector<64x8xbf16>
    %c1_230 = arith.constant 1 : index
    %c0_231 = arith.constant 0 : index
    %c0_232 = arith.constant 0 : index
    %372 = vector.load %arg31[%c1_230, %c0_231, %c0_232] : memref<2x8x32xbf16, #tpu.memory_space<vmem>>, vector<1x8x32xbf16>
    %373 = vector.shape_cast %372 : vector<1x8x32xbf16> to vector<8x32xbf16>
    %cst_233 = arith.constant dense<0.000000e+00> : vector<64x32xf32>
    %374 = tpu.matmul %371, %373, %cst_233 {dimension_numbers = #tpu.dot_dimension_numbers<[1], [0], [0], [1], [0, 0, 1, 1], [], []>} : vector<64x8xbf16>, vector<8x32xbf16>, vector<64x32xf32> -> vector<64x32xf32>
    %375 = arith.addf %331, %374 : vector<64x32xf32>
    %c0_234 = arith.constant 0 : index
    %c0_235 = arith.constant 0 : index
    %376 = vector.load %arg32[%c0_234, %c0_235] : memref<1x32xf32, #tpu.memory_space<vmem>>, vector<1x32xf32>
    %377 = vector.broadcast %376 : vector<1x32xf32> to vector<64x32xf32>
    %378 = arith.addf %375, %377 : vector<64x32xf32>
    %379 = arith.addf %3, %378 : vector<64x32xf32>
    %cst_236 = arith.constant dense<0.000000e+00> : vector<64xf32>
    %380 = vector.multi_reduction <add>, %379, %cst_236 [1] : vector<64x32xf32> to vector<64xf32>
    %381 = vector.shape_cast %380 : vector<64xf32> to vector<64x1xf32>
    %cst_237 = arith.constant 3.200000e+01 : f32
    %382 = vector.broadcast %cst_237 : f32 to vector<64x1xf32>
    %383 = arith.divf %381, %382 : vector<64x1xf32>
    %384 = vector.broadcast %383 : vector<64x1xf32> to vector<64x32xf32>
    %385 = arith.subf %379, %384 : vector<64x32xf32>
    %386 = arith.mulf %385, %385 : vector<64x32xf32>
    %cst_238 = arith.constant dense<0.000000e+00> : vector<64xf32>
    %387 = vector.multi_reduction <add>, %386, %cst_238 [1] : vector<64x32xf32> to vector<64xf32>
    %388 = vector.shape_cast %387 : vector<64xf32> to vector<64x1xf32>
    %cst_239 = arith.constant 3.200000e+01 : f32
    %389 = vector.broadcast %cst_239 : f32 to vector<64x1xf32>
    %390 = arith.divf %388, %389 : vector<64x1xf32>
    %cst_240 = arith.constant 9.99999974E-6 : f32
    %391 = vector.broadcast %cst_240 : f32 to vector<64x1xf32>
    %392 = arith.addf %390, %391 : vector<64x1xf32>
    %393 = math.rsqrt %392 : vector<64x1xf32>
    %394 = vector.broadcast %393 : vector<64x1xf32> to vector<64x32xf32>
    %395 = arith.mulf %385, %394 : vector<64x32xf32>
    %c0_241 = arith.constant 0 : index
    %c0_242 = arith.constant 0 : index
    %396 = vector.load %arg39[%c0_241, %c0_242] : memref<1x32xf32, #tpu.memory_space<vmem>>, vector<1x32xf32>
    %397 = vector.broadcast %396 : vector<1x32xf32> to vector<64x32xf32>
    %398 = arith.mulf %395, %397 : vector<64x32xf32>
    %c0_243 = arith.constant 0 : index
    %c0_244 = arith.constant 0 : index
    %399 = vector.load %arg40[%c0_243, %c0_244] : memref<1x32xf32, #tpu.memory_space<vmem>>, vector<1x32xf32>
    %400 = vector.broadcast %399 : vector<1x32xf32> to vector<64x32xf32>
    %401 = arith.addf %398, %400 : vector<64x32xf32>
    %c0_245 = arith.constant 0 : index
    %c0_246 = arith.constant 0 : index
    %c0_247 = arith.constant 0 : index
    %402 = vector.load %arg41[%c0_245, %c0_246, %c0_247] : memref<1x8x32xf32, #tpu.memory_space<vmem>>, vector<1x8x32xf32>
    %403 = vector.shape_cast %402 : vector<1x8x32xf32> to vector<8x32xf32>
    %404 = vector.shape_cast %281 : vector<8x32xf32> to vector<1x8x32xf32>
    tpu.vector_store %arg41[%c0_245, %c0_246, %c0_247], %404 {strides = array<i32>} : memref<1x8x32xf32, #tpu.memory_space<vmem>>, vector<1x8x32xf32>,
    %c0_248 = arith.constant 0 : index
    %c0_249 = arith.constant 0 : index
    %c0_250 = arith.constant 0 : index
    %405 = vector.load %arg42[%c0_248, %c0_249, %c0_250] : memref<1x64x32xf32, #tpu.memory_space<vmem>>, vector<1x64x32xf32>
    %406 = vector.shape_cast %405 : vector<1x64x32xf32> to vector<64x32xf32>
    %407 = vector.shape_cast %401 : vector<64x32xf32> to vector<1x64x32xf32>
    tpu.vector_store %arg42[%c0_248, %c0_249, %c0_250], %407 {strides = array<i32>} : memref<1x64x32xf32, #tpu.memory_space<vmem>>, vector<1x64x32xf32>,
    return
  }
  func.func @transform_0(%arg0: i32) -> (i32, i32, i32) {
    %c0_i32 = arith.constant 0 : i32
    %c0_i32_0 = arith.constant 0 : i32
    %c0_i32_1 = arith.constant 0 : i32
    return %arg0, %c0_i32, %c0_i32_0 : i32, i32, i32
  }
  func.func @transform_1(%arg0: i32) -> (i32, i32, i32) {
    %c0_i32 = arith.constant 0 : i32
    %c0_i32_0 = arith.constant 0 : i32
    %c0_i32_1 = arith.constant 0 : i32
    return %arg0, %c0_i32, %c0_i32_0 : i32, i32, i32
  }
  func.func @transform_2(%arg0: i32) -> (i32, i32, i32) {
    %c0_i32 = arith.constant 0 : i32
    %c0_i32_0 = arith.constant 0 : i32
    %c0_i32_1 = arith.constant 0 : i32
    return %arg0, %c0_i32, %c0_i32_0 : i32, i32, i32
  }
  func.func @transform_3(%arg0: i32) -> (i32, i32, i32) {
    %c0_i32 = arith.constant 0 : i32
    %c0_i32_0 = arith.constant 0 : i32
    %c0_i32_1 = arith.constant 0 : i32
    return %arg0, %c0_i32, %c0_i32_0 : i32, i32, i32
  }
  func.func @transform_4(%arg0: i32) -> (i32, i32, i32) {
    %c0_i32 = arith.constant 0 : i32
    %c0_i32_0 = arith.constant 0 : i32
    %c0_i32_1 = arith.constant 0 : i32
    %c0_i32_2 = arith.constant 0 : i32
    return %c0_i32, %c0_i32_0, %c0_i32_1 : i32, i32, i32
  }
  func.func @transform_5(%arg0: i32) -> (i32, i32, i32) {
    %c0_i32 = arith.constant 0 : i32
    %c0_i32_0 = arith.constant 0 : i32
    %c0_i32_1 = arith.constant 0 : i32
    %c0_i32_2 = arith.constant 0 : i32
    return %c0_i32, %c0_i32_0, %c0_i32_1 : i32, i32, i32
  }
  func.func @transform_6(%arg0: i32) -> (i32, i32, i32) {
    %c0_i32 = arith.constant 0 : i32
    %c0_i32_0 = arith.constant 0 : i32
    %c0_i32_1 = arith.constant 0 : i32
    %c0_i32_2 = arith.constant 0 : i32
    return %c0_i32, %c0_i32_0, %c0_i32_1 : i32, i32, i32
  }
  func.func @transform_7(%arg0: i32) -> (i32, i32, i32) {
    %c0_i32 = arith.constant 0 : i32
    %c0_i32_0 = arith.constant 0 : i32
    %c0_i32_1 = arith.constant 0 : i32
    %c0_i32_2 = arith.constant 0 : i32
    return %c0_i32, %c0_i32_0, %c0_i32_1 : i32, i32, i32
  }
  func.func @transform_8(%arg0: i32) -> (i32, i32, i32) {
    %c0_i32 = arith.constant 0 : i32
    %c0_i32_0 = arith.constant 0 : i32
    %c0_i32_1 = arith.constant 0 : i32
    %c0_i32_2 = arith.constant 0 : i32
    return %c0_i32, %c0_i32_0, %c0_i32_1 : i32, i32, i32
  }
  func.func @transform_9(%arg0: i32) -> (i32, i32, i32) {
    %c0_i32 = arith.constant 0 : i32
    %c0_i32_0 = arith.constant 0 : i32
    %c0_i32_1 = arith.constant 0 : i32
    %c0_i32_2 = arith.constant 0 : i32
    return %c0_i32, %c0_i32_0, %c0_i32_1 : i32, i32, i32
  }
  func.func @transform_10(%arg0: i32) -> (i32, i32, i32) {
    %c0_i32 = arith.constant 0 : i32
    %c0_i32_0 = arith.constant 0 : i32
    %c0_i32_1 = arith.constant 0 : i32
    %c0_i32_2 = arith.constant 0 : i32
    return %c0_i32, %c0_i32_0, %c0_i32_1 : i32, i32, i32
  }
  func.func @transform_11(%arg0: i32) -> (i32, i32) {
    %c0_i32 = arith.constant 0 : i32
    %c0_i32_0 = arith.constant 0 : i32
    %c0_i32_1 = arith.constant 0 : i32
    return %c0_i32, %c0_i32_0 : i32, i32
  }
  func.func @transform_12(%arg0: i32) -> (i32, i32, i32) {
    %c0_i32 = arith.constant 0 : i32
    %c0_i32_0 = arith.constant 0 : i32
    %c0_i32_1 = arith.constant 0 : i32
    %c0_i32_2 = arith.constant 0 : i32
    return %c0_i32, %c0_i32_0, %c0_i32_1 : i32, i32, i32
  }
  func.func @transform_13(%arg0: i32) -> (i32, i32, i32) {
    %c0_i32 = arith.constant 0 : i32
    %c0_i32_0 = arith.constant 0 : i32
    %c0_i32_1 = arith.constant 0 : i32
    %c0_i32_2 = arith.constant 0 : i32
    return %c0_i32, %c0_i32_0, %c0_i32_1 : i32, i32, i32
  }
  func.func @transform_14(%arg0: i32) -> (i32, i32, i32) {
    %c0_i32 = arith.constant 0 : i32
    %c0_i32_0 = arith.constant 0 : i32
    %c0_i32_1 = arith.constant 0 : i32
    %c0_i32_2 = arith.constant 0 : i32
    return %c0_i32, %c0_i32_0, %c0_i32_1 : i32, i32, i32
  }
  func.func @transform_15(%arg0: i32) -> (i32, i32, i32) {
    %c0_i32 = arith.constant 0 : i32
    %c0_i32_0 = arith.constant 0 : i32
    %c0_i32_1 = arith.constant 0 : i32
    %c0_i32_2 = arith.constant 0 : i32
    return %c0_i32, %c0_i32_0, %c0_i32_1 : i32, i32, i32
  }
  func.func @transform_16(%arg0: i32) -> (i32, i32, i32) {
    %c0_i32 = arith.constant 0 : i32
    %c0_i32_0 = arith.constant 0 : i32
    %c0_i32_1 = arith.constant 0 : i32
    %c0_i32_2 = arith.constant 0 : i32
    return %c0_i32, %c0_i32_0, %c0_i32_1 : i32, i32, i32
  }
  func.func @transform_17(%arg0: i32) -> (i32, i32, i32) {
    %c0_i32 = arith.constant 0 : i32
    %c0_i32_0 = arith.constant 0 : i32
    %c0_i32_1 = arith.constant 0 : i32
    %c0_i32_2 = arith.constant 0 : i32
    return %c0_i32, %c0_i32_0, %c0_i32_1 : i32, i32, i32
  }
  func.func @transform_18(%arg0: i32) -> (i32, i32, i32) {
    %c0_i32 = arith.constant 0 : i32
    %c0_i32_0 = arith.constant 0 : i32
    %c0_i32_1 = arith.constant 0 : i32
    %c0_i32_2 = arith.constant 0 : i32
    return %c0_i32, %c0_i32_0, %c0_i32_1 : i32, i32, i32
  }
  func.func @transform_19(%arg0: i32) -> (i32, i32) {
    %c0_i32 = arith.constant 0 : i32
    %c0_i32_0 = arith.constant 0 : i32
    %c0_i32_1 = arith.constant 0 : i32
    return %c0_i32, %c0_i32_0 : i32, i32
  }
  func.func @transform_20(%arg0: i32) -> (i32, i32) {
    %c0_i32 = arith.constant 0 : i32
    %c0_i32_0 = arith.constant 0 : i32
    %c0_i32_1 = arith.constant 0 : i32
    return %c0_i32, %c0_i32_0 : i32, i32
  }
  func.func @transform_21(%arg0: i32) -> (i32, i32) {
    %c0_i32 = arith.constant 0 : i32
    %c0_i32_0 = arith.constant 0 : i32
    %c0_i32_1 = arith.constant 0 : i32
    return %c0_i32, %c0_i32_0 : i32, i32
  }
  func.func @transform_22(%arg0: i32) -> (i32, i32) {
    %c0_i32 = arith.constant 0 : i32
    %c0_i32_0 = arith.constant 0 : i32
    %c0_i32_1 = arith.constant 0 : i32
    return %c0_i32, %c0_i32_0 : i32, i32
  }
  func.func @transform_23(%arg0: i32) -> (i32, i32) {
    %c0_i32 = arith.constant 0 : i32
    %c0_i32_0 = arith.constant 0 : i32
    %c0_i32_1 = arith.constant 0 : i32
    return %c0_i32, %c0_i32_0 : i32, i32
  }
  func.func @transform_24(%arg0: i32) -> (i32, i32, i32) {
    %c0_i32 = arith.constant 0 : i32
    %c0_i32_0 = arith.constant 0 : i32
    %c0_i32_1 = arith.constant 0 : i32
    %c0_i32_2 = arith.constant 0 : i32
    return %c0_i32, %c0_i32_0, %c0_i32_1 : i32, i32, i32
  }
  func.func @transform_25(%arg0: i32) -> (i32, i32, i32) {
    %c0_i32 = arith.constant 0 : i32
    %c0_i32_0 = arith.constant 0 : i32
    %c0_i32_1 = arith.constant 0 : i32
    %c0_i32_2 = arith.constant 0 : i32
    return %c0_i32, %c0_i32_0, %c0_i32_1 : i32, i32, i32
  }
  func.func @transform_26(%arg0: i32) -> (i32, i32, i32) {
    %c0_i32 = arith.constant 0 : i32
    %c0_i32_0 = arith.constant 0 : i32
    %c0_i32_1 = arith.constant 0 : i32
    %c0_i32_2 = arith.constant 0 : i32
    return %c0_i32, %c0_i32_0, %c0_i32_1 : i32, i32, i32
  }
  func.func @transform_27(%arg0: i32) -> (i32, i32, i32) {
    %c0_i32 = arith.constant 0 : i32
    %c0_i32_0 = arith.constant 0 : i32
    %c0_i32_1 = arith.constant 0 : i32
    %c0_i32_2 = arith.constant 0 : i32
    return %c0_i32, %c0_i32_0, %c0_i32_1 : i32, i32, i32
  }
  func.func @transform_28(%arg0: i32) -> (i32, i32, i32) {
    %c0_i32 = arith.constant 0 : i32
    %c0_i32_0 = arith.constant 0 : i32
    %c0_i32_1 = arith.constant 0 : i32
    %c0_i32_2 = arith.constant 0 : i32
    return %c0_i32, %c0_i32_0, %c0_i32_1 : i32, i32, i32
  }
  func.func @transform_29(%arg0: i32) -> (i32, i32, i32) {
    %c0_i32 = arith.constant 0 : i32
    %c0_i32_0 = arith.constant 0 : i32
    %c0_i32_1 = arith.constant 0 : i32
    %c0_i32_2 = arith.constant 0 : i32
    return %c0_i32, %c0_i32_0, %c0_i32_1 : i32, i32, i32
  }
  func.func @transform_30(%arg0: i32) -> (i32, i32, i32) {
    %c0_i32 = arith.constant 0 : i32
    %c0_i32_0 = arith.constant 0 : i32
    %c0_i32_1 = arith.constant 0 : i32
    %c0_i32_2 = arith.constant 0 : i32
    return %c0_i32, %c0_i32_0, %c0_i32_1 : i32, i32, i32
  }
  func.func @transform_31(%arg0: i32) -> (i32, i32) {
    %c0_i32 = arith.constant 0 : i32
    %c0_i32_0 = arith.constant 0 : i32
    %c0_i32_1 = arith.constant 0 : i32
    return %c0_i32, %c0_i32_0 : i32, i32
  }
  func.func @transform_32(%arg0: i32) -> (i32, i32) {
    %c0_i32 = arith.constant 0 : i32
    %c0_i32_0 = arith.constant 0 : i32
    %c0_i32_1 = arith.constant 0 : i32
    return %c0_i32, %c0_i32_0 : i32, i32
  }
  func.func @transform_33(%arg0: i32) -> (i32, i32) {
    %c0_i32 = arith.constant 0 : i32
    %c0_i32_0 = arith.constant 0 : i32
    %c0_i32_1 = arith.constant 0 : i32
    return %c0_i32, %c0_i32_0 : i32, i32
  }
  func.func @transform_34(%arg0: i32) -> (i32, i32) {
    %c0_i32 = arith.constant 0 : i32
    %c0_i32_0 = arith.constant 0 : i32
    %c0_i32_1 = arith.constant 0 : i32
    return %c0_i32, %c0_i32_0 : i32, i32
  }
  func.func @transform_35(%arg0: i32) -> (i32, i32) {
    %c0_i32 = arith.constant 0 : i32
    %c0_i32_0 = arith.constant 0 : i32
    %c0_i32_1 = arith.constant 0 : i32
    return %c0_i32, %c0_i32_0 : i32, i32
  }
  func.func @transform_36(%arg0: i32) -> (i32, i32) {
    %c0_i32 = arith.constant 0 : i32
    %c0_i32_0 = arith.constant 0 : i32
    %c0_i32_1 = arith.constant 0 : i32
    return %c0_i32, %c0_i32_0 : i32, i32
  }
  func.func @transform_37(%arg0: i32) -> (i32, i32) {
    %c0_i32 = arith.constant 0 : i32
    %c0_i32_0 = arith.constant 0 : i32
    %c0_i32_1 = arith.constant 0 : i32
    return %c0_i32, %c0_i32_0 : i32, i32
  }
  func.func @transform_38(%arg0: i32) -> (i32, i32) {
    %c0_i32 = arith.constant 0 : i32
    %c0_i32_0 = arith.constant 0 : i32
    %c0_i32_1 = arith.constant 0 : i32
    return %c0_i32, %c0_i32_0 : i32, i32
  }
  func.func @transform_39(%arg0: i32) -> (i32, i32) {
    %c0_i32 = arith.constant 0 : i32
    %c0_i32_0 = arith.constant 0 : i32
    %c0_i32_1 = arith.constant 0 : i32
    return %c0_i32, %c0_i32_0 : i32, i32
  }
  func.func @transform_40(%arg0: i32) -> (i32, i32, i32) {
    %c0_i32 = arith.constant 0 : i32
    %c0_i32_0 = arith.constant 0 : i32
    %c0_i32_1 = arith.constant 0 : i32
    return %arg0, %c0_i32, %c0_i32_0 : i32, i32, i32
  }
  func.func @transform_41(%arg0: i32) -> (i32, i32, i32) {
    %c0_i32 = arith.constant 0 : i32
    %c0_i32_0 = arith.constant 0 : i32
    %c0_i32_1 = arith.constant 0 : i32
    return %arg0, %c0_i32, %c0_i32_0 : i32, i32, i32
  }
}

module attributes {stable_mosaic.version = 11 : i64} {
  func.func @_final_attn_kernel(%arg0: i32, %arg1: memref<1x8x32xf32, #tpu.memory_space<vmem>>, %arg2: memref<1x64x32xf32, #tpu.memory_space<vmem>>, %arg3: memref<1x8x32xf32, #tpu.memory_space<vmem>>, %arg4: memref<1x64x32xf32, #tpu.memory_space<vmem>>, %arg5: memref<2x32x8xbf16, #tpu.memory_space<vmem>>, %arg6: memref<2x1x8xf32, #tpu.memory_space<vmem>>, %arg7: memref<2x32x8xbf16, #tpu.memory_space<vmem>>, %arg8: memref<2x1x8xf32, #tpu.memory_space<vmem>>, %arg9: memref<2x32x8xbf16, #tpu.memory_space<vmem>>, %arg10: memref<2x1x8xf32, #tpu.memory_space<vmem>>, %arg11: memref<2x8x32xbf16, #tpu.memory_space<vmem>>, %arg12: memref<1x32xf32, #tpu.memory_space<vmem>>, %arg13: memref<1x32xf32, #tpu.memory_space<vmem>>, %arg14: memref<1x32xf32, #tpu.memory_space<vmem>>, %arg15: memref<1x8x32xf32, #tpu.memory_space<vmem>>) attributes {dimension_semantics = [#tpu.dimension_semantics<parallel>], iteration_bounds = array<i64: 2>, scalar_prefetch = 0 : i64, scratch_operands = 0 : i64, tpu.core_type = #tpu.core_type<tc>, window_params = [{transform_indices = @transform_0, window_bounds = array<i64: 1, 8, 32>}, {transform_indices = @transform_1, window_bounds = array<i64: 1, 64, 32>}, {transform_indices = @transform_2, window_bounds = array<i64: 1, 8, 32>}, {transform_indices = @transform_3, window_bounds = array<i64: 1, 64, 32>}, {pipeline_mode = #tpu.pipeline_mode<synchronous>, transform_indices = @transform_4, window_bounds = array<i64: 2, 32, 8>}, {pipeline_mode = #tpu.pipeline_mode<synchronous>, transform_indices = @transform_5, window_bounds = array<i64: 2, 1, 8>}, {pipeline_mode = #tpu.pipeline_mode<synchronous>, transform_indices = @transform_6, window_bounds = array<i64: 2, 32, 8>}, {pipeline_mode = #tpu.pipeline_mode<synchronous>, transform_indices = @transform_7, window_bounds = array<i64: 2, 1, 8>}, {pipeline_mode = #tpu.pipeline_mode<synchronous>, transform_indices = @transform_8, window_bounds = array<i64: 2, 32, 8>}, {pipeline_mode = #tpu.pipeline_mode<synchronous>, transform_indices = @transform_9, window_bounds = array<i64: 2, 1, 8>}, {pipeline_mode = #tpu.pipeline_mode<synchronous>, transform_indices = @transform_10, window_bounds = array<i64: 2, 8, 32>}, {pipeline_mode = #tpu.pipeline_mode<synchronous>, transform_indices = @transform_11, window_bounds = array<i64: 1, 32>}, {pipeline_mode = #tpu.pipeline_mode<synchronous>, transform_indices = @transform_12, window_bounds = array<i64: 1, 32>}, {pipeline_mode = #tpu.pipeline_mode<synchronous>, transform_indices = @transform_13, window_bounds = array<i64: 1, 32>}, {transform_indices = @transform_14, window_bounds = array<i64: 1, 8, 32>}]} {
    %c0 = arith.constant 0 : index
    %c0_0 = arith.constant 0 : index
    %c0_1 = arith.constant 0 : index
    %0 = vector.load %arg1[%c0, %c0_0, %c0_1] : memref<1x8x32xf32, #tpu.memory_space<vmem>>, vector<1x8x32xf32>
    %1 = vector.shape_cast %0 : vector<1x8x32xf32> to vector<8x32xf32>
    %c0_2 = arith.constant 0 : index
    %c0_3 = arith.constant 0 : index
    %c0_4 = arith.constant 0 : index
    %2 = vector.load %arg2[%c0_2, %c0_3, %c0_4] : memref<1x64x32xf32, #tpu.memory_space<vmem>>, vector<1x64x32xf32>
    %3 = vector.shape_cast %2 : vector<1x64x32xf32> to vector<64x32xf32>
    %c0_5 = arith.constant 0 : index
    %c0_6 = arith.constant 0 : index
    %c0_7 = arith.constant 0 : index
    %4 = vector.load %arg3[%c0_5, %c0_6, %c0_7] : memref<1x8x32xf32, #tpu.memory_space<vmem>>, vector<1x8x32xf32>
    %5 = vector.shape_cast %4 : vector<1x8x32xf32> to vector<8x32xf32>
    %6 = arith.addf %1, %5 : vector<8x32xf32>
    %c0_8 = arith.constant 0 : index
    %c0_9 = arith.constant 0 : index
    %c0_10 = arith.constant 0 : index
    %7 = vector.load %arg4[%c0_8, %c0_9, %c0_10] : memref<1x64x32xf32, #tpu.memory_space<vmem>>, vector<1x64x32xf32>
    %8 = vector.shape_cast %7 : vector<1x64x32xf32> to vector<64x32xf32>
    %9 = arith.addf %3, %8 : vector<64x32xf32>
    %10 = arith.truncf %6 : vector<8x32xf32> to vector<8x32xbf16>
    %11 = arith.truncf %9 : vector<64x32xf32> to vector<64x32xbf16>
    %12 = arith.truncf %3 : vector<64x32xf32> to vector<64x32xbf16>
    %cst = arith.constant 0.000000e+00 : f32
    %13 = vector.broadcast %cst : f32 to vector<8x32xf32>
    %c0_11 = arith.constant 0 : index
    %c0_12 = arith.constant 0 : index
    %c0_13 = arith.constant 0 : index
    %14 = vector.load %arg5[%c0_11, %c0_12, %c0_13] : memref<2x32x8xbf16, #tpu.memory_space<vmem>>, vector<1x32x8xbf16>
    %15 = vector.shape_cast %14 : vector<1x32x8xbf16> to vector<32x8xbf16>
    %cst_14 = arith.constant dense<0.000000e+00> : vector<8x8xf32>
    %16 = tpu.matmul %10, %15, %cst_14 {dimension_numbers = #tpu.dot_dimension_numbers<[1], [0], [0], [1], [0, 0, 1, 1], [], []>} : vector<8x32xbf16>, vector<32x8xbf16>, vector<8x8xf32> -> vector<8x8xf32>
    %c0_15 = arith.constant 0 : index
    %c0_16 = arith.constant 0 : index
    %c0_17 = arith.constant 0 : index
    %17 = vector.load %arg6[%c0_15, %c0_16, %c0_17] : memref<2x1x8xf32, #tpu.memory_space<vmem>>, vector<1x1x8xf32>
    %18 = vector.shape_cast %17 : vector<1x1x8xf32> to vector<1x8xf32>
    %19 = vector.broadcast %18 : vector<1x8xf32> to vector<8x8xf32>
    %20 = arith.addf %16, %19 : vector<8x8xf32>
    %c0_18 = arith.constant 0 : index
    %c0_19 = arith.constant 0 : index
    %c0_20 = arith.constant 0 : index
    %21 = vector.load %arg7[%c0_18, %c0_19, %c0_20] : memref<2x32x8xbf16, #tpu.memory_space<vmem>>, vector<1x32x8xbf16>
    %22 = vector.shape_cast %21 : vector<1x32x8xbf16> to vector<32x8xbf16>
    %cst_21 = arith.constant dense<0.000000e+00> : vector<64x8xf32>
    %23 = tpu.matmul %11, %22, %cst_21 {dimension_numbers = #tpu.dot_dimension_numbers<[1], [0], [0], [1], [0, 0, 1, 1], [], []>} : vector<64x32xbf16>, vector<32x8xbf16>, vector<64x8xf32> -> vector<64x8xf32>
    %c0_22 = arith.constant 0 : index
    %c0_23 = arith.constant 0 : index
    %c0_24 = arith.constant 0 : index
    %24 = vector.load %arg8[%c0_22, %c0_23, %c0_24] : memref<2x1x8xf32, #tpu.memory_space<vmem>>, vector<1x1x8xf32>
    %25 = vector.shape_cast %24 : vector<1x1x8xf32> to vector<1x8xf32>
    %26 = vector.broadcast %25 : vector<1x8xf32> to vector<64x8xf32>
    %27 = arith.addf %23, %26 : vector<64x8xf32>
    %c0_25 = arith.constant 0 : index
    %c0_26 = arith.constant 0 : index
    %c0_27 = arith.constant 0 : index
    %28 = vector.load %arg9[%c0_25, %c0_26, %c0_27] : memref<2x32x8xbf16, #tpu.memory_space<vmem>>, vector<1x32x8xbf16>
    %29 = vector.shape_cast %28 : vector<1x32x8xbf16> to vector<32x8xbf16>
    %cst_28 = arith.constant dense<0.000000e+00> : vector<64x8xf32>
    %30 = tpu.matmul %12, %29, %cst_28 {dimension_numbers = #tpu.dot_dimension_numbers<[1], [0], [0], [1], [0, 0, 1, 1], [], []>} : vector<64x32xbf16>, vector<32x8xbf16>, vector<64x8xf32> -> vector<64x8xf32>
    %c0_29 = arith.constant 0 : index
    %c0_30 = arith.constant 0 : index
    %c0_31 = arith.constant 0 : index
    %31 = vector.load %arg10[%c0_29, %c0_30, %c0_31] : memref<2x1x8xf32, #tpu.memory_space<vmem>>, vector<1x1x8xf32>
    %32 = vector.shape_cast %31 : vector<1x1x8xf32> to vector<1x8xf32>
    %33 = vector.broadcast %32 : vector<1x8xf32> to vector<64x8xf32>
    %34 = arith.addf %30, %33 : vector<64x8xf32>
    %35 = arith.truncf %20 : vector<8x8xf32> to vector<8x8xbf16>
    %36 = arith.truncf %27 : vector<64x8xf32> to vector<64x8xbf16>
    %cst_32 = arith.constant dense<0.000000e+00> : vector<8x64xf32>
    %37 = tpu.matmul %35, %36, %cst_32 {dimension_numbers = #tpu.dot_dimension_numbers<[1], [1], [0], [0], [0, 0, 1, 0], [], []>} : vector<8x8xbf16>, vector<64x8xbf16>, vector<8x64xf32> -> vector<8x64xf32>
    %cst_33 = arith.constant 0.353553385 : f32
    %38 = vector.broadcast %cst_33 : f32 to vector<8x64xf32>
    %39 = arith.mulf %37, %38 : vector<8x64xf32>
    %cst_34 = arith.constant dense<0xFF800000> : vector<8xf32>
    %40 = vector.multi_reduction <maximumf>, %39, %cst_34 [1] : vector<8x64xf32> to vector<8xf32>
    %41 = vector.shape_cast %40 : vector<8xf32> to vector<8x1xf32>
    %42 = vector.broadcast %41 : vector<8x1xf32> to vector<8x64xf32>
    %43 = arith.subf %39, %42 : vector<8x64xf32>
    %44 = math.exp %43 : vector<8x64xf32>
    %cst_35 = arith.constant dense<0.000000e+00> : vector<8xf32>
    %45 = vector.multi_reduction <add>, %44, %cst_35 [1] : vector<8x64xf32> to vector<8xf32>
    %46 = vector.shape_cast %45 : vector<8xf32> to vector<8x1xf32>
    %47 = tpu.reciprocal %46 {approx = true} : vector<8x1xf32> -> vector<8x1xf32>
    %48 = vector.broadcast %47 : vector<8x1xf32> to vector<8x64xf32>
    %49 = arith.mulf %44, %48 : vector<8x64xf32>
    %50 = arith.truncf %49 : vector<8x64xf32> to vector<8x64xbf16>
    %51 = arith.truncf %34 : vector<64x8xf32> to vector<64x8xbf16>
    %cst_36 = arith.constant dense<0.000000e+00> : vector<8x8xf32>
    %52 = tpu.matmul %50, %51, %cst_36 {dimension_numbers = #tpu.dot_dimension_numbers<[1], [0], [0], [1], [0, 0, 1, 1], [], []>} : vector<8x64xbf16>, vector<64x8xbf16>, vector<8x8xf32> -> vector<8x8xf32>
    %53 = arith.truncf %52 : vector<8x8xf32> to vector<8x8xbf16>
    %c0_37 = arith.constant 0 : index
    %c0_38 = arith.constant 0 : index
    %c0_39 = arith.constant 0 : index
    %54 = vector.load %arg11[%c0_37, %c0_38, %c0_39] : memref<2x8x32xbf16, #tpu.memory_space<vmem>>, vector<1x8x32xbf16>
    %55 = vector.shape_cast %54 : vector<1x8x32xbf16> to vector<8x32xbf16>
    %cst_40 = arith.constant dense<0.000000e+00> : vector<8x32xf32>
    %56 = tpu.matmul %53, %55, %cst_40 {dimension_numbers = #tpu.dot_dimension_numbers<[1], [0], [0], [1], [0, 0, 1, 1], [], []>} : vector<8x8xbf16>, vector<8x32xbf16>, vector<8x32xf32> -> vector<8x32xf32>
    %57 = arith.addf %13, %56 : vector<8x32xf32>
    %c1 = arith.constant 1 : index
    %c0_41 = arith.constant 0 : index
    %c0_42 = arith.constant 0 : index
    %58 = vector.load %arg5[%c1, %c0_41, %c0_42] : memref<2x32x8xbf16, #tpu.memory_space<vmem>>, vector<1x32x8xbf16>
    %59 = vector.shape_cast %58 : vector<1x32x8xbf16> to vector<32x8xbf16>
    %cst_43 = arith.constant dense<0.000000e+00> : vector<8x8xf32>
    %60 = tpu.matmul %10, %59, %cst_43 {dimension_numbers = #tpu.dot_dimension_numbers<[1], [0], [0], [1], [0, 0, 1, 1], [], []>} : vector<8x32xbf16>, vector<32x8xbf16>, vector<8x8xf32> -> vector<8x8xf32>
    %c1_44 = arith.constant 1 : index
    %c0_45 = arith.constant 0 : index
    %c0_46 = arith.constant 0 : index
    %61 = vector.load %arg6[%c1_44, %c0_45, %c0_46] : memref<2x1x8xf32, #tpu.memory_space<vmem>>, vector<1x1x8xf32>
    %62 = vector.shape_cast %61 : vector<1x1x8xf32> to vector<1x8xf32>
    %63 = vector.broadcast %62 : vector<1x8xf32> to vector<8x8xf32>
    %64 = arith.addf %60, %63 : vector<8x8xf32>
    %c1_47 = arith.constant 1 : index
    %c0_48 = arith.constant 0 : index
    %c0_49 = arith.constant 0 : index
    %65 = vector.load %arg7[%c1_47, %c0_48, %c0_49] : memref<2x32x8xbf16, #tpu.memory_space<vmem>>, vector<1x32x8xbf16>
    %66 = vector.shape_cast %65 : vector<1x32x8xbf16> to vector<32x8xbf16>
    %cst_50 = arith.constant dense<0.000000e+00> : vector<64x8xf32>
    %67 = tpu.matmul %11, %66, %cst_50 {dimension_numbers = #tpu.dot_dimension_numbers<[1], [0], [0], [1], [0, 0, 1, 1], [], []>} : vector<64x32xbf16>, vector<32x8xbf16>, vector<64x8xf32> -> vector<64x8xf32>
    %c1_51 = arith.constant 1 : index
    %c0_52 = arith.constant 0 : index
    %c0_53 = arith.constant 0 : index
    %68 = vector.load %arg8[%c1_51, %c0_52, %c0_53] : memref<2x1x8xf32, #tpu.memory_space<vmem>>, vector<1x1x8xf32>
    %69 = vector.shape_cast %68 : vector<1x1x8xf32> to vector<1x8xf32>
    %70 = vector.broadcast %69 : vector<1x8xf32> to vector<64x8xf32>
    %71 = arith.addf %67, %70 : vector<64x8xf32>
    %c1_54 = arith.constant 1 : index
    %c0_55 = arith.constant 0 : index
    %c0_56 = arith.constant 0 : index
    %72 = vector.load %arg9[%c1_54, %c0_55, %c0_56] : memref<2x32x8xbf16, #tpu.memory_space<vmem>>, vector<1x32x8xbf16>
    %73 = vector.shape_cast %72 : vector<1x32x8xbf16> to vector<32x8xbf16>
    %cst_57 = arith.constant dense<0.000000e+00> : vector<64x8xf32>
    %74 = tpu.matmul %12, %73, %cst_57 {dimension_numbers = #tpu.dot_dimension_numbers<[1], [0], [0], [1], [0, 0, 1, 1], [], []>} : vector<64x32xbf16>, vector<32x8xbf16>, vector<64x8xf32> -> vector<64x8xf32>
    %c1_58 = arith.constant 1 : index
    %c0_59 = arith.constant 0 : index
    %c0_60 = arith.constant 0 : index
    %75 = vector.load %arg10[%c1_58, %c0_59, %c0_60] : memref<2x1x8xf32, #tpu.memory_space<vmem>>, vector<1x1x8xf32>
    %76 = vector.shape_cast %75 : vector<1x1x8xf32> to vector<1x8xf32>
    %77 = vector.broadcast %76 : vector<1x8xf32> to vector<64x8xf32>
    %78 = arith.addf %74, %77 : vector<64x8xf32>
    %79 = arith.truncf %64 : vector<8x8xf32> to vector<8x8xbf16>
    %80 = arith.truncf %71 : vector<64x8xf32> to vector<64x8xbf16>
    %cst_61 = arith.constant dense<0.000000e+00> : vector<8x64xf32>
    %81 = tpu.matmul %79, %80, %cst_61 {dimension_numbers = #tpu.dot_dimension_numbers<[1], [1], [0], [0], [0, 0, 1, 0], [], []>} : vector<8x8xbf16>, vector<64x8xbf16>, vector<8x64xf32> -> vector<8x64xf32>
    %cst_62 = arith.constant 0.353553385 : f32
    %82 = vector.broadcast %cst_62 : f32 to vector<8x64xf32>
    %83 = arith.mulf %81, %82 : vector<8x64xf32>
    %cst_63 = arith.constant dense<0xFF800000> : vector<8xf32>
    %84 = vector.multi_reduction <maximumf>, %83, %cst_63 [1] : vector<8x64xf32> to vector<8xf32>
    %85 = vector.shape_cast %84 : vector<8xf32> to vector<8x1xf32>
    %86 = vector.broadcast %85 : vector<8x1xf32> to vector<8x64xf32>
    %87 = arith.subf %83, %86 : vector<8x64xf32>
    %88 = math.exp %87 : vector<8x64xf32>
    %cst_64 = arith.constant dense<0.000000e+00> : vector<8xf32>
    %89 = vector.multi_reduction <add>, %88, %cst_64 [1] : vector<8x64xf32> to vector<8xf32>
    %90 = vector.shape_cast %89 : vector<8xf32> to vector<8x1xf32>
    %91 = tpu.reciprocal %90 {approx = true} : vector<8x1xf32> -> vector<8x1xf32>
    %92 = vector.broadcast %91 : vector<8x1xf32> to vector<8x64xf32>
    %93 = arith.mulf %88, %92 : vector<8x64xf32>
    %94 = arith.truncf %93 : vector<8x64xf32> to vector<8x64xbf16>
    %95 = arith.truncf %78 : vector<64x8xf32> to vector<64x8xbf16>
    %cst_65 = arith.constant dense<0.000000e+00> : vector<8x8xf32>
    %96 = tpu.matmul %94, %95, %cst_65 {dimension_numbers = #tpu.dot_dimension_numbers<[1], [0], [0], [1], [0, 0, 1, 1], [], []>} : vector<8x64xbf16>, vector<64x8xbf16>, vector<8x8xf32> -> vector<8x8xf32>
    %97 = arith.truncf %96 : vector<8x8xf32> to vector<8x8xbf16>
    %c1_66 = arith.constant 1 : index
    %c0_67 = arith.constant 0 : index
    %c0_68 = arith.constant 0 : index
    %98 = vector.load %arg11[%c1_66, %c0_67, %c0_68] : memref<2x8x32xbf16, #tpu.memory_space<vmem>>, vector<1x8x32xbf16>
    %99 = vector.shape_cast %98 : vector<1x8x32xbf16> to vector<8x32xbf16>
    %cst_69 = arith.constant dense<0.000000e+00> : vector<8x32xf32>
    %100 = tpu.matmul %97, %99, %cst_69 {dimension_numbers = #tpu.dot_dimension_numbers<[1], [0], [0], [1], [0, 0, 1, 1], [], []>} : vector<8x8xbf16>, vector<8x32xbf16>, vector<8x32xf32> -> vector<8x32xf32>
    %101 = arith.addf %57, %100 : vector<8x32xf32>
    %c0_70 = arith.constant 0 : index
    %c0_71 = arith.constant 0 : index
    %102 = vector.load %arg12[%c0_70, %c0_71] : memref<1x32xf32, #tpu.memory_space<vmem>>, vector<1x32xf32>
    %103 = vector.broadcast %102 : vector<1x32xf32> to vector<8x32xf32>
    %104 = arith.addf %101, %103 : vector<8x32xf32>
    %105 = arith.addf %1, %104 : vector<8x32xf32>
    %cst_72 = arith.constant dense<0.000000e+00> : vector<8xf32>
    %106 = vector.multi_reduction <add>, %105, %cst_72 [1] : vector<8x32xf32> to vector<8xf32>
    %107 = vector.shape_cast %106 : vector<8xf32> to vector<8x1xf32>
    %cst_73 = arith.constant 3.200000e+01 : f32
    %108 = vector.broadcast %cst_73 : f32 to vector<8x1xf32>
    %109 = arith.divf %107, %108 : vector<8x1xf32>
    %110 = vector.broadcast %109 : vector<8x1xf32> to vector<8x32xf32>
    %111 = arith.subf %105, %110 : vector<8x32xf32>
    %112 = arith.mulf %111, %111 : vector<8x32xf32>
    %cst_74 = arith.constant dense<0.000000e+00> : vector<8xf32>
    %113 = vector.multi_reduction <add>, %112, %cst_74 [1] : vector<8x32xf32> to vector<8xf32>
    %114 = vector.shape_cast %113 : vector<8xf32> to vector<8x1xf32>
    %cst_75 = arith.constant 3.200000e+01 : f32
    %115 = vector.broadcast %cst_75 : f32 to vector<8x1xf32>
    %116 = arith.divf %114, %115 : vector<8x1xf32>
    %cst_76 = arith.constant 9.99999974E-6 : f32
    %117 = vector.broadcast %cst_76 : f32 to vector<8x1xf32>
    %118 = arith.addf %116, %117 : vector<8x1xf32>
    %119 = math.rsqrt %118 : vector<8x1xf32>
    %120 = vector.broadcast %119 : vector<8x1xf32> to vector<8x32xf32>
    %121 = arith.mulf %111, %120 : vector<8x32xf32>
    %c0_77 = arith.constant 0 : index
    %c0_78 = arith.constant 0 : index
    %122 = vector.load %arg13[%c0_77, %c0_78] : memref<1x32xf32, #tpu.memory_space<vmem>>, vector<1x32xf32>
    %123 = vector.broadcast %122 : vector<1x32xf32> to vector<8x32xf32>
    %124 = arith.mulf %121, %123 : vector<8x32xf32>
    %c0_79 = arith.constant 0 : index
    %c0_80 = arith.constant 0 : index
    %125 = vector.load %arg14[%c0_79, %c0_80] : memref<1x32xf32, #tpu.memory_space<vmem>>, vector<1x32xf32>
    %126 = vector.broadcast %125 : vector<1x32xf32> to vector<8x32xf32>
    %127 = arith.addf %124, %126 : vector<8x32xf32>
    %c0_81 = arith.constant 0 : index
    %c0_82 = arith.constant 0 : index
    %c0_83 = arith.constant 0 : index
    %128 = vector.load %arg15[%c0_81, %c0_82, %c0_83] : memref<1x8x32xf32, #tpu.memory_space<vmem>>, vector<1x8x32xf32>
    %129 = vector.shape_cast %128 : vector<1x8x32xf32> to vector<8x32xf32>
    %130 = vector.shape_cast %127 : vector<8x32xf32> to vector<1x8x32xf32>
    tpu.vector_store %arg15[%c0_81, %c0_82, %c0_83], %130 {strides = array<i32>} : memref<1x8x32xf32, #tpu.memory_space<vmem>>, vector<1x8x32xf32>,
    return
  }
  func.func @transform_0(%arg0: i32) -> (i32, i32, i32) {
    %c0_i32 = arith.constant 0 : i32
    %c0_i32_0 = arith.constant 0 : i32
    %c0_i32_1 = arith.constant 0 : i32
    return %arg0, %c0_i32, %c0_i32_0 : i32, i32, i32
  }
  func.func @transform_1(%arg0: i32) -> (i32, i32, i32) {
    %c0_i32 = arith.constant 0 : i32
    %c0_i32_0 = arith.constant 0 : i32
    %c0_i32_1 = arith.constant 0 : i32
    return %arg0, %c0_i32, %c0_i32_0 : i32, i32, i32
  }
  func.func @transform_2(%arg0: i32) -> (i32, i32, i32) {
    %c0_i32 = arith.constant 0 : i32
    %c0_i32_0 = arith.constant 0 : i32
    %c0_i32_1 = arith.constant 0 : i32
    return %arg0, %c0_i32, %c0_i32_0 : i32, i32, i32
  }
  func.func @transform_3(%arg0: i32) -> (i32, i32, i32) {
    %c0_i32 = arith.constant 0 : i32
    %c0_i32_0 = arith.constant 0 : i32
    %c0_i32_1 = arith.constant 0 : i32
    return %arg0, %c0_i32, %c0_i32_0 : i32, i32, i32
  }
  func.func @transform_4(%arg0: i32) -> (i32, i32, i32) {
    %c0_i32 = arith.constant 0 : i32
    %c0_i32_0 = arith.constant 0 : i32
    %c0_i32_1 = arith.constant 0 : i32
    %c0_i32_2 = arith.constant 0 : i32
    return %c0_i32, %c0_i32_0, %c0_i32_1 : i32, i32, i32
  }
  func.func @transform_5(%arg0: i32) -> (i32, i32, i32) {
    %c0_i32 = arith.constant 0 : i32
    %c0_i32_0 = arith.constant 0 : i32
    %c0_i32_1 = arith.constant 0 : i32
    %c0_i32_2 = arith.constant 0 : i32
    return %c0_i32, %c0_i32_0, %c0_i32_1 : i32, i32, i32
  }
  func.func @transform_6(%arg0: i32) -> (i32, i32, i32) {
    %c0_i32 = arith.constant 0 : i32
    %c0_i32_0 = arith.constant 0 : i32
    %c0_i32_1 = arith.constant 0 : i32
    %c0_i32_2 = arith.constant 0 : i32
    return %c0_i32, %c0_i32_0, %c0_i32_1 : i32, i32, i32
  }
  func.func @transform_7(%arg0: i32) -> (i32, i32, i32) {
    %c0_i32 = arith.constant 0 : i32
    %c0_i32_0 = arith.constant 0 : i32
    %c0_i32_1 = arith.constant 0 : i32
    %c0_i32_2 = arith.constant 0 : i32
    return %c0_i32, %c0_i32_0, %c0_i32_1 : i32, i32, i32
  }
  func.func @transform_8(%arg0: i32) -> (i32, i32, i32) {
    %c0_i32 = arith.constant 0 : i32
    %c0_i32_0 = arith.constant 0 : i32
    %c0_i32_1 = arith.constant 0 : i32
    %c0_i32_2 = arith.constant 0 : i32
    return %c0_i32, %c0_i32_0, %c0_i32_1 : i32, i32, i32
  }
  func.func @transform_9(%arg0: i32) -> (i32, i32, i32) {
    %c0_i32 = arith.constant 0 : i32
    %c0_i32_0 = arith.constant 0 : i32
    %c0_i32_1 = arith.constant 0 : i32
    %c0_i32_2 = arith.constant 0 : i32
    return %c0_i32, %c0_i32_0, %c0_i32_1 : i32, i32, i32
  }
  func.func @transform_10(%arg0: i32) -> (i32, i32, i32) {
    %c0_i32 = arith.constant 0 : i32
    %c0_i32_0 = arith.constant 0 : i32
    %c0_i32_1 = arith.constant 0 : i32
    %c0_i32_2 = arith.constant 0 : i32
    return %c0_i32, %c0_i32_0, %c0_i32_1 : i32, i32, i32
  }
  func.func @transform_11(%arg0: i32) -> (i32, i32) {
    %c0_i32 = arith.constant 0 : i32
    %c0_i32_0 = arith.constant 0 : i32
    %c0_i32_1 = arith.constant 0 : i32
    return %c0_i32, %c0_i32_0 : i32, i32
  }
  func.func @transform_12(%arg0: i32) -> (i32, i32) {
    %c0_i32 = arith.constant 0 : i32
    %c0_i32_0 = arith.constant 0 : i32
    %c0_i32_1 = arith.constant 0 : i32
    return %c0_i32, %c0_i32_0 : i32, i32
  }
  func.func @transform_13(%arg0: i32) -> (i32, i32) {
    %c0_i32 = arith.constant 0 : i32
    %c0_i32_0 = arith.constant 0 : i32
    %c0_i32_1 = arith.constant 0 : i32
    return %c0_i32, %c0_i32_0 : i32, i32
  }
  func.func @transform_14(%arg0: i32) -> (i32, i32, i32) {
    %c0_i32 = arith.constant 0 : i32
    %c0_i32_0 = arith.constant 0 : i32
    %c0_i32_1 = arith.constant 0 : i32
    return %arg0, %c0_i32, %c0_i32_0 : i32, i32, i32
  }
}

module attributes {stable_mosaic.version = 11 : i64} {
  func.func @_two_way_block_kernel(%arg0: i32, %arg1: memref<1x8x32xf32, #tpu.memory_space<vmem>>, %arg2: memref<1x64x32xf32, #tpu.memory_space<vmem>>, %arg3: memref<1x8x32xf32, #tpu.memory_space<vmem>>, %arg4: memref<1x64x32xf32, #tpu.memory_space<vmem>>, %arg5: memref<2x32x16xbf16, #tpu.memory_space<vmem>>, %arg6: memref<2x1x16xf32, #tpu.memory_space<vmem>>, %arg7: memref<2x32x16xbf16, #tpu.memory_space<vmem>>, %arg8: memref<2x1x16xf32, #tpu.memory_space<vmem>>, %arg9: memref<2x32x16xbf16, #tpu.memory_space<vmem>>, %arg10: memref<2x1x16xf32, #tpu.memory_space<vmem>>, %arg11: memref<2x16x32xbf16, #tpu.memory_space<vmem>>, %arg12: memref<1x32xf32, #tpu.memory_space<vmem>>, %arg13: memref<2x32x8xbf16, #tpu.memory_space<vmem>>, %arg14: memref<2x1x8xf32, #tpu.memory_space<vmem>>, %arg15: memref<2x32x8xbf16, #tpu.memory_space<vmem>>, %arg16: memref<2x1x8xf32, #tpu.memory_space<vmem>>, %arg17: memref<2x32x8xbf16, #tpu.memory_space<vmem>>, %arg18: memref<2x1x8xf32, #tpu.memory_space<vmem>>, %arg19: memref<2x8x32xbf16, #tpu.memory_space<vmem>>, %arg20: memref<1x32xf32, #tpu.memory_space<vmem>>, %arg21: memref<32x64xbf16, #tpu.memory_space<vmem>>, %arg22: memref<1x64xf32, #tpu.memory_space<vmem>>, %arg23: memref<64x32xbf16, #tpu.memory_space<vmem>>, %arg24: memref<1x32xf32, #tpu.memory_space<vmem>>, %arg25: memref<2x32x8xbf16, #tpu.memory_space<vmem>>, %arg26: memref<2x1x8xf32, #tpu.memory_space<vmem>>, %arg27: memref<2x32x8xbf16, #tpu.memory_space<vmem>>, %arg28: memref<2x1x8xf32, #tpu.memory_space<vmem>>, %arg29: memref<2x32x8xbf16, #tpu.memory_space<vmem>>, %arg30: memref<2x1x8xf32, #tpu.memory_space<vmem>>, %arg31: memref<2x8x32xbf16, #tpu.memory_space<vmem>>, %arg32: memref<1x32xf32, #tpu.memory_space<vmem>>, %arg33: memref<1x32xf32, #tpu.memory_space<vmem>>, %arg34: memref<1x32xf32, #tpu.memory_space<vmem>>, %arg35: memref<1x32xf32, #tpu.memory_space<vmem>>, %arg36: memref<1x32xf32, #tpu.memory_space<vmem>>, %arg37: memref<1x32xf32, #tpu.memory_space<vmem>>, %arg38: memref<1x32xf32, #tpu.memory_space<vmem>>, %arg39: memref<1x32xf32, #tpu.memory_space<vmem>>, %arg40: memref<1x32xf32, #tpu.memory_space<vmem>>, %arg41: memref<1x8x32xf32, #tpu.memory_space<vmem>>, %arg42: memref<1x64x32xf32, #tpu.memory_space<vmem>>) attributes {dimension_semantics = [#tpu.dimension_semantics<parallel>], iteration_bounds = array<i64: 2>, scalar_prefetch = 0 : i64, scratch_operands = 0 : i64, tpu.core_type = #tpu.core_type<tc>, window_params = [{transform_indices = @transform_0, window_bounds = array<i64: 1, 8, 32>}, {transform_indices = @transform_1, window_bounds = array<i64: 1, 64, 32>}, {transform_indices = @transform_2, window_bounds = array<i64: 1, 8, 32>}, {transform_indices = @transform_3, window_bounds = array<i64: 1, 64, 32>}, {pipeline_mode = #tpu.pipeline_mode<synchronous>, transform_indices = @transform_4, window_bounds = array<i64: 2, 32, 16>}, {pipeline_mode = #tpu.pipeline_mode<synchronous>, transform_indices = @transform_5, window_bounds = array<i64: 2, 1, 16>}, {pipeline_mode = #tpu.pipeline_mode<synchronous>, transform_indices = @transform_6, window_bounds = array<i64: 2, 32, 16>}, {pipeline_mode = #tpu.pipeline_mode<synchronous>, transform_indices = @transform_7, window_bounds = array<i64: 2, 1, 16>}, {pipeline_mode = #tpu.pipeline_mode<synchronous>, transform_indices = @transform_8, window_bounds = array<i64: 2, 32, 16>}, {pipeline_mode = #tpu.pipeline_mode<synchronous>, transform_indices = @transform_9, window_bounds = array<i64: 2, 1, 16>}, {pipeline_mode = #tpu.pipeline_mode<synchronous>, transform_indices = @transform_10, window_bounds = array<i64: 2, 16, 32>}, {pipeline_mode = #tpu.pipeline_mode<synchronous>, transform_indices = @transform_11, window_bounds = array<i64: 1, 32>}, {pipeline_mode = #tpu.pipeline_mode<synchronous>, transform_indices = @transform_12, window_bounds = array<i64: 2, 32, 8>}, {pipeline_mode = #tpu.pipeline_mode<synchronous>, transform_indices = @transform_13, window_bounds = array<i64: 2, 1, 8>}, {pipeline_mode = #tpu.pipeline_mode<synchronous>, transform_indices = @transform_14, window_bounds = array<i64: 2, 32, 8>}, {pipeline_mode = #tpu.pipeline_mode<synchronous>, transform_indices = @transform_15, window_bounds = array<i64: 2, 1, 8>}, {pipeline_mode = #tpu.pipeline_mode<synchronous>, transform_indices = @transform_16, window_bounds = array<i64: 2, 32, 8>}, {pipeline_mode = #tpu.pipeline_mode<synchronous>, transform_indices = @transform_17, window_bounds = array<i64: 2, 1, 8>}, {pipeline_mode = #tpu.pipeline_mode<synchronous>, transform_indices = @transform_18, window_bounds = array<i64: 2, 8, 32>}, {pipeline_mode = #tpu.pipeline_mode<synchronous>, transform_indices = @transform_19, window_bounds = array<i64: 1, 32>}, {pipeline_mode = #tpu.pipeline_mode<synchronous>, transform_indices = @transform_20, window_bounds = array<i64: 32, 64>}, {pipeline_mode = #tpu.pipeline_mode<synchronous>, transform_indices = @transform_21, window_bounds = array<i64: 1, 64>}, {pipeline_mode = #tpu.pipeline_mode<synchronous>, transform_indices = @transform_22, window_bounds = array<i64: 64, 32>}, {pipeline_mode = #tpu.pipeline_mode<synchronous>, transform_indices = @transform_23, window_bounds = array<i64: 1, 32>}, {pipeline_mode = #tpu.pipeline_mode<synchronous>, transform_indices = @transform_24, window_bounds = array<i64: 2, 32, 8>}, {pipeline_mode = #tpu.pipeline_mode<synchronous>, transform_indices = @transform_25, window_bounds = array<i64: 2, 1, 8>}, {pipeline_mode = #tpu.pipeline_mode<synchronous>, transform_indices = @transform_26, window_bounds = array<i64: 2, 32, 8>}, {pipeline_mode = #tpu.pipeline_mode<synchronous>, transform_indices = @transform_27, window_bounds = array<i64: 2, 1, 8>}, {pipeline_mode = #tpu.pipeline_mode<synchronous>, transform_indices = @transform_28, window_bounds = array<i64: 2, 32, 8>}, {pipeline_mode = #tpu.pipeline_mode<synchronous>, transform_indices = @transform_29, window_bounds = array<i64: 2, 1, 8>}, {pipeline_mode = #tpu.pipeline_mode<synchronous>, transform_indices = @transform_30, window_bounds = array<i64: 2, 8, 32>}, {pipeline_mode = #tpu.pipeline_mode<synchronous>, transform_indices = @transform_31, window_bounds = array<i64: 1, 32>}, {pipeline_mode = #tpu.pipeline_mode<synchronous>, transform_indices = @transform_32, window_bounds = array<i64: 1, 32>}, {pipeline_mode = #tpu.pipeline_mode<synchronous>, transform_indices = @transform_33, window_bounds = array<i64: 1, 32>}, {pipeline_mode = #tpu.pipeline_mode<synchronous>, transform_indices = @transform_34, window_bounds = array<i64: 1, 32>}, {pipeline_mode = #tpu.pipeline_mode<synchronous>, transform_indices = @transform_35, window_bounds = array<i64: 1, 32>}, {pipeline_mode = #tpu.pipeline_mode<synchronous>, transform_indices = @transform_36, window_bounds = array<i64: 1, 32>}, {pipeline_mode = #tpu.pipeline_mode<synchronous>, transform_indices = @transform_37, window_bounds = array<i64: 1, 32>}, {pipeline_mode = #tpu.pipeline_mode<synchronous>, transform_indices = @transform_38, window_bounds = array<i64: 1, 32>}, {pipeline_mode = #tpu.pipeline_mode<synchronous>, transform_indices = @transform_39, window_bounds = array<i64: 1, 32>}, {transform_indices = @transform_40, window_bounds = array<i64: 1, 8, 32>}, {transform_indices = @transform_41, window_bounds = array<i64: 1, 64, 32>}]} {
    %c0 = arith.constant 0 : index
    %c0_0 = arith.constant 0 : index
    %c0_1 = arith.constant 0 : index
    %0 = vector.load %arg1[%c0, %c0_0, %c0_1] : memref<1x8x32xf32, #tpu.memory_space<vmem>>, vector<1x8x32xf32>
    %1 = vector.shape_cast %0 : vector<1x8x32xf32> to vector<8x32xf32>
    %c0_2 = arith.constant 0 : index
    %c0_3 = arith.constant 0 : index
    %c0_4 = arith.constant 0 : index
    %2 = vector.load %arg2[%c0_2, %c0_3, %c0_4] : memref<1x64x32xf32, #tpu.memory_space<vmem>>, vector<1x64x32xf32>
    %3 = vector.shape_cast %2 : vector<1x64x32xf32> to vector<64x32xf32>
    %c0_5 = arith.constant 0 : index
    %c0_6 = arith.constant 0 : index
    %c0_7 = arith.constant 0 : index
    %4 = vector.load %arg3[%c0_5, %c0_6, %c0_7] : memref<1x8x32xf32, #tpu.memory_space<vmem>>, vector<1x8x32xf32>
    %5 = vector.shape_cast %4 : vector<1x8x32xf32> to vector<8x32xf32>
    %c0_8 = arith.constant 0 : index
    %c0_9 = arith.constant 0 : index
    %c0_10 = arith.constant 0 : index
    %6 = vector.load %arg4[%c0_8, %c0_9, %c0_10] : memref<1x64x32xf32, #tpu.memory_space<vmem>>, vector<1x64x32xf32>
    %7 = vector.shape_cast %6 : vector<1x64x32xf32> to vector<64x32xf32>
    %8 = arith.addf %1, %5 : vector<8x32xf32>
    %9 = arith.truncf %8 : vector<8x32xf32> to vector<8x32xbf16>
    %10 = arith.truncf %8 : vector<8x32xf32> to vector<8x32xbf16>
    %11 = arith.truncf %1 : vector<8x32xf32> to vector<8x32xbf16>
    %cst = arith.constant 0.000000e+00 : f32
    %12 = vector.broadcast %cst : f32 to vector<8x32xf32>
    %c0_11 = arith.constant 0 : index
    %c0_12 = arith.constant 0 : index
    %c0_13 = arith.constant 0 : index
    %13 = vector.load %arg5[%c0_11, %c0_12, %c0_13] : memref<2x32x16xbf16, #tpu.memory_space<vmem>>, vector<1x32x16xbf16>
    %14 = vector.shape_cast %13 : vector<1x32x16xbf16> to vector<32x16xbf16>
    %cst_14 = arith.constant dense<0.000000e+00> : vector<8x16xf32>
    %15 = tpu.matmul %9, %14, %cst_14 {dimension_numbers = #tpu.dot_dimension_numbers<[1], [0], [0], [1], [0, 0, 1, 1], [], []>} : vector<8x32xbf16>, vector<32x16xbf16>, vector<8x16xf32> -> vector<8x16xf32>
    %c0_15 = arith.constant 0 : index
    %c0_16 = arith.constant 0 : index
    %c0_17 = arith.constant 0 : index
    %16 = vector.load %arg6[%c0_15, %c0_16, %c0_17] : memref<2x1x16xf32, #tpu.memory_space<vmem>>, vector<1x1x16xf32>
    %17 = vector.shape_cast %16 : vector<1x1x16xf32> to vector<1x16xf32>
    %18 = vector.broadcast %17 : vector<1x16xf32> to vector<8x16xf32>
    %19 = arith.addf %15, %18 : vector<8x16xf32>
    %c0_18 = arith.constant 0 : index
    %c0_19 = arith.constant 0 : index
    %c0_20 = arith.constant 0 : index
    %20 = vector.load %arg7[%c0_18, %c0_19, %c0_20] : memref<2x32x16xbf16, #tpu.memory_space<vmem>>, vector<1x32x16xbf16>
    %21 = vector.shape_cast %20 : vector<1x32x16xbf16> to vector<32x16xbf16>
    %cst_21 = arith.constant dense<0.000000e+00> : vector<8x16xf32>
    %22 = tpu.matmul %10, %21, %cst_21 {dimension_numbers = #tpu.dot_dimension_numbers<[1], [0], [0], [1], [0, 0, 1, 1], [], []>} : vector<8x32xbf16>, vector<32x16xbf16>, vector<8x16xf32> -> vector<8x16xf32>
    %c0_22 = arith.constant 0 : index
    %c0_23 = arith.constant 0 : index
    %c0_24 = arith.constant 0 : index
    %23 = vector.load %arg8[%c0_22, %c0_23, %c0_24] : memref<2x1x16xf32, #tpu.memory_space<vmem>>, vector<1x1x16xf32>
    %24 = vector.shape_cast %23 : vector<1x1x16xf32> to vector<1x16xf32>
    %25 = vector.broadcast %24 : vector<1x16xf32> to vector<8x16xf32>
    %26 = arith.addf %22, %25 : vector<8x16xf32>
    %c0_25 = arith.constant 0 : index
    %c0_26 = arith.constant 0 : index
    %c0_27 = arith.constant 0 : index
    %27 = vector.load %arg9[%c0_25, %c0_26, %c0_27] : memref<2x32x16xbf16, #tpu.memory_space<vmem>>, vector<1x32x16xbf16>
    %28 = vector.shape_cast %27 : vector<1x32x16xbf16> to vector<32x16xbf16>
    %cst_28 = arith.constant dense<0.000000e+00> : vector<8x16xf32>
    %29 = tpu.matmul %11, %28, %cst_28 {dimension_numbers = #tpu.dot_dimension_numbers<[1], [0], [0], [1], [0, 0, 1, 1], [], []>} : vector<8x32xbf16>, vector<32x16xbf16>, vector<8x16xf32> -> vector<8x16xf32>
    %c0_29 = arith.constant 0 : index
    %c0_30 = arith.constant 0 : index
    %c0_31 = arith.constant 0 : index
    %30 = vector.load %arg10[%c0_29, %c0_30, %c0_31] : memref<2x1x16xf32, #tpu.memory_space<vmem>>, vector<1x1x16xf32>
    %31 = vector.shape_cast %30 : vector<1x1x16xf32> to vector<1x16xf32>
    %32 = vector.broadcast %31 : vector<1x16xf32> to vector<8x16xf32>
    %33 = arith.addf %29, %32 : vector<8x16xf32>
    %34 = arith.truncf %19 : vector<8x16xf32> to vector<8x16xbf16>
    %35 = arith.truncf %26 : vector<8x16xf32> to vector<8x16xbf16>
    %cst_32 = arith.constant dense<0.000000e+00> : vector<8x8xf32>
    %36 = tpu.matmul %34, %35, %cst_32 {dimension_numbers = #tpu.dot_dimension_numbers<[1], [1], [0], [0], [0, 0, 1, 0], [], []>} : vector<8x16xbf16>, vector<8x16xbf16>, vector<8x8xf32> -> vector<8x8xf32>
    %cst_33 = arith.constant 2.500000e-01 : f32
    %37 = vector.broadcast %cst_33 : f32 to vector<8x8xf32>
    %38 = arith.mulf %36, %37 : vector<8x8xf32>
    %cst_34 = arith.constant dense<0xFF800000> : vector<8xf32>
    %39 = vector.multi_reduction <maximumf>, %38, %cst_34 [1] : vector<8x8xf32> to vector<8xf32>
    %40 = vector.shape_cast %39 : vector<8xf32> to vector<8x1xf32>
    %41 = vector.broadcast %40 : vector<8x1xf32> to vector<8x8xf32>
    %42 = arith.subf %38, %41 : vector<8x8xf32>
    %43 = math.exp %42 : vector<8x8xf32>
    %cst_35 = arith.constant dense<0.000000e+00> : vector<8xf32>
    %44 = vector.multi_reduction <add>, %43, %cst_35 [1] : vector<8x8xf32> to vector<8xf32>
    %45 = vector.shape_cast %44 : vector<8xf32> to vector<8x1xf32>
    %46 = tpu.reciprocal %45 {approx = true} : vector<8x1xf32> -> vector<8x1xf32>
    %47 = vector.broadcast %46 : vector<8x1xf32> to vector<8x8xf32>
    %48 = arith.mulf %43, %47 : vector<8x8xf32>
    %49 = arith.truncf %48 : vector<8x8xf32> to vector<8x8xbf16>
    %50 = arith.truncf %33 : vector<8x16xf32> to vector<8x16xbf16>
    %cst_36 = arith.constant dense<0.000000e+00> : vector<8x16xf32>
    %51 = tpu.matmul %49, %50, %cst_36 {dimension_numbers = #tpu.dot_dimension_numbers<[1], [0], [0], [1], [0, 0, 1, 1], [], []>} : vector<8x8xbf16>, vector<8x16xbf16>, vector<8x16xf32> -> vector<8x16xf32>
    %52 = arith.truncf %51 : vector<8x16xf32> to vector<8x16xbf16>
    %c0_37 = arith.constant 0 : index
    %c0_38 = arith.constant 0 : index
    %c0_39 = arith.constant 0 : index
    %53 = vector.load %arg11[%c0_37, %c0_38, %c0_39] : memref<2x16x32xbf16, #tpu.memory_space<vmem>>, vector<1x16x32xbf16>
    %54 = vector.shape_cast %53 : vector<1x16x32xbf16> to vector<16x32xbf16>
    %cst_40 = arith.constant dense<0.000000e+00> : vector<8x32xf32>
    %55 = tpu.matmul %52, %54, %cst_40 {dimension_numbers = #tpu.dot_dimension_numbers<[1], [0], [0], [1], [0, 0, 1, 1], [], []>} : vector<8x16xbf16>, vector<16x32xbf16>, vector<8x32xf32> -> vector<8x32xf32>
    %56 = arith.addf %12, %55 : vector<8x32xf32>
    %c1 = arith.constant 1 : index
    %c0_41 = arith.constant 0 : index
    %c0_42 = arith.constant 0 : index
    %57 = vector.load %arg5[%c1, %c0_41, %c0_42] : memref<2x32x16xbf16, #tpu.memory_space<vmem>>, vector<1x32x16xbf16>
    %58 = vector.shape_cast %57 : vector<1x32x16xbf16> to vector<32x16xbf16>
    %cst_43 = arith.constant dense<0.000000e+00> : vector<8x16xf32>
    %59 = tpu.matmul %9, %58, %cst_43 {dimension_numbers = #tpu.dot_dimension_numbers<[1], [0], [0], [1], [0, 0, 1, 1], [], []>} : vector<8x32xbf16>, vector<32x16xbf16>, vector<8x16xf32> -> vector<8x16xf32>
    %c1_44 = arith.constant 1 : index
    %c0_45 = arith.constant 0 : index
    %c0_46 = arith.constant 0 : index
    %60 = vector.load %arg6[%c1_44, %c0_45, %c0_46] : memref<2x1x16xf32, #tpu.memory_space<vmem>>, vector<1x1x16xf32>
    %61 = vector.shape_cast %60 : vector<1x1x16xf32> to vector<1x16xf32>
    %62 = vector.broadcast %61 : vector<1x16xf32> to vector<8x16xf32>
    %63 = arith.addf %59, %62 : vector<8x16xf32>
    %c1_47 = arith.constant 1 : index
    %c0_48 = arith.constant 0 : index
    %c0_49 = arith.constant 0 : index
    %64 = vector.load %arg7[%c1_47, %c0_48, %c0_49] : memref<2x32x16xbf16, #tpu.memory_space<vmem>>, vector<1x32x16xbf16>
    %65 = vector.shape_cast %64 : vector<1x32x16xbf16> to vector<32x16xbf16>
    %cst_50 = arith.constant dense<0.000000e+00> : vector<8x16xf32>
    %66 = tpu.matmul %10, %65, %cst_50 {dimension_numbers = #tpu.dot_dimension_numbers<[1], [0], [0], [1], [0, 0, 1, 1], [], []>} : vector<8x32xbf16>, vector<32x16xbf16>, vector<8x16xf32> -> vector<8x16xf32>
    %c1_51 = arith.constant 1 : index
    %c0_52 = arith.constant 0 : index
    %c0_53 = arith.constant 0 : index
    %67 = vector.load %arg8[%c1_51, %c0_52, %c0_53] : memref<2x1x16xf32, #tpu.memory_space<vmem>>, vector<1x1x16xf32>
    %68 = vector.shape_cast %67 : vector<1x1x16xf32> to vector<1x16xf32>
    %69 = vector.broadcast %68 : vector<1x16xf32> to vector<8x16xf32>
    %70 = arith.addf %66, %69 : vector<8x16xf32>
    %c1_54 = arith.constant 1 : index
    %c0_55 = arith.constant 0 : index
    %c0_56 = arith.constant 0 : index
    %71 = vector.load %arg9[%c1_54, %c0_55, %c0_56] : memref<2x32x16xbf16, #tpu.memory_space<vmem>>, vector<1x32x16xbf16>
    %72 = vector.shape_cast %71 : vector<1x32x16xbf16> to vector<32x16xbf16>
    %cst_57 = arith.constant dense<0.000000e+00> : vector<8x16xf32>
    %73 = tpu.matmul %11, %72, %cst_57 {dimension_numbers = #tpu.dot_dimension_numbers<[1], [0], [0], [1], [0, 0, 1, 1], [], []>} : vector<8x32xbf16>, vector<32x16xbf16>, vector<8x16xf32> -> vector<8x16xf32>
    %c1_58 = arith.constant 1 : index
    %c0_59 = arith.constant 0 : index
    %c0_60 = arith.constant 0 : index
    %74 = vector.load %arg10[%c1_58, %c0_59, %c0_60] : memref<2x1x16xf32, #tpu.memory_space<vmem>>, vector<1x1x16xf32>
    %75 = vector.shape_cast %74 : vector<1x1x16xf32> to vector<1x16xf32>
    %76 = vector.broadcast %75 : vector<1x16xf32> to vector<8x16xf32>
    %77 = arith.addf %73, %76 : vector<8x16xf32>
    %78 = arith.truncf %63 : vector<8x16xf32> to vector<8x16xbf16>
    %79 = arith.truncf %70 : vector<8x16xf32> to vector<8x16xbf16>
    %cst_61 = arith.constant dense<0.000000e+00> : vector<8x8xf32>
    %80 = tpu.matmul %78, %79, %cst_61 {dimension_numbers = #tpu.dot_dimension_numbers<[1], [1], [0], [0], [0, 0, 1, 0], [], []>} : vector<8x16xbf16>, vector<8x16xbf16>, vector<8x8xf32> -> vector<8x8xf32>
    %cst_62 = arith.constant 2.500000e-01 : f32
    %81 = vector.broadcast %cst_62 : f32 to vector<8x8xf32>
    %82 = arith.mulf %80, %81 : vector<8x8xf32>
    %cst_63 = arith.constant dense<0xFF800000> : vector<8xf32>
    %83 = vector.multi_reduction <maximumf>, %82, %cst_63 [1] : vector<8x8xf32> to vector<8xf32>
    %84 = vector.shape_cast %83 : vector<8xf32> to vector<8x1xf32>
    %85 = vector.broadcast %84 : vector<8x1xf32> to vector<8x8xf32>
    %86 = arith.subf %82, %85 : vector<8x8xf32>
    %87 = math.exp %86 : vector<8x8xf32>
    %cst_64 = arith.constant dense<0.000000e+00> : vector<8xf32>
    %88 = vector.multi_reduction <add>, %87, %cst_64 [1] : vector<8x8xf32> to vector<8xf32>
    %89 = vector.shape_cast %88 : vector<8xf32> to vector<8x1xf32>
    %90 = tpu.reciprocal %89 {approx = true} : vector<8x1xf32> -> vector<8x1xf32>
    %91 = vector.broadcast %90 : vector<8x1xf32> to vector<8x8xf32>
    %92 = arith.mulf %87, %91 : vector<8x8xf32>
    %93 = arith.truncf %92 : vector<8x8xf32> to vector<8x8xbf16>
    %94 = arith.truncf %77 : vector<8x16xf32> to vector<8x16xbf16>
    %cst_65 = arith.constant dense<0.000000e+00> : vector<8x16xf32>
    %95 = tpu.matmul %93, %94, %cst_65 {dimension_numbers = #tpu.dot_dimension_numbers<[1], [0], [0], [1], [0, 0, 1, 1], [], []>} : vector<8x8xbf16>, vector<8x16xbf16>, vector<8x16xf32> -> vector<8x16xf32>
    %96 = arith.truncf %95 : vector<8x16xf32> to vector<8x16xbf16>
    %c1_66 = arith.constant 1 : index
    %c0_67 = arith.constant 0 : index
    %c0_68 = arith.constant 0 : index
    %97 = vector.load %arg11[%c1_66, %c0_67, %c0_68] : memref<2x16x32xbf16, #tpu.memory_space<vmem>>, vector<1x16x32xbf16>
    %98 = vector.shape_cast %97 : vector<1x16x32xbf16> to vector<16x32xbf16>
    %cst_69 = arith.constant dense<0.000000e+00> : vector<8x32xf32>
    %99 = tpu.matmul %96, %98, %cst_69 {dimension_numbers = #tpu.dot_dimension_numbers<[1], [0], [0], [1], [0, 0, 1, 1], [], []>} : vector<8x16xbf16>, vector<16x32xbf16>, vector<8x32xf32> -> vector<8x32xf32>
    %100 = arith.addf %56, %99 : vector<8x32xf32>
    %c0_70 = arith.constant 0 : index
    %c0_71 = arith.constant 0 : index
    %101 = vector.load %arg12[%c0_70, %c0_71] : memref<1x32xf32, #tpu.memory_space<vmem>>, vector<1x32xf32>
    %102 = vector.broadcast %101 : vector<1x32xf32> to vector<8x32xf32>
    %103 = arith.addf %100, %102 : vector<8x32xf32>
    %104 = arith.addf %1, %103 : vector<8x32xf32>
    %cst_72 = arith.constant dense<0.000000e+00> : vector<8xf32>
    %105 = vector.multi_reduction <add>, %104, %cst_72 [1] : vector<8x32xf32> to vector<8xf32>
    %106 = vector.shape_cast %105 : vector<8xf32> to vector<8x1xf32>
    %cst_73 = arith.constant 3.200000e+01 : f32
    %107 = vector.broadcast %cst_73 : f32 to vector<8x1xf32>
    %108 = arith.divf %106, %107 : vector<8x1xf32>
    %109 = vector.broadcast %108 : vector<8x1xf32> to vector<8x32xf32>
    %110 = arith.subf %104, %109 : vector<8x32xf32>
    %111 = arith.mulf %110, %110 : vector<8x32xf32>
    %cst_74 = arith.constant dense<0.000000e+00> : vector<8xf32>
    %112 = vector.multi_reduction <add>, %111, %cst_74 [1] : vector<8x32xf32> to vector<8xf32>
    %113 = vector.shape_cast %112 : vector<8xf32> to vector<8x1xf32>
    %cst_75 = arith.constant 3.200000e+01 : f32
    %114 = vector.broadcast %cst_75 : f32 to vector<8x1xf32>
    %115 = arith.divf %113, %114 : vector<8x1xf32>
    %cst_76 = arith.constant 9.99999974E-6 : f32
    %116 = vector.broadcast %cst_76 : f32 to vector<8x1xf32>
    %117 = arith.addf %115, %116 : vector<8x1xf32>
    %118 = math.rsqrt %117 : vector<8x1xf32>
    %119 = vector.broadcast %118 : vector<8x1xf32> to vector<8x32xf32>
    %120 = arith.mulf %110, %119 : vector<8x32xf32>
    %c0_77 = arith.constant 0 : index
    %c0_78 = arith.constant 0 : index
    %121 = vector.load %arg33[%c0_77, %c0_78] : memref<1x32xf32, #tpu.memory_space<vmem>>, vector<1x32xf32>
    %122 = vector.broadcast %121 : vector<1x32xf32> to vector<8x32xf32>
    %123 = arith.mulf %120, %122 : vector<8x32xf32>
    %c0_79 = arith.constant 0 : index
    %c0_80 = arith.constant 0 : index
    %124 = vector.load %arg34[%c0_79, %c0_80] : memref<1x32xf32, #tpu.memory_space<vmem>>, vector<1x32xf32>
    %125 = vector.broadcast %124 : vector<1x32xf32> to vector<8x32xf32>
    %126 = arith.addf %123, %125 : vector<8x32xf32>
    %127 = arith.addf %126, %5 : vector<8x32xf32>
    %128 = arith.addf %3, %7 : vector<64x32xf32>
    %129 = arith.truncf %127 : vector<8x32xf32> to vector<8x32xbf16>
    %130 = arith.truncf %128 : vector<64x32xf32> to vector<64x32xbf16>
    %131 = arith.truncf %3 : vector<64x32xf32> to vector<64x32xbf16>
    %cst_81 = arith.constant 0.000000e+00 : f32
    %132 = vector.broadcast %cst_81 : f32 to vector<8x32xf32>
    %c0_82 = arith.constant 0 : index
    %c0_83 = arith.constant 0 : index
    %c0_84 = arith.constant 0 : index
    %133 = vector.load %arg13[%c0_82, %c0_83, %c0_84] : memref<2x32x8xbf16, #tpu.memory_space<vmem>>, vector<1x32x8xbf16>
    %134 = vector.shape_cast %133 : vector<1x32x8xbf16> to vector<32x8xbf16>
    %cst_85 = arith.constant dense<0.000000e+00> : vector<8x8xf32>
    %135 = tpu.matmul %129, %134, %cst_85 {dimension_numbers = #tpu.dot_dimension_numbers<[1], [0], [0], [1], [0, 0, 1, 1], [], []>} : vector<8x32xbf16>, vector<32x8xbf16>, vector<8x8xf32> -> vector<8x8xf32>
    %c0_86 = arith.constant 0 : index
    %c0_87 = arith.constant 0 : index
    %c0_88 = arith.constant 0 : index
    %136 = vector.load %arg14[%c0_86, %c0_87, %c0_88] : memref<2x1x8xf32, #tpu.memory_space<vmem>>, vector<1x1x8xf32>
    %137 = vector.shape_cast %136 : vector<1x1x8xf32> to vector<1x8xf32>
    %138 = vector.broadcast %137 : vector<1x8xf32> to vector<8x8xf32>
    %139 = arith.addf %135, %138 : vector<8x8xf32>
    %c0_89 = arith.constant 0 : index
    %c0_90 = arith.constant 0 : index
    %c0_91 = arith.constant 0 : index
    %140 = vector.load %arg15[%c0_89, %c0_90, %c0_91] : memref<2x32x8xbf16, #tpu.memory_space<vmem>>, vector<1x32x8xbf16>
    %141 = vector.shape_cast %140 : vector<1x32x8xbf16> to vector<32x8xbf16>
    %cst_92 = arith.constant dense<0.000000e+00> : vector<64x8xf32>
    %142 = tpu.matmul %130, %141, %cst_92 {dimension_numbers = #tpu.dot_dimension_numbers<[1], [0], [0], [1], [0, 0, 1, 1], [], []>} : vector<64x32xbf16>, vector<32x8xbf16>, vector<64x8xf32> -> vector<64x8xf32>
    %c0_93 = arith.constant 0 : index
    %c0_94 = arith.constant 0 : index
    %c0_95 = arith.constant 0 : index
    %143 = vector.load %arg16[%c0_93, %c0_94, %c0_95] : memref<2x1x8xf32, #tpu.memory_space<vmem>>, vector<1x1x8xf32>
    %144 = vector.shape_cast %143 : vector<1x1x8xf32> to vector<1x8xf32>
    %145 = vector.broadcast %144 : vector<1x8xf32> to vector<64x8xf32>
    %146 = arith.addf %142, %145 : vector<64x8xf32>
    %c0_96 = arith.constant 0 : index
    %c0_97 = arith.constant 0 : index
    %c0_98 = arith.constant 0 : index
    %147 = vector.load %arg17[%c0_96, %c0_97, %c0_98] : memref<2x32x8xbf16, #tpu.memory_space<vmem>>, vector<1x32x8xbf16>
    %148 = vector.shape_cast %147 : vector<1x32x8xbf16> to vector<32x8xbf16>
    %cst_99 = arith.constant dense<0.000000e+00> : vector<64x8xf32>
    %149 = tpu.matmul %131, %148, %cst_99 {dimension_numbers = #tpu.dot_dimension_numbers<[1], [0], [0], [1], [0, 0, 1, 1], [], []>} : vector<64x32xbf16>, vector<32x8xbf16>, vector<64x8xf32> -> vector<64x8xf32>
    %c0_100 = arith.constant 0 : index
    %c0_101 = arith.constant 0 : index
    %c0_102 = arith.constant 0 : index
    %150 = vector.load %arg18[%c0_100, %c0_101, %c0_102] : memref<2x1x8xf32, #tpu.memory_space<vmem>>, vector<1x1x8xf32>
    %151 = vector.shape_cast %150 : vector<1x1x8xf32> to vector<1x8xf32>
    %152 = vector.broadcast %151 : vector<1x8xf32> to vector<64x8xf32>
    %153 = arith.addf %149, %152 : vector<64x8xf32>
    %154 = arith.truncf %139 : vector<8x8xf32> to vector<8x8xbf16>
    %155 = arith.truncf %146 : vector<64x8xf32> to vector<64x8xbf16>
    %cst_103 = arith.constant dense<0.000000e+00> : vector<8x64xf32>
    %156 = tpu.matmul %154, %155, %cst_103 {dimension_numbers = #tpu.dot_dimension_numbers<[1], [1], [0], [0], [0, 0, 1, 0], [], []>} : vector<8x8xbf16>, vector<64x8xbf16>, vector<8x64xf32> -> vector<8x64xf32>
    %cst_104 = arith.constant 0.353553385 : f32
    %157 = vector.broadcast %cst_104 : f32 to vector<8x64xf32>
    %158 = arith.mulf %156, %157 : vector<8x64xf32>
    %cst_105 = arith.constant dense<0xFF800000> : vector<8xf32>
    %159 = vector.multi_reduction <maximumf>, %158, %cst_105 [1] : vector<8x64xf32> to vector<8xf32>
    %160 = vector.shape_cast %159 : vector<8xf32> to vector<8x1xf32>
    %161 = vector.broadcast %160 : vector<8x1xf32> to vector<8x64xf32>
    %162 = arith.subf %158, %161 : vector<8x64xf32>
    %163 = math.exp %162 : vector<8x64xf32>
    %cst_106 = arith.constant dense<0.000000e+00> : vector<8xf32>
    %164 = vector.multi_reduction <add>, %163, %cst_106 [1] : vector<8x64xf32> to vector<8xf32>
    %165 = vector.shape_cast %164 : vector<8xf32> to vector<8x1xf32>
    %166 = tpu.reciprocal %165 {approx = true} : vector<8x1xf32> -> vector<8x1xf32>
    %167 = vector.broadcast %166 : vector<8x1xf32> to vector<8x64xf32>
    %168 = arith.mulf %163, %167 : vector<8x64xf32>
    %169 = arith.truncf %168 : vector<8x64xf32> to vector<8x64xbf16>
    %170 = arith.truncf %153 : vector<64x8xf32> to vector<64x8xbf16>
    %cst_107 = arith.constant dense<0.000000e+00> : vector<8x8xf32>
    %171 = tpu.matmul %169, %170, %cst_107 {dimension_numbers = #tpu.dot_dimension_numbers<[1], [0], [0], [1], [0, 0, 1, 1], [], []>} : vector<8x64xbf16>, vector<64x8xbf16>, vector<8x8xf32> -> vector<8x8xf32>
    %172 = arith.truncf %171 : vector<8x8xf32> to vector<8x8xbf16>
    %c0_108 = arith.constant 0 : index
    %c0_109 = arith.constant 0 : index
    %c0_110 = arith.constant 0 : index
    %173 = vector.load %arg19[%c0_108, %c0_109, %c0_110] : memref<2x8x32xbf16, #tpu.memory_space<vmem>>, vector<1x8x32xbf16>
    %174 = vector.shape_cast %173 : vector<1x8x32xbf16> to vector<8x32xbf16>
    %cst_111 = arith.constant dense<0.000000e+00> : vector<8x32xf32>
    %175 = tpu.matmul %172, %174, %cst_111 {dimension_numbers = #tpu.dot_dimension_numbers<[1], [0], [0], [1], [0, 0, 1, 1], [], []>} : vector<8x8xbf16>, vector<8x32xbf16>, vector<8x32xf32> -> vector<8x32xf32>
    %176 = arith.addf %132, %175 : vector<8x32xf32>
    %c1_112 = arith.constant 1 : index
    %c0_113 = arith.constant 0 : index
    %c0_114 = arith.constant 0 : index
    %177 = vector.load %arg13[%c1_112, %c0_113, %c0_114] : memref<2x32x8xbf16, #tpu.memory_space<vmem>>, vector<1x32x8xbf16>
    %178 = vector.shape_cast %177 : vector<1x32x8xbf16> to vector<32x8xbf16>
    %cst_115 = arith.constant dense<0.000000e+00> : vector<8x8xf32>
    %179 = tpu.matmul %129, %178, %cst_115 {dimension_numbers = #tpu.dot_dimension_numbers<[1], [0], [0], [1], [0, 0, 1, 1], [], []>} : vector<8x32xbf16>, vector<32x8xbf16>, vector<8x8xf32> -> vector<8x8xf32>
    %c1_116 = arith.constant 1 : index
    %c0_117 = arith.constant 0 : index
    %c0_118 = arith.constant 0 : index
    %180 = vector.load %arg14[%c1_116, %c0_117, %c0_118] : memref<2x1x8xf32, #tpu.memory_space<vmem>>, vector<1x1x8xf32>
    %181 = vector.shape_cast %180 : vector<1x1x8xf32> to vector<1x8xf32>
    %182 = vector.broadcast %181 : vector<1x8xf32> to vector<8x8xf32>
    %183 = arith.addf %179, %182 : vector<8x8xf32>
    %c1_119 = arith.constant 1 : index
    %c0_120 = arith.constant 0 : index
    %c0_121 = arith.constant 0 : index
    %184 = vector.load %arg15[%c1_119, %c0_120, %c0_121] : memref<2x32x8xbf16, #tpu.memory_space<vmem>>, vector<1x32x8xbf16>
    %185 = vector.shape_cast %184 : vector<1x32x8xbf16> to vector<32x8xbf16>
    %cst_122 = arith.constant dense<0.000000e+00> : vector<64x8xf32>
    %186 = tpu.matmul %130, %185, %cst_122 {dimension_numbers = #tpu.dot_dimension_numbers<[1], [0], [0], [1], [0, 0, 1, 1], [], []>} : vector<64x32xbf16>, vector<32x8xbf16>, vector<64x8xf32> -> vector<64x8xf32>
    %c1_123 = arith.constant 1 : index
    %c0_124 = arith.constant 0 : index
    %c0_125 = arith.constant 0 : index
    %187 = vector.load %arg16[%c1_123, %c0_124, %c0_125] : memref<2x1x8xf32, #tpu.memory_space<vmem>>, vector<1x1x8xf32>
    %188 = vector.shape_cast %187 : vector<1x1x8xf32> to vector<1x8xf32>
    %189 = vector.broadcast %188 : vector<1x8xf32> to vector<64x8xf32>
    %190 = arith.addf %186, %189 : vector<64x8xf32>
    %c1_126 = arith.constant 1 : index
    %c0_127 = arith.constant 0 : index
    %c0_128 = arith.constant 0 : index
    %191 = vector.load %arg17[%c1_126, %c0_127, %c0_128] : memref<2x32x8xbf16, #tpu.memory_space<vmem>>, vector<1x32x8xbf16>
    %192 = vector.shape_cast %191 : vector<1x32x8xbf16> to vector<32x8xbf16>
    %cst_129 = arith.constant dense<0.000000e+00> : vector<64x8xf32>
    %193 = tpu.matmul %131, %192, %cst_129 {dimension_numbers = #tpu.dot_dimension_numbers<[1], [0], [0], [1], [0, 0, 1, 1], [], []>} : vector<64x32xbf16>, vector<32x8xbf16>, vector<64x8xf32> -> vector<64x8xf32>
    %c1_130 = arith.constant 1 : index
    %c0_131 = arith.constant 0 : index
    %c0_132 = arith.constant 0 : index
    %194 = vector.load %arg18[%c1_130, %c0_131, %c0_132] : memref<2x1x8xf32, #tpu.memory_space<vmem>>, vector<1x1x8xf32>
    %195 = vector.shape_cast %194 : vector<1x1x8xf32> to vector<1x8xf32>
    %196 = vector.broadcast %195 : vector<1x8xf32> to vector<64x8xf32>
    %197 = arith.addf %193, %196 : vector<64x8xf32>
    %198 = arith.truncf %183 : vector<8x8xf32> to vector<8x8xbf16>
    %199 = arith.truncf %190 : vector<64x8xf32> to vector<64x8xbf16>
    %cst_133 = arith.constant dense<0.000000e+00> : vector<8x64xf32>
    %200 = tpu.matmul %198, %199, %cst_133 {dimension_numbers = #tpu.dot_dimension_numbers<[1], [1], [0], [0], [0, 0, 1, 0], [], []>} : vector<8x8xbf16>, vector<64x8xbf16>, vector<8x64xf32> -> vector<8x64xf32>
    %cst_134 = arith.constant 0.353553385 : f32
    %201 = vector.broadcast %cst_134 : f32 to vector<8x64xf32>
    %202 = arith.mulf %200, %201 : vector<8x64xf32>
    %cst_135 = arith.constant dense<0xFF800000> : vector<8xf32>
    %203 = vector.multi_reduction <maximumf>, %202, %cst_135 [1] : vector<8x64xf32> to vector<8xf32>
    %204 = vector.shape_cast %203 : vector<8xf32> to vector<8x1xf32>
    %205 = vector.broadcast %204 : vector<8x1xf32> to vector<8x64xf32>
    %206 = arith.subf %202, %205 : vector<8x64xf32>
    %207 = math.exp %206 : vector<8x64xf32>
    %cst_136 = arith.constant dense<0.000000e+00> : vector<8xf32>
    %208 = vector.multi_reduction <add>, %207, %cst_136 [1] : vector<8x64xf32> to vector<8xf32>
    %209 = vector.shape_cast %208 : vector<8xf32> to vector<8x1xf32>
    %210 = tpu.reciprocal %209 {approx = true} : vector<8x1xf32> -> vector<8x1xf32>
    %211 = vector.broadcast %210 : vector<8x1xf32> to vector<8x64xf32>
    %212 = arith.mulf %207, %211 : vector<8x64xf32>
    %213 = arith.truncf %212 : vector<8x64xf32> to vector<8x64xbf16>
    %214 = arith.truncf %197 : vector<64x8xf32> to vector<64x8xbf16>
    %cst_137 = arith.constant dense<0.000000e+00> : vector<8x8xf32>
    %215 = tpu.matmul %213, %214, %cst_137 {dimension_numbers = #tpu.dot_dimension_numbers<[1], [0], [0], [1], [0, 0, 1, 1], [], []>} : vector<8x64xbf16>, vector<64x8xbf16>, vector<8x8xf32> -> vector<8x8xf32>
    %216 = arith.truncf %215 : vector<8x8xf32> to vector<8x8xbf16>
    %c1_138 = arith.constant 1 : index
    %c0_139 = arith.constant 0 : index
    %c0_140 = arith.constant 0 : index
    %217 = vector.load %arg19[%c1_138, %c0_139, %c0_140] : memref<2x8x32xbf16, #tpu.memory_space<vmem>>, vector<1x8x32xbf16>
    %218 = vector.shape_cast %217 : vector<1x8x32xbf16> to vector<8x32xbf16>
    %cst_141 = arith.constant dense<0.000000e+00> : vector<8x32xf32>
    %219 = tpu.matmul %216, %218, %cst_141 {dimension_numbers = #tpu.dot_dimension_numbers<[1], [0], [0], [1], [0, 0, 1, 1], [], []>} : vector<8x8xbf16>, vector<8x32xbf16>, vector<8x32xf32> -> vector<8x32xf32>
    %220 = arith.addf %176, %219 : vector<8x32xf32>
    %c0_142 = arith.constant 0 : index
    %c0_143 = arith.constant 0 : index
    %221 = vector.load %arg20[%c0_142, %c0_143] : memref<1x32xf32, #tpu.memory_space<vmem>>, vector<1x32xf32>
    %222 = vector.broadcast %221 : vector<1x32xf32> to vector<8x32xf32>
    %223 = arith.addf %220, %222 : vector<8x32xf32>
    %224 = arith.addf %126, %223 : vector<8x32xf32>
    %cst_144 = arith.constant dense<0.000000e+00> : vector<8xf32>
    %225 = vector.multi_reduction <add>, %224, %cst_144 [1] : vector<8x32xf32> to vector<8xf32>
    %226 = vector.shape_cast %225 : vector<8xf32> to vector<8x1xf32>
    %cst_145 = arith.constant 3.200000e+01 : f32
    %227 = vector.broadcast %cst_145 : f32 to vector<8x1xf32>
    %228 = arith.divf %226, %227 : vector<8x1xf32>
    %229 = vector.broadcast %228 : vector<8x1xf32> to vector<8x32xf32>
    %230 = arith.subf %224, %229 : vector<8x32xf32>
    %231 = arith.mulf %230, %230 : vector<8x32xf32>
    %cst_146 = arith.constant dense<0.000000e+00> : vector<8xf32>
    %232 = vector.multi_reduction <add>, %231, %cst_146 [1] : vector<8x32xf32> to vector<8xf32>
    %233 = vector.shape_cast %232 : vector<8xf32> to vector<8x1xf32>
    %cst_147 = arith.constant 3.200000e+01 : f32
    %234 = vector.broadcast %cst_147 : f32 to vector<8x1xf32>
    %235 = arith.divf %233, %234 : vector<8x1xf32>
    %cst_148 = arith.constant 9.99999974E-6 : f32
    %236 = vector.broadcast %cst_148 : f32 to vector<8x1xf32>
    %237 = arith.addf %235, %236 : vector<8x1xf32>
    %238 = math.rsqrt %237 : vector<8x1xf32>
    %239 = vector.broadcast %238 : vector<8x1xf32> to vector<8x32xf32>
    %240 = arith.mulf %230, %239 : vector<8x32xf32>
    %c0_149 = arith.constant 0 : index
    %c0_150 = arith.constant 0 : index
    %241 = vector.load %arg35[%c0_149, %c0_150] : memref<1x32xf32, #tpu.memory_space<vmem>>, vector<1x32xf32>
    %242 = vector.broadcast %241 : vector<1x32xf32> to vector<8x32xf32>
    %243 = arith.mulf %240, %242 : vector<8x32xf32>
    %c0_151 = arith.constant 0 : index
    %c0_152 = arith.constant 0 : index
    %244 = vector.load %arg36[%c0_151, %c0_152] : memref<1x32xf32, #tpu.memory_space<vmem>>, vector<1x32xf32>
    %245 = vector.broadcast %244 : vector<1x32xf32> to vector<8x32xf32>
    %246 = arith.addf %243, %245 : vector<8x32xf32>
    %247 = arith.truncf %246 : vector<8x32xf32> to vector<8x32xbf16>
    %c0_153 = arith.constant 0 : index
    %c0_154 = arith.constant 0 : index
    %248 = vector.load %arg21[%c0_153, %c0_154] : memref<32x64xbf16, #tpu.memory_space<vmem>>, vector<32x64xbf16>
    %cst_155 = arith.constant dense<0.000000e+00> : vector<8x64xf32>
    %249 = tpu.matmul %247, %248, %cst_155 {dimension_numbers = #tpu.dot_dimension_numbers<[1], [0], [0], [1], [0, 0, 1, 1], [], []>} : vector<8x32xbf16>, vector<32x64xbf16>, vector<8x64xf32> -> vector<8x64xf32>
    %c0_156 = arith.constant 0 : index
    %c0_157 = arith.constant 0 : index
    %250 = vector.load %arg22[%c0_156, %c0_157] : memref<1x64xf32, #tpu.memory_space<vmem>>, vector<1x64xf32>
    %251 = vector.broadcast %250 : vector<1x64xf32> to vector<8x64xf32>
    %252 = arith.addf %249, %251 : vector<8x64xf32>
    %cst_158 = arith.constant 0.000000e+00 : f32
    %253 = vector.broadcast %cst_158 : f32 to vector<8x64xf32>
    %254 = arith.maximumf %252, %253 : vector<8x64xf32>
    %255 = arith.truncf %254 : vector<8x64xf32> to vector<8x64xbf16>
    %c0_159 = arith.constant 0 : index
    %c0_160 = arith.constant 0 : index
    %256 = vector.load %arg23[%c0_159, %c0_160] : memref<64x32xbf16, #tpu.memory_space<vmem>>, vector<64x32xbf16>
    %cst_161 = arith.constant dense<0.000000e+00> : vector<8x32xf32>
    %257 = tpu.matmul %255, %256, %cst_161 {dimension_numbers = #tpu.dot_dimension_numbers<[1], [0], [0], [1], [0, 0, 1, 1], [], []>} : vector<8x64xbf16>, vector<64x32xbf16>, vector<8x32xf32> -> vector<8x32xf32>
    %c0_162 = arith.constant 0 : index
    %c0_163 = arith.constant 0 : index
    %258 = vector.load %arg24[%c0_162, %c0_163] : memref<1x32xf32, #tpu.memory_space<vmem>>, vector<1x32xf32>
    %259 = vector.broadcast %258 : vector<1x32xf32> to vector<8x32xf32>
    %260 = arith.addf %257, %259 : vector<8x32xf32>
    %261 = arith.addf %246, %260 : vector<8x32xf32>
    %cst_164 = arith.constant dense<0.000000e+00> : vector<8xf32>
    %262 = vector.multi_reduction <add>, %261, %cst_164 [1] : vector<8x32xf32> to vector<8xf32>
    %263 = vector.shape_cast %262 : vector<8xf32> to vector<8x1xf32>
    %cst_165 = arith.constant 3.200000e+01 : f32
    %264 = vector.broadcast %cst_165 : f32 to vector<8x1xf32>
    %265 = arith.divf %263, %264 : vector<8x1xf32>
    %266 = vector.broadcast %265 : vector<8x1xf32> to vector<8x32xf32>
    %267 = arith.subf %261, %266 : vector<8x32xf32>
    %268 = arith.mulf %267, %267 : vector<8x32xf32>
    %cst_166 = arith.constant dense<0.000000e+00> : vector<8xf32>
    %269 = vector.multi_reduction <add>, %268, %cst_166 [1] : vector<8x32xf32> to vector<8xf32>
    %270 = vector.shape_cast %269 : vector<8xf32> to vector<8x1xf32>
    %cst_167 = arith.constant 3.200000e+01 : f32
    %271 = vector.broadcast %cst_167 : f32 to vector<8x1xf32>
    %272 = arith.divf %270, %271 : vector<8x1xf32>
    %cst_168 = arith.constant 9.99999974E-6 : f32
    %273 = vector.broadcast %cst_168 : f32 to vector<8x1xf32>
    %274 = arith.addf %272, %273 : vector<8x1xf32>
    %275 = math.rsqrt %274 : vector<8x1xf32>
    %276 = vector.broadcast %275 : vector<8x1xf32> to vector<8x32xf32>
    %277 = arith.mulf %267, %276 : vector<8x32xf32>
    %c0_169 = arith.constant 0 : index
    %c0_170 = arith.constant 0 : index
    %278 = vector.load %arg37[%c0_169, %c0_170] : memref<1x32xf32, #tpu.memory_space<vmem>>, vector<1x32xf32>
    %279 = vector.broadcast %278 : vector<1x32xf32> to vector<8x32xf32>
    %280 = arith.mulf %277, %279 : vector<8x32xf32>
    %c0_171 = arith.constant 0 : index
    %c0_172 = arith.constant 0 : index
    %281 = vector.load %arg38[%c0_171, %c0_172] : memref<1x32xf32, #tpu.memory_space<vmem>>, vector<1x32xf32>
    %282 = vector.broadcast %281 : vector<1x32xf32> to vector<8x32xf32>
    %283 = arith.addf %280, %282 : vector<8x32xf32>
    %284 = arith.addf %283, %5 : vector<8x32xf32>
    %285 = arith.addf %3, %7 : vector<64x32xf32>
    %286 = arith.truncf %285 : vector<64x32xf32> to vector<64x32xbf16>
    %287 = arith.truncf %284 : vector<8x32xf32> to vector<8x32xbf16>
    %288 = arith.truncf %283 : vector<8x32xf32> to vector<8x32xbf16>
    %cst_173 = arith.constant 0.000000e+00 : f32
    %289 = vector.broadcast %cst_173 : f32 to vector<64x32xf32>
    %c0_174 = arith.constant 0 : index
    %c0_175 = arith.constant 0 : index
    %c0_176 = arith.constant 0 : index
    %290 = vector.load %arg25[%c0_174, %c0_175, %c0_176] : memref<2x32x8xbf16, #tpu.memory_space<vmem>>, vector<1x32x8xbf16>
    %291 = vector.shape_cast %290 : vector<1x32x8xbf16> to vector<32x8xbf16>
    %cst_177 = arith.constant dense<0.000000e+00> : vector<64x8xf32>
    %292 = tpu.matmul %286, %291, %cst_177 {dimension_numbers = #tpu.dot_dimension_numbers<[1], [0], [0], [1], [0, 0, 1, 1], [], []>} : vector<64x32xbf16>, vector<32x8xbf16>, vector<64x8xf32> -> vector<64x8xf32>
    %c0_178 = arith.constant 0 : index
    %c0_179 = arith.constant 0 : index
    %c0_180 = arith.constant 0 : index
    %293 = vector.load %arg26[%c0_178, %c0_179, %c0_180] : memref<2x1x8xf32, #tpu.memory_space<vmem>>, vector<1x1x8xf32>
    %294 = vector.shape_cast %293 : vector<1x1x8xf32> to vector<1x8xf32>
    %295 = vector.broadcast %294 : vector<1x8xf32> to vector<64x8xf32>
    %296 = arith.addf %292, %295 : vector<64x8xf32>
    %c0_181 = arith.constant 0 : index
    %c0_182 = arith.constant 0 : index
    %c0_183 = arith.constant 0 : index
    %297 = vector.load %arg27[%c0_181, %c0_182, %c0_183] : memref<2x32x8xbf16, #tpu.memory_space<vmem>>, vector<1x32x8xbf16>
    %298 = vector.shape_cast %297 : vector<1x32x8xbf16> to vector<32x8xbf16>
    %cst_184 = arith.constant dense<0.000000e+00> : vector<8x8xf32>
    %299 = tpu.matmul %287, %298, %cst_184 {dimension_numbers = #tpu.dot_dimension_numbers<[1], [0], [0], [1], [0, 0, 1, 1], [], []>} : vector<8x32xbf16>, vector<32x8xbf16>, vector<8x8xf32> -> vector<8x8xf32>
    %c0_185 = arith.constant 0 : index
    %c0_186 = arith.constant 0 : index
    %c0_187 = arith.constant 0 : index
    %300 = vector.load %arg28[%c0_185, %c0_186, %c0_187] : memref<2x1x8xf32, #tpu.memory_space<vmem>>, vector<1x1x8xf32>
    %301 = vector.shape_cast %300 : vector<1x1x8xf32> to vector<1x8xf32>
    %302 = vector.broadcast %301 : vector<1x8xf32> to vector<8x8xf32>
    %303 = arith.addf %299, %302 : vector<8x8xf32>
    %c0_188 = arith.constant 0 : index
    %c0_189 = arith.constant 0 : index
    %c0_190 = arith.constant 0 : index
    %304 = vector.load %arg29[%c0_188, %c0_189, %c0_190] : memref<2x32x8xbf16, #tpu.memory_space<vmem>>, vector<1x32x8xbf16>
    %305 = vector.shape_cast %304 : vector<1x32x8xbf16> to vector<32x8xbf16>
    %cst_191 = arith.constant dense<0.000000e+00> : vector<8x8xf32>
    %306 = tpu.matmul %288, %305, %cst_191 {dimension_numbers = #tpu.dot_dimension_numbers<[1], [0], [0], [1], [0, 0, 1, 1], [], []>} : vector<8x32xbf16>, vector<32x8xbf16>, vector<8x8xf32> -> vector<8x8xf32>
    %c0_192 = arith.constant 0 : index
    %c0_193 = arith.constant 0 : index
    %c0_194 = arith.constant 0 : index
    %307 = vector.load %arg30[%c0_192, %c0_193, %c0_194] : memref<2x1x8xf32, #tpu.memory_space<vmem>>, vector<1x1x8xf32>
    %308 = vector.shape_cast %307 : vector<1x1x8xf32> to vector<1x8xf32>
    %309 = vector.broadcast %308 : vector<1x8xf32> to vector<8x8xf32>
    %310 = arith.addf %306, %309 : vector<8x8xf32>
    %311 = arith.truncf %296 : vector<64x8xf32> to vector<64x8xbf16>
    %312 = arith.truncf %303 : vector<8x8xf32> to vector<8x8xbf16>
    %cst_195 = arith.constant dense<0.000000e+00> : vector<64x8xf32>
    %313 = tpu.matmul %311, %312, %cst_195 {dimension_numbers = #tpu.dot_dimension_numbers<[1], [1], [0], [0], [0, 0, 1, 0], [], []>} : vector<64x8xbf16>, vector<8x8xbf16>, vector<64x8xf32> -> vector<64x8xf32>
    %cst_196 = arith.constant 0.353553385 : f32
    %314 = vector.broadcast %cst_196 : f32 to vector<64x8xf32>
    %315 = arith.mulf %313, %314 : vector<64x8xf32>
    %cst_197 = arith.constant dense<0xFF800000> : vector<64xf32>
    %316 = vector.multi_reduction <maximumf>, %315, %cst_197 [1] : vector<64x8xf32> to vector<64xf32>
    %317 = vector.shape_cast %316 : vector<64xf32> to vector<64x1xf32>
    %318 = vector.broadcast %317 : vector<64x1xf32> to vector<64x8xf32>
    %319 = arith.subf %315, %318 : vector<64x8xf32>
    %320 = math.exp %319 : vector<64x8xf32>
    %cst_198 = arith.constant dense<0.000000e+00> : vector<64xf32>
    %321 = vector.multi_reduction <add>, %320, %cst_198 [1] : vector<64x8xf32> to vector<64xf32>
    %322 = vector.shape_cast %321 : vector<64xf32> to vector<64x1xf32>
    %323 = tpu.reciprocal %322 {approx = true} : vector<64x1xf32> -> vector<64x1xf32>
    %324 = vector.broadcast %323 : vector<64x1xf32> to vector<64x8xf32>
    %325 = arith.mulf %320, %324 : vector<64x8xf32>
    %326 = arith.truncf %325 : vector<64x8xf32> to vector<64x8xbf16>
    %327 = arith.truncf %310 : vector<8x8xf32> to vector<8x8xbf16>
    %cst_199 = arith.constant dense<0.000000e+00> : vector<64x8xf32>
    %328 = tpu.matmul %326, %327, %cst_199 {dimension_numbers = #tpu.dot_dimension_numbers<[1], [0], [0], [1], [0, 0, 1, 1], [], []>} : vector<64x8xbf16>, vector<8x8xbf16>, vector<64x8xf32> -> vector<64x8xf32>
    %329 = arith.truncf %328 : vector<64x8xf32> to vector<64x8xbf16>
    %c0_200 = arith.constant 0 : index
    %c0_201 = arith.constant 0 : index
    %c0_202 = arith.constant 0 : index
    %330 = vector.load %arg31[%c0_200, %c0_201, %c0_202] : memref<2x8x32xbf16, #tpu.memory_space<vmem>>, vector<1x8x32xbf16>
    %331 = vector.shape_cast %330 : vector<1x8x32xbf16> to vector<8x32xbf16>
    %cst_203 = arith.constant dense<0.000000e+00> : vector<64x32xf32>
    %332 = tpu.matmul %329, %331, %cst_203 {dimension_numbers = #tpu.dot_dimension_numbers<[1], [0], [0], [1], [0, 0, 1, 1], [], []>} : vector<64x8xbf16>, vector<8x32xbf16>, vector<64x32xf32> -> vector<64x32xf32>
    %333 = arith.addf %289, %332 : vector<64x32xf32>
    %c1_204 = arith.constant 1 : index
    %c0_205 = arith.constant 0 : index
    %c0_206 = arith.constant 0 : index
    %334 = vector.load %arg25[%c1_204, %c0_205, %c0_206] : memref<2x32x8xbf16, #tpu.memory_space<vmem>>, vector<1x32x8xbf16>
    %335 = vector.shape_cast %334 : vector<1x32x8xbf16> to vector<32x8xbf16>
    %cst_207 = arith.constant dense<0.000000e+00> : vector<64x8xf32>
    %336 = tpu.matmul %286, %335, %cst_207 {dimension_numbers = #tpu.dot_dimension_numbers<[1], [0], [0], [1], [0, 0, 1, 1], [], []>} : vector<64x32xbf16>, vector<32x8xbf16>, vector<64x8xf32> -> vector<64x8xf32>
    %c1_208 = arith.constant 1 : index
    %c0_209 = arith.constant 0 : index
    %c0_210 = arith.constant 0 : index
    %337 = vector.load %arg26[%c1_208, %c0_209, %c0_210] : memref<2x1x8xf32, #tpu.memory_space<vmem>>, vector<1x1x8xf32>
    %338 = vector.shape_cast %337 : vector<1x1x8xf32> to vector<1x8xf32>
    %339 = vector.broadcast %338 : vector<1x8xf32> to vector<64x8xf32>
    %340 = arith.addf %336, %339 : vector<64x8xf32>
    %c1_211 = arith.constant 1 : index
    %c0_212 = arith.constant 0 : index
    %c0_213 = arith.constant 0 : index
    %341 = vector.load %arg27[%c1_211, %c0_212, %c0_213] : memref<2x32x8xbf16, #tpu.memory_space<vmem>>, vector<1x32x8xbf16>
    %342 = vector.shape_cast %341 : vector<1x32x8xbf16> to vector<32x8xbf16>
    %cst_214 = arith.constant dense<0.000000e+00> : vector<8x8xf32>
    %343 = tpu.matmul %287, %342, %cst_214 {dimension_numbers = #tpu.dot_dimension_numbers<[1], [0], [0], [1], [0, 0, 1, 1], [], []>} : vector<8x32xbf16>, vector<32x8xbf16>, vector<8x8xf32> -> vector<8x8xf32>
    %c1_215 = arith.constant 1 : index
    %c0_216 = arith.constant 0 : index
    %c0_217 = arith.constant 0 : index
    %344 = vector.load %arg28[%c1_215, %c0_216, %c0_217] : memref<2x1x8xf32, #tpu.memory_space<vmem>>, vector<1x1x8xf32>
    %345 = vector.shape_cast %344 : vector<1x1x8xf32> to vector<1x8xf32>
    %346 = vector.broadcast %345 : vector<1x8xf32> to vector<8x8xf32>
    %347 = arith.addf %343, %346 : vector<8x8xf32>
    %c1_218 = arith.constant 1 : index
    %c0_219 = arith.constant 0 : index
    %c0_220 = arith.constant 0 : index
    %348 = vector.load %arg29[%c1_218, %c0_219, %c0_220] : memref<2x32x8xbf16, #tpu.memory_space<vmem>>, vector<1x32x8xbf16>
    %349 = vector.shape_cast %348 : vector<1x32x8xbf16> to vector<32x8xbf16>
    %cst_221 = arith.constant dense<0.000000e+00> : vector<8x8xf32>
    %350 = tpu.matmul %288, %349, %cst_221 {dimension_numbers = #tpu.dot_dimension_numbers<[1], [0], [0], [1], [0, 0, 1, 1], [], []>} : vector<8x32xbf16>, vector<32x8xbf16>, vector<8x8xf32> -> vector<8x8xf32>
    %c1_222 = arith.constant 1 : index
    %c0_223 = arith.constant 0 : index
    %c0_224 = arith.constant 0 : index
    %351 = vector.load %arg30[%c1_222, %c0_223, %c0_224] : memref<2x1x8xf32, #tpu.memory_space<vmem>>, vector<1x1x8xf32>
    %352 = vector.shape_cast %351 : vector<1x1x8xf32> to vector<1x8xf32>
    %353 = vector.broadcast %352 : vector<1x8xf32> to vector<8x8xf32>
    %354 = arith.addf %350, %353 : vector<8x8xf32>
    %355 = arith.truncf %340 : vector<64x8xf32> to vector<64x8xbf16>
    %356 = arith.truncf %347 : vector<8x8xf32> to vector<8x8xbf16>
    %cst_225 = arith.constant dense<0.000000e+00> : vector<64x8xf32>
    %357 = tpu.matmul %355, %356, %cst_225 {dimension_numbers = #tpu.dot_dimension_numbers<[1], [1], [0], [0], [0, 0, 1, 0], [], []>} : vector<64x8xbf16>, vector<8x8xbf16>, vector<64x8xf32> -> vector<64x8xf32>
    %cst_226 = arith.constant 0.353553385 : f32
    %358 = vector.broadcast %cst_226 : f32 to vector<64x8xf32>
    %359 = arith.mulf %357, %358 : vector<64x8xf32>
    %cst_227 = arith.constant dense<0xFF800000> : vector<64xf32>
    %360 = vector.multi_reduction <maximumf>, %359, %cst_227 [1] : vector<64x8xf32> to vector<64xf32>
    %361 = vector.shape_cast %360 : vector<64xf32> to vector<64x1xf32>
    %362 = vector.broadcast %361 : vector<64x1xf32> to vector<64x8xf32>
    %363 = arith.subf %359, %362 : vector<64x8xf32>
    %364 = math.exp %363 : vector<64x8xf32>
    %cst_228 = arith.constant dense<0.000000e+00> : vector<64xf32>
    %365 = vector.multi_reduction <add>, %364, %cst_228 [1] : vector<64x8xf32> to vector<64xf32>
    %366 = vector.shape_cast %365 : vector<64xf32> to vector<64x1xf32>
    %367 = tpu.reciprocal %366 {approx = true} : vector<64x1xf32> -> vector<64x1xf32>
    %368 = vector.broadcast %367 : vector<64x1xf32> to vector<64x8xf32>
    %369 = arith.mulf %364, %368 : vector<64x8xf32>
    %370 = arith.truncf %369 : vector<64x8xf32> to vector<64x8xbf16>
    %371 = arith.truncf %354 : vector<8x8xf32> to vector<8x8xbf16>
    %cst_229 = arith.constant dense<0.000000e+00> : vector<64x8xf32>
    %372 = tpu.matmul %370, %371, %cst_229 {dimension_numbers = #tpu.dot_dimension_numbers<[1], [0], [0], [1], [0, 0, 1, 1], [], []>} : vector<64x8xbf16>, vector<8x8xbf16>, vector<64x8xf32> -> vector<64x8xf32>
    %373 = arith.truncf %372 : vector<64x8xf32> to vector<64x8xbf16>
    %c1_230 = arith.constant 1 : index
    %c0_231 = arith.constant 0 : index
    %c0_232 = arith.constant 0 : index
    %374 = vector.load %arg31[%c1_230, %c0_231, %c0_232] : memref<2x8x32xbf16, #tpu.memory_space<vmem>>, vector<1x8x32xbf16>
    %375 = vector.shape_cast %374 : vector<1x8x32xbf16> to vector<8x32xbf16>
    %cst_233 = arith.constant dense<0.000000e+00> : vector<64x32xf32>
    %376 = tpu.matmul %373, %375, %cst_233 {dimension_numbers = #tpu.dot_dimension_numbers<[1], [0], [0], [1], [0, 0, 1, 1], [], []>} : vector<64x8xbf16>, vector<8x32xbf16>, vector<64x32xf32> -> vector<64x32xf32>
    %377 = arith.addf %333, %376 : vector<64x32xf32>
    %c0_234 = arith.constant 0 : index
    %c0_235 = arith.constant 0 : index
    %378 = vector.load %arg32[%c0_234, %c0_235] : memref<1x32xf32, #tpu.memory_space<vmem>>, vector<1x32xf32>
    %379 = vector.broadcast %378 : vector<1x32xf32> to vector<64x32xf32>
    %380 = arith.addf %377, %379 : vector<64x32xf32>
    %381 = arith.addf %3, %380 : vector<64x32xf32>
    %cst_236 = arith.constant dense<0.000000e+00> : vector<64xf32>
    %382 = vector.multi_reduction <add>, %381, %cst_236 [1] : vector<64x32xf32> to vector<64xf32>
    %383 = vector.shape_cast %382 : vector<64xf32> to vector<64x1xf32>
    %cst_237 = arith.constant 3.200000e+01 : f32
    %384 = vector.broadcast %cst_237 : f32 to vector<64x1xf32>
    %385 = arith.divf %383, %384 : vector<64x1xf32>
    %386 = vector.broadcast %385 : vector<64x1xf32> to vector<64x32xf32>
    %387 = arith.subf %381, %386 : vector<64x32xf32>
    %388 = arith.mulf %387, %387 : vector<64x32xf32>
    %cst_238 = arith.constant dense<0.000000e+00> : vector<64xf32>
    %389 = vector.multi_reduction <add>, %388, %cst_238 [1] : vector<64x32xf32> to vector<64xf32>
    %390 = vector.shape_cast %389 : vector<64xf32> to vector<64x1xf32>
    %cst_239 = arith.constant 3.200000e+01 : f32
    %391 = vector.broadcast %cst_239 : f32 to vector<64x1xf32>
    %392 = arith.divf %390, %391 : vector<64x1xf32>
    %cst_240 = arith.constant 9.99999974E-6 : f32
    %393 = vector.broadcast %cst_240 : f32 to vector<64x1xf32>
    %394 = arith.addf %392, %393 : vector<64x1xf32>
    %395 = math.rsqrt %394 : vector<64x1xf32>
    %396 = vector.broadcast %395 : vector<64x1xf32> to vector<64x32xf32>
    %397 = arith.mulf %387, %396 : vector<64x32xf32>
    %c0_241 = arith.constant 0 : index
    %c0_242 = arith.constant 0 : index
    %398 = vector.load %arg39[%c0_241, %c0_242] : memref<1x32xf32, #tpu.memory_space<vmem>>, vector<1x32xf32>
    %399 = vector.broadcast %398 : vector<1x32xf32> to vector<64x32xf32>
    %400 = arith.mulf %397, %399 : vector<64x32xf32>
    %c0_243 = arith.constant 0 : index
    %c0_244 = arith.constant 0 : index
    %401 = vector.load %arg40[%c0_243, %c0_244] : memref<1x32xf32, #tpu.memory_space<vmem>>, vector<1x32xf32>
    %402 = vector.broadcast %401 : vector<1x32xf32> to vector<64x32xf32>
    %403 = arith.addf %400, %402 : vector<64x32xf32>
    %c0_245 = arith.constant 0 : index
    %c0_246 = arith.constant 0 : index
    %c0_247 = arith.constant 0 : index
    %404 = vector.load %arg41[%c0_245, %c0_246, %c0_247] : memref<1x8x32xf32, #tpu.memory_space<vmem>>, vector<1x8x32xf32>
    %405 = vector.shape_cast %404 : vector<1x8x32xf32> to vector<8x32xf32>
    %406 = vector.shape_cast %283 : vector<8x32xf32> to vector<1x8x32xf32>
    tpu.vector_store %arg41[%c0_245, %c0_246, %c0_247], %406 {strides = array<i32>} : memref<1x8x32xf32, #tpu.memory_space<vmem>>, vector<1x8x32xf32>,
    %c0_248 = arith.constant 0 : index
    %c0_249 = arith.constant 0 : index
    %c0_250 = arith.constant 0 : index
    %407 = vector.load %arg42[%c0_248, %c0_249, %c0_250] : memref<1x64x32xf32, #tpu.memory_space<vmem>>, vector<1x64x32xf32>
    %408 = vector.shape_cast %407 : vector<1x64x32xf32> to vector<64x32xf32>
    %409 = vector.shape_cast %403 : vector<64x32xf32> to vector<1x64x32xf32>
    tpu.vector_store %arg42[%c0_248, %c0_249, %c0_250], %409 {strides = array<i32>} : memref<1x64x32xf32, #tpu.memory_space<vmem>>, vector<1x64x32xf32>,
    return
  }
  func.func @transform_0(%arg0: i32) -> (i32, i32, i32) {
    %c0_i32 = arith.constant 0 : i32
    %c0_i32_0 = arith.constant 0 : i32
    %c0_i32_1 = arith.constant 0 : i32
    return %arg0, %c0_i32, %c0_i32_0 : i32, i32, i32
  }
  func.func @transform_1(%arg0: i32) -> (i32, i32, i32) {
    %c0_i32 = arith.constant 0 : i32
    %c0_i32_0 = arith.constant 0 : i32
    %c0_i32_1 = arith.constant 0 : i32
    return %arg0, %c0_i32, %c0_i32_0 : i32, i32, i32
  }
  func.func @transform_2(%arg0: i32) -> (i32, i32, i32) {
    %c0_i32 = arith.constant 0 : i32
    %c0_i32_0 = arith.constant 0 : i32
    %c0_i32_1 = arith.constant 0 : i32
    return %arg0, %c0_i32, %c0_i32_0 : i32, i32, i32
  }
  func.func @transform_3(%arg0: i32) -> (i32, i32, i32) {
    %c0_i32 = arith.constant 0 : i32
    %c0_i32_0 = arith.constant 0 : i32
    %c0_i32_1 = arith.constant 0 : i32
    return %arg0, %c0_i32, %c0_i32_0 : i32, i32, i32
  }
  func.func @transform_4(%arg0: i32) -> (i32, i32, i32) {
    %c0_i32 = arith.constant 0 : i32
    %c0_i32_0 = arith.constant 0 : i32
    %c0_i32_1 = arith.constant 0 : i32
    %c0_i32_2 = arith.constant 0 : i32
    return %c0_i32, %c0_i32_0, %c0_i32_1 : i32, i32, i32
  }
  func.func @transform_5(%arg0: i32) -> (i32, i32, i32) {
    %c0_i32 = arith.constant 0 : i32
    %c0_i32_0 = arith.constant 0 : i32
    %c0_i32_1 = arith.constant 0 : i32
    %c0_i32_2 = arith.constant 0 : i32
    return %c0_i32, %c0_i32_0, %c0_i32_1 : i32, i32, i32
  }
  func.func @transform_6(%arg0: i32) -> (i32, i32, i32) {
    %c0_i32 = arith.constant 0 : i32
    %c0_i32_0 = arith.constant 0 : i32
    %c0_i32_1 = arith.constant 0 : i32
    %c0_i32_2 = arith.constant 0 : i32
    return %c0_i32, %c0_i32_0, %c0_i32_1 : i32, i32, i32
  }
  func.func @transform_7(%arg0: i32) -> (i32, i32, i32) {
    %c0_i32 = arith.constant 0 : i32
    %c0_i32_0 = arith.constant 0 : i32
    %c0_i32_1 = arith.constant 0 : i32
    %c0_i32_2 = arith.constant 0 : i32
    return %c0_i32, %c0_i32_0, %c0_i32_1 : i32, i32, i32
  }
  func.func @transform_8(%arg0: i32) -> (i32, i32, i32) {
    %c0_i32 = arith.constant 0 : i32
    %c0_i32_0 = arith.constant 0 : i32
    %c0_i32_1 = arith.constant 0 : i32
    %c0_i32_2 = arith.constant 0 : i32
    return %c0_i32, %c0_i32_0, %c0_i32_1 : i32, i32, i32
  }
  func.func @transform_9(%arg0: i32) -> (i32, i32, i32) {
    %c0_i32 = arith.constant 0 : i32
    %c0_i32_0 = arith.constant 0 : i32
    %c0_i32_1 = arith.constant 0 : i32
    %c0_i32_2 = arith.constant 0 : i32
    return %c0_i32, %c0_i32_0, %c0_i32_1 : i32, i32, i32
  }
  func.func @transform_10(%arg0: i32) -> (i32, i32, i32) {
    %c0_i32 = arith.constant 0 : i32
    %c0_i32_0 = arith.constant 0 : i32
    %c0_i32_1 = arith.constant 0 : i32
    %c0_i32_2 = arith.constant 0 : i32
    return %c0_i32, %c0_i32_0, %c0_i32_1 : i32, i32, i32
  }
  func.func @transform_11(%arg0: i32) -> (i32, i32) {
    %c0_i32 = arith.constant 0 : i32
    %c0_i32_0 = arith.constant 0 : i32
    %c0_i32_1 = arith.constant 0 : i32
    return %c0_i32, %c0_i32_0 : i32, i32
  }
  func.func @transform_12(%arg0: i32) -> (i32, i32, i32) {
    %c0_i32 = arith.constant 0 : i32
    %c0_i32_0 = arith.constant 0 : i32
    %c0_i32_1 = arith.constant 0 : i32
    %c0_i32_2 = arith.constant 0 : i32
    return %c0_i32, %c0_i32_0, %c0_i32_1 : i32, i32, i32
  }
  func.func @transform_13(%arg0: i32) -> (i32, i32, i32) {
    %c0_i32 = arith.constant 0 : i32
    %c0_i32_0 = arith.constant 0 : i32
    %c0_i32_1 = arith.constant 0 : i32
    %c0_i32_2 = arith.constant 0 : i32
    return %c0_i32, %c0_i32_0, %c0_i32_1 : i32, i32, i32
  }
  func.func @transform_14(%arg0: i32) -> (i32, i32, i32) {
    %c0_i32 = arith.constant 0 : i32
    %c0_i32_0 = arith.constant 0 : i32
    %c0_i32_1 = arith.constant 0 : i32
    %c0_i32_2 = arith.constant 0 : i32
    return %c0_i32, %c0_i32_0, %c0_i32_1 : i32, i32, i32
  }
  func.func @transform_15(%arg0: i32) -> (i32, i32, i32) {
    %c0_i32 = arith.constant 0 : i32
    %c0_i32_0 = arith.constant 0 : i32
    %c0_i32_1 = arith.constant 0 : i32
    %c0_i32_2 = arith.constant 0 : i32
    return %c0_i32, %c0_i32_0, %c0_i32_1 : i32, i32, i32
  }
  func.func @transform_16(%arg0: i32) -> (i32, i32, i32) {
    %c0_i32 = arith.constant 0 : i32
    %c0_i32_0 = arith.constant 0 : i32
    %c0_i32_1 = arith.constant 0 : i32
    %c0_i32_2 = arith.constant 0 : i32
    return %c0_i32, %c0_i32_0, %c0_i32_1 : i32, i32, i32
  }
  func.func @transform_17(%arg0: i32) -> (i32, i32, i32) {
    %c0_i32 = arith.constant 0 : i32
    %c0_i32_0 = arith.constant 0 : i32
    %c0_i32_1 = arith.constant 0 : i32
    %c0_i32_2 = arith.constant 0 : i32
    return %c0_i32, %c0_i32_0, %c0_i32_1 : i32, i32, i32
  }
  func.func @transform_18(%arg0: i32) -> (i32, i32, i32) {
    %c0_i32 = arith.constant 0 : i32
    %c0_i32_0 = arith.constant 0 : i32
    %c0_i32_1 = arith.constant 0 : i32
    %c0_i32_2 = arith.constant 0 : i32
    return %c0_i32, %c0_i32_0, %c0_i32_1 : i32, i32, i32
  }
  func.func @transform_19(%arg0: i32) -> (i32, i32) {
    %c0_i32 = arith.constant 0 : i32
    %c0_i32_0 = arith.constant 0 : i32
    %c0_i32_1 = arith.constant 0 : i32
    return %c0_i32, %c0_i32_0 : i32, i32
  }
  func.func @transform_20(%arg0: i32) -> (i32, i32) {
    %c0_i32 = arith.constant 0 : i32
    %c0_i32_0 = arith.constant 0 : i32
    %c0_i32_1 = arith.constant 0 : i32
    return %c0_i32, %c0_i32_0 : i32, i32
  }
  func.func @transform_21(%arg0: i32) -> (i32, i32) {
    %c0_i32 = arith.constant 0 : i32
    %c0_i32_0 = arith.constant 0 : i32
    %c0_i32_1 = arith.constant 0 : i32
    return %c0_i32, %c0_i32_0 : i32, i32
  }
  func.func @transform_22(%arg0: i32) -> (i32, i32) {
    %c0_i32 = arith.constant 0 : i32
    %c0_i32_0 = arith.constant 0 : i32
    %c0_i32_1 = arith.constant 0 : i32
    return %c0_i32, %c0_i32_0 : i32, i32
  }
  func.func @transform_23(%arg0: i32) -> (i32, i32) {
    %c0_i32 = arith.constant 0 : i32
    %c0_i32_0 = arith.constant 0 : i32
    %c0_i32_1 = arith.constant 0 : i32
    return %c0_i32, %c0_i32_0 : i32, i32
  }
  func.func @transform_24(%arg0: i32) -> (i32, i32, i32) {
    %c0_i32 = arith.constant 0 : i32
    %c0_i32_0 = arith.constant 0 : i32
    %c0_i32_1 = arith.constant 0 : i32
    %c0_i32_2 = arith.constant 0 : i32
    return %c0_i32, %c0_i32_0, %c0_i32_1 : i32, i32, i32
  }
  func.func @transform_25(%arg0: i32) -> (i32, i32, i32) {
    %c0_i32 = arith.constant 0 : i32
    %c0_i32_0 = arith.constant 0 : i32
    %c0_i32_1 = arith.constant 0 : i32
    %c0_i32_2 = arith.constant 0 : i32
    return %c0_i32, %c0_i32_0, %c0_i32_1 : i32, i32, i32
  }
  func.func @transform_26(%arg0: i32) -> (i32, i32, i32) {
    %c0_i32 = arith.constant 0 : i32
    %c0_i32_0 = arith.constant 0 : i32
    %c0_i32_1 = arith.constant 0 : i32
    %c0_i32_2 = arith.constant 0 : i32
    return %c0_i32, %c0_i32_0, %c0_i32_1 : i32, i32, i32
  }
  func.func @transform_27(%arg0: i32) -> (i32, i32, i32) {
    %c0_i32 = arith.constant 0 : i32
    %c0_i32_0 = arith.constant 0 : i32
    %c0_i32_1 = arith.constant 0 : i32
    %c0_i32_2 = arith.constant 0 : i32
    return %c0_i32, %c0_i32_0, %c0_i32_1 : i32, i32, i32
  }
  func.func @transform_28(%arg0: i32) -> (i32, i32, i32) {
    %c0_i32 = arith.constant 0 : i32
    %c0_i32_0 = arith.constant 0 : i32
    %c0_i32_1 = arith.constant 0 : i32
    %c0_i32_2 = arith.constant 0 : i32
    return %c0_i32, %c0_i32_0, %c0_i32_1 : i32, i32, i32
  }
  func.func @transform_29(%arg0: i32) -> (i32, i32, i32) {
    %c0_i32 = arith.constant 0 : i32
    %c0_i32_0 = arith.constant 0 : i32
    %c0_i32_1 = arith.constant 0 : i32
    %c0_i32_2 = arith.constant 0 : i32
    return %c0_i32, %c0_i32_0, %c0_i32_1 : i32, i32, i32
  }
  func.func @transform_30(%arg0: i32) -> (i32, i32, i32) {
    %c0_i32 = arith.constant 0 : i32
    %c0_i32_0 = arith.constant 0 : i32
    %c0_i32_1 = arith.constant 0 : i32
    %c0_i32_2 = arith.constant 0 : i32
    return %c0_i32, %c0_i32_0, %c0_i32_1 : i32, i32, i32
  }
  func.func @transform_31(%arg0: i32) -> (i32, i32) {
    %c0_i32 = arith.constant 0 : i32
    %c0_i32_0 = arith.constant 0 : i32
    %c0_i32_1 = arith.constant 0 : i32
    return %c0_i32, %c0_i32_0 : i32, i32
  }
  func.func @transform_32(%arg0: i32) -> (i32, i32) {
    %c0_i32 = arith.constant 0 : i32
    %c0_i32_0 = arith.constant 0 : i32
    %c0_i32_1 = arith.constant 0 : i32
    return %c0_i32, %c0_i32_0 : i32, i32
  }
  func.func @transform_33(%arg0: i32) -> (i32, i32) {
    %c0_i32 = arith.constant 0 : i32
    %c0_i32_0 = arith.constant 0 : i32
    %c0_i32_1 = arith.constant 0 : i32
    return %c0_i32, %c0_i32_0 : i32, i32
  }
  func.func @transform_34(%arg0: i32) -> (i32, i32) {
    %c0_i32 = arith.constant 0 : i32
    %c0_i32_0 = arith.constant 0 : i32
    %c0_i32_1 = arith.constant 0 : i32
    return %c0_i32, %c0_i32_0 : i32, i32
  }
  func.func @transform_35(%arg0: i32) -> (i32, i32) {
    %c0_i32 = arith.constant 0 : i32
    %c0_i32_0 = arith.constant 0 : i32
    %c0_i32_1 = arith.constant 0 : i32
    return %c0_i32, %c0_i32_0 : i32, i32
  }
  func.func @transform_36(%arg0: i32) -> (i32, i32) {
    %c0_i32 = arith.constant 0 : i32
    %c0_i32_0 = arith.constant 0 : i32
    %c0_i32_1 = arith.constant 0 : i32
    return %c0_i32, %c0_i32_0 : i32, i32
  }
  func.func @transform_37(%arg0: i32) -> (i32, i32) {
    %c0_i32 = arith.constant 0 : i32
    %c0_i32_0 = arith.constant 0 : i32
    %c0_i32_1 = arith.constant 0 : i32
    return %c0_i32, %c0_i32_0 : i32, i32
  }
  func.func @transform_38(%arg0: i32) -> (i32, i32) {
    %c0_i32 = arith.constant 0 : i32
    %c0_i32_0 = arith.constant 0 : i32
    %c0_i32_1 = arith.constant 0 : i32
    return %c0_i32, %c0_i32_0 : i32, i32
  }
  func.func @transform_39(%arg0: i32) -> (i32, i32) {
    %c0_i32 = arith.constant 0 : i32
    %c0_i32_0 = arith.constant 0 : i32
    %c0_i32_1 = arith.constant 0 : i32
    return %c0_i32, %c0_i32_0 : i32, i32
  }
  func.func @transform_40(%arg0: i32) -> (i32, i32, i32) {
    %c0_i32 = arith.constant 0 : i32
    %c0_i32_0 = arith.constant 0 : i32
    %c0_i32_1 = arith.constant 0 : i32
    return %arg0, %c0_i32, %c0_i32_0 : i32, i32, i32
  }
  func.func @transform_41(%arg0: i32) -> (i32, i32, i32) {
    %c0_i32 = arith.constant 0 : i32
    %c0_i32_0 = arith.constant 0 : i32
    %c0_i32_1 = arith.constant 0 : i32
    return %arg0, %c0_i32, %c0_i32_0 : i32, i32, i32
  }
}

</mosaic_0001>

<bundles_post_ra>
// kernel: two_way_transformer.5
= control target key start
LH: loop header
LB: loop body
LE: loop exit
PB: predicated region body
PF: predicated region fallthrough
CT: control target
= control target key end

     0   :  { %s2339_s0 = inlined_call_operand.vmem [shape: f32[2,8,32], index: 0, kind: input, shape index: {}]   ;;  %s2340_s1 = inlined_call_operand.vmem [shape: f32[2,64,32], index: 1, kind: input, shape index: {}]   ;;  %s2341_s2 = inlined_call_operand.vmem [shape: f32[2,8,32], index: 2, kind: input, shape index: {}]   ;;  %s2342_s3 = inlined_call_operand.vmem [shape: f32[2,64,32], index: 3, kind: input, shape index: {}]   ;;  %s2343_s4 = inlined_call_operand.vmem [shape: bf16[2,32,8], index: 4, kind: input, shape index: {}]   ;;  %s2344_s5 = inlined_call_operand.vmem [shape: f32[2,1,8], index: 5, kind: input, shape index: {}]   ;;  %s2345_s6 = inlined_call_operand.vmem [shape: bf16[2,32,8], index: 6, kind: input, shape index: {}]   ;;  %s2346_s7 = inlined_call_operand.vmem [shape: f32[2,1,8], index: 7, kind: input, shape index: {}]   ;;  %s2347_s8 = inlined_call_operand.vmem [shape: bf16[2,32,8], index: 8, kind: input, shape index: {}]   ;;  %s2348_s9 = inlined_call_operand.vmem [shape: f32[2,1,8], index: 9, kind: input, shape index: {}]   ;;  %s2349_s10 = inlined_call_operand.vmem [shape: bf16[2,8,32], index: 10, kind: input, shape index: {}]   ;;  %s2350_s11 = inlined_call_operand.vmem [shape: f32[1,32], index: 11, kind: input, shape index: {}]   ;;  %s2351_s12 = inlined_call_operand.vmem [shape: f32[1,32], index: 12, kind: input, shape index: {}]   ;;  %s2352_s13 = inlined_call_operand.vmem [shape: f32[1,32], index: 13, kind: input, shape index: {}]   ;;  %s2353_s14 = inlined_call_operand.hbm [shape: f32[2,8,32], index: 14, kind: output, shape index: {}]  }
   0x1   :  { %2359 = sst [smem:[#allocation10_spill]] %s2339_s0 }
   0x2   :  { %19 = vsyncpa [#allocation3], 0 }
   0x3   :  { %21 = vsyncpa [#allocation3 + $0x1], 0  ;;  %s2017_s29 = smov 0   ;;  %s2019_s30 = smov 0  }
   0x4   :  { %s2021_s15 = smov 0   ;;  %s2023_s16 = smov 0  }
   0x5 LB: > { %2360 = sst [smem:[#allocation5_spill]] %s1925_s29  ;;  %s2038_s17 = sadd.s32 4294967295, %s1937_s16   ;;  %s1937_s16 = sphi %s2023_s16, %s2370_s16   ;;  %s1933_s15 = sphi %s2021_s15, %s2372_s15   ;;  %s1929_s30 = sphi %s2019_s30, %s2374_s30   ;;  %s1925_s29 = sphi %s2017_s29, %s2373_s29  }
   0x6   : > { %2361 = sst [smem:[#allocation6_spill]] %s1933_s15  ;;  %s1558_s18 = sadd.s32 4294967294, %s1937_s16  }
   0x7   : > { %s2042_s19 = sadd.s32 1, %s1937_s16   ;;  %s348_s20 = sadd.s32 1, %s1933_s15 }
   0x8   : > { %2362 = sst [smem:[#allocation7_spill]] %s2042_s19  ;;  %s345_s21 = ssub.s32 %s1937_s16, %s2042_s19 }
   0x9   : > { %p358_p0 = scmp.ne.s32.totalorder %s1933_s15, %s1929_s30  ;;  %p346_p1 = scmp.eq.s32.totalorder %s345_s21, 0 }
   0xa   : > { %p359_p2 = scmp.eq.s32.totalorder %s2038_s17, 1  ;;  %p364_p3 = scmp.ne.s32.totalorder %s1929_s30, %s1925_s29 }
   0xb   : > { %p365_p4 = scmp.eq.s32.totalorder %s1558_s18, 1  ;;  %p1561_p7 = scmp.ge.s32.totalorder %s1937_s16, 1 }
   0xc   : > { %s2053_s22 = scalar_select %p346_p1, %s1933_s15, %s348_s20  }
   0xd   : > { %p2055_p5 = por %p359_p2, %p358_p0  ;;  %p2059_p6 = por %p365_p4, %p364_p3 }
   0xe   : > { %2363 = sst [smem:[#allocation8_spill]] %s2053_s22  ;;  %p443_p8 = scmp.lt.s32.totalorder %s1937_s16, 3 }
   0xf   : > { %s2365_s24 = scalar_select %p2059_p6, 1, 0 }
  0x10   : > { %p444_p9 = pnand %p1561_p7, %p443_p8 }
  0x11   : > { %2366 = sst [smem:[#allocation9_spill]] %s2365_s24  ;;  %p502_p10 = scmp.lt.s32.totalorder (!%p444_p9), %s2038_s17, 1 }
  0x12   : > { %447 = sbr.rel (%p444_p9) target bundleno = 2273 (0x8e1), region = 76  ;;  %s2367_s0 = sld [smem:[#allocation10_spill]] (!%p444_p9) }
  0x13   : > { %s499_s20 = sand.u32 (!%p444_p9), 1, %s1929_s30   ;;  %s1631_s28 = sshll.u32 (!%p444_p9), %s2038_s17, 7 }
  0x17   : > { %v1855_v0 = vld [vmem:[%s2345_s6 + $0x8] sm:$0xff]   ;;  %v1856_v1 = vld [vmem:[%s2345_s6] sm:$0xff]   ;;  %s2073_s18 = scalar_select %p502_p10, %s2038_s17, 1  ;;  %v1939_v2 = vmov 0.0   ;;  %vm1940_vm0 = vmmov 0   ;;  %vm580_vm1 = vcmask 261120  }
  0x18   : > { %1698 = vmatprep.subr.bf16.mxu1 %v1855_v0  ;;  %1690 = vmatprep.subr.bf16.mxu0 %v1939_v2  ;;  %v1857_v3 = vld [vmem:[%s2343_s4 + $0x8] sm:$0xff]   ;;  %v1858_v4 = vld [vmem:[%s2343_s4] sm:$0xff]   ;;  %vm829_vm2 = vcmask 64512   ;;  %vm886_vm3 = vcmask 523264   ;;  %vm1319_vm4 = vcmask 1043456  }
  0x19   : > { %1699 = vmatpush3.bf16.msra.mxu1 %v1855_v0  ;;  %s1634_s25 = sshll.u32 %s2073_s18, 6  ;;  %1694 = vmatprep.mubr.msk.bf16.mxu0 %vm1940_vm0, %v1939_v2  ;;  %s1563_s27 = sshll.u32 %s2073_s18, 3  ;;  %v1573_v49 = vld [vmem:[%s2346_s7] ss:$0 sm:$0xff] }
  0x1a   : > { %1700 = vmatprep.subr.bf16.mxu1 %v1856_v1  ;;  %s2089_s19 = scalar_lea.vmem %s2340_s1, %s1634_s25  ;;  %s2094_s22 = scalar_lea.vmem %s2342_s3, %s1634_s25  ;;  %1691 = vmatpush3.bf16.msra.mxu0 %v1857_v3 }
  0x1b   : > { %v522_v5 = vld [vmem:[%s2089_s19] sm:$0xff]  ;;  %v523_v6 = vld [vmem:[%s2089_s19 + $0x8] sm:$0xff]  ;;  %1692 = vmatprep.subr.bf16.mxu0 %v1939_v2  ;;  %v524_v10 = vld [vmem:[%s2089_s19 + $0x10] sm:$0xff]  ;;  %s505_s24 = scalar_lea.vmem %s2367_s0, %s1563_s27  ;;  %s514_s21 = scalar_lea.vmem %s2341_s2, %s1563_s27 }
  0x1c   : > { %v532_v7 = vld [vmem:[%s2094_s22] sm:$0xff]  ;;  %v533_v8 = vld [vmem:[%s2094_s22 + $0x8] sm:$0xff]  ;;  %v525_v11 = vld [vmem:[%s2089_s19 + $0x18] sm:$0xff]  ;;  %v553_v34 = vpack.c.bf16 %v523_v6, %v522_v5  ;;  %s1461_s18 = scalar_lea.hbm %s2353_s14, %s1631_s28  ;;  %s1450_s0 = scalar_lea.sflag [#allocation3], %s499_s20 }
  0x1d   : > { %1701 = vmatpush3.bf16.msra.mxu1 %v1856_v1  ;;  %v540_v9 = vadd.f32 %v532_v7, %v522_v5  ;;  %v541_v12 = vadd.f32 %v533_v8, %v523_v6  ;;  %v534_v13 = vld [vmem:[%s2094_s22 + $0x10] sm:$0xff]  ;;  %v535_v14 = vld [vmem:[%s2094_s22 + $0x18] sm:$0xff]  ;;  %v2105_v15 = vpack.c.bf16 %v525_v11, %v524_v10  ;;  %v2108_v16 = vld [vmem:[%s2089_s19 + $0x20] sm:$0xff]  ;;  %s1941_s25 = smov [#allocation2]  }
  0x1e   : > { %1722 = vmatprep.subr.bf16.mxu1 %v1939_v2  ;;  %v542_v17 = vadd.f32 %v534_v13, %v524_v10  ;;  %v543_v18 = vadd.f32 %v535_v14, %v525_v11  ;;  %v2118_v19 = vld [vmem:[%s2089_s19 + $0x28] sm:$0xff]  ;;  %v536_v20 = vld [vmem:[%s2094_s22 + $0x20] sm:$0xff]  ;;  %1693 = vmatpush3.bf16.msra.mxu0 %v1858_v4  ;;  %v2127_v25 = vld [vmem:[%s2089_s19 + $0x30] sm:$0xff]  ;;  %s1881_s26 = sshll.u32 %s1941_s25, 4  ;;  %s1882_s26 = int_to_ptr.vmem [resolvable:$false] %s1881_s26 }
  0x1f   : > { %v537_v21 = vld [vmem:[%s2094_s22 + $0x28] sm:$0xff]  ;;  %v2122_v22 = vpack.c.bf16 %v541_v12, %v540_v9  ;;  %v544_v23 = vadd.f32 %v536_v20, %v2108_v16  ;;  %v2130_v26 = vld [vmem:[%s2089_s19 + $0x38] sm:$0xff]  ;;  %v538_v27 = vld [vmem:[%s2094_s22 + $0x30] sm:$0xff]  ;;  %v2183_v10 = vpack.c.bf16 %v2118_v19, %v2108_v16  ;;  %s1883_s17 = scalar_lea.vmem %s1882_s26, 256 }
  0x20   : > { %v545_v24 = vadd.f32 %v537_v21, %v2118_v19  ;;  %v2133_v28 = vpack.c.bf16 %v543_v18, %v542_v17  ;;  %v539_v29 = vld [vmem:[%s2094_s22 + $0x38] sm:$0xff]  ;;  %v2136_v30 = vld [vmem:[%s505_s24] sm:$0xff]  ;;  %v546_v35 = vadd.f32 %v538_v27, %v2127_v25  ;;  %v1859_v8 = vld [vmem:[%s2347_s8 + $0x8] sm:$0xff]   ;;  %v2192_v11 = vpack.c.bf16 %v2130_v26, %v2127_v25 }
  0x21   : > { %v530_v31 = vld [vmem:[%s514_s21] sm:$0xff]  ;;  %1702 = vmatprep.mubr.msk.bf16.mxu1 %vm580_vm1, %v2122_v22  ;;  %v547_v36 = vadd.f32 %v539_v29, %v2130_v26  ;;  %1710 = vmatprep.subr.bf16.mxu0 %v1859_v8  ;;  %s1562_s21 = sshll.u32 %s499_s20, 3 }
  0x22   : > { %v2140_v32 = vpack.c.bf16 %v545_v24, %v544_v23  ;;  %v531_v33 = vadd.f32 %v530_v31, %v2136_v30  ;;  %1703 = vmatmul.mubr.msk.bf16.vlgmr.msra.gmra.mxu1 %vm580_vm1, %v2133_v28  ;;  %v1569_v4 = vld [vmem:[%s2344_s5] ss:$0 sm:$0xff]  ;;  %s501_s22 = scalar_lea.vmem [#allocation2], %s1562_s21 }
  0x23   : > { %v2153_v38 = vpack.c.bf16 %v547_v36, %v546_v35  ;;  %v1860_v9 = vld [vmem:[%s2347_s8] sm:$0xff]   ;;  %s1463_s29 = sshll.u32 %s501_s22, 4  ;;  %s1464_s29 = int_to_ptr.vmem [resolvable:$true] %s1463_s29 }
  0x24   : > { %1706 = vmatprep.mubr.msk.bf16.mxu1 %vm580_vm1, %v2140_v32  ;;  %v2149_v37 = vpack.c.bf16 %v531_v33, %v531_v33  ;;  %v1580_v24 = vld [vmem:[%s2348_s9] ss:$0 sm:$0xff]  ;;  %s1877_s19 = scalar_lea.vmem %s1464_s29, 128  ;;  %p1884_p0 = scmp.lt.s32.totalorder %s1464_s29, %s1882_s26 }
  0x25   : > { %p1878_p11 = scmp.ne.s32.totalorder %s1464_s29, %s1877_s19  ;;  %p1885_p1 = scmp.lt.s32.totalorder %s1883_s17, %s1877_s19 }
  0x26   : > { %1695 = vmatmul.mubr.msk.bf16.vlgmr.msra.gmra.mxu0 %vm580_vm1, %v2149_v37 }
  0x27   : > { %1714 = vmatprep.mubr.msk.bf16.mxu0 %vm580_vm1, %v553_v34  ;;  %1711 = vmatpush3.bf16.msra.mxu0 %v1859_v8  ;;  %p1879_p12 = pnand %p1878_p11, %p2055_p5  ;;  %p1886_p2 = por %p1885_p1, %p1884_p0 }
  0x28   : > { %1712 = vmatprep.subr.bf16.mxu0 %v1860_v9 }
  0x29   : > { %p1880_p13 = pneg %p1879_p12 }
  0x2a   : > { %1707 = vmatmul.mubr.msk.bf16.gmra.mxu1 %vm580_vm1, %v2153_v38 }
  0x2b   : > { %1730 = vmatprep.mubr.msk.bf16.mxu1 %vm1940_vm0, %v1939_v2  ;;  %1713 = vmatpush3.bf16.msra.mxu0 %v1860_v9  ;;  %p1887_p3 = pnand %p1886_p2, %p1880_p13 }
  0x2c   : > { %1734 = vmatprep.subr.bf16.mxu0 %v1939_v2 }
  0x2e   : > { %1715 = vmatmul.mubr.msk.bf16.vlgmr.msra.gmra.mxu0 %vm580_vm1, %v2105_v15 }
  0x2f   : > { %1718 = vmatprep.mubr.msk.bf16.mxu0 %vm580_vm1, %v2183_v10 }
  0x36   : > { %1719 = vmatmul.mubr.msk.bf16.gmra.mxu0 %vm580_vm1, %v2192_v11 }
  0x37   : > { %1742 = vmatprep.mubr.msk.bf16.mxu0 %vm1940_vm0, %v1939_v2 }
  0xe2   : > { %v1704_v39 = vpop.f32.mrf.mxu1 }
  0xe3   : > { %v702_v61 = vadd.f32 %v1704_v39, %v1573_v49 }
  0xe4   : > { %v693_v40 = vpop.f32.mrf.mxu1 }
  0xe5   : > { %v694_v1 = vadd.f32 %v1573_v49, %v693_v40 }
  0xe6   : > { %v618_v41 = vpop.f32.mrf.mxu0  ;;  %v1705_v42 = vpop.f32.mrf.mxu1 }
  0xe7   : > { %v705_v59 = vadd.f32 %v1705_v42, %v1573_v49  ;;  %v619_v5 = vadd.f32 %v1569_v4, %v618_v41 }
  0xe8   : > { %v1696_v43 = vpop.f32.mrf.mxu0  ;;  %v696_v44 = vpop.f32.mrf.mxu1 }
  0xe9   : > { %v826_v62 = vpack.c.bf16 %v705_v59, %v702_v61  ;;  %v697_v63 = vadd.f32 %v1573_v49, %v696_v44  ;;  %v824_v7 = vpack.c.bf16 %v619_v5, %v619_v5 }
  0xea   : > { %v621_v45 = vpop.f32.mrf.mxu0  ;;  %v1708_v46 = vpop.f32.mrf.mxu1 }
  0xeb   : > { %v718_v51 = vadd.f32 %v1708_v46, %v1573_v49  ;;  %v837_v0 = vsel %vm829_vm2, %v826_v62, 0  ;;  %v825_v3 = vpack.c.bf16 %v697_v63, %v694_v1 }
  0xec   : > { %v1697_v47 = vpop.f32.mrf.mxu0  ;;  %v709_v48 = vpop.f32.mrf.mxu1 }
  0xed   : > { %v710_v57 = vadd.f32 %v1573_v49, %v709_v48  ;;  %v834_v6 = vsel %vm829_vm2, %v825_v3, 0 }
  0xee   : > { %v1709_v50 = vpop.f32.mrf.mxu1  ;;  %v1716_v19 = vpop.f32.mrf.mxu0 }
  0xef   : > { %v721_v52 = vadd.f32 %v1709_v50, %v1573_v49  ;;  %v802_v39 = vadd.f32 %v1716_v19, %v1580_v24 }
  0xf0   : > { %v712_v53 = vpop.f32.mrf.mxu1  ;;  %v793_v20 = vpop.f32.mrf.mxu0 }
  0xf1   : > { %v828_v54 = vpack.c.bf16 %v721_v52, %v718_v51  ;;  %v713_v55 = vadd.f32 %v1573_v49, %v712_v53  ;;  %v794_v42 = vadd.f32 %v1580_v24, %v793_v20 }
  0xf2   : > { %v1717_v21 = vpop.f32.mrf.mxu0 }
  0xf3   : > { %v843_v56 = vsel %vm829_vm2, %v828_v54, 0  ;;  %v827_v58 = vpack.c.bf16 %v713_v55, %v710_v57  ;;  %v805_v40 = vadd.f32 %v1717_v21, %v1580_v24  ;;  %v1861_v54 = vld [vmem:[%s2343_s4 + $0x18] sm:$0xff]  }
  0xf4   : > { %1723 = vmatpush3.bf16.xpose.msra.mxu1 %v843_v56  ;;  %v796_v23 = vpop.f32.mrf.mxu0  ;;  %v1862_v56 = vld [vmem:[%s2343_s4 + $0x10] sm:$0xff]   ;;  %v1863_v57 = vld [vmem:[%s2345_s6 + $0x18] sm:$0xff]  }
  0xf5   : > { %1724 = vmatprep.subr.bf16.mxu1 %v1939_v2  ;;  %v840_v60 = vsel %vm829_vm2, %v827_v58, 0  ;;  %v900_v43 = vpack.c.bf16 %v805_v40, %v802_v39  ;;  %v797_v44 = vadd.f32 %v1580_v24, %v796_v23  ;;  %v1864_v58 = vld [vmem:[%s2345_s6 + $0x10] sm:$0xff]  }
  0xf6   : > { %v1720_v25 = vpop.f32.mrf.mxu0 }
  0xf7   : > { %v818_v27 = vadd.f32 %v1720_v25, %v1580_v24  ;;  %v899_v45 = vpack.c.bf16 %v797_v44, %v794_v42 }
  0xf8   : > { %v809_v26 = vpop.f32.mrf.mxu0 }
  0xf9   : > { %v810_v31 = vadd.f32 %v1580_v24, %v809_v26 }
  0xfa   : > { %v1721_v29 = vpop.f32.mrf.mxu0 }
  0xfb   : > { %v821_v33 = vadd.f32 %v1721_v29, %v1580_v24 }
  0xfc   : > { %1725 = vmatpush3.bf16.xpose.msra.mxu1 %v840_v60 }
  0xfd   : > { %1726 = vmatprep.subr.bf16.mxu1 %v1939_v2  ;;  %v902_v35 = vpack.c.bf16 %v821_v33, %v818_v27  ;;  %v1594_v27 = vld [vmem:[%s2344_s5 + $0x1] ss:$0 sm:$0xff] }
  0xff   : > { %1735 = vmatpush3.bf16.msra.mxu0 %v902_v35  ;;  %v1866_v35 = vld [vmem:[%s2347_s8 + $0x10] sm:$0xff]  }
 0x100   : > { %1736 = vmatprep.subr.bf16.mxu0 %v1939_v2 }
 0x104   : > { %1727 = vmatpush3.bf16.xpose.msra.mxu1 %v837_v0 }
 0x105   : > { %1728 = vmatprep.subr.bf16.mxu1 %v1939_v2 }
 0x10c   : > { %1729 = vmatpush3.bf16.xpose.msra.mxu1 %v834_v6 }
 0x113   : > { %1731 = vmatmul.mubr.msk.bf16.vlgmr.msra.gmra.mxu1 %vm829_vm2, %v824_v7 }
 0x114   : > { %1770 = vmatprep.mubr.msk.bf16.mxu1 %vm580_vm1, %v553_v34  ;;  %v812_v34 = vpop.f32.mrf.mxu0 }
 0x115   : > { %v813_v36 = vadd.f32 %v1580_v24, %v812_v34  ;;  %v1865_v34 = vld [vmem:[%s2347_s8 + $0x18] sm:$0xff]  }
 0x116   : > { %1766 = vmatprep.subr.bf16.mxu1 %v1865_v34 }
 0x117   : > { %v901_v41 = vpack.c.bf16 %v813_v36, %v810_v31  ;;  %1767 = vmatpush3.bf16.msra.mxu1 %v1865_v34 }
 0x118   : > { %1768 = vmatprep.subr.bf16.mxu1 %v1866_v35 }
 0x119   : > { %1737 = vmatpush3.bf16.msra.mxu0 %v901_v41 }
 0x11a   : > { %1738 = vmatprep.subr.bf16.mxu0 %v1939_v2 }
 0x11b   : > { %1769 = vmatpush3.bf16.msra.mxu1 %v1866_v35 }
 0x11c   : > { %1790 = vmatprep.subr.bf16.mxu1 %v1939_v2 }
 0x11d   : > { %1739 = vmatpush3.bf16.msra.mxu0 %v900_v43 }
 0x11e   : > { %1740 = vmatprep.subr.bf16.mxu0 %v1939_v2  ;;  %1771 = vmatmul.mubr.msk.bf16.vlgmr.msra.gmra.mxu1 %vm580_vm1, %v2105_v15 }
 0x11f   : > { %1774 = vmatprep.mubr.msk.bf16.mxu1 %vm580_vm1, %v2183_v10  ;;  %v1615_v10 = vld [vmem:[%s2348_s9 + $0x1] ss:$0 sm:$0xff] }
 0x121   : > { %1741 = vmatpush3.bf16.msra.mxu0 %v899_v45 }
 0x122   : > { %1746 = vmatprep.subr.bf16.mxu0 %v1939_v2 }
 0x126   : > { %1775 = vmatmul.mubr.msk.bf16.gmra.mxu1 %vm580_vm1, %v2192_v11 }
 0x127   : > { %1798 = vmatprep.mubr.msk.bf16.mxu1 %vm1940_vm0, %v1939_v2 }
 0x1d3   : > { %v879_v12 = vpop.f32.mrf.mxu1 }
 0x1d4   : > { %v885_v13 = vmul.f32 0.35355338, %v879_v12 }
 0x1d5   : > { %v1732_v14 = vpop.f32.mrf.mxu1 }
 0x1d6   : > { %v887_v16 = vsel %vm886_vm3, %v885_v13, -inf }
 0x1d7   : > { %888 = vmax.xlane.f32.xlu0 %v887_v16  ;;  %v882_v17 = vpop.f32.mrf.mxu1 }
 0x1d9   : > { %v1733_v18 = vpop.f32.mrf.mxu1 }
 0x1de   : > { %v1772_v44 = vpop.f32.mrf.mxu1 }
 0x1e0   : > { %v1162_v45 = vpop.f32.mrf.mxu1 }
 0x1e2   : > { %v1773_v15 = vpop.f32.mrf.mxu1 }
 0x260   : > { %v889_v46 = vpop.xlane.xlu0 %888 }
 0x261   : > { %v890_v47 = vsub.f32 %v885_v13, %v889_v46  ;;  %v1165_v46 = vpop.f32.mrf.mxu1 }
 0x263   : > { %v891_v48 = vmul.f32 1.442695, %v890_v47  ;;  %v1776_v11 = vpop.f32.mrf.mxu1 }
 0x265   : > { %1867 = vpow2.f32 %v891_v48  ;;  %v1178_v47 = vpop.f32.mrf.mxu1  ;;  %v1187_v48 = vadd.f32 %v1776_v11, %v1615_v10 }
 0x272   : > { %v1868_v49 = vpop.eup %1867 }
 0x273   : > { %v893_v50 = vsel %vm886_vm3, %v1868_v49, 0.0 }
 0x274   : > { %894 = vadd.xlane.f32.xlu0 %v893_v50  ;;  %v1179_v50 = vadd.f32 %v1615_v10, %v1178_v47 }
 0x2fd   : > { %v895_v51 = vpop.xlane.xlu0 %894 }
 0x2fe   : > { %1869 = vrcp.f32 %v895_v51 }
 0x30b   : > { %v1870_v52 = vpop.eup %1869 }
 0x30c   : > { %v897_v53 = vmul.f32 %v1870_v52, %v1868_v49  ;;  %v1777_v49 = vpop.f32.mrf.mxu1 }
 0x30d   : > { %v1190_v51 = vadd.f32 %v1777_v49, %v1615_v10 }
 0x30e   : > { %v898_v55 = vpack.c.bf16 %v897_v53, %v897_v53  ;;  %v1181_v52 = vpop.f32.mrf.mxu1 }
 0x30f   : > { %v1269_v53 = vpack.c.bf16 %v1190_v51, %v1187_v48 }
 0x310   : > { %1743 = vmatmul.mubr.msk.bf16.vlgmr.msra.gmra.mxu0 %vm886_vm3, %v898_v55  ;;  %v1171_v55 = vadd.f32 %v1772_v44, %v1615_v10  ;;  %v1629_v44 = vld [vmem:[%s2352_s13] ss:$0 sm:$0xff] }
 0x311   : > { %1747 = vmatpush3.bf16.msra.mxu0 %v1861_v54  ;;  %1750 = vmatprep.mubr.msk.bf16.mxu0 %vm1940_vm0, %v1939_v2  ;;  %v1182_v54 = vadd.f32 %v1615_v10, %v1181_v52 }
 0x312   : > { %1748 = vmatprep.subr.bf16.mxu0 %v1939_v2  ;;  %1791 = vmatpush3.bf16.msra.mxu1 %v1269_v53 }
 0x313   : > { %1792 = vmatprep.subr.bf16.mxu1 %v1939_v2 }
 0x315   : > { %1749 = vmatpush3.bf16.msra.mxu0 %v1862_v56  ;;  %v1174_v56 = vadd.f32 %v1773_v15, %v1615_v10 }
 0x316   : > { %1754 = vmatprep.subr.bf16.mxu0 %v1863_v57 }
 0x318   : > { %1751 = vmatmul.mubr.msk.bf16.vlgmr.msra.gmra.mxu0 %vm580_vm1, %v2149_v37 }
 0x319   : > { %1755 = vmatpush3.bf16.msra.mxu0 %v1863_v57  ;;  %1758 = vmatprep.mubr.msk.bf16.mxu0 %vm580_vm1, %v2122_v22  ;;  %v1268_v57 = vpack.c.bf16 %v1182_v54, %v1179_v50 }
 0x31a   : > { %1756 = vmatprep.subr.bf16.mxu0 %v1864_v58 }
 0x31b   : > { %1793 = vmatpush3.bf16.msra.mxu1 %v1268_v57 }
 0x31c   : > { %1794 = vmatprep.subr.bf16.mxu1 %v1939_v2 }
 0x31d   : > { %1757 = vmatpush3.bf16.msra.mxu0 %v1864_v58  ;;  %v1163_v58 = vadd.f32 %v1615_v10, %v1162_v45 }
 0x31e   : > { %1778 = vmatprep.subr.bf16.mxu0 %v1939_v2 }
 0x320   : > { %1759 = vmatmul.mubr.msk.bf16.vlgmr.msra.gmra.mxu0 %vm580_vm1, %v2133_v28 }
 0x321   : > { %1762 = vmatprep.mubr.msk.bf16.mxu0 %vm580_vm1, %v2140_v32 }
 0x328   : > { %1763 = vmatmul.mubr.msk.bf16.gmra.mxu0 %vm580_vm1, %v2153_v38  ;;  %v1603_v38 = vld [vmem:[%s2346_s7 + $0x1] ss:$0 sm:$0xff] }
 0x329   : > { %1786 = vmatprep.mubr.msk.bf16.mxu0 %vm1940_vm0, %v1939_v2 }
 0x3d0   : > { %v2236_v37 = vpop.f32.mrf.mxu0 }
 0x3d2   : > { %v1744_v59 = vpop.f32.mrf.mxu0 }
 0x3d3   : > { %v1267_v59 = vpack.c.bf16 %v1174_v56, %v1171_v55 }
 0x3d4   : > { %v943_v22 = vpop.f32.mrf.mxu0 }
 0x3d5   : > { %v1166_v22 = vadd.f32 %v1615_v10, %v1165_v46  ;;  %1795 = vmatpush3.bf16.msra.mxu1 %v1267_v59 }
 0x3d6   : > { %v1745_v60 = vpop.f32.mrf.mxu0  ;;  %1796 = vmatprep.subr.bf16.mxu1 %v1939_v2 }
 0x3d7   : > { %v1266_v60 = vpack.c.bf16 %v1166_v22, %v1163_v58 }
 0x3d8   : > { %v1007_v61 = vpop.f32.mrf.mxu0 }
 0x3d9   : > { %v1008_v31 = vadd.f32 %v1594_v27, %v1007_v61  ;;  %1797 = vmatpush3.bf16.msra.mxu1 %v1266_v60 }
 0x3da   : > { %v1752_v62 = vpop.f32.mrf.mxu0  ;;  %1802 = vmatprep.subr.bf16.mxu1 %v1939_v2 }
 0x3db   : > { %v1193_v33 = vpack.c.bf16 %v1008_v31, %v1008_v31 }
 0x3dc   : > { %v1010_v63 = vpop.f32.mrf.mxu0 }
 0x3de   : > { %v1753_v0 = vpop.f32.mrf.mxu0 }
 0x3e0   : > { %v1760_v1 = vpop.f32.mrf.mxu0 }
 0x3e1   : > { %v1081_v20 = vadd.f32 %v1760_v1, %v1603_v38 }
 0x3e2   : > { %v1072_v28 = vpop.f32.mrf.mxu0 }
 0x3e3   : > { %v1073_v25 = vadd.f32 %v1603_v38, %v1072_v28 }
 0x3e4   : > { %v1761_v3 = vpop.f32.mrf.mxu0 }
 0x3e5   : > { %v1084_v18 = vadd.f32 %v1761_v3, %v1603_v38 }
 0x3e6   : > { %v1075_v4 = vpop.f32.mrf.mxu0 }
 0x3e7   : > { %v1195_v21 = vpack.c.bf16 %v1084_v18, %v1081_v20  ;;  %v1076_v23 = vadd.f32 %v1603_v38, %v1075_v4  ;;  %v1624_v4 = vld [vmem:[%s2349_s10 + $0x4] sm:$0xf] }
 0x3e8   : > { %v1764_v32 = vpop.f32.mrf.mxu0 }
 0x3e9   : > { %v1097_v7 = vadd.f32 %v1764_v32, %v1603_v38  ;;  %v1205_v24 = vsel %vm829_vm2, %v1195_v21, 0  ;;  %v1194_v26 = vpack.c.bf16 %v1076_v23, %v1073_v25  ;;  %v1627_v23 = vld [vmem:[%s2350_s11] ss:$0 sm:$0xff] }
 0x3ea   : > { %v1088_v5 = vpop.f32.mrf.mxu0 }
 0x3eb   : > { %v1089_v16 = vadd.f32 %v1603_v38, %v1088_v5  ;;  %v1202_v29 = vsel %vm829_vm2, %v1194_v26, 0 }
 0x3ec   : > { %v1765_v6 = vpop.f32.mrf.mxu0 }
 0x3ed   : > { %v1100_v8 = vadd.f32 %v1765_v6, %v1603_v38  ;;  %v947_v6 = vld [vmem:[%s2349_s10] sm:$0xf] }
 0x3ee   : > { %v1091_v9 = vpop.f32.mrf.mxu0 }
 0x3ef   : > { %v1197_v12 = vpack.c.bf16 %v1100_v8, %v1097_v7  ;;  %v1092_v13 = vadd.f32 %v1603_v38, %v1091_v9  ;;  %v1321_v38 = vsel %vm1319_vm4, %v1624_v4, 0  ;;  %v1367_v9 = vsel %vm1319_vm4, %v947_v6, 0 }
 0x3f1   : > { %v1211_v14 = vsel %vm829_vm2, %v1197_v12, 0  ;;  %v1196_v17 = vpack.c.bf16 %v1092_v13, %v1089_v16  ;;  %v946_v16 = vpack.c.bf16 %v2236_v37, %v2236_v37 }
 0x3f2   : > { %1779 = vmatpush3.bf16.xpose.msra.mxu0 %v1211_v14 }
 0x3f3   : > { %1780 = vmatprep.subr.bf16.mxu0 %v1939_v2  ;;  %v1208_v19 = vsel %vm829_vm2, %v1196_v17, 0 }
 0x3fa   : > { %1781 = vmatpush3.bf16.xpose.msra.mxu0 %v1208_v19 }
 0x3fb   : > { %1782 = vmatprep.subr.bf16.mxu0 %v1939_v2 }
 0x402   : > { %1783 = vmatpush3.bf16.xpose.msra.mxu0 %v1205_v24 }
 0x403   : > { %1784 = vmatprep.subr.bf16.mxu0 %v1939_v2 }
 0x40a   : > { %1785 = vmatpush3.bf16.xpose.msra.mxu0 %v1202_v29 }
 0x411   : > { %1787 = vmatmul.mubr.msk.bf16.vlgmr.msra.gmra.mxu0 %vm829_vm2, %v1193_v33 }
 0x4d1   : > { %v1247_v36 = vpop.f32.mrf.mxu0 }
 0x4d2   : > { %v1253_v39 = vmul.f32 0.35355338, %v1247_v36 }
 0x4d3   : > { %v1788_v40 = vpop.f32.mrf.mxu0 }
 0x4d4   : > { %v1254_v41 = vsel %vm886_vm3, %v1253_v39, -inf }
 0x4d5   : > { %1255 = vmax.xlane.f32.xlu1 %v1254_v41  ;;  %v1250_v42 = vpop.f32.mrf.mxu0 }
 0x4d6   : > { %v1628_v42 = vld [vmem:[%s2351_s12] ss:$0 sm:$0xff] }
 0x4d7   : > { %v1789_v43 = vpop.f32.mrf.mxu0 }
 0x55e   : > { %v1256_v61 = vpop.xlane.xlu1 %1255 }
 0x55f   : > { %v1257_v62 = vsub.f32 %v1253_v39, %v1256_v61 }
 0x561   : > { %v1258_v63 = vmul.f32 1.442695, %v1257_v62 }
 0x563   : > { %1871 = vpow2.f32 %v1258_v63 }
 0x570   : > { %v1872_v0 = vpop.eup %1871 }
 0x571   : > { %v1260_v1 = vsel %vm886_vm3, %v1872_v0, 0.0 }
 0x572   : > { %1261 = vadd.xlane.f32.xlu1 %v1260_v1 }
 0x5fb   : > { %v1262_v28 = vpop.xlane.xlu1 %1261 }
 0x5fc   : > { %1873 = vrcp.f32 %v1262_v28 }
 0x609   : > { %v1874_v3 = vpop.eup %1873 }
 0x60a   : > { %v1264_v32 = vmul.f32 %v1874_v3, %v1872_v0 }
 0x60c   : > { %v1265_v5 = vpack.c.bf16 %v1264_v32, %v1264_v32 }
 0x60e   : > { %1799 = vmatmul.mubr.msk.bf16.vlgmr.msra.gmra.mxu1 %vm886_vm3, %v1265_v5 }
 0x60f   : > { %1803 = vmatpush3.bf16.msra.mxu1 %v1321_v38  ;;  %1804 = vmatprep.mubr.msk.bf16.mxu1 %vm1940_vm0, %v1939_v2 }
 0x610   : > { %1808 = vmatprep.subr.bf16.mxu1 %v1939_v2 }
 0x6ce   : > { %v1307_v7 = vpop.f32.mrf.mxu1 }
 0x6cf   : > { %v1313_v8 = vpack.c.bf16 %v1307_v7, %v1307_v7 }
 0x6d0   : > { %v1800_v12 = vpop.f32.mrf.mxu1 }
 0x6d1   : > { %1805 = vmatmul.mubr.msk.bf16.vlgmr.msra.gmra.mxu1 %vm829_vm2, %v1313_v8 }
 0x6d2   : > { %1809 = vmatpush3.bf16.msra.mxu1 %v1367_v9  ;;  %v1310_v13 = vpop.f32.mrf.mxu1  ;;  %1810 = vmatprep.mubr.msk.bf16.mxu1 %vm1940_vm0, %v1939_v2 }
 0x6d4   : > { %v1801_v14 = vpop.f32.mrf.mxu1 }
 0x6d9   : > { %1811 = vmatmul.mubr.msk.bf16.vlgmr.msra.gmra.mxu1 %vm829_vm2, %v946_v16 }
 0x791   : > { %v1357_v17 = vpop.f32.mrf.mxu1 }
 0x793   : > { %v1806_v18 = vpop.f32.mrf.mxu1 }
 0x795   : > { %v1360_v19 = vpop.f32.mrf.mxu1 }
 0x797   : > { %v1807_v20 = vpop.f32.mrf.mxu1 }
 0x799   : > { %v1403_v21 = vpop.f32.mrf.mxu1 }
 0x79a   : > { %v1404_v24 = vadd.f32 %v1403_v21, %v1357_v17 }
 0x79b   : > { %v1812_v25 = vpop.f32.mrf.mxu1 }
 0x79c   : > { %v1416_v26 = vadd.f32 %v1627_v23, %v1404_v24 }
 0x79d   : > { %v1406_v2 = vpop.f32.mrf.mxu1 }
 0x79e   : > { %v1417_v27 = vadd.f32 %v1416_v26, %v2136_v30 }
 0x79f   : > { %v1813_v29 = vpop.f32.mrf.mxu1 }
 0x7a0   : > { %v1418_v37 = vsel %vm580_vm1, %v1417_v27, 0.0 }
 0x7a1   : > { %1419 = vadd.xlane.f32.xlu0 %v1418_v37 }
 0x82a   : > { %v1420_v31 = vpop.xlane.xlu0 %1419 }
 0x82b   : > { %v1422_v33 = vmul.f32 0.03125, %v1420_v31 }
 0x82d   : > { %v1423_v34 = vsub.f32 %v1417_v27, %v1422_v33 }
 0x82f   : > { %v1424_v35 = vmul.f32 %v1423_v34, %v1423_v34 }
 0x831   : > { %v1425_v36 = vsel %vm580_vm1, %v1424_v35, 0.0 }
 0x832   : > { %1426 = vadd.xlane.f32.xlu1 %v1425_v36 }
 0x8bb   : > { %v1427_v39 = vpop.xlane.xlu1 %1426 }
 0x8bc   : > { %v1428_v40 = vmul.f32 0.03125, %v1427_v39 }
 0x8be   : > { %v1429_v41 = vadd.f32 1e-05, %v1428_v40 }
 0x8c0   : > { %1875 = vrsqrt.f32 %v1429_v41 }
 0x8cd   : > { %v1876_v30 = vpop.eup %1875 }
 0x8ce   : > { %v1431_v43 = vmul.f32 %v1876_v30, %v1423_v34 }
 0x8d0   : > { %v1439_v45 = vmul.f32 %v1628_v42, %v1431_v43 }
 0x8d2   : > { %v1447_v15 = vadd.f32 %v1629_v44, %v1439_v45 }
 0x8d4   : > { %1448 = vst.msk [vmem:[%s501_s22] sm:$0xff] %vm580_vm1, %v1447_v15 }
 0x8d5   : > { %1890 = shalt.err (!%p1887_p3)
}
 0x8d6   : > { %s1891_s21 = scalar_lea.hbm %s1461_s18, 128  ;;  %s1895_s28 = scalar_lea.hbm %s2353_s14, 256 }
 0x8d7   : > { %p1892_p4 = scmp.ne.s32.totalorder %s1461_s18, %s1891_s21  ;;  %p1896_p9 = scmp.lt.s32.totalorder %s1461_s18, %s2353_s14 }
 0x8d8   : > { %p1897_p10 = scmp.lt.s32.totalorder %s1895_s28, %s1891_s21 }
 0x8d9   : > { %p1893_p7 = pnand %p1892_p4, %p2055_p5 }
 0x8da   : > { %p1898_p11 = por %p1897_p10, %p1896_p9 }
 0x8db   : > { %p1894_p8 = pneg %p1893_p7 }
 0x8dd   : > { %p1899_p12 = pnand %p1898_p11, %p1894_p8 }
 0x8df   : > { %1902 = shalt.err (!%p1899_p12)
}
 0x8e0   : > { %1814 = dma.vmem_to_hbm [thread:$0]  (%p2055_p5), %s1464_s29, 128, %s1461_s18, %s1450_s0  }
 0x8e1 PF: > { %s2368_s24 = sld [smem:[#allocation5_spill]]  ;;  %p1820_p13 = scmp.ge.s32.totalorder %s1937_s16, 2 }
 0x8e3   : > { %p1817_p0 = pnand %p1820_p13, %p2059_p6 }
 0x8e5   : > { %p1818_p1 = pneg %p1817_p0 }
 0x8e7   : > { %s1475_s25 = sand.u32 1, %s2368_s24  }
 0x8e8   : > { %s1476_s26 = scalar_lea.sflag [#allocation3], %s1475_s25 }
 0x8e9   : > { %1920 = dma.done.wait (%p1818_p1), %s1476_s26, 128  }
 0x8ea   : > { %1922 = vsyncadd (%p1818_p1), %s1476_s26, 4294967168  ;;  %s2370_s16 = sld [smem:[#allocation7_spill]]  ;;  %s2373_s29 = smov %s1929_s30 }
 0x8eb   : > { %s2371_s17 = sld [smem:[#allocation6_spill]] }
 0x8ec   : > { %s2372_s15 = sld [smem:[#allocation8_spill]] }
 0x8f0   : > { %p24_p2 = scmp.ge.s32.totalorder %s2370_s16, 4  }
 0x8f1   : > { %s2374_s30 = smov %s2371_s17 }
 0x8f2   :  { %26 = sbr.rel (!%p24_p2) target bundleno = 5 (0x5), region = 127 }
 0x8f7   :  { %1481 = vsyncpa [#allocation3], 1 }
 0x8f8   :  { %1483 = vsyncpa [#allocation3 + $0x1], 1 }

// kernel: two_way_transformer.3
= control target key start
LH: loop header
LB: loop body
LE: loop exit
PB: predicated region body
PF: predicated region fallthrough
CT: control target
= control target key end

     0   :  { %s5561_s6 = smov 1   ;;  %s5562_s10 = smov 2   ;;  %s6410_s0 = inlined_call_operand.smem [shape: u32[42], index: -1, kind: input, shape index: {}] }
   0x1   :  { %s5612_s5 = sld [smem:[%s6410_s0]]   ;;  %s5563_s14 = smov 3  }
   0x2   :  { %s5617_s9 = sld [smem:[%s6410_s0 + %s5561_s6]]   ;;  %s5564_s18 = smov 4  }
   0x3   :  { %s5622_s13 = sld [smem:[%s6410_s0 + %s5562_s10]]   ;;  %s5565_s22 = smov 5  }
   0x4   :  { %s5627_s17 = sld [smem:[%s6410_s0 + %s5563_s14]]   ;;  %s5566_s26 = smov 6  }
   0x5   :  { %s5632_s21 = sld [smem:[%s6410_s0 + %s5564_s18]]   ;;  %s5567_s30 = smov 7  }
   0x6   :  { %s5637_s25 = sld [smem:[%s6410_s0 + %s5565_s22]]   ;;  %s5568_s4 = smov 8  }
   0x7   :  { %6427 = sst [smem:[#allocation2_spill]] %s5612_s5  ;;  %s5569_s10 = smov 9  }
   0x8   :  { %s5642_s29 = sld [smem:[%s6410_s0 + %s5566_s26]]   ;;  %s5570_s15 = smov 10  }
   0x9   :  { %6428 = sst [smem:[#allocation3_spill]] %s5622_s13  ;;  %s5571_s20 = smov 11  }
   0xa   :  { %s5647_s3 = sld [smem:[%s6410_s0 + %s5567_s30]]   ;;  %s5572_s26 = smov 12  }
   0xb   :  { %s5652_s8 = sld [smem:[%s6410_s0 + %s5568_s4]]   ;;  %s5573_s1 = smov 13  }
   0xc   :  { %s5657_s14 = sld [smem:[%s6410_s0 + %s5569_s10]]   ;;  %s5574_s7 = smov 14  }
   0xd   :  { %s5662_s19 = sld [smem:[%s6410_s0 + %s5570_s15]]   ;;  %s5575_s15 = smov 15  }
   0xe   :  { %s5667_s24 = sld [smem:[%s6410_s0 + %s5571_s20]]   ;;  %s5576_s22 = smov 16  }
   0xf   :  { %s5672_s30 = sld [smem:[%s6410_s0 + %s5572_s26]]   ;;  %s5577_s28 = smov 17  }
  0x10   :  { %6429 = sst [smem:[#allocation4_spill]] %s5647_s3 }
  0x11   :  { %6430 = sst [smem:[#allocation5_spill]] %s5652_s8 }
  0x12   :  { %s5677_s6 = sld [smem:[%s6410_s0 + %s5573_s1]]  }
  0x13   :  { %s5682_s12 = sld [smem:[%s6410_s0 + %s5574_s7]]   ;;  %s5578_s7 = smov 18  }
  0x14   :  { %s5687_s20 = sld [smem:[%s6410_s0 + %s5575_s15]]   ;;  %s5579_s15 = smov 19  }
  0x15   :  { %s5692_s27 = sld [smem:[%s6410_s0 + %s5576_s22]]   ;;  %s5580_s22 = smov 20  }
  0x16   :  { %s5697_s4 = sld [smem:[%s6410_s0 + %s5577_s28]]   ;;  %s5581_s28 = smov 21  }
  0x17   :  { %s5707_s13 = sld [smem:[%s6410_s0 + %s5579_s15]]   ;;  %s5583_s15 = smov 23  }
  0x18   :  { %6431 = sst [smem:[#allocation6_spill]] %s5677_s6 }
  0x19   :  { %s5702_s6 = sld [smem:[%s6410_s0 + %s5578_s7]]   ;;  %s5582_s7 = smov 22  }
  0x1b   :  { %6432 = sst [smem:[#allocation7_spill]] %s5692_s27 }
  0x1c   :  { %6433 = sst [smem:[#allocation8_spill]] %s5697_s4 }
  0x1d   :  { %6435 = sst [smem:[#allocation10_spill]] %s5707_s13 }
  0x1e   :  { %s5712_s27 = sld [smem:[%s6410_s0 + %s5580_s22]]   ;;  %s5584_s22 = smov 24  }
  0x1f   :  { %6434 = sst [smem:[#allocation9_spill]] %s5702_s6 }
  0x20   :  { %s5717_s4 = sld [smem:[%s6410_s0 + %s5581_s28]]   ;;  %s5585_s28 = smov 25  }
  0x21   :  { %s5722_s6 = sld [smem:[%s6410_s0 + %s5582_s7]]   ;;  %s5586_s7 = smov 26  }
  0x22   :  { %s5727_s13 = sld [smem:[%s6410_s0 + %s5583_s15]]   ;;  %s5587_s15 = smov 27  }
  0x24   :  { %6436 = sst [smem:[#allocation11_spill]] %s5712_s27 }
  0x25   :  { %s5732_s27 = sld [smem:[%s6410_s0 + %s5584_s22]]   ;;  %s5588_s22 = smov 28  }
  0x26   :  { %6437 = sst [smem:[#allocation12_spill]] %s5717_s4 }
  0x27   :  { %6438 = sst [smem:[#allocation13_spill]] %s5722_s6 }
  0x28   :  { %6439 = sst [smem:[#allocation14_spill]] %s5727_s13 }
  0x29   :  { %s5737_s4 = sld [smem:[%s6410_s0 + %s5585_s28]]   ;;  %s5589_s28 = smov 29  }
  0x2a   :  { %s5742_s6 = sld [smem:[%s6410_s0 + %s5586_s7]]   ;;  %s5590_s7 = smov 30  }
  0x2b   :  { %6440 = sst [smem:[#allocation15_spill]] %s5732_s27 }
  0x2c   :  { %s5747_s13 = sld [smem:[%s6410_s0 + %s5587_s15]]   ;;  %s5591_s15 = smov 31  }
  0x2d   :  { %s5752_s27 = sld [smem:[%s6410_s0 + %s5588_s22]]   ;;  %s5592_s22 = smov 32  }
  0x2f   :  { %6441 = sst [smem:[#allocation16_spill]] %s5737_s4 }
  0x30   :  { %6442 = sst [smem:[#allocation17_spill]] %s5742_s6 }
  0x31   :  { %s5757_s4 = sld [smem:[%s6410_s0 + %s5589_s28]]   ;;  %s5593_s28 = smov 33  }
  0x32   :  { %6443 = sst [smem:[#allocation18_spill]] %s5747_s13 }
  0x33   :  { %6444 = sst [smem:[#allocation19_spill]] %s5752_s27 }
  0x34   :  { %s5762_s6 = sld [smem:[%s6410_s0 + %s5590_s7]]   ;;  %s5594_s7 = smov 34  }
  0x35   :  { %s5767_s13 = sld [smem:[%s6410_s0 + %s5591_s15]]   ;;  %s5595_s15 = smov 35  }
  0x36   :  { %s5772_s27 = sld [smem:[%s6410_s0 + %s5592_s22]]   ;;  %s5596_s22 = smov 36  }
  0x37   :  { %6445 = sst [smem:[#allocation20_spill]] %s5757_s4 }
  0x38   :  { %s5777_s4 = sld [smem:[%s6410_s0 + %s5593_s28]]   ;;  %s5597_s28 = smov 37  }
  0x3a   :  { %6446 = sst [smem:[#allocation21_spill]] %s5762_s6 }
  0x3b   :  { %6447 = sst [smem:[#allocation22_spill]] %s5767_s13 }
  0x3c   :  { %6448 = sst [smem:[#allocation23_spill]] %s5772_s27 }
  0x3d   :  { %s5782_s6 = sld [smem:[%s6410_s0 + %s5594_s7]]   ;;  %s5598_s7 = smov 38  }
  0x3e   :  { %6449 = sst [smem:[#allocation24_spill]] %s5777_s4 }
  0x3f   :  { %s5787_s13 = sld [smem:[%s6410_s0 + %s5595_s15]]   ;;  %s5599_s15 = smov 39  }
  0x40   :  { %s5792_s27 = sld [smem:[%s6410_s0 + %s5596_s22]]   ;;  %s5600_s22 = smov 40  }
  0x41   :  { %s5797_s4 = sld [smem:[%s6410_s0 + %s5597_s28]]   ;;  %s5601_s28 = smov 41  }
  0x43   :  { %6450 = sst [smem:[#allocation25_spill]] %s5782_s6 }
  0x44   :  { %s5802_s6 = sld [smem:[%s6410_s0 + %s5598_s7]]   ;;  %s5819_s7 = smov 0  }
  0x45   :  { %6451 = sst [smem:[#allocation26_spill]] %s5787_s13 }
  0x46   :  { %6452 = sst [smem:[#allocation27_spill]] %s5792_s27 }
  0x47   :  { %6453 = sst [smem:[#allocation28_spill]] %s5797_s4 }
  0x48   :  { %s5807_s13 = sld [smem:[%s6410_s0 + %s5599_s15]]  }
  0x49   :  { %s5812_s27 = sld [smem:[%s6410_s0 + %s5600_s22]]  }
  0x4a   :  { %s5817_s4 = sld [smem:[%s6410_s0 + %s5601_s28]]  }
  0x4b LB: > { %s6454_s8 = sld [smem:[#allocation5_spill]]  ;;  %s4635_s10 = sadd.s32 4294967295, %s5559_s7   ;;  %s5559_s7 = sphi %s5819_s7, %s94_s7  }
  0x4c   : > { %s6455_s3 = sld [smem:[#allocation4_spill]]  ;;  %p4639_p0 = scmp.ge.s32.totalorder %s5559_s7, 1 }
  0x4d   : > { %p1160_p1 = scmp.lt.s32.totalorder %s5559_s7, 3 }
  0x4f   : > { %p1161_p2 = pnand %p4639_p0, %p1160_p1 }
  0x50   : > { %s6456_s5 = sld [smem:[#allocation2_spill]] (!%p1161_p2)  ;;  %p1277_p3 = scmp.lt.s32.totalorder (!%p1161_p2), %s4635_s10, 1 }
  0x51   : > { %1164 = sbr.rel (%p1161_p2) target bundleno = 7321 (0x1c99), region = 180  ;;  %s6457_s22 = sld [smem:[#allocation23_spill]] (!%p1161_p2) }
  0x52   : > { %s6458_s23 = sld [smem:[#allocation3_spill]] (!%p1161_p2) }
  0x53   : > { %s6459_s26 = sld [smem:[#allocation24_spill]] (!%p1161_p2) }
  0x54   : > { %s6460_s28 = sld [smem:[#allocation6_spill]] (!%p1161_p2) }
  0x55   : > { %s6461_s2 = sld [smem:[#allocation7_spill]] (!%p1161_p2) }
  0x56   : > { %v5399_v0 = vld [vmem:[%s5642_s29 + $0x8] sm:$0xff]   ;;  %v5602_v1 = vmov 0.0   ;;  %v5401_v3 = vld [vmem:[%s5642_s29] sm:$0xff]   ;;  %vm5603_vm0 = vmmov 0   ;;  %s6482_s10 = smov (!%p1277_p3, %s4635_s10), 1  ;;  %vm1347_vm1 = vcmask 261120  }
  0x57   : > { %5006 = vmatprep.subr.bf16.mxu1 %v5602_v1  ;;  %4998 = vmatprep.subr.bf16.mxu0 %v5602_v1  ;;  %v5400_v2 = vld [vmem:[%s5632_s21 + $0x8] sm:$0xff]   ;;  %v5402_v4 = vld [vmem:[%s5632_s21] sm:$0xff]   ;;  %s5842_s0 = sshll.u32 %s6482_s10, 3  ;;  %vm1519_vm2 = vcmask 130048   ;;  %vm1567_vm3 = vcmask 64512   ;;  %vm1584_vm4 = vcmask 1043456  }
  0x58   : > { %5007 = vmatpush3.bf16.msra.mxu1 %v5399_v0  ;;  %5010 = vmatprep.mubr.msk.bf16.mxu1 %vm5603_vm0, %v5602_v1  ;;  %s1280_s11 = scalar_lea.vmem %s6456_s5, %s5842_s0  ;;  %v4653_v7 = vld [vmem:[%s6455_s3] ss:$0 sm:$0xff]  ;;  %v5403_v22 = vld [vmem:[%s6454_s8 + $0x8] sm:$0xff]   ;;  %v5406_v43 = vld [vmem:[%s5632_s21 + $0x18] sm:$0xff]   ;;  %s5930_s15 = sshll.u32 %s6482_s10, 6  ;;  %vm2419_vm5 = vcmask 523264  }
  0x59   : > { %4999 = vmatpush3.bf16.msra.mxu0 %v5400_v2  ;;  %5008 = vmatprep.subr.bf16.mxu1 %v5602_v1  ;;  %v1305_v5 = vld [vmem:[%s1280_s11] sm:$0xff]  ;;  %v5408_v44 = vld [vmem:[%s5632_s21 + $0x10] sm:$0xff]   ;;  %v5405_v48 = vld [vmem:[%s5642_s29 + $0x18] sm:$0xff]   ;;  %s5934_s16 = scalar_lea.vmem %s5617_s9, %s5930_s15  ;;  %s1294_s18 = scalar_lea.vmem %s5627_s17, %s5930_s15 }
  0x5a   : > { %5000 = vmatprep.subr.bf16.mxu0 %v5602_v1  ;;  %5002 = vmatprep.mubr.msk.bf16.mxu0 %vm5603_vm0, %v5602_v1  ;;  %v5848_v6 = vpack.c.bf16 %v1305_v5, %v1305_v5  ;;  %v4649_v11 = vld [vmem:[%s5637_s25] ss:$0 sm:$0xff]  ;;  %v5407_v50 = vld [vmem:[%s5642_s29 + $0x10] sm:$0xff]   ;;  %v4677_v59 = vld [vmem:[%s6455_s3 + $0x1] ss:$0 sm:$0xff]  ;;  %s1289_s1 = scalar_lea.vmem %s6458_s23, %s5842_s0  ;;  %s6462_s10 = sld [smem:[#allocation8_spill]] }
  0x5b   : > { %v5404_v23 = vld [vmem:[%s6454_s8] sm:$0xff]   ;;  %s6463_s11 = sld [smem:[#allocation9_spill]] }
  0x5c   : > { %5009 = vmatpush3.bf16.msra.mxu1 %v5401_v3  ;;  %v4657_v35 = vld [vmem:[%s5657_s14] ss:$0 sm:$0xff]  ;;  %v4668_v62 = vld [vmem:[%s5637_s25 + $0x1] ss:$0 sm:$0xff]  ;;  %s6466_s23 = sld [smem:[#allocation13_spill]] }
  0x5d   : > { %5001 = vmatpush3.bf16.msra.mxu0 %v5402_v4  ;;  %5022 = vmatprep.subr.bf16.mxu1 %v5602_v1  ;;  %s6475_s3 = sld [smem:[#allocation28_spill]] }
  0x5e   : > { %5014 = vmatprep.subr.bf16.mxu0 %v5602_v1  ;;  %s6476_s5 = sld [smem:[#allocation16_spill]] }
  0x5f   : > { %5011 = vmatmul.mubr.msk.bf16.vlgmr.msra.gmra.mxu1 %vm1347_vm1, %v5848_v6 }
  0x60   : > { %5003 = vmatmul.mubr.msk.bf16.vlgmr.msra.gmra.mxu0 %vm1347_vm1, %v5848_v6  ;;  %5024 = vmatprep.mubr.msk.bf16.mxu1 %vm5603_vm0, %v5602_v1 }
  0x61   : > { %5018 = vmatprep.mubr.msk.bf16.mxu0 %vm5603_vm0, %v5602_v1  ;;  %5015 = vmatpush3.bf16.msra.mxu0 %v5403_v22 }
  0x62   : > { %5016 = vmatprep.subr.bf16.mxu0 %v5602_v1 }
  0x65   : > { %5017 = vmatpush3.bf16.msra.mxu0 %v5404_v23 }
  0x66   : > { %5028 = vmatprep.subr.bf16.mxu0 %v5602_v1 }
  0x68   : > { %5019 = vmatmul.mubr.msk.bf16.vlgmr.msra.gmra.mxu0 %vm1347_vm1, %v5848_v6 }
  0x69   : > { %5030 = vmatprep.mubr.msk.bf16.mxu0 %vm5603_vm0, %v5602_v1 }
 0x11f   : > { %v1448_v8 = vpop.f32.mrf.mxu1 }
 0x120   : > { %v1385_v9 = vpop.f32.mrf.mxu0  ;;  %v1449_v10 = vadd.f32 %v4653_v7, %v1448_v8  ;;  %v5409_v8 = vld [vmem:[%s6454_s8 + $0x18] sm:$0xff]  }
 0x121   : > { %v5012_v12 = vpop.f32.mrf.mxu1  ;;  %v1386_v18 = vadd.f32 %v4649_v11, %v1385_v9  ;;  %v5410_v9 = vld [vmem:[%s6454_s8 + $0x10] sm:$0xff]   ;;  %s1298_s8 = scalar_lea.vmem %s5812_s27, %s5842_s0  ;;  %s6480_s0 = sld [smem:[#allocation22_spill]] }
 0x122   : > { %v5004_v13 = vpop.f32.mrf.mxu0  ;;  %v1518_v14 = vpack.c.bf16 %v1449_v10, %v1449_v10 }
 0x123   : > { %v1451_v15 = vpop.f32.mrf.mxu1  ;;  %v1517_v21 = vpack.c.bf16 %v1386_v18, %v1386_v18 }
 0x124   : > { %v1388_v16 = vpop.f32.mrf.mxu0  ;;  %v1524_v17 = vsel %vm1519_vm2, %v1518_v14, 0 }
 0x125   : > { %v5013_v19 = vpop.f32.mrf.mxu1  ;;  %5023 = vmatpush3.bf16.xpose.msra.mxu1 %v1524_v17 }
 0x126   : > { %v5005_v20 = vpop.f32.mrf.mxu0  ;;  %5034 = vmatprep.subr.bf16.mxu1 %v5602_v1 }
 0x128   : > { %v1511_v36 = vpop.f32.mrf.mxu0 }
 0x129   : > { %v1512_v37 = vadd.f32 %v4657_v35, %v1511_v36 }
 0x12a   : > { %v5020_v38 = vpop.f32.mrf.mxu0 }
 0x12b   : > { %v1580_v39 = vpack.c.bf16 %v1512_v37, %v1512_v37 }
 0x12c   : > { %5025 = vmatmul.mubr.msk.bf16.vlgmr.msra.gmra.mxu1 %vm1519_vm2, %v1517_v21  ;;  %v1514_v40 = vpop.f32.mrf.mxu0 }
 0x12d   : > { %5038 = vmatprep.mubr.msk.bf16.mxu1 %vm5603_vm0, %v5602_v1  ;;  %v1586_v41 = vsel %vm1584_vm4, %v1580_v39, 0  ;;  %5035 = vmatpush3.bf16.msra.mxu1 %v5406_v43 }
 0x12e   : > { %v5021_v42 = vpop.f32.mrf.mxu0  ;;  %5029 = vmatpush3.bf16.msra.mxu0 %v1586_v41  ;;  %5036 = vmatprep.subr.bf16.mxu1 %v5602_v1 }
 0x12f   : > { %5042 = vmatprep.subr.bf16.mxu0 %v5602_v1 }
 0x131   : > { %5037 = vmatpush3.bf16.msra.mxu1 %v5408_v44 }
 0x132   : > { %5050 = vmatprep.subr.bf16.mxu1 %v5602_v1 }
 0x134   : > { %5039 = vmatmul.mubr.msk.bf16.vlgmr.msra.gmra.mxu1 %vm1347_vm1, %v5848_v6 }
 0x135   : > { %5054 = vmatprep.mubr.msk.bf16.mxu1 %vm5603_vm0, %v5602_v1  ;;  %5051 = vmatpush3.bf16.msra.mxu1 %v5409_v8  ;;  %v1320_v8 = vld [vmem:[%s1294_s18 + $0x28] sm:$0xff] }
 0x136   : > { %5052 = vmatprep.subr.bf16.mxu1 %v5602_v1 }
 0x139   : > { %5053 = vmatpush3.bf16.msra.mxu1 %v5410_v9 }
 0x13a   : > { %5064 = vmatprep.subr.bf16.mxu1 %v5602_v1 }
 0x13c   : > { %5055 = vmatmul.mubr.msk.bf16.vlgmr.msra.gmra.mxu1 %vm1347_vm1, %v5848_v6 }
 0x13d   : > { %5066 = vmatprep.mubr.msk.bf16.mxu1 %vm5603_vm0, %v5602_v1 }
 0x1ec   : > { %v1560_v24 = vpop.f32.mrf.mxu1 }
 0x1ed   : > { %v1566_v25 = vmul.f32 0.25, %v1560_v24 }
 0x1ee   : > { %v5026_v26 = vpop.f32.mrf.mxu1 }
 0x1ef   : > { %v1568_v27 = vsel %vm1567_vm3, %v1566_v25, -inf }
 0x1f0   : > { %1569 = vmax.xlane.f32.xlu0 %v1568_v27  ;;  %v1563_v28 = vpop.f32.mrf.mxu1 }
 0x1f2   : > { %v5027_v29 = vpop.f32.mrf.mxu1 }
 0x1f4   : > { %v1690_v51 = vpop.f32.mrf.mxu1 }
 0x1f5   : > { %v1691_v4 = vadd.f32 %v4668_v62, %v1690_v51  ;;  %v1317_v62 = vld [vmem:[%s1294_s18 + $0x10] sm:$0xff] }
 0x1f6   : > { %v5040_v52 = vpop.f32.mrf.mxu1 }
 0x1f7   : > { %v1826_v7 = vpack.c.bf16 %v1691_v4, %v1691_v4  ;;  %v5413_v52 = vld [vmem:[%s5682_s12 + $0x8] sm:$0xff]  }
 0x1f8   : > { %v1693_v53 = vpop.f32.mrf.mxu1 }
 0x1f9   : > { %v5414_v53 = vld [vmem:[%s5682_s12] sm:$0xff]  }
 0x1fa   : > { %v5041_v54 = vpop.f32.mrf.mxu1 }
 0x1fb   : > { %v5941_v54 = vld [vmem:[%s5934_s16] sm:$0xff] }
 0x1fc   : > { %v1820_v21 = vpop.f32.mrf.mxu1 }
 0x1fe   : > { %v5056_v23 = vpop.f32.mrf.mxu1 }
 0x279   : > { %v1570_v30 = vpop.xlane.xlu0 %1569 }
 0x27a   : > { %v1571_v31 = vsub.f32 %v1566_v25, %v1570_v30  ;;  %v1823_v25 = vpop.f32.mrf.mxu1 }
 0x27b   : > { %v5416_v25 = vld [vmem:[%s5672_s30] sm:$0xff]  }
 0x27c   : > { %v1572_v32 = vmul.f32 1.442695, %v1571_v31  ;;  %v5057_v27 = vpop.f32.mrf.mxu1  ;;  %v5411_v31 = vld [vmem:[%s5662_s19] sm:$0xff]  }
 0x27e   : > { %5443 = vpow2.f32 %v1572_v32 }
 0x28b   : > { %v5444_v33 = vpop.eup %5443 }
 0x28c   : > { %v1574_v34 = vsel %vm1567_vm3, %v5444_v33, 0.0 }
 0x28d   : > { %1575 = vadd.xlane.f32.xlu0 %v1574_v34  ;;  %v5412_v34 = vld [vmem:[%s5662_s19 + $0x8] sm:$0xff]  }
 0x316   : > { %v1576_v45 = vpop.xlane.xlu0 %1575 }
 0x317   : > { %5445 = vrcp.f32 %v1576_v45  ;;  %v4698_v45 = vld [vmem:[%s5667_s24] ss:$0 sm:$0xff] }
 0x324   : > { %v5446_v46 = vpop.eup %5445 }
 0x325   : > { %v1578_v47 = vmul.f32 %v5446_v46, %v5444_v33 }
 0x327   : > { %v1579_v49 = vpack.c.bf16 %v1578_v47, %v1578_v47 }
 0x329   : > { %5031 = vmatmul.mubr.msk.bf16.vlgmr.msra.gmra.mxu0 %vm1567_vm3, %v1579_v49 }
 0x32a   : > { %5043 = vmatpush3.bf16.msra.mxu0 %v5405_v48  ;;  %5046 = vmatprep.mubr.msk.bf16.mxu0 %vm5603_vm0, %v5602_v1 }
 0x32b   : > { %5044 = vmatprep.subr.bf16.mxu0 %v5602_v1 }
 0x32e   : > { %5045 = vmatpush3.bf16.msra.mxu0 %v5407_v50 }
 0x32f   : > { %5058 = vmatprep.subr.bf16.mxu0 %v5602_v1 }
 0x331   : > { %5047 = vmatmul.mubr.msk.bf16.vlgmr.msra.gmra.mxu0 %vm1347_vm1, %v5848_v6  ;;  %v4686_v6 = vld [vmem:[%s5657_s14 + $0x1] ss:$0 sm:$0xff] }
 0x332   : > { %5060 = vmatprep.mubr.msk.bf16.mxu0 %vm5603_vm0, %v5602_v1  ;;  %v1821_v22 = vadd.f32 %v4686_v6, %v1820_v21 }
 0x334   : > { %v1887_v24 = vpack.c.bf16 %v1821_v22, %v1821_v22 }
 0x336   : > { %v1892_v26 = vsel %vm1584_vm4, %v1887_v24, 0  ;;  %v5415_v24 = vld [vmem:[%s5672_s30 + $0x8] sm:$0xff]  }
 0x337   : > { %5065 = vmatpush3.bf16.msra.mxu1 %v1892_v26 }
 0x338   : > { %5076 = vmatprep.subr.bf16.mxu1 %v5602_v1 }
 0x3e9   : > { %v1622_v55 = vpop.f32.mrf.mxu0 }
 0x3ea   : > { %v1628_v33 = vpack.c.bf16 %v1622_v55, %v1622_v55  ;;  %v5944_v55 = vld [vmem:[%s5934_s16 + $0x8] sm:$0xff] }
 0x3eb   : > { %v5032_v56 = vpop.f32.mrf.mxu0 }
 0x3ec   : > { %v1315_v56 = vld [vmem:[%s1294_s18] sm:$0xff] }
 0x3ed   : > { %v1625_v57 = vpop.f32.mrf.mxu0 }
 0x3ee   : > { %v1316_v57 = vld [vmem:[%s1294_s18 + $0x8] sm:$0xff] }
 0x3ef   : > { %v5033_v58 = vpop.f32.mrf.mxu0 }
 0x3f0   : > { %v2075_v58 = vadd.f32 %v1315_v56, %v5941_v54 }
 0x3f1   : > { %v1755_v60 = vpop.f32.mrf.mxu0 }
 0x3f2   : > { %v1756_v61 = vadd.f32 %v4677_v59, %v1755_v60  ;;  %v2076_v59 = vadd.f32 %v1316_v57, %v5944_v55  ;;  %v5949_v60 = vld [vmem:[%s5934_s16 + $0x10] sm:$0xff]  ;;  %v4699_v57 = vld [vmem:[%s6457_s22] ss:$0 sm:$0xff]  ;;  %s6465_s22 = sld [smem:[#allocation11_spill]] }
 0x3f3   : > { %v5048_v63 = vpop.f32.mrf.mxu0 }
 0x3f4   : > { %v1827_v0 = vpack.c.bf16 %v1756_v61, %v1756_v61  ;;  %v5952_v61 = vld [vmem:[%s5934_s16 + $0x18] sm:$0xff]  ;;  %v5961_v4 = vpack.c.bf16 %v2076_v59, %v2075_v58  ;;  %v4700_v59 = vld [vmem:[%s6459_s26] ss:$0 sm:$0xff]  ;;  %s6467_s26 = sld [smem:[#allocation25_spill]] }
 0x3f5   : > { %v1758_v2 = vpop.f32.mrf.mxu0  ;;  %v1318_v63 = vld [vmem:[%s1294_s18 + $0x18] sm:$0xff] }
 0x3f6   : > { %v1832_v3 = vsel %vm1519_vm2, %v1827_v0, 0  ;;  %v2077_v0 = vadd.f32 %v1317_v62, %v5949_v60  ;;  %v5956_v2 = vld [vmem:[%s5934_s16 + $0x20] sm:$0xff] }
 0x3f7   : > { %v5049_v5 = vpop.f32.mrf.mxu0  ;;  %5059 = vmatpush3.bf16.xpose.msra.mxu0 %v1832_v3  ;;  %v5959_v3 = vld [vmem:[%s5934_s16 + $0x28] sm:$0xff] }
 0x3f8   : > { %5070 = vmatprep.subr.bf16.mxu0 %v5602_v1  ;;  %v2078_v5 = vadd.f32 %v1318_v63, %v5952_v61  ;;  %v6007_v63 = vld [vmem:[%s1289_s1] sm:$0xff]  ;;  %s6468_s1 = sld [smem:[#allocation26_spill]] }
 0x3fe   : > { %5061 = vmatmul.mubr.msk.bf16.vlgmr.msra.gmra.mxu0 %vm1519_vm2, %v1826_v7  ;;  %v1319_v7 = vld [vmem:[%s1294_s18 + $0x20] sm:$0xff] }
 0x3ff   : > { %5072 = vmatprep.mubr.msk.bf16.mxu0 %vm5603_vm0, %v5602_v1  ;;  %5071 = vmatpush3.bf16.msra.mxu0 %v5412_v34  ;;  %v2079_v9 = vadd.f32 %v1319_v7, %v5956_v2 }
 0x400   : > { %5082 = vmatprep.subr.bf16.mxu0 %v5602_v1 }
 0x4be   : > { %v1868_v10 = vpop.f32.mrf.mxu0 }
 0x4bf   : > { %v1874_v11 = vmul.f32 0.25, %v1868_v10  ;;  %v2080_v10 = vadd.f32 %v1320_v8, %v5959_v3  ;;  %v4701_v8 = vld [vmem:[%s6460_s28] ss:$0 sm:$0xff] }
 0x4c0   : > { %v5062_v12 = vpop.f32.mrf.mxu0 }
 0x4c1   : > { %v1875_v13 = vsel %vm1567_vm3, %v1874_v11, -inf  ;;  %v5971_v12 = vld [vmem:[%s5934_s16 + $0x30] sm:$0xff] }
 0x4c2   : > { %1876 = vmax.xlane.f32.xlu1 %v1875_v13  ;;  %v1871_v14 = vpop.f32.mrf.mxu0  ;;  %v5973_v13 = vpack.c.bf16 %v2080_v10, %v2079_v9 }
 0x4c3   : > { %v5976_v14 = vld [vmem:[%s5934_s16 + $0x38] sm:$0xff] }
 0x4c4   : > { %v5063_v15 = vpop.f32.mrf.mxu0 }
 0x4c5   : > { %v1321_v15 = vld [vmem:[%s1294_s18 + $0x30] sm:$0xff] }
 0x54b   : > { %v1877_v16 = vpop.xlane.xlu1 %1876 }
 0x54c   : > { %v1878_v17 = vsub.f32 %v1874_v11, %v1877_v16  ;;  %v5968_v11 = vpack.c.bf16 %v2078_v5, %v2077_v0  ;;  %v1322_v16 = vld [vmem:[%s1294_s18 + $0x38] sm:$0xff]  ;;  %s6464_s18 = sld [smem:[#allocation10_spill]] }
 0x54e   : > { %v1879_v18 = vmul.f32 1.442695, %v1878_v17  ;;  %v2081_v17 = vadd.f32 %v1321_v15, %v5971_v12 }
 0x550   : > { %5447 = vpow2.f32 %v1879_v18  ;;  %v2082_v18 = vadd.f32 %v1322_v16, %v5976_v14 }
 0x55d   : > { %v5448_v19 = vpop.eup %5447 }
 0x55e   : > { %v1881_v20 = vsel %vm1567_vm3, %v5448_v19, 0.0 }
 0x55f   : > { %1882 = vadd.xlane.f32.xlu1 %v1881_v20 }
 0x5e8   : > { %v1883_v28 = vpop.xlane.xlu1 %1882 }
 0x5e9   : > { %5449 = vrcp.f32 %v1883_v28 }
 0x5f6   : > { %v5450_v29 = vpop.eup %5449 }
 0x5f7   : > { %v1885_v30 = vmul.f32 %v5450_v29, %v5448_v19  ;;  %v5985_v19 = vpack.c.bf16 %v2082_v18, %v2081_v17 }
 0x5f9   : > { %v1886_v32 = vpack.c.bf16 %v1885_v30, %v1885_v30  ;;  %v4705_v30 = vld [vmem:[%s5687_s20] ss:$0 sm:$0xff] }
 0x5fb   : > { %5067 = vmatmul.mubr.msk.bf16.vlgmr.msra.gmra.mxu1 %vm1567_vm3, %v1886_v32 }
 0x5fc   : > { %5077 = vmatpush3.bf16.msra.mxu1 %v5411_v31  ;;  %5078 = vmatprep.mubr.msk.bf16.mxu1 %vm5603_vm0, %v5602_v1 }
 0x5fd   : > { %5090 = vmatprep.subr.bf16.mxu1 %v5413_v52 }
 0x603   : > { %5079 = vmatmul.mubr.msk.bf16.vlgmr.msra.gmra.mxu1 %vm1519_vm2, %v1628_v33 }
 0x604   : > { %5091 = vmatpush3.bf16.msra.mxu1 %v5413_v52  ;;  %5094 = vmatprep.mubr.msk.bf16.mxu1 %vm1347_vm1, %v5961_v4 }
 0x605   : > { %5092 = vmatprep.subr.bf16.mxu1 %v5414_v53 }
 0x608   : > { %5093 = vmatpush3.bf16.msra.mxu1 %v5414_v53 }
 0x609   : > { %5114 = vmatprep.subr.bf16.mxu1 %v5602_v1 }
 0x60b   : > { %5095 = vmatmul.mubr.msk.bf16.vlgmr.msra.gmra.mxu1 %vm1347_vm1, %v5968_v11 }
 0x60c   : > { %5098 = vmatprep.mubr.msk.bf16.mxu1 %vm1347_vm1, %v5973_v13 }
 0x613   : > { %5099 = vmatmul.mubr.msk.bf16.gmra.mxu1 %vm1347_vm1, %v5985_v19 }
 0x614   : > { %5122 = vmatprep.mubr.msk.bf16.mxu1 %vm5603_vm0, %v5602_v1 }
 0x6bb   : > { %v1928_v35 = vpop.f32.mrf.mxu1 }
 0x6bc   : > { %v1934_v36 = vpack.c.bf16 %v1928_v35, %v1928_v35 }
 0x6bd   : > { %v5068_v37 = vpop.f32.mrf.mxu1 }
 0x6be   : > { %5073 = vmatmul.mubr.msk.bf16.vlgmr.msra.gmra.mxu0 %vm1519_vm2, %v1934_v36 }
 0x6bf   : > { %v1931_v38 = vpop.f32.mrf.mxu1  ;;  %5086 = vmatprep.mubr.msk.bf16.mxu0 %vm5603_vm0, %v5602_v1  ;;  %5083 = vmatpush3.bf16.msra.mxu0 %v5415_v24 }
 0x6c0   : > { %5084 = vmatprep.subr.bf16.mxu0 %v5602_v1 }
 0x6c1   : > { %v5069_v39 = vpop.f32.mrf.mxu1 }
 0x6c3   : > { %v2030_v40 = vpop.f32.mrf.mxu1  ;;  %5085 = vmatpush3.bf16.msra.mxu0 %v5416_v25 }
 0x6c5   : > { %v5080_v41 = vpop.f32.mrf.mxu1 }
 0x6c7   : > { %v2033_v42 = vpop.f32.mrf.mxu1 }
 0x6c9   : > { %v5081_v43 = vpop.f32.mrf.mxu1 }
 0x6cb   : > { %v5096_v26 = vpop.f32.mrf.mxu1 }
 0x6cc   : > { %v2236_v42 = vadd.f32 %v5096_v26, %v4705_v30 }
 0x6cd   : > { %v2227_v27 = vpop.f32.mrf.mxu1 }
 0x6cf   : > { %v5097_v28 = vpop.f32.mrf.mxu1 }
 0x6d0   : > { %v2239_v43 = vadd.f32 %v5097_v28, %v4705_v30 }
 0x6d1   : > { %v2230_v29 = vpop.f32.mrf.mxu1 }
 0x6d3   : > { %v5100_v31 = vpop.f32.mrf.mxu1 }
 0x6d4   : > { %v2252_v33 = vadd.f32 %v5100_v31, %v4705_v30 }
 0x6d5   : > { %v2243_v32 = vpop.f32.mrf.mxu1 }
 0x6d6   : > { %v2244_v37 = vadd.f32 %v4705_v30, %v2243_v32 }
 0x6d7   : > { %v5101_v34 = vpop.f32.mrf.mxu1 }
 0x6d8   : > { %v2255_v35 = vadd.f32 %v5101_v34, %v4705_v30 }
 0x6d9   : > { %v2246_v36 = vpop.f32.mrf.mxu1 }
 0x6da   : > { %v2362_v38 = vpack.c.bf16 %v2255_v35, %v2252_v33  ;;  %v2247_v39 = vadd.f32 %v4705_v30, %v2246_v36 }
 0x6dc   : > { %v2361_v41 = vpack.c.bf16 %v2247_v39, %v2244_v37 }
 0x77e   : > { %v1981_v44 = vpop.f32.mrf.mxu0 }
 0x77f   : > { %v2031_v46 = vadd.f32 %v2030_v40, %v1981_v44  ;;  %v2376_v40 = vsel %vm1567_vm3, %v2362_v38, 0  ;;  %v2373_v44 = vsel %vm1567_vm3, %v2361_v41, 0 }
 0x780   : > { %v5074_v47 = vpop.f32.mrf.mxu0  ;;  %5115 = vmatpush3.bf16.xpose.msra.mxu1 %v2376_v40 }
 0x781   : > { %v2043_v48 = vadd.f32 %v4698_v45, %v2031_v46  ;;  %5116 = vmatprep.subr.bf16.mxu1 %v5602_v1  ;;  %v2360_v45 = vpack.c.bf16 %v2239_v43, %v2236_v42  ;;  %v2228_v46 = vadd.f32 %v4705_v30, %v2227_v27  ;;  %v2231_v47 = vadd.f32 %v4705_v30, %v2230_v29 }
 0x782   : > { %v1984_v49 = vpop.f32.mrf.mxu0 }
 0x783   : > { %v2044_v50 = vsel %vm1347_vm1, %v2043_v48, 0.0  ;;  %v2359_v49 = vpack.c.bf16 %v2231_v47, %v2228_v46 }
 0x784   : > { %2045 = vadd.xlane.f32.xlu0 %v2044_v50  ;;  %v5075_v51 = vpop.f32.mrf.mxu0 }
 0x785   : > { %v2367_v50 = vsel %vm1567_vm3, %v2359_v49, 0 }
 0x788   : > { %5117 = vmatpush3.bf16.xpose.msra.mxu1 %v2373_v44 }
 0x789   : > { %5118 = vmatprep.subr.bf16.mxu1 %v5602_v1 }
 0x80d   : > { %v2046_v20 = vpop.xlane.xlu0 %2045 }
 0x80e   : > { %v2048_v6 = vmul.f32 0.03125, %v2046_v20  ;;  %v5417_v20 = vld [vmem:[%s6461_s2 + $0x8] sm:$0xff]  }
 0x80f   : > { %5102 = vmatprep.subr.bf16.mxu0 %v5417_v20 }
 0x810   : > { %v2049_v21 = vsub.f32 %v2043_v48, %v2048_v6  ;;  %v2370_v48 = vsel %vm1567_vm3, %v2360_v45, 0  ;;  %v5418_v6 = vld [vmem:[%s6461_s2] sm:$0xff]  }
 0x811   : > { %5119 = vmatpush3.bf16.xpose.msra.mxu1 %v2370_v48 }
 0x812   : > { %v2050_v22 = vmul.f32 %v2049_v21, %v2049_v21  ;;  %5120 = vmatprep.subr.bf16.mxu1 %v5602_v1 }
 0x814   : > { %v2051_v23 = vsel %vm1347_vm1, %v2050_v22, 0.0  ;;  %v6027_v22 = vpack.c.bf16 %v5952_v61, %v5949_v60 }
 0x815   : > { %2052 = vadd.xlane.f32.xlu1 %v2051_v23  ;;  %v6031_v23 = vpack.c.bf16 %v5959_v3, %v5956_v2 }
 0x819   : > { %5121 = vmatpush3.bf16.xpose.msra.mxu1 %v2367_v50 }
 0x89e   : > { %v2053_v51 = vpop.xlane.xlu1 %2052 }
 0x89f   : > { %v2054_v52 = vmul.f32 0.03125, %v2053_v51 }
 0x8a1   : > { %v2055_v53 = vadd.f32 1e-05, %v2054_v52  ;;  %v5419_v52 = vld [vmem:[%s5672_s30 + $0x18] sm:$0xff]  }
 0x8a3   : > { %5451 = vrsqrt.f32 %v2055_v53 }
 0x8b0   : > { %v5452_v56 = vpop.eup %5451 }
 0x8b1   : > { %v2057_v58 = vmul.f32 %v5452_v56, %v2049_v21  ;;  %v2088_v21 = vpack.c.bf16 %v5944_v55, %v5941_v54  ;;  %v6040_v54 = vpack.c.bf16 %v5976_v14, %v5971_v12  ;;  %v4712_v14 = vld [vmem:[%s6462_s10] ss:$0 sm:$0xff]  ;;  %v5420_v56 = vld [vmem:[%s5672_s30 + $0x10] sm:$0xff]  }
 0x8b3   : > { %v2065_v62 = vmul.f32 %v4699_v57, %v2057_v58  ;;  %v5421_v57 = vld [vmem:[%s5682_s12 + $0x18] sm:$0xff]   ;;  %v5422_v58 = vld [vmem:[%s5682_s12 + $0x10] sm:$0xff]  }
 0x8b5   : > { %v6009_v0 = vadd.f32 %v4700_v59, %v2065_v62 }
 0x8b7   : > { %v2074_v5 = vadd.f32 %v6009_v0, %v6007_v63 }
 0x8b9   : > { %v6013_v7 = vpack.c.bf16 %v2074_v5, %v2074_v5 }
 0x8bb   : > { %5087 = vmatmul.mubr.msk.bf16.vlgmr.msra.gmra.mxu0 %vm1347_vm1, %v6013_v7 }
 0x8bc   : > { %5106 = vmatprep.mubr.msk.bf16.mxu0 %vm1347_vm1, %v2088_v21  ;;  %5103 = vmatpush3.bf16.msra.mxu0 %v5417_v20 }
 0x8bd   : > { %5104 = vmatprep.subr.bf16.mxu0 %v5418_v6 }
 0x8c0   : > { %5105 = vmatpush3.bf16.msra.mxu0 %v5418_v6 }
 0x8c1   : > { %5126 = vmatprep.subr.bf16.mxu0 %v5602_v1 }
 0x8c3   : > { %5107 = vmatmul.mubr.msk.bf16.vlgmr.msra.gmra.mxu0 %vm1347_vm1, %v6027_v22 }
 0x8c4   : > { %5110 = vmatprep.mubr.msk.bf16.mxu0 %vm1347_vm1, %v6031_v23 }
 0x8cb   : > { %5111 = vmatmul.mubr.msk.bf16.gmra.mxu0 %vm1347_vm1, %v6040_v54 }
 0x8cc   : > { %5134 = vmatprep.mubr.msk.bf16.mxu0 %vm5603_vm0, %v5602_v1 }
 0x97b   : > { %v2152_v9 = vpop.f32.mrf.mxu0 }
 0x97c   : > { %v2153_v10 = vadd.f32 %v4701_v8, %v2152_v9 }
 0x97d   : > { %v5088_v15 = vpop.f32.mrf.mxu0 }
 0x97e   : > { %v2358_v16 = vpack.c.bf16 %v2153_v10, %v2153_v10 }
 0x97f   : > { %v2155_v17 = vpop.f32.mrf.mxu0 }
 0x980   : > { %5123 = vmatmul.mubr.msk.bf16.vlgmr.msra.gmra.mxu1 %vm1567_vm3, %v2358_v16 }
 0x981   : > { %v5089_v18 = vpop.f32.mrf.mxu0  ;;  %5162 = vmatprep.mubr.msk.bf16.mxu1 %vm1347_vm1, %v2088_v21 }
 0x983   : > { %v5108_v25 = vpop.f32.mrf.mxu0 }
 0x984   : > { %v2336_v37 = vadd.f32 %v5108_v25, %v4712_v14 }
 0x985   : > { %v2327_v26 = vpop.f32.mrf.mxu0 }
 0x986   : > { %v2328_v40 = vadd.f32 %v4712_v14, %v2327_v26 }
 0x987   : > { %v5109_v27 = vpop.f32.mrf.mxu0 }
 0x988   : > { %v2339_v38 = vadd.f32 %v5109_v27, %v4712_v14 }
 0x989   : > { %v2330_v12 = vpop.f32.mrf.mxu0 }
 0x98a   : > { %v2433_v41 = vpack.c.bf16 %v2339_v38, %v2336_v37  ;;  %v2331_v42 = vadd.f32 %v4712_v14, %v2330_v12 }
 0x98b   : > { %v5112_v28 = vpop.f32.mrf.mxu0 }
 0x98c   : > { %v2352_v30 = vadd.f32 %v5112_v28, %v4712_v14  ;;  %v2432_v43 = vpack.c.bf16 %v2331_v42, %v2328_v40  ;;  %v5424_v40 = vld [vmem:[%s6461_s2 + $0x10] sm:$0xff]  }
 0x98d   : > { %v2343_v29 = vpop.f32.mrf.mxu0 }
 0x98e   : > { %v2344_v32 = vadd.f32 %v4712_v14, %v2343_v29 }
 0x98f   : > { %v5113_v31 = vpop.f32.mrf.mxu0 }
 0x990   : > { %v2355_v33 = vadd.f32 %v5113_v31, %v4712_v14 }
 0x991   : > { %v2346_v34 = vpop.f32.mrf.mxu0 }
 0x992   : > { %v2435_v35 = vpack.c.bf16 %v2355_v33, %v2352_v30  ;;  %v2347_v36 = vadd.f32 %v4712_v14, %v2346_v34 }
 0x994   : > { %v2434_v39 = vpack.c.bf16 %v2347_v36, %v2344_v32  ;;  %5127 = vmatpush3.bf16.msra.mxu0 %v2435_v35  ;;  %v4726_v35 = vld [vmem:[%s6460_s28 + $0x1] ss:$0 sm:$0xff] }
 0x995   : > { %5128 = vmatprep.subr.bf16.mxu0 %v5602_v1 }
 0x998   : > { %5129 = vmatpush3.bf16.msra.mxu0 %v2434_v39  ;;  %v5423_v39 = vld [vmem:[%s6461_s2 + $0x18] sm:$0xff]   ;;  %s6470_s2 = sld [smem:[#allocation14_spill]] }
 0x999   : > { %5130 = vmatprep.subr.bf16.mxu0 %v5602_v1  ;;  %5158 = vmatprep.subr.bf16.mxu1 %v5423_v39 }
 0x99a   : > { %5159 = vmatpush3.bf16.msra.mxu1 %v5423_v39 }
 0x99b   : > { %5160 = vmatprep.subr.bf16.mxu1 %v5424_v40 }
 0x99c   : > { %5131 = vmatpush3.bf16.msra.mxu0 %v2433_v41 }
 0x99d   : > { %5132 = vmatprep.subr.bf16.mxu0 %v5602_v1 }
 0x99e   : > { %5161 = vmatpush3.bf16.msra.mxu1 %v5424_v40 }
 0x99f   : > { %5182 = vmatprep.subr.bf16.mxu1 %v5602_v1 }
 0x9a0   : > { %5133 = vmatpush3.bf16.msra.mxu0 %v2432_v43 }
 0x9a1   : > { %5138 = vmatprep.subr.bf16.mxu0 %v5602_v1  ;;  %5163 = vmatmul.mubr.msk.bf16.vlgmr.msra.gmra.mxu1 %vm1347_vm1, %v6027_v22 }
 0x9a2   : > { %5166 = vmatprep.mubr.msk.bf16.mxu1 %vm1347_vm1, %v6031_v23 }
 0x9a9   : > { %5167 = vmatmul.mubr.msk.bf16.gmra.mxu1 %vm1347_vm1, %v6040_v54 }
 0x9aa   : > { %5190 = vmatprep.mubr.msk.bf16.mxu1 %vm5603_vm0, %v5602_v1 }
 0xa40   : > { %v2412_v55 = vpop.f32.mrf.mxu1 }
 0xa41   : > { %v2418_v60 = vmul.f32 0.35355338, %v2412_v55  ;;  %v4735_v55 = vld [vmem:[%s5687_s20 + $0x1] ss:$0 sm:$0xff] }
 0xa42   : > { %v5124_v61 = vpop.f32.mrf.mxu1 }
 0xa43   : > { %v2420_v2 = vsel %vm2419_vm5, %v2418_v60, -inf }
 0xa44   : > { %2421 = vmax.xlane.f32.xlu0 %v2420_v2  ;;  %v2415_v3 = vpop.f32.mrf.mxu1 }
 0xa46   : > { %v5125_v24 = vpop.f32.mrf.mxu1 }
 0xacd   : > { %v2422_v44 = vpop.xlane.xlu0 %2421 }
 0xace   : > { %v2423_v45 = vsub.f32 %v2418_v60, %v2422_v44 }
 0xad0   : > { %v2424_v46 = vmul.f32 1.442695, %v2423_v45 }
 0xad2   : > { %5453 = vpow2.f32 %v2424_v46 }
 0xadf   : > { %v5454_v47 = vpop.eup %5453 }
 0xae0   : > { %v2426_v48 = vsel %vm2419_vm5, %v5454_v47, 0.0 }
 0xae1   : > { %2427 = vadd.xlane.f32.xlu1 %v2426_v48 }
 0xb6a   : > { %v2428_v49 = vpop.xlane.xlu1 %2427 }
 0xb6b   : > { %5455 = vrcp.f32 %v2428_v49 }
 0xb78   : > { %v5456_v50 = vpop.eup %5455 }
 0xb79   : > { %v2430_v51 = vmul.f32 %v5456_v50, %v5454_v47  ;;  %v5164_v47 = vpop.f32.mrf.mxu1  ;;  %v4747_v50 = vld [vmem:[%s6462_s10 + $0x1] ss:$0 sm:$0xff] }
 0xb7b   : > { %v2431_v53 = vpack.c.bf16 %v2430_v51, %v2430_v51  ;;  %v2695_v48 = vpop.f32.mrf.mxu1 }
 0xb7d   : > { %5135 = vmatmul.mubr.msk.bf16.vlgmr.msra.gmra.mxu0 %vm2419_vm5, %v2431_v53  ;;  %v5165_v22 = vpop.f32.mrf.mxu1 }
 0xb7e   : > { %5139 = vmatpush3.bf16.msra.mxu0 %v5419_v52  ;;  %5142 = vmatprep.mubr.msk.bf16.mxu0 %vm5603_vm0, %v5602_v1 }
 0xb7f   : > { %5140 = vmatprep.subr.bf16.mxu0 %v5602_v1  ;;  %v2698_v49 = vpop.f32.mrf.mxu1 }
 0xb81   : > { %v5168_v23 = vpop.f32.mrf.mxu1 }
 0xb82   : > { %5141 = vmatpush3.bf16.msra.mxu0 %v5420_v56  ;;  %v2720_v52 = vadd.f32 %v5168_v23, %v4747_v50 }
 0xb83   : > { %5146 = vmatprep.subr.bf16.mxu0 %v5421_v57  ;;  %v2711_v51 = vpop.f32.mrf.mxu1 }
 0xb84   : > { %v2712_v53 = vadd.f32 %v4747_v50, %v2711_v51 }
 0xb85   : > { %5143 = vmatmul.mubr.msk.bf16.vlgmr.msra.gmra.mxu0 %vm1347_vm1, %v6013_v7  ;;  %v5169_v54 = vpop.f32.mrf.mxu1 }
 0xb86   : > { %5147 = vmatpush3.bf16.msra.mxu0 %v5421_v57  ;;  %5150 = vmatprep.mubr.msk.bf16.mxu0 %vm1347_vm1, %v5961_v4  ;;  %v2723_v56 = vadd.f32 %v5169_v54, %v4747_v50  ;;  %v4760_v54 = vld [vmem:[%s6467_s26] ss:$0 sm:$0xff]  ;;  %s6471_s26 = sld [smem:[#allocation15_spill]] }
 0xb87   : > { %5148 = vmatprep.subr.bf16.mxu0 %v5422_v58  ;;  %v2714_v57 = vpop.f32.mrf.mxu1 }
 0xb8a   : > { %5149 = vmatpush3.bf16.msra.mxu0 %v5422_v58  ;;  %v2802_v58 = vpack.c.bf16 %v2723_v56, %v2720_v52  ;;  %v4761_v56 = vld [vmem:[%s6468_s1] ss:$0 sm:$0xff]  ;;  %s6472_s1 = sld [smem:[#allocation19_spill]] }
 0xb8b   : > { %5170 = vmatprep.subr.bf16.mxu0 %v5602_v1 }
 0xb8c   : > { %5183 = vmatpush3.bf16.msra.mxu1 %v2802_v58 }
 0xb8d   : > { %5151 = vmatmul.mubr.msk.bf16.vlgmr.msra.gmra.mxu0 %vm1347_vm1, %v5968_v11  ;;  %5184 = vmatprep.subr.bf16.mxu1 %v5602_v1 }
 0xb8e   : > { %5154 = vmatprep.mubr.msk.bf16.mxu0 %vm1347_vm1, %v5973_v13 }
 0xb95   : > { %5155 = vmatmul.mubr.msk.bf16.gmra.mxu0 %vm1347_vm1, %v5985_v19 }
 0xb96   : > { %5178 = vmatprep.mubr.msk.bf16.mxu0 %vm5603_vm0, %v5602_v1 }
 0xc3d   : > { %v6074_v59 = vpop.f32.mrf.mxu0 }
 0xc3f   : > { %v5136_v62 = vpop.f32.mrf.mxu0 }
 0xc40   : > { %v2715_v62 = vadd.f32 %v4747_v50, %v2714_v57 }
 0xc41   : > { %v2476_v5 = vpop.f32.mrf.mxu0 }
 0xc42   : > { %v2704_v5 = vadd.f32 %v5164_v47, %v4747_v50 }
 0xc43   : > { %v5137_v7 = vpop.f32.mrf.mxu0 }
 0xc44   : > { %v2707_v7 = vadd.f32 %v5165_v22, %v4747_v50  ;;  %v5426_v22 = vld [vmem:[%s6465_s22] sm:$0xff]  }
 0xc45   : > { %v2540_v8 = vpop.f32.mrf.mxu0 }
 0xc46   : > { %v2541_v37 = vadd.f32 %v4726_v35, %v2540_v8  ;;  %v2801_v8 = vpack.c.bf16 %v2715_v62, %v2712_v53 }
 0xc47   : > { %v5144_v9 = vpop.f32.mrf.mxu0 }
 0xc48   : > { %v2726_v38 = vpack.c.bf16 %v2541_v37, %v2541_v37  ;;  %v2696_v9 = vadd.f32 %v4747_v50, %v2695_v48  ;;  %5185 = vmatpush3.bf16.msra.mxu1 %v2801_v8  ;;  %v5425_v48 = vld [vmem:[%s6465_s22 + $0x8] sm:$0xff]  }
 0xc49   : > { %v2543_v10 = vpop.f32.mrf.mxu0  ;;  %5186 = vmatprep.subr.bf16.mxu1 %v5602_v1 }
 0xc4a   : > { %v2800_v10 = vpack.c.bf16 %v2707_v7, %v2704_v5  ;;  %v5429_v5 = vld [vmem:[%s6466_s23 + $0x8] sm:$0xff]   ;;  %v5430_v7 = vld [vmem:[%s6466_s23] sm:$0xff]  }
 0xc4b   : > { %v5145_v15 = vpop.f32.mrf.mxu0 }
 0xc4c   : > { %v2699_v15 = vadd.f32 %v4747_v50, %v2698_v49  ;;  %5187 = vmatpush3.bf16.msra.mxu1 %v2800_v10  ;;  %v5428_v49 = vld [vmem:[%s6466_s23 + $0x10] sm:$0xff]  }
 0xc4d   : > { %v5152_v16 = vpop.f32.mrf.mxu0  ;;  %5188 = vmatprep.subr.bf16.mxu1 %v5602_v1 }
 0xc4e   : > { %v2614_v29 = vadd.f32 %v5152_v16, %v4735_v55  ;;  %v2799_v16 = vpack.c.bf16 %v2699_v15, %v2696_v9 }
 0xc4f   : > { %v2605_v17 = vpop.f32.mrf.mxu0 }
 0xc50   : > { %v2606_v33 = vadd.f32 %v4735_v55, %v2605_v17  ;;  %5189 = vmatpush3.bf16.msra.mxu1 %v2799_v16 }
 0xc51   : > { %v5153_v18 = vpop.f32.mrf.mxu0  ;;  %5194 = vmatprep.subr.bf16.mxu1 %v5602_v1 }
 0xc52   : > { %v2617_v14 = vadd.f32 %v5153_v18, %v4735_v55 }
 0xc53   : > { %v2608_v20 = vpop.f32.mrf.mxu0 }
 0xc54   : > { %v2728_v30 = vpack.c.bf16 %v2617_v14, %v2614_v29  ;;  %v2609_v31 = vadd.f32 %v4735_v55, %v2608_v20 }
 0xc55   : > { %v5156_v6 = vpop.f32.mrf.mxu0 }
 0xc56   : > { %v2630_v61 = vadd.f32 %v5156_v6, %v4735_v55  ;;  %v2738_v32 = vsel %vm1567_vm3, %v2728_v30, 0  ;;  %v2727_v34 = vpack.c.bf16 %v2609_v31, %v2606_v33  ;;  %v2479_v30 = vpack.c.bf16 %v6074_v59, %v6074_v59 }
 0xc57   : > { %v2621_v21 = vpop.f32.mrf.mxu0 }
 0xc58   : > { %v2622_v27 = vadd.f32 %v4735_v55, %v2621_v21  ;;  %v2735_v36 = vsel %vm1567_vm3, %v2727_v34, 0 }
 0xc59   : > { %v5157_v60 = vpop.f32.mrf.mxu0 }
 0xc5a   : > { %v2633_v2 = vadd.f32 %v5157_v60, %v4735_v55 }
 0xc5b   : > { %v2624_v3 = vpop.f32.mrf.mxu0 }
 0xc5c   : > { %v2730_v24 = vpack.c.bf16 %v2633_v2, %v2630_v61  ;;  %v2625_v25 = vadd.f32 %v4735_v55, %v2624_v3  ;;  %v4756_v3 = vld [vmem:[%s6463_s11 + $0x4] sm:$0xf] }
 0xc5e   : > { %v2744_v26 = vsel %vm1567_vm3, %v2730_v24, 0  ;;  %v2729_v12 = vpack.c.bf16 %v2625_v25, %v2622_v27  ;;  %v2853_v24 = vsel %vm1584_vm4, %v4756_v3, 0  ;;  %v2480_v25 = vld [vmem:[%s6463_s11] sm:$0xf] }
 0xc5f   : > { %5171 = vmatpush3.bf16.xpose.msra.mxu0 %v2744_v26 }
 0xc60   : > { %5172 = vmatprep.subr.bf16.mxu0 %v5602_v1  ;;  %v2741_v28 = vsel %vm1567_vm3, %v2729_v12, 0  ;;  %v2899_v12 = vsel %vm1584_vm4, %v2480_v25, 0 }
 0xc67   : > { %5173 = vmatpush3.bf16.xpose.msra.mxu0 %v2741_v28 }
 0xc68   : > { %5174 = vmatprep.subr.bf16.mxu0 %v5602_v1 }
 0xc6f   : > { %5175 = vmatpush3.bf16.xpose.msra.mxu0 %v2738_v32 }
 0xc70   : > { %5176 = vmatprep.subr.bf16.mxu0 %v5602_v1 }
 0xc77   : > { %5177 = vmatpush3.bf16.xpose.msra.mxu0 %v2735_v36  ;;  %v4759_v36 = vld [vmem:[%s6464_s18] ss:$0 sm:$0xff]  ;;  %s6469_s18 = sld [smem:[#allocation12_spill]] }
 0xc78   : > { %5206 = vmatprep.subr.bf16.mxu0 %v5602_v1 }
 0xc7d   : > { %v4762_v8 = vld [vmem:[%s6469_s18] ss:$0 sm:$0xff]  ;;  %s6473_s18 = sld [smem:[#allocation17_spill]] }
 0xc7e   : > { %5179 = vmatmul.mubr.msk.bf16.vlgmr.msra.gmra.mxu0 %vm1567_vm3, %v2726_v38 }
 0xc7f   : > { %5210 = vmatprep.mubr.msk.bf16.mxu0 %vm5603_vm0, %v5602_v1  ;;  %5207 = vmatpush3.bf16.msra.mxu0 %v5425_v48 }
 0xc80   : > { %5208 = vmatprep.subr.bf16.mxu0 %v5602_v1 }
 0xc83   : > { %5209 = vmatpush3.bf16.msra.mxu0 %v5426_v22 }
 0xd3e   : > { %v2780_v41 = vpop.f32.mrf.mxu0 }
 0xd3f   : > { %v2786_v42 = vmul.f32 0.35355338, %v2780_v41 }
 0xd40   : > { %v5180_v43 = vpop.f32.mrf.mxu0 }
 0xd41   : > { %v2787_v44 = vsel %vm2419_vm5, %v2786_v42, -inf }
 0xd42   : > { %2788 = vmax.xlane.f32.xlu0 %v2787_v44  ;;  %v2783_v45 = vpop.f32.mrf.mxu0 }
 0xd44   : > { %v5181_v46 = vpop.f32.mrf.mxu0 }
 0xdcb   : > { %v2789_v17 = vpop.xlane.xlu0 %2788 }
 0xdcc   : > { %v2790_v18 = vsub.f32 %v2786_v42, %v2789_v17 }
 0xdce   : > { %v2791_v20 = vmul.f32 1.442695, %v2790_v18 }
 0xdd0   : > { %5457 = vpow2.f32 %v2791_v20 }
 0xddd   : > { %v5458_v6 = vpop.eup %5457 }
 0xdde   : > { %v2793_v21 = vsel %vm2419_vm5, %v5458_v6, 0.0 }
 0xddf   : > { %2794 = vadd.xlane.f32.xlu1 %v2793_v21 }
 0xe68   : > { %v2795_v55 = vpop.xlane.xlu1 %2794 }
 0xe69   : > { %5459 = vrcp.f32 %v2795_v55 }
 0xe76   : > { %v5460_v60 = vpop.eup %5459 }
 0xe77   : > { %v2797_v61 = vmul.f32 %v5460_v60, %v5458_v6  ;;  %v4766_v6 = vld [vmem:[%s6470_s2] ss:$0 sm:$0xff]  ;;  %s6474_s2 = sld [smem:[#allocation27_spill]] }
 0xe79   : > { %v2798_v2 = vpack.c.bf16 %v2797_v61, %v2797_v61 }
 0xe7b   : > { %5191 = vmatmul.mubr.msk.bf16.vlgmr.msra.gmra.mxu1 %vm2419_vm5, %v2798_v2 }
 0xe7c   : > { %5196 = vmatprep.mubr.msk.bf16.mxu1 %vm5603_vm0, %v5602_v1  ;;  %5195 = vmatpush3.bf16.msra.mxu1 %v2853_v24 }
 0xe7d   : > { %5200 = vmatprep.subr.bf16.mxu1 %v5602_v1 }
 0xf3b   : > { %v2840_v26 = vpop.f32.mrf.mxu1 }
 0xf3c   : > { %v2846_v27 = vpack.c.bf16 %v2840_v26, %v2840_v26 }
 0xf3d   : > { %v5192_v14 = vpop.f32.mrf.mxu1 }
 0xf3e   : > { %5197 = vmatmul.mubr.msk.bf16.vlgmr.msra.gmra.mxu1 %vm1567_vm3, %v2846_v27 }
 0xf3f   : > { %v2843_v28 = vpop.f32.mrf.mxu1  ;;  %5201 = vmatpush3.bf16.msra.mxu1 %v2899_v12  ;;  %5202 = vmatprep.mubr.msk.bf16.mxu1 %vm5603_vm0, %v5602_v1 }
 0xf40   : > { %5214 = vmatprep.subr.bf16.mxu1 %v5602_v1  ;;  %v5431_v28 = vld [vmem:[%s6471_s26 + $0x8] sm:$0xff]  }
 0xf41   : > { %v5193_v29 = vpop.f32.mrf.mxu1  ;;  %5226 = vmatprep.subr.bf16.mxu0 %v5431_v28 }
 0xf42   : > { %v5432_v29 = vld [vmem:[%s6471_s26] sm:$0xff]  }
 0xf46   : > { %5203 = vmatmul.mubr.msk.bf16.vlgmr.msra.gmra.mxu1 %vm1567_vm3, %v2479_v30  ;;  %v5433_v30 = vld [vmem:[%s6472_s1 + $0x8] sm:$0xff]  }
 0xf47   : > { %5222 = vmatprep.mubr.msk.bf16.mxu1 %vm5603_vm0, %v5602_v1 }
 0xffe   : > { %v2889_v31 = vpop.f32.mrf.mxu1 }
0x1000   : > { %v5198_v32 = vpop.f32.mrf.mxu1 }
0x1001   : > { %v5435_v32 = vld [vmem:[%s6472_s1] sm:$0xff]  }
0x1002   : > { %v2892_v33 = vpop.f32.mrf.mxu1 }
0x1003   : > { %v5436_v33 = vld [vmem:[%s6473_s18] sm:$0xff]  }
0x1004   : > { %v5199_v34 = vpop.f32.mrf.mxu1 }
0x1006   : > { %v2935_v35 = vpop.f32.mrf.mxu1 }
0x1007   : > { %v2936_v37 = vadd.f32 %v2935_v35, %v2889_v31  ;;  %v5434_v31 = vld [vmem:[%s6473_s18 + $0x8] sm:$0xff]  }
0x1008   : > { %v5204_v38 = vpop.f32.mrf.mxu1 }
0x1009   : > { %v2948_v39 = vadd.f32 %v4759_v36, %v2936_v37  ;;  %v4772_v38 = vld [vmem:[%s6474_s2] ss:$0 sm:$0xff]  ;;  %s6477_s2 = sld [smem:[#allocation20_spill]] }
0x100a   : > { %v2938_v40 = vpop.f32.mrf.mxu1 }
0x100b   : > { %v2949_v59 = vadd.f32 %v2948_v39, %v6009_v0  ;;  %v5427_v0 = vld [vmem:[%s6466_s23 + $0x18] sm:$0xff]   ;;  %v4773_v40 = vld [vmem:[%s6475_s3] ss:$0 sm:$0xff]  ;;  %s6478_s3 = sld [smem:[#allocation18_spill]] }
0x100c   : > { %v5205_v41 = vpop.f32.mrf.mxu1  ;;  %5215 = vmatpush3.bf16.msra.mxu1 %v5427_v0 }
0x100d   : > { %v2950_v42 = vsel %vm1347_vm1, %v2949_v59, 0.0  ;;  %5216 = vmatprep.subr.bf16.mxu1 %v5602_v1 }
0x100e   : > { %2951 = vadd.xlane.f32.xlu0 %v2950_v42 }
0x1010   : > { %5217 = vmatpush3.bf16.msra.mxu1 %v5428_v49 }
0x1011   : > { %5218 = vmatprep.subr.bf16.mxu1 %v5602_v1 }
0x1014   : > { %5219 = vmatpush3.bf16.msra.mxu1 %v5429_v5 }
0x1015   : > { %5220 = vmatprep.subr.bf16.mxu1 %v5602_v1 }
0x1018   : > { %5221 = vmatpush3.bf16.msra.mxu1 %v5430_v7 }
0x1019   : > { %5238 = vmatprep.subr.bf16.mxu1 %v5602_v1 }
0x1097   : > { %v2952_v43 = vpop.xlane.xlu0 %2951 }
0x1098   : > { %v2953_v44 = vmul.f32 0.03125, %v2952_v43 }
0x109a   : > { %v2954_v45 = vsub.f32 %v2949_v59, %v2953_v44 }
0x109c   : > { %v2955_v46 = vmul.f32 %v2954_v45, %v2954_v45 }
0x109e   : > { %v2956_v47 = vsel %vm1347_vm1, %v2955_v46, 0.0 }
0x109f   : > { %2957 = vadd.xlane.f32.xlu1 %v2956_v47 }
0x1128   : > { %v2958_v50 = vpop.xlane.xlu1 %2957 }
0x1129   : > { %v2959_v23 = vmul.f32 0.03125, %v2958_v50 }
0x112b   : > { %v2960_v51 = vadd.f32 1e-05, %v2959_v23 }
0x112d   : > { %5461 = vrsqrt.f32 %v2960_v51 }
0x113a   : > { %v5462_v52 = vpop.eup %5461 }
0x113b   : > { %v2962_v53 = vmul.f32 %v5462_v52, %v2954_v45  ;;  %v4774_v45 = vld [vmem:[%s6476_s5] ss:$0 sm:$0xff] }
0x113d   : > { %v2970_v57 = vmul.f32 %v4760_v54, %v2962_v53 }
0x113f   : > { %v2978_v58 = vadd.f32 %v4761_v56, %v2970_v57  ;;  %v4785_v57 = vld [vmem:[%s6477_s2] ss:$0 sm:$0xff] }
0x1141   : > { %v2979_v62 = vpack.c.bf16 %v2978_v58, %v2978_v58 }
0x1143   : > { %5211 = vmatmul.mubr.msk.bf16.vlgmr.msra.gmra.mxu0 %vm1347_vm1, %v2979_v62  ;;  %v4781_v62 = vld [vmem:[%s6478_s3] ss:$0 sm:$0xff] }
0x1144   : > { %5230 = vmatprep.mubr.msk.bf16.mxu0 %vm1347_vm1, %v5961_v4  ;;  %5227 = vmatpush3.bf16.msra.mxu0 %v5431_v28 }
0x1145   : > { %5228 = vmatprep.subr.bf16.mxu0 %v5432_v29 }
0x1148   : > { %5229 = vmatpush3.bf16.msra.mxu0 %v5432_v29 }
0x1149   : > { %5246 = vmatprep.subr.bf16.mxu0 %v5602_v1 }
0x114b   : > { %5231 = vmatmul.mubr.msk.bf16.vlgmr.msra.gmra.mxu0 %vm1347_vm1, %v5968_v11 }
0x114c   : > { %5234 = vmatprep.mubr.msk.bf16.mxu0 %vm1347_vm1, %v5973_v13  ;;  %5247 = vmatpush3.bf16.msra.mxu0 %v5433_v30 }
0x114d   : > { %5248 = vmatprep.subr.bf16.mxu0 %v5602_v1 }
0x1150   : > { %5249 = vmatpush3.bf16.msra.mxu0 %v5435_v32 }
0x1153   : > { %5235 = vmatmul.mubr.msk.bf16.gmra.mxu0 %vm1347_vm1, %v5985_v19 }
0x1154   : > { %5250 = vmatprep.mubr.msk.bf16.mxu0 %vm5603_vm0, %v5602_v1 }
0x1203   : > { %v3040_v9 = vpop.f32.mrf.mxu0 }
0x1204   : > { %v3041_v10 = vadd.f32 %v4762_v8, %v3040_v9 }
0x1205   : > { %v5212_v15 = vpop.f32.mrf.mxu0 }
0x1206   : > { %v3046_v16 = vmax.f32 %v3041_v10, 0.0 }
0x1207   : > { %v3043_v17 = vpop.f32.mrf.mxu0 }
0x1208   : > { %v3047_v18 = vpack.c.bf16 %v3046_v16, %v3046_v16 }
0x1209   : > { %v5213_v20 = vpop.f32.mrf.mxu0 }
0x120a   : > { %5223 = vmatmul.mubr.msk.bf16.vlgmr.msra.gmra.mxu1 %vm2419_vm5, %v3047_v18 }
0x120b   : > { %5242 = vmatprep.mubr.msk.bf16.mxu1 %vm5603_vm0, %v5602_v1  ;;  %5239 = vmatpush3.bf16.msra.mxu1 %v5434_v31  ;;  %v5232_v46 = vpop.f32.mrf.mxu0 }
0x120c   : > { %5240 = vmatprep.subr.bf16.mxu1 %v5602_v1  ;;  %v3229_v47 = vadd.f32 %v5232_v46, %v4774_v45 }
0x120d   : > { %v3220_v48 = vpop.f32.mrf.mxu0 }
0x120e   : > { %v3221_v0 = vadd.f32 %v4774_v45, %v3220_v48 }
0x120f   : > { %5241 = vmatpush3.bf16.msra.mxu1 %v5436_v33  ;;  %v5233_v22 = vpop.f32.mrf.mxu0 }
0x1210   : > { %v3232_v49 = vadd.f32 %v5233_v22, %v4774_v45 }
0x1211   : > { %v3223_v50 = vpop.f32.mrf.mxu0 }
0x1212   : > { %v3384_v23 = vpack.c.bf16 %v3232_v49, %v3229_v47 }
0x1213   : > { %v5236_v52 = vpop.f32.mrf.mxu0 }
0x1215   : > { %v3236_v54 = vpop.f32.mrf.mxu0 }
0x1217   : > { %v5237_v53 = vpop.f32.mrf.mxu0 }
0x1219   : > { %v3239_v56 = vpop.f32.mrf.mxu0 }
0x12ca   : > { %v3124_v21 = vpop.f32.mrf.mxu1 }
0x12cb   : > { %v3125_v55 = vadd.f32 %v4766_v6, %v3124_v21 }
0x12cc   : > { %v5224_v60 = vpop.f32.mrf.mxu1 }
0x12cd   : > { %v3130_v61 = vadd.f32 %v3125_v55, %v2978_v58  ;;  %v3237_v55 = vadd.f32 %v4774_v45, %v3236_v54  ;;  %v3240_v60 = vadd.f32 %v4774_v45, %v3239_v56 }
0x12ce   : > { %v3127_v2 = vpop.f32.mrf.mxu1 }
0x12cf   : > { %v3131_v3 = vsel %vm1347_vm1, %v3130_v61, 0.0  ;;  %v3385_v2 = vpack.c.bf16 %v3240_v60, %v3237_v55 }
0x12d0   : > { %3132 = vadd.xlane.f32.xlu0 %v3131_v3  ;;  %v5225_v24 = vpop.f32.mrf.mxu1  ;;  %v3245_v3 = vadd.f32 %v5236_v52, %v4774_v45 }
0x12d1   : > { %v3248_v24 = vadd.f32 %v5237_v53, %v4774_v45 }
0x1359   : > { %v3133_v25 = vpop.xlane.xlu0 %3132 }
0x135a   : > { %v3134_v26 = vmul.f32 0.03125, %v3133_v25  ;;  %v3386_v25 = vpack.c.bf16 %v3248_v24, %v3245_v3 }
0x135c   : > { %v3135_v27 = vsub.f32 %v3130_v61, %v3134_v26 }
0x135e   : > { %v3136_v12 = vmul.f32 %v3135_v27, %v3135_v27 }
0x1360   : > { %v3137_v14 = vsel %vm1347_vm1, %v3136_v12, 0.0 }
0x1361   : > { %3138 = vadd.xlane.f32.xlu1 %v3137_v14 }
0x13ea   : > { %v3139_v34 = vpop.xlane.xlu1 %3138 }
0x13eb   : > { %v3140_v35 = vmul.f32 0.03125, %v3139_v34 }
0x13ed   : > { %v3141_v36 = vadd.f32 1e-05, %v3140_v35 }
0x13ef   : > { %5463 = vrsqrt.f32 %v3141_v36 }
0x13fc   : > { %v5464_v37 = vpop.eup %5463 }
0x13fd   : > { %v3143_v39 = vmul.f32 %v5464_v37, %v3135_v27 }
0x13ff   : > { %v3151_v59 = vmul.f32 %v4772_v38, %v3143_v39 }
0x1401   : > { %v3159_v41 = vadd.f32 %v4773_v40, %v3151_v59 }
0x1403   : > { %4463 = vst.msk [vmem:[%s1298_s8] sm:$0xff] %vm1347_vm1, %v3159_v41  ;;  %v6173_v42 = vpack.c.bf16 %v3159_v41, %v3159_v41  ;;  %v3160_v43 = vadd.f32 %v3159_v41, %v6007_v63  ;;  %v3224_v63 = vadd.f32 %v4774_v45, %v3223_v50  ;;  %s6479_s8 = sld [smem:[#allocation21_spill]] }
0x1405   : > { %5251 = vmatmul.mubr.msk.bf16.vlgmr.msra.gmra.mxu0 %vm1347_vm1, %v6173_v42  ;;  %v6178_v44 = vpack.c.bf16 %v3160_v43, %v3160_v43  ;;  %v3383_v51 = vpack.c.bf16 %v3224_v63, %v3221_v0 }
0x1407   : > { %5243 = vmatmul.mubr.msk.bf16.vlgmr.msra.gmra.mxu1 %vm1347_vm1, %v6178_v44 }
0x1408   : > { %5256 = vmatprep.mubr.msk.bf16.mxu1 %vm1567_vm3, %v3383_v51 }
0x14c5   : > { %v3377_v58 = vpop.f32.mrf.mxu0 }
0x14c6   : > { %v3378_v5 = vadd.f32 %v4785_v57, %v3377_v58 }
0x14c7   : > { %v3311_v7 = vpop.f32.mrf.mxu1  ;;  %v5252_v8 = vpop.f32.mrf.mxu0 }
0x14c8   : > { %v3568_v9 = vpack.c.bf16 %v3378_v5, %v3378_v5  ;;  %v3312_v10 = vadd.f32 %v4781_v62, %v3311_v7 }
0x14c9   : > { %v5244_v15 = vpop.f32.mrf.mxu1  ;;  %v3380_v16 = vpop.f32.mrf.mxu0 }
0x14ca   : > { %v3582_v17 = vsel %vm1584_vm4, %v3568_v9, 0  ;;  %v3387_v18 = vpack.c.bf16 %v3312_v10, %v3312_v10  ;;  %5343 = vmatprep.subr.msk.bf16.mxu0 %vm1584_vm4, %v3568_v9 }
0x14cb   : > { %v3314_v20 = vpop.f32.mrf.mxu1  ;;  %v5253_v6 = vpop.f32.mrf.mxu0  ;;  %5265 = vmatpush3.bf16.msra.mxu0 %v3582_v17 }
0x14cc   : > { %v3401_v21 = vsel %vm1567_vm3, %v3387_v18, 0  ;;  %5342 = vmatprep.subr.msk.bf16.mxu1 %vm1567_vm3, %v3387_v18  ;;  %5286 = vmatprep.subr.bf16.mxu0 %v5602_v1 }
0x14cd   : > { %v5245_v61 = vpop.f32.mrf.mxu1  ;;  %5255 = vmatpush3.bf16.xpose.msra.mxu1 %v3401_v21 }
0x14d4   : > { %5257 = vmatmul.mubr.msk.bf16.vlgmr.msra.gmra.mxu1 %vm1567_vm3, %v3384_v23 }
0x14d5   : > { %5260 = vmatprep.mubr.msk.bf16.mxu1 %vm1567_vm3, %v3385_v2 }
0x14dc   : > { %5261 = vmatmul.mubr.msk.bf16.gmra.mxu1 %vm1567_vm3, %v3386_v25 }
0x14dd   : > { %5278 = vmatprep.mubr.msk.bf16.mxu1 %vm1347_vm1, %v5961_v4 }
0x1594   : > { %v5258_v26 = vpop.f32.mrf.mxu1 }
0x1595   : > { %v3470_v28 = vmul.f32 0.35355338, %v5258_v26 }
0x1596   : > { %v3437_v27 = vpop.f32.mrf.mxu1 }
0x1597   : > { %v3468_v12 = vmul.f32 0.35355338, %v3437_v27  ;;  %v3482_v34 = vsel %vm1567_vm3, %v3470_v28, -inf }
0x1598   : > { %v5259_v14 = vpop.f32.mrf.mxu1 }
0x1599   : > { %v3476_v29 = vsel %vm1567_vm3, %v3468_v12, -inf  ;;  %v3471_v33 = vmul.f32 0.35355338, %v5259_v14 }
0x159a   : > { %3477 = vmax.xlane.f32.xlu0 %v3476_v29  ;;  %v3440_v30 = vpop.f32.mrf.mxu1 }
0x159b   : > { %v3469_v31 = vmul.f32 0.35355338, %v3440_v30  ;;  %v3485_v39 = vsel %vm1567_vm3, %v3471_v33, -inf  ;;  %v5437_v30 = vld [vmem:[%s6471_s26 + $0x18] sm:$0xff]  }
0x159c   : > { %v5262_v32 = vpop.f32.mrf.mxu1  ;;  %5274 = vmatprep.subr.bf16.mxu1 %v5437_v30 }
0x159d   : > { %v3479_v35 = vsel %vm1567_vm3, %v3469_v31, -inf  ;;  %v3474_v38 = vmul.f32 0.35355338, %v5262_v32  ;;  %5275 = vmatpush3.bf16.msra.mxu1 %v5437_v30 }
0x159e   : > { %3483 = vmax.xlane.f32.xlu0 %v3482_v34  ;;  %3480 = vmax.xlane.f32.xlu1 %v3479_v35  ;;  %v3453_v36 = vpop.f32.mrf.mxu1 }
0x159f   : > { %v3472_v4 = vmul.f32 0.35355338, %v3453_v36  ;;  %v3494_v45 = vsel %vm1567_vm3, %v3474_v38, -inf }
0x15a0   : > { %v5263_v37 = vpop.f32.mrf.mxu1 }
0x15a1   : > { %v3488_v40 = vsel %vm1567_vm3, %v3472_v4, -inf  ;;  %v3475_v43 = vmul.f32 0.35355338, %v5263_v37 }
0x15a2   : > { %3486 = vmax.xlane.f32.xlu1 %v3485_v39  ;;  %3489 = vmax.xlane.f32.xlu0 %v3488_v40  ;;  %v3456_v59 = vpop.f32.mrf.mxu1 }
0x15a3   : > { %v3473_v41 = vmul.f32 0.35355338, %v3456_v59  ;;  %v3497_v47 = vsel %vm1567_vm3, %v3475_v43, -inf }
0x15a5   : > { %v3491_v46 = vsel %vm1567_vm3, %v3473_v41, -inf }
0x15a6   : > { %3495 = vmax.xlane.f32.xlu0 %v3494_v45  ;;  %3492 = vmax.xlane.f32.xlu1 %v3491_v46 }
0x15aa   : > { %3498 = vmax.xlane.f32.xlu1 %v3497_v47  ;;  %v5438_v47 = vld [vmem:[%s6473_s18 + $0x18] sm:$0xff]  }
0x1623   : > { %v3478_v48 = vpop.xlane.xlu0 %3477 }
0x1624   : > { %v3500_v22 = vsub.f32 %v3468_v12, %v3478_v48 }
0x1626   : > { %v3508_v0 = vmul.f32 1.442695, %v3500_v22 }
0x1627   : > { %v3484_v49 = vpop.xlane.xlu0 %3483  ;;  %v3481_v50 = vpop.xlane.xlu1 %3480 }
0x1628   : > { %5465 = vpow2.f32 %v3508_v0  ;;  %v3502_v23 = vsub.f32 %v3470_v28, %v3484_v49  ;;  %v3501_v63 = vsub.f32 %v3469_v31, %v3481_v50  ;;  %v5439_v31 = vld [vmem:[%s6471_s26 + $0x10] sm:$0xff]  }
0x1629   : > { %5276 = vmatprep.subr.bf16.mxu1 %v5439_v31 }
0x162a   : > { %v3512_v51 = vmul.f32 1.442695, %v3502_v23  ;;  %v3510_v52 = vmul.f32 1.442695, %v3501_v63  ;;  %5277 = vmatpush3.bf16.msra.mxu1 %v5439_v31  ;;  %v5440_v23 = vld [vmem:[%s6473_s18 + $0x10] sm:$0xff]  }
0x162b   : > { %v3487_v54 = vpop.xlane.xlu1 %3486  ;;  %v3490_v53 = vpop.xlane.xlu0 %3489 }
0x162c   : > { %5467 = vpow2.f32 %v3512_v51  ;;  %v3503_v56 = vsub.f32 %v3471_v33, %v3487_v54  ;;  %v3504_v57 = vsub.f32 %v3472_v4, %v3490_v53 }
0x162d   : > { %5469 = vpow2.f32 %v3510_v52  ;;  %5279 = vmatmul.mubr.msk.bf16.vlgmr.msra.gmra.mxu1 %vm1347_vm1, %v5968_v11 }
0x162e   : > { %v3514_v58 = vmul.f32 1.442695, %v3503_v56  ;;  %v3516_v62 = vmul.f32 1.442695, %v3504_v57  ;;  %5282 = vmatprep.mubr.msk.bf16.mxu1 %vm1347_vm1, %v5973_v13  ;;  %v5441_v56 = vld [vmem:[%s6472_s1 + $0x18] sm:$0xff]   ;;  %v5442_v57 = vld [vmem:[%s6472_s1 + $0x10] sm:$0xff]  }
0x162f   : > { %v3496_v5 = vpop.xlane.xlu0 %3495  ;;  %v3493_v7 = vpop.xlane.xlu1 %3492 }
0x1630   : > { %5471 = vpow2.f32 %v3514_v58  ;;  %v3506_v8 = vsub.f32 %v3474_v38, %v3496_v5  ;;  %v3505_v9 = vsub.f32 %v3473_v41, %v3493_v7  ;;  %v4802_v7 = vld [vmem:[%s6476_s5 + $0x1] ss:$0 sm:$0xff] }
0x1631   : > { %5473 = vpow2.f32 %v3516_v62 }
0x1632   : > { %v3520_v10 = vmul.f32 1.442695, %v3506_v8  ;;  %v3518_v15 = vmul.f32 1.442695, %v3505_v9 }
0x1633   : > { %v3499_v16 = vpop.xlane.xlu1 %3498 }
0x1634   : > { %5475 = vpow2.f32 %v3520_v10  ;;  %v3507_v17 = vsub.f32 %v3475_v43, %v3499_v16 }
0x1635   : > { %v5466_v18 = vpop.eup %5465  ;;  %5477 = vpow2.f32 %v3518_v15  ;;  %5283 = vmatmul.mubr.msk.bf16.gmra.mxu1 %vm1347_vm1, %v5985_v19 }
0x1636   : > { %v3522_v20 = vmul.f32 1.442695, %v3507_v17  ;;  %v3524_v6 = vsel %vm1567_vm3, %v5466_v18, 0.0 }
0x1637   : > { %3525 = vadd.xlane.f32.xlu0 %v3524_v6 }
0x1638   : > { %5479 = vpow2.f32 %v3522_v20 }
0x1639   : > { %v5468_v21 = vpop.eup %5467 }
0x163a   : > { %v5470_v55 = vpop.eup %5469  ;;  %v3530_v60 = vsel %vm1567_vm3, %v5468_v21, 0.0 }
0x163b   : > { %3531 = vadd.xlane.f32.xlu0 %v3530_v60  ;;  %v3527_v61 = vsel %vm1567_vm3, %v5470_v55, 0.0 }
0x163c   : > { %3528 = vadd.xlane.f32.xlu1 %v3527_v61 }
0x163d   : > { %v5472_v2 = vpop.eup %5471 }
0x163e   : > { %v5474_v3 = vpop.eup %5473  ;;  %v3533_v24 = vsel %vm1567_vm3, %v5472_v2, 0.0 }
0x163f   : > { %v3536_v25 = vsel %vm1567_vm3, %v5474_v3, 0.0 }
0x1640   : > { %3537 = vadd.xlane.f32.xlu0 %v3536_v25  ;;  %3534 = vadd.xlane.f32.xlu1 %v3533_v24 }
0x1641   : > { %v5476_v26 = vpop.eup %5475 }
0x1642   : > { %v5478_v27 = vpop.eup %5477  ;;  %v3542_v12 = vsel %vm1567_vm3, %v5476_v26, 0.0 }
0x1643   : > { %v3539_v14 = vsel %vm1567_vm3, %v5478_v27, 0.0 }
0x1644   : > { %3543 = vadd.xlane.f32.xlu0 %v3542_v12  ;;  %3540 = vadd.xlane.f32.xlu1 %v3539_v14 }
0x1645   : > { %v5480_v28 = vpop.eup %5479 }
0x1646   : > { %v3545_v29 = vsel %vm1567_vm3, %v5480_v28, 0.0 }
0x1648   : > { %3546 = vadd.xlane.f32.xlu1 %v3545_v29 }
0x16c0   : > { %v3526_v32 = vpop.xlane.xlu0 %3525 }
0x16c1   : > { %5481 = vrcp.f32 %v3526_v32 }
0x16c4   : > { %v3532_v33 = vpop.xlane.xlu0 %3531 }
0x16c5   : > { %v3529_v34 = vpop.xlane.xlu1 %3528 }
0x16c6   : > { %5483 = vrcp.f32 %v3529_v34 }
0x16c7   : > { %5485 = vrcp.f32 %v3532_v33 }
0x16c9   : > { %v3538_v35 = vpop.xlane.xlu0 %3537  ;;  %v3535_v36 = vpop.xlane.xlu1 %3534 }
0x16ca   : > { %5487 = vrcp.f32 %v3535_v36 }
0x16cb   : > { %5489 = vrcp.f32 %v3538_v35  ;;  %v4823_v35 = vld [vmem:[%s6477_s2 + $0x1] ss:$0 sm:$0xff] }
0x16cd   : > { %v3544_v4 = vpop.xlane.xlu0 %3543  ;;  %v3541_v37 = vpop.xlane.xlu1 %3540 }
0x16ce   : > { %5491 = vrcp.f32 %v3541_v37  ;;  %v5482_v11 = vpop.eup %5481 }
0x16cf   : > { %5493 = vrcp.f32 %v3544_v4  ;;  %v3556_v19 = vmul.f32 %v5482_v11, %v5466_v18 }
0x16d1   : > { %v3547_v13 = vpop.xlane.xlu1 %3546 }
0x16d2   : > { %5495 = vrcp.f32 %v3547_v13 }
0x16d3   : > { %v5484_v38 = vpop.eup %5483 }
0x16d4   : > { %v3557_v39 = vmul.f32 %v5484_v38, %v5470_v55  ;;  %v5486_v40 = vpop.eup %5485 }
0x16d5   : > { %v3558_v43 = vmul.f32 %v5486_v40, %v5468_v21 }
0x16d6   : > { %v3564_v59 = vpack.c.bf16 %v3557_v39, %v3556_v19 }
0x16d7   : > { %v5488_v41 = vpop.eup %5487 }
0x16d8   : > { %5266 = vmatprep.mubr.msk.bf16.mxu0 %vm1567_vm3, %v3564_v59  ;;  %v3559_v45 = vmul.f32 %v5488_v41, %v5472_v2  ;;  %v5490_v46 = vpop.eup %5489 }
0x16d9   : > { %v3560_v49 = vmul.f32 %v5490_v46, %v5474_v3 }
0x16da   : > { %v3565_v48 = vpack.c.bf16 %v3559_v45, %v3558_v43 }
0x16db   : > { %v5492_v22 = vpop.eup %5491 }
0x16dc   : > { %v5494_v0 = vpop.eup %5493  ;;  %5267 = vmatmul.mubr.msk.bf16.vlgmr.msra.gmra.mxu0 %vm1567_vm3, %v3565_v48  ;;  %v3561_v50 = vmul.f32 %v5492_v22, %v5478_v27 }
0x16dd   : > { %5287 = vmatpush3.bf16.msra.mxu0 %v5438_v47  ;;  %v3562_v52 = vmul.f32 %v5494_v0, %v5476_v26  ;;  %v4814_v26 = vld [vmem:[%s6478_s3 + $0x1] ss:$0 sm:$0xff] }
0x16de   : > { %v3566_v51 = vpack.c.bf16 %v3561_v50, %v3560_v49  ;;  %5288 = vmatprep.subr.bf16.mxu0 %v5602_v1 }
0x16df   : > { %v5496_v63 = vpop.eup %5495 }
0x16e0   : > { %v3563_v54 = vmul.f32 %v5496_v63, %v5480_v28  ;;  %5270 = vmatprep.mubr.msk.bf16.mxu0 %vm1567_vm3, %v3566_v51 }
0x16e1   : > { %5289 = vmatpush3.bf16.msra.mxu0 %v5440_v23 }
0x16e2   : > { %v3567_v53 = vpack.c.bf16 %v3563_v54, %v3562_v52  ;;  %5294 = vmatprep.subr.bf16.mxu0 %v5602_v1 }
0x16e4   : > { %5271 = vmatmul.mubr.msk.bf16.gmra.mxu0 %vm1567_vm3, %v3567_v53 }
0x16e5   : > { %5290 = vmatprep.mubr.msk.bf16.mxu0 %vm5603_vm0, %v5602_v1 }
0x16ec   : > { %5291 = vmatmul.mubr.msk.bf16.vlgmr.msra.gmra.mxu0 %vm1347_vm1, %v6178_v44 }
0x16ed   : > { %5295 = vmatpush3.bf16.msra.mxu0 %v5441_v56  ;;  %5298 = vmatprep.mubr.msk.bf16.mxu0 %vm5603_vm0, %v5602_v1  ;;  %v5280_v58 = vpop.f32.mrf.mxu1 }
0x16ee   : > { %5296 = vmatprep.subr.bf16.mxu0 %v5602_v1  ;;  %v3722_v9 = vadd.f32 %v5280_v58, %v4802_v7 }
0x16ef   : > { %v3713_v62 = vpop.f32.mrf.mxu1 }
0x16f0   : > { %v3714_v10 = vadd.f32 %v4802_v7, %v3713_v62 }
0x16f1   : > { %5297 = vmatpush3.bf16.msra.mxu0 %v5442_v57  ;;  %v5281_v5 = vpop.f32.mrf.mxu1 }
0x16f2   : > { %v3725_v15 = vadd.f32 %v5281_v5, %v4802_v7 }
0x16f3   : > { %v3716_v8 = vpop.f32.mrf.mxu1 }
0x16f4   : > { %5299 = vmatmul.mubr.msk.bf16.vlgmr.msra.gmra.mxu0 %vm1347_vm1, %v6173_v42  ;;  %v3717_v44 = vadd.f32 %v4802_v7, %v3716_v8  ;;  %v3875_v16 = vpack.c.bf16 %v3725_v15, %v3722_v9 }
0x16f5   : > { %v5284_v55 = vpop.f32.mrf.mxu1 }
0x16f6   : > { %v3874_v17 = vpack.c.bf16 %v3717_v44, %v3714_v10  ;;  %v3738_v41 = vadd.f32 %v5284_v55, %v4802_v7 }
0x16f7   : > { %v3729_v2 = vpop.f32.mrf.mxu1 }
0x16f8   : > { %5304 = vmatprep.mubr.msk.bf16.mxu1 %vm1567_vm3, %v3874_v17  ;;  %v3730_v36 = vadd.f32 %v4802_v7, %v3729_v2 }
0x16f9   : > { %v5285_v12 = vpop.f32.mrf.mxu1 }
0x16fa   : > { %v3741_v43 = vadd.f32 %v5285_v12, %v4802_v7 }
0x16fb   : > { %v3732_v31 = vpop.f32.mrf.mxu1 }
0x16fc   : > { %v3733_v4 = vadd.f32 %v4802_v7, %v3732_v31  ;;  %v3877_v45 = vpack.c.bf16 %v3741_v43, %v3738_v41 }
0x16fe   : > { %v3876_v38 = vpack.c.bf16 %v3733_v4, %v3730_v36 }
0x179c   : > { %v6241_v18 = vpop.f32.mrf.mxu0 }
0x179e   : > { %v6243_v1 = vpop.f32.mrf.mxu0 }
0x17a0   : > { %v6245_v20 = vpop.f32.mrf.mxu0 }
0x17a1   : > { %v3650_v42 = vpack.c.bf16 %v6245_v20, %v6241_v18 }
0x17a2   : > { %v6249_v6 = vpop.f32.mrf.mxu0 }
0x17a3   : > { %v3649_v21 = vpack.c.bf16 %v6249_v6, %v6243_v1 }
0x17a4   : > { %v6253_v60 = vpop.f32.mrf.mxu0 }
0x17a6   : > { %v6255_v61 = vpop.f32.mrf.mxu0 }
0x17a8   : > { %v6257_v3 = vpop.f32.mrf.mxu0 }
0x17a9   : > { %v3652_v24 = vpack.c.bf16 %v6257_v3, %v6253_v60 }
0x17aa   : > { %v6261_v25 = vpop.f32.mrf.mxu0 }
0x17ab   : > { %v3651_v27 = vpack.c.bf16 %v6261_v25, %v6255_v61 }
0x17ac   : > { %v3803_v14 = vpop.f32.mrf.mxu0 }
0x17ad   : > { %v3804_v28 = vadd.f32 %v4814_v26, %v3803_v14 }
0x17ae   : > { %v5292_v29 = vpop.f32.mrf.mxu0 }
0x17af   : > { %v3878_v30 = vpack.c.bf16 %v3804_v28, %v3804_v28 }
0x17b0   : > { %v3806_v32 = vpop.f32.mrf.mxu0 }
0x17b1   : > { %v3892_v33 = vsel %vm1567_vm3, %v3878_v30, 0  ;;  %5344 = vmatprep.subr.msk.bf16.mxu1 %vm1567_vm3, %v3878_v30 }
0x17b2   : > { %v5293_v34 = vpop.f32.mrf.mxu0  ;;  %5303 = vmatpush3.bf16.xpose.msra.mxu1 %v3892_v33 }
0x17b4   : > { %v3868_v37 = vpop.f32.mrf.mxu0 }
0x17b5   : > { %v3869_v11 = vadd.f32 %v4823_v35, %v3868_v37 }
0x17b6   : > { %v5300_v13 = vpop.f32.mrf.mxu0 }
0x17b7   : > { %v4059_v19 = vpack.c.bf16 %v3869_v11, %v3869_v11 }
0x17b8   : > { %v3871_v39 = vpop.f32.mrf.mxu0 }
0x17b9   : > { %v4073_v40 = vsel %vm1584_vm4, %v4059_v19, 0  ;;  %5305 = vmatmul.mubr.msk.bf16.vlgmr.msra.gmra.mxu1 %vm1567_vm3, %v3875_v16  ;;  %5345 = vmatprep.subr.msk.bf16.mxu0 %vm1584_vm4, %v4059_v19 }
0x17ba   : > { %v5301_v59 = vpop.f32.mrf.mxu0  ;;  %5313 = vmatpush3.bf16.msra.mxu0 %v4073_v40  ;;  %5308 = vmatprep.mubr.msk.bf16.mxu1 %vm1567_vm3, %v3876_v38 }
0x17c1   : > { %5309 = vmatmul.mubr.msk.bf16.gmra.mxu1 %vm1567_vm3, %v3877_v45 }
0x1879   : > { %v5306_v46 = vpop.f32.mrf.mxu1 }
0x187a   : > { %v3961_v0 = vmul.f32 0.35355338, %v5306_v46 }
0x187b   : > { %v3928_v47 = vpop.f32.mrf.mxu1 }
0x187c   : > { %v3959_v48 = vmul.f32 0.35355338, %v3928_v47  ;;  %v3973_v52 = vsel %vm1567_vm3, %v3961_v0, -inf }
0x187d   : > { %v5307_v22 = vpop.f32.mrf.mxu1 }
0x187e   : > { %v3967_v49 = vsel %vm1567_vm3, %v3959_v48, -inf  ;;  %v3962_v51 = vmul.f32 0.35355338, %v5307_v22 }
0x187f   : > { %3968 = vmax.xlane.f32.xlu0 %v3967_v49  ;;  %v3931_v50 = vpop.f32.mrf.mxu1 }
0x1880   : > { %v3960_v23 = vmul.f32 0.35355338, %v3931_v50  ;;  %v3976_v62 = vsel %vm1567_vm3, %v3962_v51, -inf }
0x1881   : > { %v5310_v63 = vpop.f32.mrf.mxu1 }
0x1882   : > { %v3970_v54 = vsel %vm1567_vm3, %v3960_v23, -inf  ;;  %v3965_v58 = vmul.f32 0.35355338, %v5310_v63 }
0x1883   : > { %3974 = vmax.xlane.f32.xlu0 %v3973_v52  ;;  %3971 = vmax.xlane.f32.xlu1 %v3970_v54  ;;  %v3944_v53 = vpop.f32.mrf.mxu1 }
0x1884   : > { %v3963_v56 = vmul.f32 0.35355338, %v3944_v53  ;;  %v3985_v10 = vsel %vm1567_vm3, %v3965_v58, -inf  ;;  %v3653_v53 = vld [vmem:[%s6479_s8] sm:$0xf] }
0x1885   : > { %v5311_v57 = vpop.f32.mrf.mxu1  ;;  %5347 = vmatprep.subr.msk.bf16.mxu0 %vm1584_vm4, %v3653_v53 }
0x1886   : > { %v3979_v5 = vsel %vm1567_vm3, %v3963_v56, -inf  ;;  %v3966_v9 = vmul.f32 0.35355338, %v5311_v57 }
0x1887   : > { %3977 = vmax.xlane.f32.xlu1 %v3976_v62  ;;  %3980 = vmax.xlane.f32.xlu0 %v3979_v5  ;;  %v3947_v7 = vpop.f32.mrf.mxu1 }
0x1888   : > { %v3964_v8 = vmul.f32 0.35355338, %v3947_v7  ;;  %v3988_v44 = vsel %vm1567_vm3, %v3966_v9, -inf }
0x188a   : > { %v3982_v15 = vsel %vm1567_vm3, %v3964_v8, -inf }
0x188b   : > { %3986 = vmax.xlane.f32.xlu0 %v3985_v10  ;;  %3983 = vmax.xlane.f32.xlu1 %v3982_v15 }
0x188f   : > { %3989 = vmax.xlane.f32.xlu1 %v3988_v44 }
0x1908   : > { %v3969_v16 = vpop.xlane.xlu0 %3968 }
0x1909   : > { %v3991_v17 = vsub.f32 %v3959_v48, %v3969_v16 }
0x190b   : > { %v3999_v55 = vmul.f32 1.442695, %v3991_v17 }
0x190c   : > { %v3975_v2 = vpop.xlane.xlu0 %3974  ;;  %v3972_v26 = vpop.xlane.xlu1 %3971 }
0x190d   : > { %5497 = vpow2.f32 %v3999_v55  ;;  %v3993_v12 = vsub.f32 %v3961_v0, %v3975_v2  ;;  %v3992_v14 = vsub.f32 %v3960_v23, %v3972_v26 }
0x190f   : > { %v4003_v28 = vmul.f32 1.442695, %v3993_v12  ;;  %v4001_v29 = vmul.f32 1.442695, %v3992_v14 }
0x1910   : > { %v3978_v30 = vpop.xlane.xlu1 %3977  ;;  %v3981_v31 = vpop.xlane.xlu0 %3980 }
0x1911   : > { %5499 = vpow2.f32 %v4003_v28  ;;  %v3994_v32 = vsub.f32 %v3962_v51, %v3978_v30  ;;  %v3995_v33 = vsub.f32 %v3963_v56, %v3981_v31 }
0x1912   : > { %5501 = vpow2.f32 %v4001_v29  ;;  %v4239_v29 = vsel %vm1584_vm4, %v3653_v53, 0 }
0x1913   : > { %v4005_v34 = vmul.f32 1.442695, %v3994_v32  ;;  %v4007_v35 = vmul.f32 1.442695, %v3995_v33 }
0x1914   : > { %v3987_v36 = vpop.xlane.xlu0 %3986  ;;  %v3984_v4 = vpop.xlane.xlu1 %3983 }
0x1915   : > { %5503 = vpow2.f32 %v4005_v34  ;;  %v3997_v37 = vsub.f32 %v3965_v58, %v3987_v36  ;;  %v3996_v11 = vsub.f32 %v3964_v8, %v3984_v4 }
0x1916   : > { %5505 = vpow2.f32 %v4007_v35 }
0x1917   : > { %v4011_v13 = vmul.f32 1.442695, %v3997_v37  ;;  %v4009_v38 = vmul.f32 1.442695, %v3996_v11  ;;  %v4835_v11 = vld [vmem:[%s6479_s8 + $0x4] sm:$0xf] }
0x1918   : > { %v3990_v19 = vpop.xlane.xlu1 %3989  ;;  %5346 = vmatprep.subr.msk.bf16.mxu1 %vm1584_vm4, %v4835_v11  ;;  %v4159_v1 = vsel %vm1584_vm4, %v4835_v11, 0  ;;  %v5551_v11 = vld [vmem:[%s5934_s16 + $0x28] sm:$0xff] }
0x1919   : > { %5507 = vpow2.f32 %v4011_v13  ;;  %v3998_v39 = vsub.f32 %v3966_v9, %v3990_v19  ;;  %5323 = vmatpush3.bf16.msra.mxu1 %v4159_v1 }
0x191a   : > { %v5498_v40 = vpop.eup %5497  ;;  %5509 = vpow2.f32 %v4009_v38 }
0x191b   : > { %v4013_v59 = vmul.f32 1.442695, %v3998_v39  ;;  %v4015_v41 = vsel %vm1567_vm3, %v5498_v40, 0.0 }
0x191c   : > { %4016 = vadd.xlane.f32.xlu0 %v4015_v41  ;;  %v4844_v41 = vld [vmem:[%s6480_s0] ss:$0 sm:$0xff] }
0x191d   : > { %5511 = vpow2.f32 %v4013_v59 }
0x191e   : > { %v5500_v43 = vpop.eup %5499 }
0x191f   : > { %v5502_v45 = vpop.eup %5501  ;;  %v4021_v46 = vsel %vm1567_vm3, %v5500_v43, 0.0 }
0x1920   : > { %4022 = vadd.xlane.f32.xlu0 %v4021_v46  ;;  %v4018_v47 = vsel %vm1567_vm3, %v5502_v45, 0.0 }
0x1921   : > { %4019 = vadd.xlane.f32.xlu1 %v4018_v47 }
0x1922   : > { %v5504_v48 = vpop.eup %5503 }
0x1923   : > { %v5506_v22 = vpop.eup %5505  ;;  %v4024_v0 = vsel %vm1567_vm3, %v5504_v48, 0.0 }
0x1924   : > { %v4027_v49 = vsel %vm1567_vm3, %v5506_v22, 0.0 }
0x1925   : > { %4028 = vadd.xlane.f32.xlu0 %v4027_v49  ;;  %4025 = vadd.xlane.f32.xlu1 %v4024_v0 }
0x1926   : > { %v5508_v50 = vpop.eup %5507 }
0x1927   : > { %v5510_v23 = vpop.eup %5509  ;;  %v4033_v63 = vsel %vm1567_vm3, %v5508_v50, 0.0 }
0x1928   : > { %v4030_v51 = vsel %vm1567_vm3, %v5510_v23, 0.0 }
0x1929   : > { %4034 = vadd.xlane.f32.xlu0 %v4033_v63  ;;  %4031 = vadd.xlane.f32.xlu1 %v4030_v51 }
0x192a   : > { %v5512_v52 = vpop.eup %5511 }
0x192b   : > { %v4036_v54 = vsel %vm1567_vm3, %v5512_v52, 0.0 }
0x192d   : > { %4037 = vadd.xlane.f32.xlu1 %v4036_v54 }
0x19a5   : > { %v4017_v56 = vpop.xlane.xlu0 %4016 }
0x19a6   : > { %5513 = vrcp.f32 %v4017_v56  ;;  %v5546_v56 = vld [vmem:[%s5934_s16] sm:$0xff] }
0x19a9   : > { %v4023_v57 = vpop.xlane.xlu0 %4022 }
0x19aa   : > { %v4020_v58 = vpop.xlane.xlu1 %4019 }
0x19ab   : > { %5515 = vrcp.f32 %v4020_v58 }
0x19ac   : > { %5517 = vrcp.f32 %v4023_v57 }
0x19ae   : > { %v4029_v62 = vpop.xlane.xlu0 %4028  ;;  %v4026_v5 = vpop.xlane.xlu1 %4025 }
0x19af   : > { %5519 = vrcp.f32 %v4026_v5 }
0x19b0   : > { %5521 = vrcp.f32 %v4029_v62 }
0x19b2   : > { %v4035_v7 = vpop.xlane.xlu0 %4034  ;;  %v4032_v8 = vpop.xlane.xlu1 %4031 }
0x19b3   : > { %5523 = vrcp.f32 %v4032_v8  ;;  %v5514_v9 = vpop.eup %5513 }
0x19b4   : > { %5525 = vrcp.f32 %v4035_v7  ;;  %v4047_v44 = vmul.f32 %v5514_v9, %v5498_v40  ;;  %v5547_v7 = vld [vmem:[%s5934_s16 + $0x18] sm:$0xff] }
0x19b6   : > { %v4038_v10 = vpop.xlane.xlu1 %4037 }
0x19b7   : > { %5527 = vrcp.f32 %v4038_v10 }
0x19b8   : > { %v5516_v15 = vpop.eup %5515 }
0x19b9   : > { %v4048_v16 = vmul.f32 %v5516_v15, %v5502_v45  ;;  %v5518_v17 = vpop.eup %5517 }
0x19ba   : > { %v4049_v26 = vmul.f32 %v5518_v17, %v5500_v43  ;;  %v5548_v17 = vld [vmem:[%s5934_s16 + $0x8] sm:$0xff] }
0x19bb   : > { %v4055_v55 = vpack.c.bf16 %v4048_v16, %v4047_v44 }
0x19bc   : > { %v5520_v2 = vpop.eup %5519 }
0x19bd   : > { %5314 = vmatprep.mubr.msk.bf16.mxu0 %vm1567_vm3, %v4055_v55  ;;  %v4050_v12 = vmul.f32 %v5520_v2, %v5504_v48  ;;  %v5522_v14 = vpop.eup %5521 }
0x19be   : > { %v4051_v32 = vmul.f32 %v5522_v14, %v5506_v22 }
0x19bf   : > { %v4056_v28 = vpack.c.bf16 %v4050_v12, %v4049_v26 }
0x19c0   : > { %v5524_v30 = vpop.eup %5523 }
0x19c1   : > { %v5526_v31 = vpop.eup %5525  ;;  %5315 = vmatmul.mubr.msk.bf16.vlgmr.msra.gmra.mxu0 %vm1567_vm3, %v4056_v28  ;;  %v4052_v33 = vmul.f32 %v5524_v30, %v5510_v23 }
0x19c2   : > { %5333 = vmatpush3.bf16.msra.mxu0 %v4239_v29  ;;  %v4053_v36 = vmul.f32 %v5526_v31, %v5508_v50  ;;  %v5545_v50 = vld [vmem:[%s5934_s16 + $0x10] sm:$0xff] }
0x19c3   : > { %v4057_v35 = vpack.c.bf16 %v4052_v33, %v4051_v32  ;;  %v5549_v32 = vld [vmem:[%s5934_s16 + $0x20] sm:$0xff] }
0x19c4   : > { %v5528_v34 = vpop.eup %5527 }
0x19c5   : > { %v4054_v4 = vmul.f32 %v5528_v34, %v5512_v52  ;;  %5318 = vmatprep.mubr.msk.bf16.mxu0 %vm1567_vm3, %v4057_v35 }
0x19c7   : > { %v4058_v37 = vpack.c.bf16 %v4054_v4, %v4053_v36  ;;  %v5550_v4 = vld [vmem:[%s5934_s16 + $0x30] sm:$0xff] }
0x19c9   : > { %5319 = vmatmul.mubr.msk.bf16.gmra.mxu0 %vm1567_vm3, %v4058_v37 }
0x19ca   : > { %5334 = vmatprep.mubr.msk.bf16.mxu0 %vm1567_vm3, %v3649_v21 }
0x19d1   : > { %5335 = vmatmul.mubr.msk.bf16.vlgmr.msra.gmra.mxu0 %vm1567_vm3, %v3650_v42 }
0x19d2   : > { %5338 = vmatprep.mubr.msk.bf16.mxu0 %vm1567_vm3, %v3651_v27 }
0x19d9   : > { %5339 = vmatmul.mubr.msk.bf16.gmra.mxu0 %vm1567_vm3, %v3652_v24 }
0x1a81   : > { %v5316_v6 = vpop.f32.mrf.mxu0 }
0x1a83   : > { %v4109_v18 = vpop.f32.mrf.mxu0 }
0x1a85   : > { %v5317_v20 = vpop.f32.mrf.mxu0 }
0x1a86   : > { %v4141_v13 = vpack.c.bf16 %v5317_v20, %v5316_v6  ;;  %v5552_v20 = vld [vmem:[%s5934_s16 + $0x38] sm:$0xff]  ;;  %s6382_s16 = scalar_lea.vmem %s5817_s4, %s5930_s15 }
0x1a87   : > { %v4112_v42 = vpop.f32.mrf.mxu0 }
0x1a88   : > { %v4140_v21 = vpack.c.bf16 %v4112_v42, %v4109_v18 }
0x1a89   : > { %v5320_v61 = vpop.f32.mrf.mxu0 }
0x1a8a   : > { %5324 = vmatprep.mubr.msk.bf16.mxu1 %vm1567_vm3, %v4140_v21 }
0x1a8b   : > { %v4125_v25 = vpop.f32.mrf.mxu0  ;;  %5325 = vmatmul.mubr.msk.bf16.vlgmr.msra.gmra.mxu1 %vm1567_vm3, %v4141_v13 }
0x1a8d   : > { %v5321_v60 = vpop.f32.mrf.mxu0 }
0x1a8e   : > { %v4143_v27 = vpack.c.bf16 %v5321_v60, %v5320_v61 }
0x1a8f   : > { %v4128_v3 = vpop.f32.mrf.mxu0 }
0x1a90   : > { %v4142_v24 = vpack.c.bf16 %v4128_v3, %v4125_v25 }
0x1a91   : > { %v5336_v38 = vpop.f32.mrf.mxu0 }
0x1a92   : > { %5328 = vmatprep.mubr.msk.bf16.mxu1 %vm1567_vm3, %v4142_v24 }
0x1a93   : > { %5329 = vmatmul.mubr.msk.bf16.gmra.mxu1 %vm1567_vm3, %v4143_v27  ;;  %v4275_v19 = vpop.f32.mrf.mxu0 }
0x1a95   : > { %v5337_v39 = vpop.f32.mrf.mxu0 }
0x1a97   : > { %v4278_v40 = vpop.f32.mrf.mxu0 }
0x1a99   : > { %v5340_v45 = vpop.f32.mrf.mxu0 }
0x1a9b   : > { %v4291_v63 = vpop.f32.mrf.mxu0 }
0x1a9d   : > { %v5341_v9 = vpop.f32.mrf.mxu0 }
0x1a9f   : > { %v4294_v28 = vpop.f32.mrf.mxu0 }
0x1b4b   : > { %v5326_v59 = vpop.f32.mrf.mxu1 }
0x1b4c   : > { %v4284_v43 = vadd.f32 %v5336_v38, %v5326_v59 }
0x1b4d   : > { %v4195_v46 = vpop.f32.mrf.mxu1 }
0x1b4e   : > { %v4315_v47 = vadd.f32 %v4844_v41, %v4284_v43  ;;  %v4276_v48 = vadd.f32 %v4275_v19, %v4195_v46 }
0x1b4f   : > { %v5327_v22 = vpop.f32.mrf.mxu1 }
0x1b50   : > { %v4313_v0 = vadd.f32 %v4844_v41, %v4276_v48  ;;  %v4287_v49 = vadd.f32 %v5337_v39, %v5327_v22  ;;  %v4323_v23 = vadd.f32 %v5545_v50, %v4315_v47 }
0x1b51   : > { %v4198_v51 = vpop.f32.mrf.mxu1 }
0x1b52   : > { %v4316_v52 = vadd.f32 %v4844_v41, %v4287_v49  ;;  %v4279_v54 = vadd.f32 %v4278_v40, %v4198_v51  ;;  %v4335_v53 = vsel %vm1347_vm1, %v4323_v23, 0.0  ;;  %v4321_v57 = vadd.f32 %v5546_v56, %v4313_v0 }
0x1b53   : > { %4336 = vadd.xlane.f32.xlu0 %v4335_v53  ;;  %v5330_v58 = vpop.f32.mrf.mxu1 }
0x1b54   : > { %v4314_v62 = vadd.f32 %v4844_v41, %v4279_v54  ;;  %v4300_v5 = vadd.f32 %v5340_v45, %v5330_v58  ;;  %v4324_v8 = vadd.f32 %v5547_v7, %v4316_v52  ;;  %v4329_v16 = vsel %vm1347_vm1, %v4321_v57, 0.0 }
0x1b55   : > { %v4211_v10 = vpop.f32.mrf.mxu1 }
0x1b56   : > { %v4292_v15 = vadd.f32 %v4291_v63, %v4211_v10  ;;  %v4338_v44 = vsel %vm1347_vm1, %v4324_v8, 0.0  ;;  %v4322_v55 = vadd.f32 %v5548_v17, %v4314_v62  ;;  %v4319_v26 = vadd.f32 %v4844_v41, %v4300_v5 }
0x1b57   : > { %4339 = vadd.xlane.f32.xlu1 %v4338_v44  ;;  %4330 = vadd.xlane.f32.xlu0 %v4329_v16  ;;  %v5331_v2 = vpop.f32.mrf.mxu1 }
0x1b58   : > { %v4317_v12 = vadd.f32 %v4844_v41, %v4292_v15  ;;  %v4303_v14 = vadd.f32 %v5341_v9, %v5331_v2  ;;  %v4332_v31 = vsel %vm1347_vm1, %v4322_v55, 0.0  ;;  %v4327_v37 = vadd.f32 %v5550_v4, %v4319_v26 }
0x1b59   : > { %v4214_v29 = vpop.f32.mrf.mxu1 }
0x1b5a   : > { %v4295_v30 = vadd.f32 %v4294_v28, %v4214_v29  ;;  %v4325_v33 = vadd.f32 %v5549_v32, %v4317_v12  ;;  %v4320_v34 = vadd.f32 %v4844_v41, %v4303_v14  ;;  %v4347_v18 = vsel %vm1347_vm1, %v4327_v37, 0.0 }
0x1b5b   : > { %4333 = vadd.xlane.f32.xlu1 %v4332_v31 }
0x1b5c   : > { %v4318_v35 = vadd.f32 %v4844_v41, %v4295_v30  ;;  %v4341_v36 = vsel %vm1347_vm1, %v4325_v33, 0.0  ;;  %v4328_v42 = vadd.f32 %v5552_v20, %v4320_v34 }
0x1b5d   : > { %4342 = vadd.xlane.f32.xlu0 %v4341_v36 }
0x1b5e   : > { %v4326_v1 = vadd.f32 %v5551_v11, %v4318_v35  ;;  %v4350_v21 = vsel %vm1347_vm1, %v4328_v42, 0.0 }
0x1b60   : > { %v4344_v6 = vsel %vm1347_vm1, %v4326_v1, 0.0 }
0x1b61   : > { %4345 = vadd.xlane.f32.xlu1 %v4344_v6  ;;  %4348 = vadd.xlane.f32.xlu0 %v4347_v18 }
0x1b65   : > { %4351 = vadd.xlane.f32.xlu1 %v4350_v21 }
0x1bdc   : > { %v4337_v13 = vpop.xlane.xlu0 %4336 }
0x1bdd   : > { %v4355_v61 = vmul.f32 0.03125, %v4337_v13 }
0x1bdf   : > { %v6337_v25 = vsub.f32 %v4323_v23, %v4355_v61 }
0x1be0   : > { %v4340_v60 = vpop.xlane.xlu1 %4339  ;;  %v4331_v3 = vpop.xlane.xlu0 %4330 }
0x1be1   : > { %v4356_v24 = vmul.f32 0.03125, %v4340_v60  ;;  %v4353_v27 = vmul.f32 0.03125, %v4331_v3  ;;  %v4371_v38 = vmul.f32 %v6337_v25, %v6337_v25  ;;  %v4846_v60 = vld [vmem:[%s5807_s13] ss:$0 sm:$0xff] }
0x1be3   : > { %v6341_v19 = vsub.f32 %v4324_v8, %v4356_v24  ;;  %v6343_v39 = vsub.f32 %v4321_v57, %v4353_v27  ;;  %v4383_v40 = vsel %vm1347_vm1, %v4371_v38, 0.0 }
0x1be4   : > { %v4334_v59 = vpop.xlane.xlu1 %4333  ;;  %4384 = vadd.xlane.f32.xlu0 %v4383_v40 }
0x1be5   : > { %v4354_v41 = vmul.f32 0.03125, %v4334_v59  ;;  %v4372_v43 = vmul.f32 %v6341_v19, %v6341_v19  ;;  %v4369_v45 = vmul.f32 %v6343_v39, %v6343_v39 }
0x1be6   : > { %v4343_v46 = vpop.xlane.xlu0 %4342 }
0x1be7   : > { %v6350_v47 = vsub.f32 %v4322_v55, %v4354_v41  ;;  %v4357_v48 = vmul.f32 0.03125, %v4343_v46  ;;  %v4386_v22 = vsel %vm1347_vm1, %v4372_v43, 0.0  ;;  %v4377_v0 = vsel %vm1347_vm1, %v4369_v45, 0.0 }
0x1be8   : > { %4387 = vadd.xlane.f32.xlu1 %v4386_v22  ;;  %4378 = vadd.xlane.f32.xlu0 %v4377_v0 }
0x1be9   : > { %v6354_v49 = vsub.f32 %v4325_v33, %v4357_v48  ;;  %v4370_v50 = vmul.f32 %v6350_v47, %v6350_v47 }
0x1bea   : > { %v4346_v23 = vpop.xlane.xlu1 %4345  ;;  %v4349_v63 = vpop.xlane.xlu0 %4348 }
0x1beb   : > { %v4358_v51 = vmul.f32 0.03125, %v4346_v23  ;;  %v4359_v52 = vmul.f32 0.03125, %v4349_v63  ;;  %v4380_v54 = vsel %vm1347_vm1, %v4370_v50, 0.0  ;;  %v4373_v53 = vmul.f32 %v6354_v49, %v6354_v49 }
0x1bec   : > { %4381 = vadd.xlane.f32.xlu1 %v4380_v54 }
0x1bed   : > { %v6361_v56 = vsub.f32 %v4326_v1, %v4358_v51  ;;  %v6363_v57 = vsub.f32 %v4327_v37, %v4359_v52  ;;  %v4389_v58 = vsel %vm1347_vm1, %v4373_v53, 0.0 }
0x1bee   : > { %v4352_v62 = vpop.xlane.xlu1 %4351  ;;  %4390 = vadd.xlane.f32.xlu0 %v4389_v58 }
0x1bef   : > { %v4360_v5 = vmul.f32 0.03125, %v4352_v62  ;;  %v4374_v7 = vmul.f32 %v6361_v56, %v6361_v56  ;;  %v4375_v8 = vmul.f32 %v6363_v57, %v6363_v57 }
0x1bf1   : > { %v6370_v9 = vsub.f32 %v4328_v42, %v4360_v5  ;;  %v4392_v10 = vsel %vm1347_vm1, %v4374_v7, 0.0  ;;  %v4395_v15 = vsel %vm1347_vm1, %v4375_v8, 0.0  ;;  %v4845_v42 = vld [vmem:[%s5802_s6] ss:$0 sm:$0xff] }
0x1bf2   : > { %4393 = vadd.xlane.f32.xlu1 %v4392_v10  ;;  %4396 = vadd.xlane.f32.xlu0 %v4395_v15 }
0x1bf3   : > { %v4376_v44 = vmul.f32 %v6370_v9, %v6370_v9 }
0x1bf5   : > { %v4398_v16 = vsel %vm1347_vm1, %v4376_v44, 0.0 }
0x1bf6   : > { %4399 = vadd.xlane.f32.xlu1 %v4398_v16 }
0x1c6d   : > { %v4385_v17 = vpop.xlane.xlu0 %4384 }
0x1c6e   : > { %v4403_v55 = vmul.f32 0.03125, %v4385_v17 }
0x1c70   : > { %v4411_v2 = vadd.f32 1e-05, %v4403_v55 }
0x1c71   : > { %v4388_v26 = vpop.xlane.xlu1 %4387  ;;  %v4379_v12 = vpop.xlane.xlu0 %4378 }
0x1c72   : > { %5529 = vrsqrt.f32 %v4411_v2  ;;  %v4404_v14 = vmul.f32 0.03125, %v4388_v26  ;;  %v4401_v28 = vmul.f32 0.03125, %v4379_v12 }
0x1c74   : > { %v4412_v29 = vadd.f32 1e-05, %v4404_v14  ;;  %v4409_v30 = vadd.f32 1e-05, %v4401_v28 }
0x1c75   : > { %v4382_v31 = vpop.xlane.xlu1 %4381 }
0x1c76   : > { %5531 = vrsqrt.f32 %v4412_v29  ;;  %v4402_v32 = vmul.f32 0.03125, %v4382_v31 }
0x1c77   : > { %5533 = vrsqrt.f32 %v4409_v30  ;;  %v4391_v33 = vpop.xlane.xlu0 %4390 }
0x1c78   : > { %v4410_v34 = vadd.f32 1e-05, %v4402_v32  ;;  %v4405_v35 = vmul.f32 0.03125, %v4391_v33 }
0x1c7a   : > { %5535 = vrsqrt.f32 %v4410_v34  ;;  %v4413_v36 = vadd.f32 1e-05, %v4405_v35 }
0x1c7b   : > { %v4394_v4 = vpop.xlane.xlu1 %4393  ;;  %v4397_v37 = vpop.xlane.xlu0 %4396 }
0x1c7c   : > { %5537 = vrsqrt.f32 %v4413_v36  ;;  %v4406_v11 = vmul.f32 0.03125, %v4394_v4  ;;  %v4407_v1 = vmul.f32 0.03125, %v4397_v37 }
0x1c7e   : > { %v4414_v6 = vadd.f32 1e-05, %v4406_v11  ;;  %v4415_v18 = vadd.f32 1e-05, %v4407_v1 }
0x1c7f   : > { %v5530_v20 = vpop.eup %5529  ;;  %v4400_v21 = vpop.xlane.xlu1 %4399 }
0x1c80   : > { %v4427_v13 = vmul.f32 %v5530_v20, %v6337_v25  ;;  %5539 = vrsqrt.f32 %v4414_v6  ;;  %v4408_v61 = vmul.f32 0.03125, %v4400_v21 }
0x1c81   : > { %5541 = vrsqrt.f32 %v4415_v18 }
0x1c82   : > { %v4442_v3 = vmul.f32 %v4845_v42, %v4427_v13  ;;  %v4416_v24 = vadd.f32 1e-05, %v4408_v61 }
0x1c83   : > { %v5532_v27 = vpop.eup %5531 }
0x1c84   : > { %v5534_v38 = vpop.eup %5533  ;;  %v4457_v40 = vadd.f32 %v4846_v60, %v4442_v3  ;;  %v4428_v59 = vmul.f32 %v5532_v27, %v6341_v19  ;;  %5543 = vrsqrt.f32 %v4416_v24 }
0x1c85   : > { %v4425_v41 = vmul.f32 %v5534_v38, %v6343_v39 }
0x1c86   : > { %4466 = vst.msk [vmem:[%s6382_s16 + $0x10] sm:$0xff] %vm1347_vm1, %v4457_v40  ;;  %v4443_v25 = vmul.f32 %v4845_v42, %v4428_v59 }
0x1c87   : > { %v5536_v43 = vpop.eup %5535  ;;  %v4440_v45 = vmul.f32 %v4845_v42, %v4425_v41 }
0x1c88   : > { %v4458_v46 = vadd.f32 %v4846_v60, %v4443_v25  ;;  %v4426_v48 = vmul.f32 %v5536_v43, %v6350_v47 }
0x1c89   : > { %v5538_v22 = vpop.eup %5537  ;;  %v4455_v0 = vadd.f32 %v4846_v60, %v4440_v45 }
0x1c8a   : > { %4467 = vst.msk [vmem:[%s6382_s16 + $0x18] sm:$0xff] %vm1347_vm1, %v4458_v46  ;;  %v4441_v50 = vmul.f32 %v4845_v42, %v4426_v48  ;;  %v4429_v19 = vmul.f32 %v5538_v22, %v6354_v49 }
0x1c8b   : > { %4464 = vst.msk [vmem:[%s6382_s16] sm:$0xff] %vm1347_vm1, %v4455_v0 }
0x1c8c   : > { %v4456_v39 = vadd.f32 %v4846_v60, %v4441_v50  ;;  %v4444_v23 = vmul.f32 %v4845_v42, %v4429_v19 }
0x1c8d   : > { %v5540_v63 = vpop.eup %5539 }
0x1c8e   : > { %v5542_v51 = vpop.eup %5541  ;;  %4465 = vst.msk [vmem:[%s6382_s16 + $0x8] sm:$0xff] %vm1347_vm1, %v4456_v39  ;;  %v4459_v52 = vadd.f32 %v4846_v60, %v4444_v23  ;;  %v4430_v47 = vmul.f32 %v5540_v63, %v6361_v56 }
0x1c8f   : > { %v4431_v54 = vmul.f32 %v5542_v51, %v6363_v57 }
0x1c90   : > { %4468 = vst.msk [vmem:[%s6382_s16 + $0x20] sm:$0xff] %vm1347_vm1, %v4459_v52  ;;  %v4445_v53 = vmul.f32 %v4845_v42, %v4430_v47 }
0x1c91   : > { %v5544_v49 = vpop.eup %5543  ;;  %v4446_v58 = vmul.f32 %v4845_v42, %v4431_v54 }
0x1c92   : > { %v4460_v62 = vadd.f32 %v4846_v60, %v4445_v53  ;;  %v4432_v5 = vmul.f32 %v5544_v49, %v6370_v9 }
0x1c93   : > { %v4461_v7 = vadd.f32 %v4846_v60, %v4446_v58 }
0x1c94   : > { %4469 = vst.msk [vmem:[%s6382_s16 + $0x28] sm:$0xff] %vm1347_vm1, %v4460_v62  ;;  %v4447_v8 = vmul.f32 %v4845_v42, %v4432_v5 }
0x1c95   : > { %4470 = vst.msk [vmem:[%s6382_s16 + $0x30] sm:$0xff] %vm1347_vm1, %v4461_v7 }
0x1c96   : > { %v4462_v10 = vadd.f32 %v4846_v60, %v4447_v8 }
0x1c98   : > { %4471 = vst.msk [vmem:[%s6382_s16 + $0x38] sm:$0xff] %vm1347_vm1, %v4462_v10 }
0x1c99 PF: > { %s94_s7 = sadd.s32 1, %s5559_s7  }
0x1c9a   : > { %p91_p4 = scmp.ge.s32.totalorder %s94_s7, 4  }
0x1c9c   :  { %93 = sbr.rel (!%p91_p4) target bundleno = 75 (0x4b), region = 293 }

// kernel: two_way_transformer.4
= control target key start
LH: loop header
LB: loop body
LE: loop exit
PB: predicated region body
PF: predicated region fallthrough
CT: control target
= control target key end

     0   :  { %s5568_s6 = smov 1   ;;  %s5569_s10 = smov 2   ;;  %s6439_s0 = inlined_call_operand.smem [shape: u32[42], index: -1, kind: input, shape index: {}] }
   0x1   :  { %s5619_s5 = sld [smem:[%s6439_s0]]   ;;  %s5570_s14 = smov 3  }
   0x2   :  { %s5624_s9 = sld [smem:[%s6439_s0 + %s5568_s6]]   ;;  %s5571_s18 = smov 4  }
   0x3   :  { %s5629_s13 = sld [smem:[%s6439_s0 + %s5569_s10]]   ;;  %s5572_s22 = smov 5  }
   0x4   :  { %s5634_s17 = sld [smem:[%s6439_s0 + %s5570_s14]]   ;;  %s5573_s26 = smov 6  }
   0x5   :  { %s5639_s21 = sld [smem:[%s6439_s0 + %s5571_s18]]   ;;  %s5574_s30 = smov 7  }
   0x6   :  { %s5644_s25 = sld [smem:[%s6439_s0 + %s5572_s22]]   ;;  %s5575_s4 = smov 8  }
   0x7   :  { %6458 = sst [smem:[#allocation2_spill]] %s5619_s5  ;;  %s5576_s10 = smov 9  }
   0x8   :  { %6459 = sst [smem:[#allocation3_spill]] %s5624_s9  ;;  %s5577_s15 = smov 10  }
   0x9   :  { %s5649_s29 = sld [smem:[%s6439_s0 + %s5573_s26]]   ;;  %s5578_s20 = smov 11  }
   0xa   :  { %s5654_s3 = sld [smem:[%s6439_s0 + %s5574_s30]]   ;;  %s5579_s26 = smov 12  }
   0xb   :  { %s5659_s8 = sld [smem:[%s6439_s0 + %s5575_s4]]   ;;  %s5580_s1 = smov 13  }
   0xc   :  { %s5664_s14 = sld [smem:[%s6439_s0 + %s5576_s10]]   ;;  %s5581_s7 = smov 14  }
   0xd   :  { %s5669_s19 = sld [smem:[%s6439_s0 + %s5577_s15]]   ;;  %s5582_s15 = smov 15  }
   0xe   :  { %s5674_s24 = sld [smem:[%s6439_s0 + %s5578_s20]]   ;;  %s5583_s22 = smov 16  }
   0xf   :  { %s5679_s30 = sld [smem:[%s6439_s0 + %s5579_s26]]   ;;  %s5584_s28 = smov 17  }
  0x10   :  { %6460 = sst [smem:[#allocation4_spill]] %s5654_s3 }
  0x11   :  { %6461 = sst [smem:[#allocation5_spill]] %s5659_s8 }
  0x12   :  { %s5684_s6 = sld [smem:[%s6439_s0 + %s5580_s1]]  }
  0x13   :  { %s5689_s12 = sld [smem:[%s6439_s0 + %s5581_s7]]   ;;  %s5585_s7 = smov 18  }
  0x14   :  { %s5694_s20 = sld [smem:[%s6439_s0 + %s5582_s15]]   ;;  %s5586_s15 = smov 19  }
  0x15   :  { %s5699_s27 = sld [smem:[%s6439_s0 + %s5583_s22]]   ;;  %s5587_s22 = smov 20  }
  0x16   :  { %s5704_s4 = sld [smem:[%s6439_s0 + %s5584_s28]]   ;;  %s5588_s28 = smov 21  }
  0x18   :  { %6462 = sst [smem:[#allocation6_spill]] %s5684_s6 }
  0x19   :  { %s5709_s6 = sld [smem:[%s6439_s0 + %s5585_s7]]   ;;  %s5589_s7 = smov 22  }
  0x1a   :  { %6463 = sst [smem:[#allocation7_spill]] %s5694_s20 }
  0x1b   :  { %6464 = sst [smem:[#allocation8_spill]] %s5699_s27 }
  0x1c   :  { %6465 = sst [smem:[#allocation9_spill]] %s5704_s4 }
  0x1d   :  { %s5714_s20 = sld [smem:[%s6439_s0 + %s5586_s15]]   ;;  %s5590_s15 = smov 23  }
  0x1e   :  { %s5719_s27 = sld [smem:[%s6439_s0 + %s5587_s22]]   ;;  %s5591_s22 = smov 24  }
  0x1f   :  { %6466 = sst [smem:[#allocation10_spill]] %s5709_s6 }
  0x20   :  { %s5724_s4 = sld [smem:[%s6439_s0 + %s5588_s28]]   ;;  %s5592_s28 = smov 25  }
  0x21   :  { %s5729_s6 = sld [smem:[%s6439_s0 + %s5589_s7]]   ;;  %s5593_s7 = smov 26  }
  0x23   :  { %6467 = sst [smem:[#allocation11_spill]] %s5714_s20 }
  0x24   :  { %6468 = sst [smem:[#allocation12_spill]] %s5719_s27 }
  0x25   :  { %s5734_s20 = sld [smem:[%s6439_s0 + %s5590_s15]]   ;;  %s5594_s15 = smov 27  }
  0x26   :  { %6469 = sst [smem:[#allocation13_spill]] %s5724_s4 }
  0x27   :  { %6470 = sst [smem:[#allocation14_spill]] %s5729_s6 }
  0x28   :  { %s5739_s27 = sld [smem:[%s6439_s0 + %s5591_s22]]   ;;  %s5595_s22 = smov 28  }
  0x29   :  { %s5744_s4 = sld [smem:[%s6439_s0 + %s5592_s28]]   ;;  %s5596_s28 = smov 29  }
  0x2a   :  { %s5749_s6 = sld [smem:[%s6439_s0 + %s5593_s7]]   ;;  %s5597_s7 = smov 30  }
  0x2b   :  { %6471 = sst [smem:[#allocation15_spill]] %s5734_s20 }
  0x2c   :  { %s5754_s20 = sld [smem:[%s6439_s0 + %s5594_s15]]   ;;  %s5598_s15 = smov 31  }
  0x2e   :  { %6472 = sst [smem:[#allocation16_spill]] %s5739_s27 }
  0x2f   :  { %6473 = sst [smem:[#allocation17_spill]] %s5744_s4 }
  0x30   :  { %6474 = sst [smem:[#allocation18_spill]] %s5749_s6 }
  0x31   :  { %s5759_s27 = sld [smem:[%s6439_s0 + %s5595_s22]]   ;;  %s5599_s22 = smov 32  }
  0x32   :  { %6475 = sst [smem:[#allocation19_spill]] %s5754_s20 }
  0x33   :  { %s5764_s4 = sld [smem:[%s6439_s0 + %s5596_s28]]   ;;  %s5600_s28 = smov 33  }
  0x34   :  { %s5769_s6 = sld [smem:[%s6439_s0 + %s5597_s7]]   ;;  %s5601_s7 = smov 34  }
  0x35   :  { %s5774_s20 = sld [smem:[%s6439_s0 + %s5598_s15]]   ;;  %s5602_s15 = smov 35  }
  0x37   :  { %6476 = sst [smem:[#allocation20_spill]] %s5759_s27 }
  0x38   :  { %s5779_s27 = sld [smem:[%s6439_s0 + %s5599_s22]]   ;;  %s5603_s22 = smov 36  }
  0x39   :  { %6477 = sst [smem:[#allocation21_spill]] %s5764_s4 }
  0x3a   :  { %6478 = sst [smem:[#allocation22_spill]] %s5769_s6 }
  0x3b   :  { %6479 = sst [smem:[#allocation23_spill]] %s5774_s20 }
  0x3c   :  { %s5784_s4 = sld [smem:[%s6439_s0 + %s5600_s28]]   ;;  %s5604_s28 = smov 37  }
  0x3d   :  { %s5789_s6 = sld [smem:[%s6439_s0 + %s5601_s7]]   ;;  %s5605_s7 = smov 38  }
  0x3e   :  { %6480 = sst [smem:[#allocation24_spill]] %s5779_s27 }
  0x3f   :  { %s5794_s20 = sld [smem:[%s6439_s0 + %s5602_s15]]   ;;  %s5606_s15 = smov 39  }
  0x40   :  { %s5799_s27 = sld [smem:[%s6439_s0 + %s5603_s22]]   ;;  %s5607_s22 = smov 40  }
  0x42   :  { %6481 = sst [smem:[#allocation25_spill]] %s5784_s4 }
  0x43   :  { %6482 = sst [smem:[#allocation26_spill]] %s5789_s6 }
  0x44   :  { %s5804_s4 = sld [smem:[%s6439_s0 + %s5604_s28]]   ;;  %s5608_s28 = smov 41  }
  0x45   :  { %6483 = sst [smem:[#allocation27_spill]] %s5794_s20 }
  0x46   :  { %6484 = sst [smem:[#allocation28_spill]] %s5799_s27 }
  0x47   :  { %s5809_s6 = sld [smem:[%s6439_s0 + %s5605_s7]]   ;;  %s5826_s7 = smov 0  }
  0x48   :  { %s5814_s20 = sld [smem:[%s6439_s0 + %s5606_s15]]  }
  0x49   :  { %s5819_s27 = sld [smem:[%s6439_s0 + %s5607_s22]]  }
  0x4a   :  { %6485 = sst [smem:[#allocation29_spill]] %s5804_s4 }
  0x4b   :  { %s5824_s4 = sld [smem:[%s6439_s0 + %s5608_s28]]  }
  0x4c LB: > { %s6486_s8 = sld [smem:[#allocation5_spill]]  ;;  %s4641_s10 = sadd.s32 4294967295, %s5566_s7   ;;  %s5566_s7 = sphi %s5826_s7, %s94_s7  }
  0x4d   : > { %s6487_s3 = sld [smem:[#allocation4_spill]]  ;;  %p4645_p0 = scmp.ge.s32.totalorder %s5566_s7, 1 }
  0x4e   : > { %p1160_p1 = scmp.lt.s32.totalorder %s5566_s7, 3 }
  0x50   : > { %p1161_p2 = pnand %p4645_p0, %p1160_p1 }
  0x51   : > { %s6488_s5 = sld [smem:[#allocation2_spill]] (!%p1161_p2)  ;;  %p1277_p3 = scmp.lt.s32.totalorder (!%p1161_p2), %s4641_s10, 1 }
  0x52   : > { %1164 = sbr.rel (%p1161_p2) target bundleno = 7324 (0x1c9c), region = 180  ;;  %s6489_s9 = sld [smem:[#allocation3_spill]] (!%p1161_p2) }
  0x53   : > { %s6490_s23 = sld [smem:[#allocation7_spill]] (!%p1161_p2) }
  0x54   : > { %s6491_s26 = sld [smem:[#allocation24_spill]] (!%p1161_p2) }
  0x55   : > { %s6492_s28 = sld [smem:[#allocation25_spill]] (!%p1161_p2) }
  0x56   : > { %s6493_s1 = sld [smem:[#allocation6_spill]] (!%p1161_p2) }
  0x57   : > { %v5405_v0 = vld [vmem:[%s5649_s29 + $0x8] sm:$0xff]   ;;  %v5609_v1 = vmov 0.0   ;;  %v5407_v3 = vld [vmem:[%s5649_s29] sm:$0xff]   ;;  %vm5610_vm0 = vmmov 0   ;;  %s6515_s10 = smov (!%p1277_p3, %s4641_s10), 1  ;;  %vm1349_vm1 = vcmask 261120  }
  0x58   : > { %5012 = vmatprep.subr.bf16.mxu1 %v5609_v1  ;;  %5004 = vmatprep.subr.bf16.mxu0 %v5609_v1  ;;  %v5406_v2 = vld [vmem:[%s5639_s21 + $0x8] sm:$0xff]   ;;  %v5408_v4 = vld [vmem:[%s5639_s21] sm:$0xff]   ;;  %s5849_s0 = sshll.u32 %s6515_s10, 3  ;;  %vm1524_vm2 = vcmask 130048   ;;  %vm1572_vm3 = vcmask 64512   ;;  %vm1589_vm4 = vcmask 1043456  }
  0x59   : > { %5013 = vmatpush3.bf16.msra.mxu1 %v5405_v0  ;;  %5016 = vmatprep.mubr.msk.bf16.mxu1 %vm5610_vm0, %v5609_v1  ;;  %s1280_s11 = scalar_lea.vmem %s6488_s5, %s5849_s0  ;;  %s5856_s15 = scalar_lea.vmem %s5629_s13, %s5849_s0  ;;  %v4659_v9 = vld [vmem:[%s6487_s3] ss:$0 sm:$0xff]  ;;  %v5409_v24 = vld [vmem:[%s6486_s8 + $0x8] sm:$0xff]   ;;  %v5412_v46 = vld [vmem:[%s5639_s21 + $0x18] sm:$0xff]   ;;  %vm2425_vm5 = vcmask 523264  }
  0x5a   : > { %5005 = vmatpush3.bf16.msra.mxu0 %v5406_v2  ;;  %5014 = vmatprep.subr.bf16.mxu1 %v5609_v1  ;;  %v5858_v5 = vld [vmem:[%s1280_s11] sm:$0xff]  ;;  %v5414_v47 = vld [vmem:[%s5639_s21 + $0x10] sm:$0xff]   ;;  %v5411_v51 = vld [vmem:[%s5649_s29 + $0x18] sm:$0xff]   ;;  %s5953_s16 = sshll.u32 %s6515_s10, 6  ;;  %s6494_s2 = sld [smem:[#allocation8_spill]] }
  0x5b   : > { %5006 = vmatprep.subr.bf16.mxu0 %v5609_v1  ;;  %5008 = vmatprep.mubr.msk.bf16.mxu0 %vm5610_vm0, %v5609_v1  ;;  %v5862_v6 = vld [vmem:[%s5856_s15] sm:$0xff]  ;;  %v5888_v26 = vpack.c.bf16 %v5858_v5, %v5858_v5  ;;  %v5413_v53 = vld [vmem:[%s5649_s29 + $0x10] sm:$0xff]   ;;  %s5957_s18 = scalar_lea.vmem %s6489_s9, %s5953_s16  ;;  %s5961_s22 = scalar_lea.vmem %s5634_s17, %s5953_s16 }
  0x5c   : > { %v1323_v7 = vadd.f32 %v5862_v6, %v5858_v5  ;;  %v4655_v13 = vld [vmem:[%s5644_s25] ss:$0 sm:$0xff]  ;;  %v4683_v62 = vld [vmem:[%s6487_s3 + $0x1] ss:$0 sm:$0xff]  ;;  %s6495_s10 = sld [smem:[#allocation9_spill]]  ;;  %s1298_s9 = scalar_lea.vmem %s5819_s27, %s5849_s0 }
  0x5d   : > { %5015 = vmatpush3.bf16.msra.mxu1 %v5407_v3  ;;  %v5410_v25 = vld [vmem:[%s6486_s8] sm:$0xff]   ;;  %s6496_s11 = sld [smem:[#allocation10_spill]] }
  0x5e   : > { %5007 = vmatpush3.bf16.msra.mxu0 %v5408_v4  ;;  %5028 = vmatprep.subr.bf16.mxu1 %v5609_v1  ;;  %v5866_v8 = vpack.c.bf16 %v1323_v7, %v1323_v7  ;;  %v4663_v38 = vld [vmem:[%s5664_s14] ss:$0 sm:$0xff]  ;;  %v4674_v2 = vld [vmem:[%s5644_s25 + $0x1] ss:$0 sm:$0xff]  ;;  %s6503_s3 = sld [smem:[#allocation15_spill]] }
  0x5f   : > { %5020 = vmatprep.subr.bf16.mxu0 %v5609_v1  ;;  %s6508_s5 = sld [smem:[#allocation29_spill]] }
  0x60   : > { %5017 = vmatmul.mubr.msk.bf16.vlgmr.msra.gmra.mxu1 %vm1349_vm1, %v5866_v8  ;;  %s6513_s0 = sld [smem:[#allocation23_spill]] }
  0x61   : > { %5009 = vmatmul.mubr.msk.bf16.vlgmr.msra.gmra.mxu0 %vm1349_vm1, %v5866_v8  ;;  %5030 = vmatprep.mubr.msk.bf16.mxu1 %vm5610_vm0, %v5609_v1 }
  0x62   : > { %5024 = vmatprep.mubr.msk.bf16.mxu0 %vm5610_vm0, %v5609_v1  ;;  %5021 = vmatpush3.bf16.msra.mxu0 %v5409_v24 }
  0x63   : > { %5022 = vmatprep.subr.bf16.mxu0 %v5609_v1 }
  0x66   : > { %5023 = vmatpush3.bf16.msra.mxu0 %v5410_v25  ;;  %v4692_v25 = vld [vmem:[%s5664_s14 + $0x1] ss:$0 sm:$0xff] }
  0x67   : > { %5034 = vmatprep.subr.bf16.mxu0 %v5609_v1 }
  0x69   : > { %5025 = vmatmul.mubr.msk.bf16.vlgmr.msra.gmra.mxu0 %vm1349_vm1, %v5888_v26 }
  0x6a   : > { %5036 = vmatprep.mubr.msk.bf16.mxu0 %vm5610_vm0, %v5609_v1 }
 0x120   : > { %v1450_v10 = vpop.f32.mrf.mxu1 }
 0x121   : > { %v1387_v11 = vpop.f32.mrf.mxu0  ;;  %v1451_v12 = vadd.f32 %v4659_v9, %v1450_v10 }
 0x122   : > { %v5018_v14 = vpop.f32.mrf.mxu1  ;;  %v1388_v20 = vadd.f32 %v4655_v13, %v1387_v11  ;;  %v5416_v13 = vld [vmem:[%s6486_s8 + $0x10] sm:$0xff]  }
 0x123   : > { %v5010_v15 = vpop.f32.mrf.mxu0  ;;  %v1523_v16 = vpack.c.bf16 %v1451_v12, %v1451_v12  ;;  %v5415_v12 = vld [vmem:[%s6486_s8 + $0x18] sm:$0xff]   ;;  %s6509_s8 = sld [smem:[#allocation17_spill]] }
 0x124   : > { %v1453_v17 = vpop.f32.mrf.mxu1  ;;  %v1522_v23 = vpack.c.bf16 %v1388_v20, %v1388_v20 }
 0x125   : > { %v1390_v18 = vpop.f32.mrf.mxu0  ;;  %v1529_v19 = vsel %vm1524_vm2, %v1523_v16, 0 }
 0x126   : > { %v5019_v21 = vpop.f32.mrf.mxu1  ;;  %5029 = vmatpush3.bf16.xpose.msra.mxu1 %v1529_v19 }
 0x127   : > { %v5011_v22 = vpop.f32.mrf.mxu0  ;;  %5040 = vmatprep.subr.bf16.mxu1 %v5609_v1 }
 0x129   : > { %v1516_v39 = vpop.f32.mrf.mxu0 }
 0x12a   : > { %v1517_v40 = vadd.f32 %v4663_v38, %v1516_v39  ;;  %v5418_v39 = vld [vmem:[%s5669_s19 + $0x8] sm:$0xff]  }
 0x12b   : > { %v5026_v41 = vpop.f32.mrf.mxu0 }
 0x12c   : > { %v1585_v42 = vpack.c.bf16 %v1517_v40, %v1517_v40 }
 0x12d   : > { %5031 = vmatmul.mubr.msk.bf16.vlgmr.msra.gmra.mxu1 %vm1524_vm2, %v1522_v23  ;;  %v1519_v43 = vpop.f32.mrf.mxu0 }
 0x12e   : > { %5044 = vmatprep.mubr.msk.bf16.mxu1 %vm5610_vm0, %v5609_v1  ;;  %v1591_v44 = vsel %vm1589_vm4, %v1585_v42, 0  ;;  %5041 = vmatpush3.bf16.msra.mxu1 %v5412_v46 }
 0x12f   : > { %v5027_v45 = vpop.f32.mrf.mxu0  ;;  %5035 = vmatpush3.bf16.msra.mxu0 %v1591_v44  ;;  %5042 = vmatprep.subr.bf16.mxu1 %v5609_v1 }
 0x130   : > { %5048 = vmatprep.subr.bf16.mxu0 %v5609_v1 }
 0x132   : > { %5043 = vmatpush3.bf16.msra.mxu1 %v5414_v47 }
 0x133   : > { %5056 = vmatprep.subr.bf16.mxu1 %v5609_v1 }
 0x135   : > { %5045 = vmatmul.mubr.msk.bf16.vlgmr.msra.gmra.mxu1 %vm1349_vm1, %v5866_v8 }
 0x136   : > { %5060 = vmatprep.mubr.msk.bf16.mxu1 %vm5610_vm0, %v5609_v1  ;;  %5057 = vmatpush3.bf16.msra.mxu1 %v5415_v12 }
 0x137   : > { %5058 = vmatprep.subr.bf16.mxu1 %v5609_v1 }
 0x13a   : > { %5059 = vmatpush3.bf16.msra.mxu1 %v5416_v13  ;;  %v1319_v13 = vld [vmem:[%s5961_s22 + $0x20] sm:$0xff] }
 0x13b   : > { %5070 = vmatprep.subr.bf16.mxu1 %v5609_v1 }
 0x13d   : > { %5061 = vmatmul.mubr.msk.bf16.vlgmr.msra.gmra.mxu1 %vm1349_vm1, %v5888_v26 }
 0x13e   : > { %5072 = vmatprep.mubr.msk.bf16.mxu1 %vm5610_vm0, %v5609_v1 }
 0x1ed   : > { %v1565_v27 = vpop.f32.mrf.mxu1 }
 0x1ee   : > { %v1571_v28 = vmul.f32 0.25, %v1565_v27 }
 0x1ef   : > { %v5032_v29 = vpop.f32.mrf.mxu1 }
 0x1f0   : > { %v1573_v30 = vsel %vm1572_vm3, %v1571_v28, -inf }
 0x1f1   : > { %1574 = vmax.xlane.f32.xlu0 %v1573_v30  ;;  %v1568_v31 = vpop.f32.mrf.mxu1 }
 0x1f3   : > { %v5033_v32 = vpop.f32.mrf.mxu1 }
 0x1f5   : > { %v1695_v54 = vpop.f32.mrf.mxu1 }
 0x1f6   : > { %v1696_v9 = vadd.f32 %v4674_v2, %v1695_v54  ;;  %v5976_v2 = vld [vmem:[%s5957_s18 + $0x10] sm:$0xff] }
 0x1f7   : > { %v5046_v55 = vpop.f32.mrf.mxu1 }
 0x1f8   : > { %v1831_v11 = vpack.c.bf16 %v1696_v9, %v1696_v9  ;;  %v5985_v9 = vld [vmem:[%s5957_s18 + $0x20] sm:$0xff] }
 0x1f9   : > { %v1698_v56 = vpop.f32.mrf.mxu1 }
 0x1fb   : > { %v5047_v57 = vpop.f32.mrf.mxu1 }
 0x1fd   : > { %v1825_v26 = vpop.f32.mrf.mxu1 }
 0x1fe   : > { %v1826_v27 = vadd.f32 %v4692_v25, %v1825_v26 }
 0x200   : > { %v1892_v29 = vpack.c.bf16 %v1826_v27, %v1826_v27 }
 0x202   : > { %v1897_v31 = vsel %vm1589_vm4, %v1892_v29, 0 }
 0x203   : > { %5071 = vmatpush3.bf16.msra.mxu1 %v1897_v31  ;;  %v5421_v31 = vld [vmem:[%s5679_s30 + $0x8] sm:$0xff]  }
 0x204   : > { %5082 = vmatprep.subr.bf16.mxu1 %v5609_v1 }
 0x27a   : > { %v1575_v33 = vpop.xlane.xlu0 %1574 }
 0x27b   : > { %v1576_v34 = vsub.f32 %v1571_v28, %v1575_v33  ;;  %v5062_v28 = vpop.f32.mrf.mxu1 }
 0x27d   : > { %v1577_v35 = vmul.f32 1.442695, %v1576_v34  ;;  %v1828_v30 = vpop.f32.mrf.mxu1 }
 0x27f   : > { %5449 = vpow2.f32 %v1577_v35  ;;  %v5063_v32 = vpop.f32.mrf.mxu1 }
 0x280   : > { %v5422_v32 = vld [vmem:[%s5679_s30] sm:$0xff]  }
 0x28c   : > { %v5450_v36 = vpop.eup %5449 }
 0x28d   : > { %v1579_v37 = vsel %vm1572_vm3, %v5450_v36, 0.0 }
 0x28e   : > { %1580 = vadd.xlane.f32.xlu0 %v1579_v37 }
 0x317   : > { %v1581_v48 = vpop.xlane.xlu0 %1580 }
 0x318   : > { %5451 = vrcp.f32 %v1581_v48 }
 0x325   : > { %v5452_v49 = vpop.eup %5451 }
 0x326   : > { %v1583_v50 = vmul.f32 %v5452_v49, %v5450_v36  ;;  %v5417_v36 = vld [vmem:[%s5669_s19] sm:$0xff]  }
 0x328   : > { %v1584_v52 = vpack.c.bf16 %v1583_v50, %v1583_v50  ;;  %v4704_v50 = vld [vmem:[%s5674_s24] ss:$0 sm:$0xff] }
 0x32a   : > { %5037 = vmatmul.mubr.msk.bf16.vlgmr.msra.gmra.mxu0 %vm1572_vm3, %v1584_v52 }
 0x32b   : > { %5049 = vmatpush3.bf16.msra.mxu0 %v5411_v51  ;;  %5052 = vmatprep.mubr.msk.bf16.mxu0 %vm5610_vm0, %v5609_v1 }
 0x32c   : > { %5050 = vmatprep.subr.bf16.mxu0 %v5609_v1 }
 0x32f   : > { %5051 = vmatpush3.bf16.msra.mxu0 %v5413_v53 }
 0x330   : > { %5064 = vmatprep.subr.bf16.mxu0 %v5609_v1 }
 0x332   : > { %5053 = vmatmul.mubr.msk.bf16.vlgmr.msra.gmra.mxu0 %vm1349_vm1, %v5866_v8 }
 0x333   : > { %5066 = vmatprep.mubr.msk.bf16.mxu0 %vm5610_vm0, %v5609_v1 }
 0x3ea   : > { %v1627_v58 = vpop.f32.mrf.mxu0 }
 0x3eb   : > { %v1633_v38 = vpack.c.bf16 %v1627_v58, %v1627_v58  ;;  %v5420_v58 = vld [vmem:[%s5689_s12] sm:$0xff]  }
 0x3ec   : > { %v5038_v59 = vpop.f32.mrf.mxu0 }
 0x3ed   : > { %v5966_v59 = vld [vmem:[%s5957_s18] sm:$0xff] }
 0x3ee   : > { %v1630_v60 = vpop.f32.mrf.mxu0 }
 0x3ef   : > { %v5969_v60 = vld [vmem:[%s5957_s18 + $0x8] sm:$0xff] }
 0x3f0   : > { %v5039_v61 = vpop.f32.mrf.mxu0 }
 0x3f1   : > { %v1315_v61 = vld [vmem:[%s5961_s22] sm:$0xff] }
 0x3f2   : > { %v1760_v63 = vpop.f32.mrf.mxu0 }
 0x3f3   : > { %v1761_v0 = vadd.f32 %v4683_v62, %v1760_v63  ;;  %v1316_v62 = vld [vmem:[%s5961_s22 + $0x8] sm:$0xff]  ;;  %v2081_v63 = vadd.f32 %v1315_v61, %v5966_v59 }
 0x3f4   : > { %v5054_v3 = vpop.f32.mrf.mxu0 }
 0x3f5   : > { %v1832_v4 = vpack.c.bf16 %v1761_v0, %v1761_v0  ;;  %v2082_v0 = vadd.f32 %v1316_v62, %v5969_v60  ;;  %v5979_v3 = vld [vmem:[%s5957_s18 + $0x18] sm:$0xff] }
 0x3f6   : > { %v1763_v7 = vpop.f32.mrf.mxu0 }
 0x3f7   : > { %v1837_v8 = vsel %vm1524_vm2, %v1832_v4, 0  ;;  %v1317_v4 = vld [vmem:[%s5961_s22 + $0x10] sm:$0xff]  ;;  %v1318_v7 = vld [vmem:[%s5961_s22 + $0x18] sm:$0xff] }
 0x3f8   : > { %v5055_v10 = vpop.f32.mrf.mxu0  ;;  %5065 = vmatpush3.bf16.xpose.msra.mxu0 %v1837_v8  ;;  %v2083_v8 = vadd.f32 %v1317_v4, %v5976_v2  ;;  %v2084_v12 = vadd.f32 %v1318_v7, %v5979_v3  ;;  %v4706_v4 = vld [vmem:[%s6492_s28] ss:$0 sm:$0xff]  ;;  %s6499_s28 = sld [smem:[#allocation14_spill]] }
 0x3f9   : > { %5076 = vmatprep.subr.bf16.mxu0 %v5609_v1  ;;  %v5988_v10 = vld [vmem:[%s5957_s18 + $0x28] sm:$0xff] }
 0x3ff   : > { %5067 = vmatmul.mubr.msk.bf16.vlgmr.msra.gmra.mxu0 %vm1524_vm2, %v1831_v11  ;;  %v5990_v11 = vpack.c.bf16 %v2082_v0, %v2081_v63  ;;  %v4705_v63 = vld [vmem:[%s6491_s26] ss:$0 sm:$0xff]  ;;  %s6498_s26 = sld [smem:[#allocation12_spill]] }
 0x400   : > { %5078 = vmatprep.mubr.msk.bf16.mxu0 %vm5610_vm0, %v5609_v1  ;;  %5077 = vmatpush3.bf16.msra.mxu0 %v5418_v39 }
 0x401   : > { %5088 = vmatprep.subr.bf16.mxu0 %v5609_v1 }
 0x4bf   : > { %v1873_v14 = vpop.f32.mrf.mxu0 }
 0x4c0   : > { %v1879_v15 = vmul.f32 0.25, %v1873_v14  ;;  %v1320_v14 = vld [vmem:[%s5961_s22 + $0x28] sm:$0xff] }
 0x4c1   : > { %v5068_v16 = vpop.f32.mrf.mxu0 }
 0x4c2   : > { %v1880_v17 = vsel %vm1572_vm3, %v1879_v15, -inf  ;;  %v2086_v16 = vadd.f32 %v1320_v14, %v5988_v10  ;;  %v4707_v14 = vld [vmem:[%s6493_s1] ss:$0 sm:$0xff] }
 0x4c3   : > { %1881 = vmax.xlane.f32.xlu1 %v1880_v17  ;;  %v1876_v18 = vpop.f32.mrf.mxu0  ;;  %v5999_v17 = vpack.c.bf16 %v2084_v12, %v2083_v8 }
 0x4c4   : > { %v6002_v18 = vld [vmem:[%s5957_s18 + $0x30] sm:$0xff] }
 0x4c5   : > { %v5069_v19 = vpop.f32.mrf.mxu0 }
 0x54c   : > { %v1882_v20 = vpop.xlane.xlu1 %1881 }
 0x54d   : > { %v1883_v21 = vsub.f32 %v1879_v15, %v1882_v20  ;;  %v2085_v15 = vadd.f32 %v1319_v13, %v5985_v9  ;;  %v6007_v20 = vld [vmem:[%s5957_s18 + $0x38] sm:$0xff] }
 0x54f   : > { %v1884_v22 = vmul.f32 1.442695, %v1883_v21  ;;  %v6004_v19 = vpack.c.bf16 %v2086_v16, %v2085_v15  ;;  %v1321_v21 = vld [vmem:[%s5961_s22 + $0x30] sm:$0xff] }
 0x551   : > { %5453 = vpow2.f32 %v1884_v22  ;;  %v1322_v22 = vld [vmem:[%s5961_s22 + $0x38] sm:$0xff]  ;;  %s6497_s22 = sld [smem:[#allocation11_spill]] }
 0x55e   : > { %v5454_v23 = vpop.eup %5453 }
 0x55f   : > { %v1886_v24 = vsel %vm1572_vm3, %v5454_v23, 0.0 }
 0x560   : > { %1887 = vadd.xlane.f32.xlu1 %v1886_v24  ;;  %v2088_v24 = vadd.f32 %v1322_v22, %v6007_v20 }
 0x5e9   : > { %v1888_v33 = vpop.xlane.xlu1 %1887 }
 0x5ea   : > { %5455 = vrcp.f32 %v1888_v33 }
 0x5f7   : > { %v5456_v34 = vpop.eup %5455 }
 0x5f8   : > { %v1890_v35 = vmul.f32 %v5456_v34, %v5454_v23  ;;  %v2087_v23 = vadd.f32 %v1321_v21, %v6002_v18 }
 0x5fa   : > { %v1891_v37 = vpack.c.bf16 %v1890_v35, %v1890_v35  ;;  %v6018_v25 = vpack.c.bf16 %v2088_v24, %v2087_v23 }
 0x5fc   : > { %5073 = vmatmul.mubr.msk.bf16.vlgmr.msra.gmra.mxu1 %vm1572_vm3, %v1891_v37  ;;  %v4711_v37 = vld [vmem:[%s6490_s23] ss:$0 sm:$0xff] }
 0x5fd   : > { %5083 = vmatpush3.bf16.msra.mxu1 %v5417_v36  ;;  %5084 = vmatprep.mubr.msk.bf16.mxu1 %vm5610_vm0, %v5609_v1 }
 0x604   : > { %5085 = vmatmul.mubr.msk.bf16.vlgmr.msra.gmra.mxu1 %vm1524_vm2, %v1633_v38 }
 0x605   : > { %5100 = vmatprep.mubr.msk.bf16.mxu1 %vm1349_vm1, %v5990_v11 }
 0x6bc   : > { %v1933_v40 = vpop.f32.mrf.mxu1 }
 0x6bd   : > { %v1939_v41 = vpack.c.bf16 %v1933_v40, %v1933_v40 }
 0x6be   : > { %v5074_v42 = vpop.f32.mrf.mxu1 }
 0x6bf   : > { %5079 = vmatmul.mubr.msk.bf16.vlgmr.msra.gmra.mxu0 %vm1524_vm2, %v1939_v41 }
 0x6c0   : > { %v1936_v43 = vpop.f32.mrf.mxu1  ;;  %5092 = vmatprep.mubr.msk.bf16.mxu0 %vm5610_vm0, %v5609_v1  ;;  %5089 = vmatpush3.bf16.msra.mxu0 %v5421_v31 }
 0x6c1   : > { %5090 = vmatprep.subr.bf16.mxu0 %v5609_v1 }
 0x6c2   : > { %v5075_v44 = vpop.f32.mrf.mxu1 }
 0x6c4   : > { %v2035_v45 = vpop.f32.mrf.mxu1  ;;  %5091 = vmatpush3.bf16.msra.mxu0 %v5422_v32 }
 0x6c6   : > { %v5086_v46 = vpop.f32.mrf.mxu1 }
 0x6c8   : > { %v2038_v47 = vpop.f32.mrf.mxu1 }
 0x6ca   : > { %v5087_v48 = vpop.f32.mrf.mxu1 }
 0x77f   : > { %v1986_v49 = vpop.f32.mrf.mxu0 }
 0x780   : > { %v2036_v51 = vadd.f32 %v2035_v45, %v1986_v49 }
 0x781   : > { %v5080_v52 = vpop.f32.mrf.mxu0 }
 0x782   : > { %v2048_v53 = vadd.f32 %v4704_v50, %v2036_v51 }
 0x783   : > { %v1989_v54 = vpop.f32.mrf.mxu0 }
 0x784   : > { %v2049_v55 = vadd.f32 %v2048_v53, %v5858_v5  ;;  %v5419_v5 = vld [vmem:[%s5689_s12 + $0x8] sm:$0xff]  }
 0x785   : > { %v5081_v56 = vpop.f32.mrf.mxu0  ;;  %5096 = vmatprep.subr.bf16.mxu1 %v5419_v5 }
 0x786   : > { %v2050_v57 = vsel %vm1349_vm1, %v2049_v55, 0.0  ;;  %5097 = vmatpush3.bf16.msra.mxu1 %v5419_v5 }
 0x787   : > { %2051 = vadd.xlane.f32.xlu0 %v2050_v57  ;;  %5098 = vmatprep.subr.bf16.mxu1 %v5420_v58 }
 0x78a   : > { %5099 = vmatpush3.bf16.msra.mxu1 %v5420_v58 }
 0x78b   : > { %5120 = vmatprep.subr.bf16.mxu1 %v5609_v1 }
 0x78d   : > { %5101 = vmatmul.mubr.msk.bf16.vlgmr.msra.gmra.mxu1 %vm1349_vm1, %v5999_v17 }
 0x78e   : > { %5104 = vmatprep.mubr.msk.bf16.mxu1 %vm1349_vm1, %v6004_v19 }
 0x795   : > { %5105 = vmatmul.mubr.msk.bf16.gmra.mxu1 %vm1349_vm1, %v6018_v25 }
 0x796   : > { %5128 = vmatprep.mubr.msk.bf16.mxu1 %vm5610_vm0, %v5609_v1 }
 0x810   : > { %v2052_v26 = vpop.xlane.xlu0 %2051 }
 0x811   : > { %v2054_v27 = vmul.f32 0.03125, %v2052_v26  ;;  %v5423_v26 = vld [vmem:[%s6494_s2 + $0x8] sm:$0xff]  }
 0x812   : > { %5108 = vmatprep.subr.bf16.mxu0 %v5423_v26 }
 0x813   : > { %v2055_v28 = vsub.f32 %v2049_v55, %v2054_v27  ;;  %v5424_v27 = vld [vmem:[%s6494_s2] sm:$0xff]  }
 0x815   : > { %v2056_v29 = vmul.f32 %v2055_v28, %v2055_v28 }
 0x817   : > { %v2057_v30 = vsel %vm1349_vm1, %v2056_v29, 0.0  ;;  %v6060_v29 = vpack.c.bf16 %v5988_v10, %v5985_v9 }
 0x818   : > { %2058 = vadd.xlane.f32.xlu1 %v2057_v30 }
 0x84d   : > { %v5102_v33 = vpop.f32.mrf.mxu1 }
 0x84e   : > { %v2242_v49 = vadd.f32 %v5102_v33, %v4711_v37 }
 0x84f   : > { %v2233_v34 = vpop.f32.mrf.mxu1 }
 0x850   : > { %v2234_v53 = vadd.f32 %v4711_v37, %v2233_v34 }
 0x851   : > { %v5103_v35 = vpop.f32.mrf.mxu1 }
 0x852   : > { %v2245_v50 = vadd.f32 %v5103_v35, %v4711_v37 }
 0x853   : > { %v2236_v36 = vpop.f32.mrf.mxu1 }
 0x854   : > { %v2366_v52 = vpack.c.bf16 %v2245_v50, %v2242_v49  ;;  %v2237_v54 = vadd.f32 %v4711_v37, %v2236_v36 }
 0x855   : > { %v5106_v38 = vpop.f32.mrf.mxu1 }
 0x856   : > { %v2258_v40 = vadd.f32 %v5106_v38, %v4711_v37  ;;  %v2376_v55 = vsel %vm1572_vm3, %v2366_v52, 0  ;;  %v2365_v56 = vpack.c.bf16 %v2237_v54, %v2234_v53 }
 0x857   : > { %v2249_v39 = vpop.f32.mrf.mxu1 }
 0x858   : > { %v2250_v44 = vadd.f32 %v4711_v37, %v2249_v39  ;;  %v2373_v57 = vsel %vm1572_vm3, %v2365_v56, 0 }
 0x859   : > { %v5107_v41 = vpop.f32.mrf.mxu1 }
 0x85a   : > { %v2261_v42 = vadd.f32 %v5107_v41, %v4711_v37 }
 0x85b   : > { %v2252_v43 = vpop.f32.mrf.mxu1 }
 0x85c   : > { %v2368_v45 = vpack.c.bf16 %v2261_v42, %v2258_v40  ;;  %v2253_v46 = vadd.f32 %v4711_v37, %v2252_v43 }
 0x85e   : > { %v2382_v47 = vsel %vm1572_vm3, %v2368_v45, 0  ;;  %v2367_v48 = vpack.c.bf16 %v2253_v46, %v2250_v44 }
 0x85f   : > { %5121 = vmatpush3.bf16.xpose.msra.mxu1 %v2382_v47 }
 0x860   : > { %5122 = vmatprep.subr.bf16.mxu1 %v5609_v1  ;;  %v2379_v51 = vsel %vm1572_vm3, %v2367_v48, 0 }
 0x867   : > { %5123 = vmatpush3.bf16.xpose.msra.mxu1 %v2379_v51 }
 0x868   : > { %5124 = vmatprep.subr.bf16.mxu1 %v5609_v1 }
 0x86f   : > { %5125 = vmatpush3.bf16.xpose.msra.mxu1 %v2376_v55 }
 0x870   : > { %5126 = vmatprep.subr.bf16.mxu1 %v5609_v1 }
 0x877   : > { %5127 = vmatpush3.bf16.xpose.msra.mxu1 %v2373_v57 }
 0x8a1   : > { %v2059_v5 = vpop.xlane.xlu1 %2058 }
 0x8a2   : > { %v2060_v58 = vmul.f32 0.03125, %v2059_v5  ;;  %v5425_v5 = vld [vmem:[%s5679_s30 + $0x18] sm:$0xff]  }
 0x8a4   : > { %v2061_v61 = vadd.f32 1e-05, %v2060_v58 }
 0x8a6   : > { %5457 = vrsqrt.f32 %v2061_v61  ;;  %v5426_v61 = vld [vmem:[%s5679_s30 + $0x10] sm:$0xff]  }
 0x8b3   : > { %v5458_v62 = vpop.eup %5457 }
 0x8b4   : > { %v2063_v0 = vmul.f32 %v5458_v62, %v2055_v28  ;;  %v2094_v28 = vpack.c.bf16 %v5969_v60, %v5966_v59  ;;  %v6069_v59 = vpack.c.bf16 %v6007_v20, %v6002_v18  ;;  %v4718_v20 = vld [vmem:[%s6495_s10] ss:$0 sm:$0xff]  ;;  %v5427_v62 = vld [vmem:[%s5689_s12 + $0x18] sm:$0xff]  }
 0x8b6   : > { %v2071_v7 = vmul.f32 %v4705_v63, %v2063_v0  ;;  %v5428_v63 = vld [vmem:[%s5689_s12 + $0x10] sm:$0xff]  }
 0x8b8   : > { %v6038_v8 = vadd.f32 %v4706_v4, %v2071_v7 }
 0x8ba   : > { %v2080_v12 = vadd.f32 %v6038_v8, %v5862_v6  ;;  %v6056_v6 = vpack.c.bf16 %v5979_v3, %v5976_v2 }
 0x8bc   : > { %v6042_v13 = vpack.c.bf16 %v2080_v12, %v2080_v12 }
 0x8be   : > { %5093 = vmatmul.mubr.msk.bf16.vlgmr.msra.gmra.mxu0 %vm1349_vm1, %v6042_v13 }
 0x8bf   : > { %5112 = vmatprep.mubr.msk.bf16.mxu0 %vm1349_vm1, %v2094_v28  ;;  %5109 = vmatpush3.bf16.msra.mxu0 %v5423_v26 }
 0x8c0   : > { %5110 = vmatprep.subr.bf16.mxu0 %v5424_v27 }
 0x8c3   : > { %5111 = vmatpush3.bf16.msra.mxu0 %v5424_v27 }
 0x8c4   : > { %5132 = vmatprep.subr.bf16.mxu0 %v5609_v1 }
 0x8c6   : > { %5113 = vmatmul.mubr.msk.bf16.vlgmr.msra.gmra.mxu0 %vm1349_vm1, %v6056_v6 }
 0x8c7   : > { %5116 = vmatprep.mubr.msk.bf16.mxu0 %vm1349_vm1, %v6060_v29 }
 0x8ce   : > { %5117 = vmatmul.mubr.msk.bf16.gmra.mxu0 %vm1349_vm1, %v6069_v59 }
 0x8cf   : > { %5140 = vmatprep.mubr.msk.bf16.mxu0 %vm5610_vm0, %v5609_v1 }
 0x97e   : > { %v2158_v15 = vpop.f32.mrf.mxu0 }
 0x97f   : > { %v2159_v16 = vadd.f32 %v4707_v14, %v2158_v15 }
 0x980   : > { %v5094_v21 = vpop.f32.mrf.mxu0 }
 0x981   : > { %v2364_v22 = vpack.c.bf16 %v2159_v16, %v2159_v16 }
 0x982   : > { %v2161_v23 = vpop.f32.mrf.mxu0 }
 0x983   : > { %5129 = vmatmul.mubr.msk.bf16.vlgmr.msra.gmra.mxu1 %vm1572_vm3, %v2364_v22 }
 0x984   : > { %v5095_v24 = vpop.f32.mrf.mxu0  ;;  %5168 = vmatprep.mubr.msk.bf16.mxu1 %vm1349_vm1, %v2094_v28  ;;  %v4741_v28 = vld [vmem:[%s6490_s23 + $0x1] ss:$0 sm:$0xff] }
 0x986   : > { %v5114_v31 = vpop.f32.mrf.mxu0 }
 0x987   : > { %v2342_v43 = vadd.f32 %v5114_v31, %v4718_v20 }
 0x988   : > { %v2333_v32 = vpop.f32.mrf.mxu0 }
 0x989   : > { %v2334_v46 = vadd.f32 %v4718_v20, %v2333_v32 }
 0x98a   : > { %v5115_v33 = vpop.f32.mrf.mxu0 }
 0x98b   : > { %v2345_v44 = vadd.f32 %v5115_v33, %v4718_v20 }
 0x98c   : > { %v2336_v18 = vpop.f32.mrf.mxu0 }
 0x98d   : > { %v2439_v47 = vpack.c.bf16 %v2345_v44, %v2342_v43  ;;  %v2337_v48 = vadd.f32 %v4718_v20, %v2336_v18  ;;  %v5429_v44 = vld [vmem:[%s6494_s2 + $0x18] sm:$0xff]  }
 0x98e   : > { %v5118_v34 = vpop.f32.mrf.mxu0  ;;  %5164 = vmatprep.subr.bf16.mxu1 %v5429_v44 }
 0x98f   : > { %v2358_v36 = vadd.f32 %v5118_v34, %v4718_v20  ;;  %v2438_v49 = vpack.c.bf16 %v2337_v48, %v2334_v46  ;;  %5165 = vmatpush3.bf16.msra.mxu1 %v5429_v44 }
 0x990   : > { %v2349_v35 = vpop.f32.mrf.mxu0 }
 0x991   : > { %v2350_v38 = vadd.f32 %v4718_v20, %v2349_v35 }
 0x992   : > { %v5119_v37 = vpop.f32.mrf.mxu0 }
 0x993   : > { %v2361_v39 = vadd.f32 %v5119_v37, %v4718_v20 }
 0x994   : > { %v2352_v40 = vpop.f32.mrf.mxu0 }
 0x995   : > { %v2441_v41 = vpack.c.bf16 %v2361_v39, %v2358_v36  ;;  %v2353_v42 = vadd.f32 %v4718_v20, %v2352_v40  ;;  %v4732_v40 = vld [vmem:[%s6493_s1 + $0x1] ss:$0 sm:$0xff]  ;;  %s6501_s1 = sld [smem:[#allocation27_spill]] }
 0x997   : > { %v2440_v45 = vpack.c.bf16 %v2353_v42, %v2350_v38  ;;  %5133 = vmatpush3.bf16.msra.mxu0 %v2441_v41 }
 0x998   : > { %5134 = vmatprep.subr.bf16.mxu0 %v5609_v1 }
 0x99b   : > { %5135 = vmatpush3.bf16.msra.mxu0 %v2440_v45  ;;  %v5430_v45 = vld [vmem:[%s6494_s2 + $0x10] sm:$0xff]   ;;  %s6502_s2 = sld [smem:[#allocation13_spill]] }
 0x99c   : > { %5136 = vmatprep.subr.bf16.mxu0 %v5609_v1  ;;  %5166 = vmatprep.subr.bf16.mxu1 %v5430_v45 }
 0x99d   : > { %5167 = vmatpush3.bf16.msra.mxu1 %v5430_v45 }
 0x99e   : > { %5188 = vmatprep.subr.bf16.mxu1 %v5609_v1 }
 0x99f   : > { %5137 = vmatpush3.bf16.msra.mxu0 %v2439_v47 }
 0x9a0   : > { %5138 = vmatprep.subr.bf16.mxu0 %v5609_v1  ;;  %5169 = vmatmul.mubr.msk.bf16.vlgmr.msra.gmra.mxu1 %vm1349_vm1, %v6056_v6 }
 0x9a1   : > { %5172 = vmatprep.mubr.msk.bf16.mxu1 %vm1349_vm1, %v6060_v29 }
 0x9a3   : > { %5139 = vmatpush3.bf16.msra.mxu0 %v2438_v49 }
 0x9a4   : > { %5144 = vmatprep.subr.bf16.mxu0 %v5609_v1 }
 0x9a8   : > { %5173 = vmatmul.mubr.msk.bf16.gmra.mxu1 %vm1349_vm1, %v6069_v59 }
 0x9a9   : > { %5196 = vmatprep.mubr.msk.bf16.mxu1 %vm5610_vm0, %v5609_v1 }
 0xa43   : > { %v2418_v60 = vpop.f32.mrf.mxu1 }
 0xa44   : > { %v2424_v2 = vmul.f32 0.35355338, %v2418_v60 }
 0xa45   : > { %v5130_v3 = vpop.f32.mrf.mxu1 }
 0xa46   : > { %v2426_v9 = vsel %vm2425_vm5, %v2424_v2, -inf }
 0xa47   : > { %2427 = vmax.xlane.f32.xlu0 %v2426_v9  ;;  %v2421_v10 = vpop.f32.mrf.mxu1 }
 0xa49   : > { %v5131_v30 = vpop.f32.mrf.mxu1 }
 0xad0   : > { %v2428_v50 = vpop.xlane.xlu0 %2427 }
 0xad1   : > { %v2429_v51 = vsub.f32 %v2424_v2, %v2428_v50 }
 0xad3   : > { %v2430_v52 = vmul.f32 1.442695, %v2429_v51 }
 0xad5   : > { %5459 = vpow2.f32 %v2430_v52  ;;  %v5170_v52 = vpop.f32.mrf.mxu1 }
 0xae2   : > { %v5460_v53 = vpop.eup %5459 }
 0xae3   : > { %v2432_v54 = vsel %vm2425_vm5, %v5460_v53, 0.0 }
 0xae4   : > { %2433 = vadd.xlane.f32.xlu1 %v2432_v54 }
 0xb6d   : > { %v2434_v55 = vpop.xlane.xlu1 %2433 }
 0xb6e   : > { %5461 = vrcp.f32 %v2434_v55  ;;  %v4753_v55 = vld [vmem:[%s6495_s10 + $0x1] ss:$0 sm:$0xff] }
 0xb7b   : > { %v5462_v56 = vpop.eup %5461 }
 0xb7c   : > { %v2436_v57 = vmul.f32 %v5462_v56, %v5460_v53  ;;  %v2701_v53 = vpop.f32.mrf.mxu1 }
 0xb7e   : > { %v2437_v58 = vpack.c.bf16 %v2436_v57, %v2436_v57  ;;  %v5171_v6 = vpop.f32.mrf.mxu1 }
 0xb80   : > { %5141 = vmatmul.mubr.msk.bf16.vlgmr.msra.gmra.mxu0 %vm2425_vm5, %v2437_v58  ;;  %v2704_v54 = vpop.f32.mrf.mxu1 }
 0xb81   : > { %5145 = vmatpush3.bf16.msra.mxu0 %v5425_v5  ;;  %5148 = vmatprep.mubr.msk.bf16.mxu0 %vm5610_vm0, %v5609_v1 }
 0xb82   : > { %5146 = vmatprep.subr.bf16.mxu0 %v5609_v1  ;;  %v5174_v29 = vpop.f32.mrf.mxu1 }
 0xb83   : > { %v2726_v57 = vadd.f32 %v5174_v29, %v4753_v55 }
 0xb84   : > { %v2717_v56 = vpop.f32.mrf.mxu1 }
 0xb85   : > { %5147 = vmatpush3.bf16.msra.mxu0 %v5426_v61  ;;  %v2718_v5 = vadd.f32 %v4753_v55, %v2717_v56 }
 0xb86   : > { %5152 = vmatprep.subr.bf16.mxu0 %v5427_v62  ;;  %v5175_v59 = vpop.f32.mrf.mxu1 }
 0xb87   : > { %v2729_v58 = vadd.f32 %v5175_v59, %v4753_v55 }
 0xb88   : > { %5149 = vmatmul.mubr.msk.bf16.vlgmr.msra.gmra.mxu0 %vm1349_vm1, %v6042_v13  ;;  %v2720_v61 = vpop.f32.mrf.mxu1 }
 0xb89   : > { %5153 = vmatpush3.bf16.msra.mxu0 %v5427_v62  ;;  %5156 = vmatprep.mubr.msk.bf16.mxu0 %vm1349_vm1, %v5990_v11  ;;  %v2808_v62 = vpack.c.bf16 %v2729_v58, %v2726_v57 }
 0xb8a   : > { %5154 = vmatprep.subr.bf16.mxu0 %v5428_v63 }
 0xb8b   : > { %5189 = vmatpush3.bf16.msra.mxu1 %v2808_v62 }
 0xb8c   : > { %5190 = vmatprep.subr.bf16.mxu1 %v5609_v1 }
 0xb8d   : > { %5155 = vmatpush3.bf16.msra.mxu0 %v5428_v63  ;;  %v2721_v63 = vadd.f32 %v4753_v55, %v2720_v61 }
 0xb8e   : > { %5176 = vmatprep.subr.bf16.mxu0 %v5609_v1 }
 0xb90   : > { %5157 = vmatmul.mubr.msk.bf16.vlgmr.msra.gmra.mxu0 %vm1349_vm1, %v5999_v17 }
 0xb91   : > { %5160 = vmatprep.mubr.msk.bf16.mxu0 %vm1349_vm1, %v6004_v19 }
 0xb98   : > { %5161 = vmatmul.mubr.msk.bf16.gmra.mxu0 %vm1349_vm1, %v6018_v25 }
 0xb99   : > { %5184 = vmatprep.mubr.msk.bf16.mxu0 %vm5610_vm0, %v5609_v1 }
 0xc40   : > { %v6103_v0 = vpop.f32.mrf.mxu0 }
 0xc42   : > { %v5142_v4 = vpop.f32.mrf.mxu0 }
 0xc43   : > { %v2710_v4 = vadd.f32 %v5170_v52, %v4753_v55  ;;  %v5431_v52 = vld [vmem:[%s6498_s26 + $0x8] sm:$0xff]  }
 0xc44   : > { %v2482_v7 = vpop.f32.mrf.mxu0 }
 0xc45   : > { %v2713_v7 = vadd.f32 %v5171_v6, %v4753_v55  ;;  %v5434_v6 = vld [vmem:[%s6499_s28 + $0x10] sm:$0xff]  }
 0xc46   : > { %v5143_v12 = vpop.f32.mrf.mxu0 }
 0xc47   : > { %v2807_v12 = vpack.c.bf16 %v2721_v63, %v2718_v5  ;;  %v4767_v5 = vld [vmem:[%s6501_s1] ss:$0 sm:$0xff]  ;;  %v5435_v63 = vld [vmem:[%s6499_s28 + $0x8] sm:$0xff]   ;;  %s6504_s1 = sld [smem:[#allocation16_spill]] }
 0xc48   : > { %v2546_v13 = vpop.f32.mrf.mxu0 }
 0xc49   : > { %v2547_v42 = vadd.f32 %v4732_v40, %v2546_v13  ;;  %v2702_v13 = vadd.f32 %v4753_v55, %v2701_v53  ;;  %5191 = vmatpush3.bf16.msra.mxu1 %v2807_v12  ;;  %v4765_v40 = vld [vmem:[%s6497_s22] ss:$0 sm:$0xff]  ;;  %s6500_s22 = sld [smem:[#allocation26_spill]] }
 0xc4a   : > { %v5150_v14 = vpop.f32.mrf.mxu0  ;;  %5192 = vmatprep.subr.bf16.mxu1 %v5609_v1  ;;  %v5432_v53 = vld [vmem:[%s6498_s26] sm:$0xff]  }
 0xc4b   : > { %v2732_v43 = vpack.c.bf16 %v2547_v42, %v2547_v42  ;;  %v2806_v14 = vpack.c.bf16 %v2713_v7, %v2710_v4  ;;  %v5436_v4 = vld [vmem:[%s6499_s28] sm:$0xff]  }
 0xc4c   : > { %v2549_v15 = vpop.f32.mrf.mxu0  ;;  %v4768_v7 = vld [vmem:[%s6502_s2] ss:$0 sm:$0xff]  ;;  %s6505_s2 = sld [smem:[#allocation20_spill]] }
 0xc4d   : > { %v2705_v15 = vadd.f32 %v4753_v55, %v2704_v54  ;;  %5193 = vmatpush3.bf16.msra.mxu1 %v2806_v14 }
 0xc4e   : > { %v5151_v16 = vpop.f32.mrf.mxu0  ;;  %5194 = vmatprep.subr.bf16.mxu1 %v5609_v1 }
 0xc4f   : > { %v2805_v16 = vpack.c.bf16 %v2705_v15, %v2702_v13  ;;  %v4766_v57 = vld [vmem:[%s6500_s22] ss:$0 sm:$0xff]  ;;  %s6506_s22 = sld [smem:[#allocation18_spill]] }
 0xc50   : > { %v5158_v21 = vpop.f32.mrf.mxu0 }
 0xc51   : > { %v2620_v34 = vadd.f32 %v5158_v21, %v4741_v28  ;;  %5195 = vmatpush3.bf16.msra.mxu1 %v2805_v16 }
 0xc52   : > { %v2611_v22 = vpop.f32.mrf.mxu0  ;;  %5200 = vmatprep.subr.bf16.mxu1 %v5609_v1 }
 0xc53   : > { %v2612_v38 = vadd.f32 %v4741_v28, %v2611_v22 }
 0xc54   : > { %v5159_v23 = vpop.f32.mrf.mxu0 }
 0xc55   : > { %v2623_v18 = vadd.f32 %v5159_v23, %v4741_v28 }
 0xc56   : > { %v2614_v24 = vpop.f32.mrf.mxu0 }
 0xc57   : > { %v2734_v35 = vpack.c.bf16 %v2623_v18, %v2620_v34  ;;  %v2615_v36 = vadd.f32 %v4741_v28, %v2614_v24  ;;  %v2485_v34 = vpack.c.bf16 %v6103_v0, %v6103_v0 }
 0xc58   : > { %v5162_v26 = vpop.f32.mrf.mxu0 }
 0xc59   : > { %v2636_v2 = vadd.f32 %v5162_v26, %v4741_v28  ;;  %v2744_v37 = vsel %vm1572_vm3, %v2734_v35, 0  ;;  %v2733_v39 = vpack.c.bf16 %v2615_v36, %v2612_v38 }
 0xc5a   : > { %v2627_v27 = vpop.f32.mrf.mxu0 }
 0xc5b   : > { %v2628_v32 = vadd.f32 %v4741_v28, %v2627_v27  ;;  %v2741_v41 = vsel %vm1572_vm3, %v2733_v39, 0 }
 0xc5c   : > { %v5163_v60 = vpop.f32.mrf.mxu0 }
 0xc5d   : > { %v2639_v3 = vadd.f32 %v5163_v60, %v4741_v28 }
 0xc5e   : > { %v2630_v9 = vpop.f32.mrf.mxu0 }
 0xc5f   : > { %v2736_v10 = vpack.c.bf16 %v2639_v3, %v2636_v2  ;;  %v2631_v30 = vadd.f32 %v4741_v28, %v2630_v9  ;;  %v4762_v3 = vld [vmem:[%s6496_s11 + $0x4] sm:$0xf] }
 0xc60   : > { %v2859_v9 = vsel %vm1589_vm4, %v4762_v3, 0 }
 0xc61   : > { %v2750_v31 = vsel %vm1572_vm3, %v2736_v10, 0  ;;  %v2735_v33 = vpack.c.bf16 %v2631_v30, %v2628_v32  ;;  %v2486_v10 = vld [vmem:[%s6496_s11] sm:$0xf] }
 0xc62   : > { %5177 = vmatpush3.bf16.xpose.msra.mxu0 %v2750_v31  ;;  %v2905_v32 = vsel %vm1589_vm4, %v2486_v10, 0 }
 0xc63   : > { %5178 = vmatprep.subr.bf16.mxu0 %v5609_v1  ;;  %v2747_v20 = vsel %vm1572_vm3, %v2735_v33, 0 }
 0xc6a   : > { %5179 = vmatpush3.bf16.xpose.msra.mxu0 %v2747_v20 }
 0xc6b   : > { %5180 = vmatprep.subr.bf16.mxu0 %v5609_v1 }
 0xc72   : > { %5181 = vmatpush3.bf16.xpose.msra.mxu0 %v2744_v37 }
 0xc73   : > { %5182 = vmatprep.subr.bf16.mxu0 %v5609_v1 }
 0xc7a   : > { %5183 = vmatpush3.bf16.xpose.msra.mxu0 %v2741_v41 }
 0xc7b   : > { %5212 = vmatprep.subr.bf16.mxu0 %v5609_v1 }
 0xc81   : > { %5185 = vmatmul.mubr.msk.bf16.vlgmr.msra.gmra.mxu0 %vm1572_vm3, %v2732_v43 }
 0xc82   : > { %5216 = vmatprep.mubr.msk.bf16.mxu0 %vm5610_vm0, %v5609_v1  ;;  %5213 = vmatpush3.bf16.msra.mxu0 %v5431_v52 }
 0xc83   : > { %5214 = vmatprep.subr.bf16.mxu0 %v5609_v1 }
 0xc86   : > { %5215 = vmatpush3.bf16.msra.mxu0 %v5432_v53 }
 0xd41   : > { %v2786_v46 = vpop.f32.mrf.mxu0 }
 0xd42   : > { %v2792_v47 = vmul.f32 0.35355338, %v2786_v46 }
 0xd43   : > { %v5186_v48 = vpop.f32.mrf.mxu0 }
 0xd44   : > { %v2793_v49 = vsel %vm2425_vm5, %v2792_v47, -inf }
 0xd45   : > { %2794 = vmax.xlane.f32.xlu0 %v2793_v49  ;;  %v2789_v50 = vpop.f32.mrf.mxu0 }
 0xd47   : > { %v5187_v51 = vpop.f32.mrf.mxu0 }
 0xdce   : > { %v2795_v21 = vpop.xlane.xlu0 %2794 }
 0xdcf   : > { %v2796_v22 = vsub.f32 %v2792_v47, %v2795_v21 }
 0xdd1   : > { %v2797_v23 = vmul.f32 1.442695, %v2796_v22 }
 0xdd3   : > { %5463 = vpow2.f32 %v2797_v23  ;;  %v4772_v23 = vld [vmem:[%s6503_s3] ss:$0 sm:$0xff]  ;;  %s6507_s3 = sld [smem:[#allocation28_spill]] }
 0xde0   : > { %v5464_v24 = vpop.eup %5463 }
 0xde1   : > { %v2799_v26 = vsel %vm2425_vm5, %v5464_v24, 0.0 }
 0xde2   : > { %2800 = vadd.xlane.f32.xlu1 %v2799_v26 }
 0xe6b   : > { %v2801_v27 = vpop.xlane.xlu1 %2800 }
 0xe6c   : > { %5465 = vrcp.f32 %v2801_v27 }
 0xe79   : > { %v5466_v28 = vpop.eup %5465 }
 0xe7a   : > { %v2803_v60 = vmul.f32 %v5466_v28, %v5464_v24 }
 0xe7c   : > { %v2804_v2 = vpack.c.bf16 %v2803_v60, %v2803_v60 }
 0xe7e   : > { %5197 = vmatmul.mubr.msk.bf16.vlgmr.msra.gmra.mxu1 %vm2425_vm5, %v2804_v2 }
 0xe7f   : > { %5202 = vmatprep.mubr.msk.bf16.mxu1 %vm5610_vm0, %v5609_v1  ;;  %5201 = vmatpush3.bf16.msra.mxu1 %v2859_v9 }
 0xe80   : > { %5206 = vmatprep.subr.bf16.mxu1 %v5609_v1 }
 0xf3e   : > { %v2846_v30 = vpop.f32.mrf.mxu1 }
 0xf3f   : > { %v2852_v31 = vpack.c.bf16 %v2846_v30, %v2846_v30 }
 0xf40   : > { %v5198_v33 = vpop.f32.mrf.mxu1 }
 0xf41   : > { %5203 = vmatmul.mubr.msk.bf16.vlgmr.msra.gmra.mxu1 %vm1572_vm3, %v2852_v31  ;;  %v5437_v33 = vld [vmem:[%s6504_s1 + $0x8] sm:$0xff]  }
 0xf42   : > { %v2849_v18 = vpop.f32.mrf.mxu1  ;;  %5207 = vmatpush3.bf16.msra.mxu1 %v2905_v32  ;;  %5208 = vmatprep.mubr.msk.bf16.mxu1 %vm5610_vm0, %v5609_v1 }
 0xf43   : > { %5220 = vmatprep.subr.bf16.mxu1 %v5609_v1  ;;  %5232 = vmatprep.subr.bf16.mxu0 %v5437_v33  ;;  %v5438_v18 = vld [vmem:[%s6504_s1] sm:$0xff]  }
 0xf44   : > { %v5199_v20 = vpop.f32.mrf.mxu1 }
 0xf45   : > { %v5439_v20 = vld [vmem:[%s6505_s2 + $0x8] sm:$0xff]  }
 0xf49   : > { %5209 = vmatmul.mubr.msk.bf16.vlgmr.msra.gmra.mxu1 %vm1572_vm3, %v2485_v34  ;;  %v5440_v34 = vld [vmem:[%s6506_s22 + $0x8] sm:$0xff]  }
 0xf4a   : > { %5228 = vmatprep.mubr.msk.bf16.mxu1 %vm5610_vm0, %v5609_v1 }
0x1001   : > { %v2895_v35 = vpop.f32.mrf.mxu1 }
0x1003   : > { %v5204_v36 = vpop.f32.mrf.mxu1 }
0x1004   : > { %v5442_v36 = vld [vmem:[%s6506_s22] sm:$0xff]  }
0x1005   : > { %v2898_v37 = vpop.f32.mrf.mxu1 }
0x1007   : > { %v5205_v38 = vpop.f32.mrf.mxu1 }
0x1009   : > { %v2941_v39 = vpop.f32.mrf.mxu1 }
0x100a   : > { %v2942_v41 = vadd.f32 %v2941_v39, %v2895_v35  ;;  %v5441_v35 = vld [vmem:[%s6505_s2] sm:$0xff]  }
0x100b   : > { %v5210_v42 = vpop.f32.mrf.mxu1 }
0x100c   : > { %v2954_v43 = vadd.f32 %v4765_v40, %v2942_v41  ;;  %v4778_v41 = vld [vmem:[%s6507_s3] ss:$0 sm:$0xff]  ;;  %s6510_s3 = sld [smem:[#allocation21_spill]] }
0x100d   : > { %v2944_v44 = vpop.f32.mrf.mxu1 }
0x100e   : > { %v2955_v0 = vadd.f32 %v2954_v43, %v6038_v8  ;;  %v5433_v8 = vld [vmem:[%s6499_s28 + $0x18] sm:$0xff]   ;;  %v4779_v43 = vld [vmem:[%s6508_s5] ss:$0 sm:$0xff]  ;;  %s6511_s5 = sld [smem:[#allocation19_spill]] }
0x100f   : > { %v5211_v45 = vpop.f32.mrf.mxu1  ;;  %5221 = vmatpush3.bf16.msra.mxu1 %v5433_v8 }
0x1010   : > { %v2956_v46 = vsel %vm1349_vm1, %v2955_v0, 0.0  ;;  %5222 = vmatprep.subr.bf16.mxu1 %v5609_v1 }
0x1011   : > { %2957 = vadd.xlane.f32.xlu0 %v2956_v46  ;;  %v5551_v46 = vld [vmem:[%s5856_s15] sm:$0xff]  ;;  %s6411_s15 = scalar_lea.vmem %s5824_s4, %s5953_s16 }
0x1013   : > { %5223 = vmatpush3.bf16.msra.mxu1 %v5434_v6 }
0x1014   : > { %5224 = vmatprep.subr.bf16.mxu1 %v5609_v1 }
0x1017   : > { %5225 = vmatpush3.bf16.msra.mxu1 %v5435_v63  ;;  %v4787_v63 = vld [vmem:[%s6511_s5] ss:$0 sm:$0xff] }
0x1018   : > { %5226 = vmatprep.subr.bf16.mxu1 %v5609_v1 }
0x101b   : > { %5227 = vmatpush3.bf16.msra.mxu1 %v5436_v4 }
0x101c   : > { %5244 = vmatprep.subr.bf16.mxu1 %v5609_v1 }
0x109a   : > { %v2958_v47 = vpop.xlane.xlu0 %2957 }
0x109b   : > { %v2959_v48 = vmul.f32 0.03125, %v2958_v47 }
0x109d   : > { %v2960_v49 = vsub.f32 %v2955_v0, %v2959_v48 }
0x109f   : > { %v2961_v50 = vmul.f32 %v2960_v49, %v2960_v49 }
0x10a1   : > { %v2962_v51 = vsel %vm1349_vm1, %v2961_v50, 0.0 }
0x10a2   : > { %2963 = vadd.xlane.f32.xlu1 %v2962_v51 }
0x112b   : > { %v2964_v54 = vpop.xlane.xlu1 %2963 }
0x112c   : > { %v2965_v55 = vmul.f32 0.03125, %v2964_v54 }
0x112e   : > { %v2966_v29 = vadd.f32 1e-05, %v2965_v55 }
0x1130   : > { %5467 = vrsqrt.f32 %v2966_v29 }
0x113d   : > { %v5468_v56 = vpop.eup %5467 }
0x113e   : > { %v2968_v59 = vmul.f32 %v5468_v56, %v2960_v49  ;;  %v4780_v49 = vld [vmem:[%s6509_s8] ss:$0 sm:$0xff] }
0x1140   : > { %v2976_v58 = vmul.f32 %v4766_v57, %v2968_v59 }
0x1142   : > { %v2984_v61 = vadd.f32 %v4767_v5, %v2976_v58 }
0x1144   : > { %v2985_v62 = vpack.c.bf16 %v2984_v61, %v2984_v61 }
0x1146   : > { %5217 = vmatmul.mubr.msk.bf16.vlgmr.msra.gmra.mxu0 %vm1349_vm1, %v2985_v62 }
0x1147   : > { %5236 = vmatprep.mubr.msk.bf16.mxu0 %vm1349_vm1, %v5990_v11  ;;  %5233 = vmatpush3.bf16.msra.mxu0 %v5437_v33 }
0x1148   : > { %5234 = vmatprep.subr.bf16.mxu0 %v5438_v18 }
0x114b   : > { %5235 = vmatpush3.bf16.msra.mxu0 %v5438_v18 }
0x114c   : > { %5252 = vmatprep.subr.bf16.mxu0 %v5609_v1 }
0x114e   : > { %5237 = vmatmul.mubr.msk.bf16.vlgmr.msra.gmra.mxu0 %vm1349_vm1, %v5999_v17 }
0x114f   : > { %5240 = vmatprep.mubr.msk.bf16.mxu0 %vm1349_vm1, %v6004_v19  ;;  %5253 = vmatpush3.bf16.msra.mxu0 %v5439_v20 }
0x1150   : > { %5254 = vmatprep.subr.bf16.mxu0 %v5609_v1 }
0x1153   : > { %5255 = vmatpush3.bf16.msra.mxu0 %v5441_v35 }
0x1156   : > { %5241 = vmatmul.mubr.msk.bf16.gmra.mxu0 %vm1349_vm1, %v6018_v25 }
0x1157   : > { %5256 = vmatprep.mubr.msk.bf16.mxu0 %vm5610_vm0, %v5609_v1 }
0x1206   : > { %v3046_v12 = vpop.f32.mrf.mxu0 }
0x1207   : > { %v3047_v13 = vadd.f32 %v4768_v7, %v3046_v12 }
0x1208   : > { %v5218_v14 = vpop.f32.mrf.mxu0 }
0x1209   : > { %v3052_v15 = vmax.f32 %v3047_v13, 0.0 }
0x120a   : > { %v3049_v16 = vpop.f32.mrf.mxu0 }
0x120b   : > { %v3053_v21 = vpack.c.bf16 %v3052_v15, %v3052_v15 }
0x120c   : > { %v5219_v22 = vpop.f32.mrf.mxu0 }
0x120d   : > { %5229 = vmatmul.mubr.msk.bf16.vlgmr.msra.gmra.mxu1 %vm2425_vm5, %v3053_v21 }
0x120e   : > { %5248 = vmatprep.mubr.msk.bf16.mxu1 %vm5610_vm0, %v5609_v1  ;;  %5245 = vmatpush3.bf16.msra.mxu1 %v5440_v34  ;;  %v5238_v50 = vpop.f32.mrf.mxu0 }
0x120f   : > { %5246 = vmatprep.subr.bf16.mxu1 %v5609_v1  ;;  %v3235_v51 = vadd.f32 %v5238_v50, %v4780_v49 }
0x1210   : > { %v3226_v52 = vpop.f32.mrf.mxu0 }
0x1211   : > { %v3227_v8 = vadd.f32 %v4780_v49, %v3226_v52 }
0x1212   : > { %5247 = vmatpush3.bf16.msra.mxu1 %v5442_v36  ;;  %v5239_v53 = vpop.f32.mrf.mxu0 }
0x1213   : > { %v3238_v6 = vadd.f32 %v5239_v53, %v4780_v49 }
0x1214   : > { %v3229_v54 = vpop.f32.mrf.mxu0 }
0x1215   : > { %v3390_v55 = vpack.c.bf16 %v3238_v6, %v3235_v51  ;;  %v3230_v29 = vadd.f32 %v4780_v49, %v3229_v54 }
0x1216   : > { %v5242_v57 = vpop.f32.mrf.mxu0 }
0x1217   : > { %v3389_v56 = vpack.c.bf16 %v3230_v29, %v3227_v8 }
0x1218   : > { %v3242_v59 = vpop.f32.mrf.mxu0 }
0x121a   : > { %v5243_v5 = vpop.f32.mrf.mxu0 }
0x121c   : > { %v3245_v58 = vpop.f32.mrf.mxu0 }
0x12cd   : > { %v3130_v24 = vpop.f32.mrf.mxu1 }
0x12ce   : > { %v3131_v26 = vadd.f32 %v4772_v23, %v3130_v24 }
0x12cf   : > { %v5230_v27 = vpop.f32.mrf.mxu1 }
0x12d0   : > { %v3136_v28 = vadd.f32 %v3131_v26, %v2984_v61  ;;  %v4791_v61 = vld [vmem:[%s6510_s3] ss:$0 sm:$0xff]  ;;  %v3243_v27 = vadd.f32 %v4780_v49, %v3242_v59 }
0x12d1   : > { %v3133_v60 = vpop.f32.mrf.mxu1 }
0x12d2   : > { %v3137_v2 = vsel %vm1349_vm1, %v3136_v28, 0.0 }
0x12d3   : > { %3138 = vadd.xlane.f32.xlu0 %v3137_v2  ;;  %v5231_v3 = vpop.f32.mrf.mxu1 }
0x12d4   : > { %v3251_v3 = vadd.f32 %v5242_v57, %v4780_v49 }
0x135c   : > { %v3139_v9 = vpop.xlane.xlu0 %3138 }
0x135d   : > { %v3140_v10 = vmul.f32 0.03125, %v3139_v9  ;;  %v3254_v9 = vadd.f32 %v5243_v5, %v4780_v49 }
0x135f   : > { %v3141_v30 = vsub.f32 %v3136_v28, %v3140_v10  ;;  %v3246_v28 = vadd.f32 %v4780_v49, %v3245_v58  ;;  %v3392_v10 = vpack.c.bf16 %v3254_v9, %v3251_v3 }
0x1361   : > { %v3142_v31 = vmul.f32 %v3141_v30, %v3141_v30  ;;  %v3391_v2 = vpack.c.bf16 %v3246_v28, %v3243_v27 }
0x1363   : > { %v3143_v32 = vsel %vm1349_vm1, %v3142_v31, 0.0 }
0x1364   : > { %3144 = vadd.xlane.f32.xlu1 %v3143_v32 }
0x13ed   : > { %v3145_v37 = vpop.xlane.xlu1 %3144 }
0x13ee   : > { %v3146_v38 = vmul.f32 0.03125, %v3145_v37 }
0x13f0   : > { %v3147_v39 = vadd.f32 1e-05, %v3146_v38 }
0x13f2   : > { %5469 = vrsqrt.f32 %v3147_v39 }
0x13ff   : > { %v5470_v40 = vpop.eup %5469 }
0x1400   : > { %v3149_v42 = vmul.f32 %v5470_v40, %v3141_v30 }
0x1402   : > { %v3157_v44 = vmul.f32 %v4778_v41, %v3149_v42 }
0x1404   : > { %v3165_v0 = vadd.f32 %v4779_v43, %v3157_v44 }
0x1406   : > { %4469 = vst.msk [vmem:[%s1298_s9] sm:$0xff] %vm1349_vm1, %v3165_v0  ;;  %v6202_v45 = vpack.c.bf16 %v3165_v0, %v3165_v0  ;;  %v3166_v47 = vadd.f32 %v5551_v46, %v3165_v0  ;;  %s6512_s9 = sld [smem:[#allocation22_spill]] }
0x1408   : > { %5257 = vmatmul.mubr.msk.bf16.vlgmr.msra.gmra.mxu0 %vm1349_vm1, %v6202_v45  ;;  %v6207_v48 = vpack.c.bf16 %v3166_v47, %v3166_v47 }
0x140a   : > { %5249 = vmatmul.mubr.msk.bf16.vlgmr.msra.gmra.mxu1 %vm1349_vm1, %v6207_v48 }
0x140b   : > { %5262 = vmatprep.mubr.msk.bf16.mxu1 %vm1572_vm3, %v3389_v56 }
0x14c8   : > { %v3383_v62 = vpop.f32.mrf.mxu0 }
0x14c9   : > { %v3384_v4 = vadd.f32 %v4791_v61, %v3383_v62 }
0x14ca   : > { %v3317_v7 = vpop.f32.mrf.mxu1  ;;  %v5258_v12 = vpop.f32.mrf.mxu0 }
0x14cb   : > { %v3574_v13 = vpack.c.bf16 %v3384_v4, %v3384_v4  ;;  %v3318_v14 = vadd.f32 %v4787_v63, %v3317_v7 }
0x14cc   : > { %v5250_v15 = vpop.f32.mrf.mxu1  ;;  %v3386_v16 = vpop.f32.mrf.mxu0 }
0x14cd   : > { %v3588_v21 = vsel %vm1589_vm4, %v3574_v13, 0  ;;  %v3393_v22 = vpack.c.bf16 %v3318_v14, %v3318_v14  ;;  %5349 = vmatprep.subr.msk.bf16.mxu0 %vm1589_vm4, %v3574_v13 }
0x14ce   : > { %v3320_v23 = vpop.f32.mrf.mxu1  ;;  %v5259_v24 = vpop.f32.mrf.mxu0  ;;  %5271 = vmatpush3.bf16.msra.mxu0 %v3588_v21 }
0x14cf   : > { %v3407_v26 = vsel %vm1572_vm3, %v3393_v22, 0  ;;  %5348 = vmatprep.subr.msk.bf16.mxu1 %vm1572_vm3, %v3393_v22  ;;  %5292 = vmatprep.subr.bf16.mxu0 %v5609_v1 }
0x14d0   : > { %v5251_v60 = vpop.f32.mrf.mxu1  ;;  %5261 = vmatpush3.bf16.xpose.msra.mxu1 %v3407_v26 }
0x14d7   : > { %5263 = vmatmul.mubr.msk.bf16.vlgmr.msra.gmra.mxu1 %vm1572_vm3, %v3390_v55 }
0x14d8   : > { %5266 = vmatprep.mubr.msk.bf16.mxu1 %vm1572_vm3, %v3391_v2 }
0x14df   : > { %5267 = vmatmul.mubr.msk.bf16.gmra.mxu1 %vm1572_vm3, %v3392_v10 }
0x14e0   : > { %5284 = vmatprep.mubr.msk.bf16.mxu1 %vm1349_vm1, %v5990_v11 }
0x1597   : > { %v5264_v30 = vpop.f32.mrf.mxu1 }
0x1598   : > { %v3476_v18 = vmul.f32 0.35355338, %v5264_v30 }
0x1599   : > { %v3443_v31 = vpop.f32.mrf.mxu1 }
0x159a   : > { %v3474_v32 = vmul.f32 0.35355338, %v3443_v31  ;;  %v3488_v38 = vsel %vm1572_vm3, %v3476_v18, -inf }
0x159b   : > { %v5265_v33 = vpop.f32.mrf.mxu1 }
0x159c   : > { %v3482_v20 = vsel %vm1572_vm3, %v3474_v32, -inf  ;;  %v3477_v37 = vmul.f32 0.35355338, %v5265_v33 }
0x159d   : > { %3483 = vmax.xlane.f32.xlu0 %v3482_v20  ;;  %v3446_v34 = vpop.f32.mrf.mxu1 }
0x159e   : > { %v3475_v35 = vmul.f32 0.35355338, %v3446_v34  ;;  %v3491_v43 = vsel %vm1572_vm3, %v3477_v37, -inf  ;;  %v5443_v34 = vld [vmem:[%s6504_s1 + $0x18] sm:$0xff]  }
0x159f   : > { %v5268_v36 = vpop.f32.mrf.mxu1  ;;  %5280 = vmatprep.subr.bf16.mxu1 %v5443_v34 }
0x15a0   : > { %v3485_v39 = vsel %vm1572_vm3, %v3475_v35, -inf  ;;  %v3480_v42 = vmul.f32 0.35355338, %v5268_v36  ;;  %5281 = vmatpush3.bf16.msra.mxu1 %v5443_v34 }
0x15a1   : > { %3489 = vmax.xlane.f32.xlu0 %v3488_v38  ;;  %3486 = vmax.xlane.f32.xlu1 %v3485_v39  ;;  %v3459_v40 = vpop.f32.mrf.mxu1 }
0x15a2   : > { %v3478_v11 = vmul.f32 0.35355338, %v3459_v40  ;;  %v3500_v49 = vsel %vm1572_vm3, %v3480_v42, -inf }
0x15a3   : > { %v5269_v41 = vpop.f32.mrf.mxu1 }
0x15a4   : > { %v3494_v44 = vsel %vm1572_vm3, %v3478_v11, -inf  ;;  %v3481_v47 = vmul.f32 0.35355338, %v5269_v41 }
0x15a5   : > { %3492 = vmax.xlane.f32.xlu1 %v3491_v43  ;;  %3495 = vmax.xlane.f32.xlu0 %v3494_v44  ;;  %v3462_v0 = vpop.f32.mrf.mxu1 }
0x15a6   : > { %v3479_v46 = vmul.f32 0.35355338, %v3462_v0  ;;  %v3503_v51 = vsel %vm1572_vm3, %v3481_v47, -inf }
0x15a8   : > { %v3497_v50 = vsel %vm1572_vm3, %v3479_v46, -inf }
0x15a9   : > { %3501 = vmax.xlane.f32.xlu0 %v3500_v49  ;;  %3498 = vmax.xlane.f32.xlu1 %v3497_v50 }
0x15ad   : > { %3504 = vmax.xlane.f32.xlu1 %v3503_v51  ;;  %v5444_v51 = vld [vmem:[%s6506_s22 + $0x18] sm:$0xff]  }
0x1626   : > { %v3484_v52 = vpop.xlane.xlu0 %3483 }
0x1627   : > { %v3506_v53 = vsub.f32 %v3474_v32, %v3484_v52 }
0x1629   : > { %v3514_v8 = vmul.f32 1.442695, %v3506_v53 }
0x162a   : > { %v3490_v6 = vpop.xlane.xlu0 %3489  ;;  %v3487_v54 = vpop.xlane.xlu1 %3486 }
0x162b   : > { %5471 = vpow2.f32 %v3514_v8  ;;  %v3508_v55 = vsub.f32 %v3476_v18, %v3490_v6  ;;  %v3507_v29 = vsub.f32 %v3475_v35, %v3487_v54  ;;  %v5445_v35 = vld [vmem:[%s6504_s1 + $0x10] sm:$0xff]  }
0x162c   : > { %5282 = vmatprep.subr.bf16.mxu1 %v5445_v35 }
0x162d   : > { %v3518_v56 = vmul.f32 1.442695, %v3508_v55  ;;  %v3516_v57 = vmul.f32 1.442695, %v3507_v29  ;;  %5283 = vmatpush3.bf16.msra.mxu1 %v5445_v35  ;;  %v5446_v55 = vld [vmem:[%s6506_s22 + $0x10] sm:$0xff]  }
0x162e   : > { %v3493_v59 = vpop.xlane.xlu1 %3492  ;;  %v3496_v5 = vpop.xlane.xlu0 %3495 }
0x162f   : > { %5473 = vpow2.f32 %v3518_v56  ;;  %v3509_v58 = vsub.f32 %v3477_v37, %v3493_v59  ;;  %v3510_v61 = vsub.f32 %v3478_v11, %v3496_v5 }
0x1630   : > { %5475 = vpow2.f32 %v3516_v57  ;;  %5285 = vmatmul.mubr.msk.bf16.vlgmr.msra.gmra.mxu1 %vm1349_vm1, %v5999_v17 }
0x1631   : > { %v3520_v62 = vmul.f32 1.442695, %v3509_v58  ;;  %v3522_v63 = vmul.f32 1.442695, %v3510_v61  ;;  %5288 = vmatprep.mubr.msk.bf16.mxu1 %vm1349_vm1, %v6004_v19  ;;  %v5447_v58 = vld [vmem:[%s6505_s2 + $0x18] sm:$0xff]   ;;  %v5448_v61 = vld [vmem:[%s6505_s2 + $0x10] sm:$0xff]  }
0x1632   : > { %v3502_v4 = vpop.xlane.xlu0 %3501  ;;  %v3499_v7 = vpop.xlane.xlu1 %3498 }
0x1633   : > { %5477 = vpow2.f32 %v3520_v62  ;;  %v3512_v12 = vsub.f32 %v3480_v42, %v3502_v4  ;;  %v3511_v13 = vsub.f32 %v3479_v46, %v3499_v7  ;;  %v4808_v7 = vld [vmem:[%s6509_s8 + $0x1] ss:$0 sm:$0xff] }
0x1634   : > { %5479 = vpow2.f32 %v3522_v63 }
0x1635   : > { %v3526_v14 = vmul.f32 1.442695, %v3512_v12  ;;  %v3524_v15 = vmul.f32 1.442695, %v3511_v13 }
0x1636   : > { %v3505_v16 = vpop.xlane.xlu1 %3504 }
0x1637   : > { %5481 = vpow2.f32 %v3526_v14  ;;  %v3513_v21 = vsub.f32 %v3481_v47, %v3505_v16 }
0x1638   : > { %v5472_v22 = vpop.eup %5471  ;;  %5483 = vpow2.f32 %v3524_v15  ;;  %5289 = vmatmul.mubr.msk.bf16.gmra.mxu1 %vm1349_vm1, %v6018_v25 }
0x1639   : > { %v3528_v23 = vmul.f32 1.442695, %v3513_v21  ;;  %v3530_v24 = vsel %vm1572_vm3, %v5472_v22, 0.0 }
0x163a   : > { %3531 = vadd.xlane.f32.xlu0 %v3530_v24 }
0x163b   : > { %5485 = vpow2.f32 %v3528_v23 }
0x163c   : > { %v5474_v26 = vpop.eup %5473 }
0x163d   : > { %v5476_v27 = vpop.eup %5475  ;;  %v3536_v28 = vsel %vm1572_vm3, %v5474_v26, 0.0 }
0x163e   : > { %3537 = vadd.xlane.f32.xlu0 %v3536_v28  ;;  %v3533_v60 = vsel %vm1572_vm3, %v5476_v27, 0.0 }
0x163f   : > { %3534 = vadd.xlane.f32.xlu1 %v3533_v60 }
0x1640   : > { %v5478_v2 = vpop.eup %5477 }
0x1641   : > { %v5480_v3 = vpop.eup %5479  ;;  %v3539_v9 = vsel %vm1572_vm3, %v5478_v2, 0.0 }
0x1642   : > { %v3542_v10 = vsel %vm1572_vm3, %v5480_v3, 0.0 }
0x1643   : > { %3543 = vadd.xlane.f32.xlu0 %v3542_v10  ;;  %3540 = vadd.xlane.f32.xlu1 %v3539_v9 }
0x1644   : > { %v5482_v30 = vpop.eup %5481 }
0x1645   : > { %v5484_v31 = vpop.eup %5483  ;;  %v3548_v32 = vsel %vm1572_vm3, %v5482_v30, 0.0 }
0x1646   : > { %v3545_v33 = vsel %vm1572_vm3, %v5484_v31, 0.0 }
0x1647   : > { %3549 = vadd.xlane.f32.xlu0 %v3548_v32  ;;  %3546 = vadd.xlane.f32.xlu1 %v3545_v33 }
0x1648   : > { %v5486_v18 = vpop.eup %5485 }
0x1649   : > { %v3551_v20 = vsel %vm1572_vm3, %v5486_v18, 0.0 }
0x164b   : > { %3552 = vadd.xlane.f32.xlu1 %v3551_v20 }
0x16c3   : > { %v3532_v36 = vpop.xlane.xlu0 %3531 }
0x16c4   : > { %5487 = vrcp.f32 %v3532_v36 }
0x16c7   : > { %v3538_v37 = vpop.xlane.xlu0 %3537 }
0x16c8   : > { %v3535_v38 = vpop.xlane.xlu1 %3534 }
0x16c9   : > { %5489 = vrcp.f32 %v3535_v38 }
0x16ca   : > { %5491 = vrcp.f32 %v3538_v37 }
0x16cc   : > { %v3544_v39 = vpop.xlane.xlu0 %3543  ;;  %v3541_v40 = vpop.xlane.xlu1 %3540 }
0x16cd   : > { %5493 = vrcp.f32 %v3541_v40 }
0x16ce   : > { %5495 = vrcp.f32 %v3544_v39  ;;  %v4829_v39 = vld [vmem:[%s6510_s3 + $0x1] ss:$0 sm:$0xff] }
0x16d0   : > { %v3550_v11 = vpop.xlane.xlu0 %3549  ;;  %v3547_v41 = vpop.xlane.xlu1 %3546 }
0x16d1   : > { %5497 = vrcp.f32 %v3547_v41  ;;  %v5488_v17 = vpop.eup %5487 }
0x16d2   : > { %5499 = vrcp.f32 %v3550_v11  ;;  %v3562_v25 = vmul.f32 %v5488_v17, %v5472_v22 }
0x16d4   : > { %v3553_v19 = vpop.xlane.xlu1 %3552 }
0x16d5   : > { %5501 = vrcp.f32 %v3553_v19 }
0x16d6   : > { %v5490_v42 = vpop.eup %5489 }
0x16d7   : > { %v3563_v43 = vmul.f32 %v5490_v42, %v5476_v27  ;;  %v5492_v44 = vpop.eup %5491 }
0x16d8   : > { %v3564_v47 = vmul.f32 %v5492_v44, %v5474_v26 }
0x16d9   : > { %v3570_v0 = vpack.c.bf16 %v3563_v43, %v3562_v25 }
0x16da   : > { %v5494_v46 = vpop.eup %5493 }
0x16db   : > { %5272 = vmatprep.mubr.msk.bf16.mxu0 %vm1572_vm3, %v3570_v0  ;;  %v3565_v49 = vmul.f32 %v5494_v46, %v5478_v2  ;;  %v5496_v50 = vpop.eup %5495 }
0x16dc   : > { %v3566_v6 = vmul.f32 %v5496_v50, %v5480_v3 }
0x16dd   : > { %v3571_v52 = vpack.c.bf16 %v3565_v49, %v3564_v47 }
0x16de   : > { %v5498_v53 = vpop.eup %5497 }
0x16df   : > { %v5500_v8 = vpop.eup %5499  ;;  %5273 = vmatmul.mubr.msk.bf16.vlgmr.msra.gmra.mxu0 %vm1572_vm3, %v3571_v52  ;;  %v3567_v54 = vmul.f32 %v5498_v53, %v5484_v31 }
0x16e0   : > { %5293 = vmatpush3.bf16.msra.mxu0 %v5444_v51  ;;  %v3568_v57 = vmul.f32 %v5500_v8, %v5482_v30  ;;  %v4820_v30 = vld [vmem:[%s6511_s5 + $0x1] ss:$0 sm:$0xff] }
0x16e1   : > { %v3572_v56 = vpack.c.bf16 %v3567_v54, %v3566_v6  ;;  %5294 = vmatprep.subr.bf16.mxu0 %v5609_v1 }
0x16e2   : > { %v5502_v29 = vpop.eup %5501 }
0x16e3   : > { %v3569_v59 = vmul.f32 %v5502_v29, %v5486_v18  ;;  %5276 = vmatprep.mubr.msk.bf16.mxu0 %vm1572_vm3, %v3572_v56 }
0x16e4   : > { %5295 = vmatpush3.bf16.msra.mxu0 %v5446_v55 }
0x16e5   : > { %v3573_v5 = vpack.c.bf16 %v3569_v59, %v3568_v57  ;;  %5300 = vmatprep.subr.bf16.mxu0 %v5609_v1 }
0x16e7   : > { %5277 = vmatmul.mubr.msk.bf16.gmra.mxu0 %vm1572_vm3, %v3573_v5 }
0x16e8   : > { %5296 = vmatprep.mubr.msk.bf16.mxu0 %vm5610_vm0, %v5609_v1 }
0x16ef   : > { %5297 = vmatmul.mubr.msk.bf16.vlgmr.msra.gmra.mxu0 %vm1349_vm1, %v6207_v48 }
0x16f0   : > { %5301 = vmatpush3.bf16.msra.mxu0 %v5447_v58  ;;  %5304 = vmatprep.mubr.msk.bf16.mxu0 %vm5610_vm0, %v5609_v1  ;;  %v5286_v62 = vpop.f32.mrf.mxu1 }
0x16f1   : > { %5302 = vmatprep.subr.bf16.mxu0 %v5609_v1  ;;  %v3728_v13 = vadd.f32 %v5286_v62, %v4808_v7 }
0x16f2   : > { %v3719_v63 = vpop.f32.mrf.mxu1 }
0x16f3   : > { %v3720_v14 = vadd.f32 %v4808_v7, %v3719_v63 }
0x16f4   : > { %5303 = vmatpush3.bf16.msra.mxu0 %v5448_v61  ;;  %v5287_v4 = vpop.f32.mrf.mxu1 }
0x16f5   : > { %v3731_v15 = vadd.f32 %v5287_v4, %v4808_v7 }
0x16f6   : > { %v3722_v12 = vpop.f32.mrf.mxu1 }
0x16f7   : > { %5305 = vmatmul.mubr.msk.bf16.vlgmr.msra.gmra.mxu0 %vm1349_vm1, %v6202_v45  ;;  %v3723_v48 = vadd.f32 %v4808_v7, %v3722_v12  ;;  %v3881_v16 = vpack.c.bf16 %v3731_v15, %v3728_v13 }
0x16f8   : > { %v5290_v27 = vpop.f32.mrf.mxu1 }
0x16f9   : > { %v3880_v21 = vpack.c.bf16 %v3723_v48, %v3720_v14  ;;  %v3744_v46 = vadd.f32 %v5290_v27, %v4808_v7 }
0x16fa   : > { %v3735_v2 = vpop.f32.mrf.mxu1 }
0x16fb   : > { %5310 = vmatprep.mubr.msk.bf16.mxu1 %vm1572_vm3, %v3880_v21  ;;  %v3736_v40 = vadd.f32 %v4808_v7, %v3735_v2 }
0x16fc   : > { %v5291_v32 = vpop.f32.mrf.mxu1 }
0x16fd   : > { %v3747_v47 = vadd.f32 %v5291_v32, %v4808_v7 }
0x16fe   : > { %v3738_v35 = vpop.f32.mrf.mxu1 }
0x16ff   : > { %v3739_v11 = vadd.f32 %v4808_v7, %v3738_v35  ;;  %v3883_v49 = vpack.c.bf16 %v3747_v47, %v3744_v46 }
0x1701   : > { %v3882_v42 = vpack.c.bf16 %v3739_v11, %v3736_v40 }
0x179f   : > { %v6270_v22 = vpop.f32.mrf.mxu0 }
0x17a1   : > { %v6272_v1 = vpop.f32.mrf.mxu0 }
0x17a3   : > { %v6274_v23 = vpop.f32.mrf.mxu0 }
0x17a4   : > { %v3656_v45 = vpack.c.bf16 %v6274_v23, %v6270_v22 }
0x17a5   : > { %v6278_v24 = vpop.f32.mrf.mxu0 }
0x17a6   : > { %v3655_v26 = vpack.c.bf16 %v6278_v24, %v6272_v1 }
0x17a7   : > { %v6282_v28 = vpop.f32.mrf.mxu0 }
0x17a9   : > { %v6284_v60 = vpop.f32.mrf.mxu0 }
0x17ab   : > { %v6286_v3 = vpop.f32.mrf.mxu0 }
0x17ac   : > { %v3658_v9 = vpack.c.bf16 %v6286_v3, %v6282_v28 }
0x17ad   : > { %v6290_v10 = vpop.f32.mrf.mxu0 }
0x17ae   : > { %v3657_v31 = vpack.c.bf16 %v6290_v10, %v6284_v60 }
0x17af   : > { %v3809_v33 = vpop.f32.mrf.mxu0 }
0x17b0   : > { %v3810_v18 = vadd.f32 %v4820_v30, %v3809_v33 }
0x17b1   : > { %v5298_v20 = vpop.f32.mrf.mxu0 }
0x17b2   : > { %v3884_v34 = vpack.c.bf16 %v3810_v18, %v3810_v18 }
0x17b3   : > { %v3812_v36 = vpop.f32.mrf.mxu0 }
0x17b4   : > { %v3898_v37 = vsel %vm1572_vm3, %v3884_v34, 0  ;;  %5350 = vmatprep.subr.msk.bf16.mxu1 %vm1572_vm3, %v3884_v34 }
0x17b5   : > { %v5299_v38 = vpop.f32.mrf.mxu0  ;;  %5309 = vmatpush3.bf16.xpose.msra.mxu1 %v3898_v37 }
0x17b7   : > { %v3874_v41 = vpop.f32.mrf.mxu0 }
0x17b8   : > { %v3875_v17 = vadd.f32 %v4829_v39, %v3874_v41 }
0x17b9   : > { %v5306_v19 = vpop.f32.mrf.mxu0 }
0x17ba   : > { %v4065_v25 = vpack.c.bf16 %v3875_v17, %v3875_v17 }
0x17bb   : > { %v3877_v43 = vpop.f32.mrf.mxu0 }
0x17bc   : > { %v4079_v44 = vsel %vm1589_vm4, %v4065_v25, 0  ;;  %5311 = vmatmul.mubr.msk.bf16.vlgmr.msra.gmra.mxu1 %vm1572_vm3, %v3881_v16  ;;  %5351 = vmatprep.subr.msk.bf16.mxu0 %vm1589_vm4, %v4065_v25 }
0x17bd   : > { %v5307_v0 = vpop.f32.mrf.mxu0  ;;  %5319 = vmatpush3.bf16.msra.mxu0 %v4079_v44  ;;  %5314 = vmatprep.mubr.msk.bf16.mxu1 %vm1572_vm3, %v3882_v42 }
0x17c4   : > { %5315 = vmatmul.mubr.msk.bf16.gmra.mxu1 %vm1572_vm3, %v3883_v49 }
0x187c   : > { %v5312_v50 = vpop.f32.mrf.mxu1 }
0x187d   : > { %v3967_v8 = vmul.f32 0.35355338, %v5312_v50 }
0x187e   : > { %v3934_v51 = vpop.f32.mrf.mxu1 }
0x187f   : > { %v3965_v52 = vmul.f32 0.35355338, %v3934_v51  ;;  %v3979_v57 = vsel %vm1572_vm3, %v3967_v8, -inf }
0x1880   : > { %v5313_v53 = vpop.f32.mrf.mxu1 }
0x1881   : > { %v3973_v6 = vsel %vm1572_vm3, %v3965_v52, -inf  ;;  %v3968_v56 = vmul.f32 0.35355338, %v5313_v53 }
0x1882   : > { %3974 = vmax.xlane.f32.xlu0 %v3973_v6  ;;  %v3937_v54 = vpop.f32.mrf.mxu1 }
0x1883   : > { %v3966_v55 = vmul.f32 0.35355338, %v3937_v54  ;;  %v3982_v63 = vsel %vm1572_vm3, %v3968_v56, -inf }
0x1884   : > { %v5316_v29 = vpop.f32.mrf.mxu1 }
0x1885   : > { %v3976_v59 = vsel %vm1572_vm3, %v3966_v55, -inf  ;;  %v3971_v62 = vmul.f32 0.35355338, %v5316_v29 }
0x1886   : > { %3980 = vmax.xlane.f32.xlu0 %v3979_v57  ;;  %3977 = vmax.xlane.f32.xlu1 %v3976_v59  ;;  %v3950_v5 = vpop.f32.mrf.mxu1 }
0x1887   : > { %v3969_v58 = vmul.f32 0.35355338, %v3950_v5  ;;  %v3991_v14 = vsel %vm1572_vm3, %v3971_v62, -inf  ;;  %v3659_v5 = vld [vmem:[%s6512_s9] sm:$0xf] }
0x1888   : > { %v5317_v61 = vpop.f32.mrf.mxu1  ;;  %5353 = vmatprep.subr.msk.bf16.mxu0 %vm1589_vm4, %v3659_v5 }
0x1889   : > { %v3985_v4 = vsel %vm1572_vm3, %v3969_v58, -inf  ;;  %v3972_v13 = vmul.f32 0.35355338, %v5317_v61 }
0x188a   : > { %3983 = vmax.xlane.f32.xlu1 %v3982_v63  ;;  %3986 = vmax.xlane.f32.xlu0 %v3985_v4  ;;  %v3953_v7 = vpop.f32.mrf.mxu1 }
0x188b   : > { %v3970_v12 = vmul.f32 0.35355338, %v3953_v7  ;;  %v3994_v48 = vsel %vm1572_vm3, %v3972_v13, -inf }
0x188d   : > { %v3988_v15 = vsel %vm1572_vm3, %v3970_v12, -inf }
0x188e   : > { %3992 = vmax.xlane.f32.xlu0 %v3991_v14  ;;  %3989 = vmax.xlane.f32.xlu1 %v3988_v15 }
0x1892   : > { %3995 = vmax.xlane.f32.xlu1 %v3994_v48 }
0x190b   : > { %v3975_v16 = vpop.xlane.xlu0 %3974 }
0x190c   : > { %v3997_v21 = vsub.f32 %v3965_v52, %v3975_v16 }
0x190e   : > { %v4005_v27 = vmul.f32 1.442695, %v3997_v21 }
0x190f   : > { %v3981_v2 = vpop.xlane.xlu0 %3980  ;;  %v3978_v30 = vpop.xlane.xlu1 %3977 }
0x1910   : > { %5503 = vpow2.f32 %v4005_v27  ;;  %v3999_v32 = vsub.f32 %v3967_v8, %v3981_v2  ;;  %v3998_v33 = vsub.f32 %v3966_v55, %v3978_v30 }
0x1912   : > { %v4009_v18 = vmul.f32 1.442695, %v3999_v32  ;;  %v4007_v20 = vmul.f32 1.442695, %v3998_v33 }
0x1913   : > { %v3984_v34 = vpop.xlane.xlu1 %3983  ;;  %v3987_v35 = vpop.xlane.xlu0 %3986 }
0x1914   : > { %5505 = vpow2.f32 %v4009_v18  ;;  %v4000_v36 = vsub.f32 %v3968_v56, %v3984_v34  ;;  %v4001_v37 = vsub.f32 %v3969_v58, %v3987_v35 }
0x1915   : > { %5507 = vpow2.f32 %v4007_v20  ;;  %v4245_v20 = vsel %vm1589_vm4, %v3659_v5, 0 }
0x1916   : > { %v4011_v38 = vmul.f32 1.442695, %v4000_v36  ;;  %v4013_v39 = vmul.f32 1.442695, %v4001_v37 }
0x1917   : > { %v3993_v40 = vpop.xlane.xlu0 %3992  ;;  %v3990_v11 = vpop.xlane.xlu1 %3989 }
0x1918   : > { %5509 = vpow2.f32 %v4011_v38  ;;  %v4003_v41 = vsub.f32 %v3971_v62, %v3993_v40  ;;  %v4002_v17 = vsub.f32 %v3970_v12, %v3990_v11 }
0x1919   : > { %5511 = vpow2.f32 %v4013_v39 }
0x191a   : > { %v4017_v19 = vmul.f32 1.442695, %v4003_v41  ;;  %v4015_v42 = vmul.f32 1.442695, %v4002_v17  ;;  %v4841_v17 = vld [vmem:[%s6512_s9 + $0x4] sm:$0xf] }
0x191b   : > { %v3996_v25 = vpop.xlane.xlu1 %3995  ;;  %5352 = vmatprep.subr.msk.bf16.mxu1 %vm1589_vm4, %v4841_v17  ;;  %v4165_v1 = vsel %vm1589_vm4, %v4841_v17, 0  ;;  %v5558_v17 = vld [vmem:[%s5957_s18 + $0x28] sm:$0xff] }
0x191c   : > { %5513 = vpow2.f32 %v4017_v19  ;;  %v4004_v43 = vsub.f32 %v3972_v13, %v3996_v25  ;;  %5329 = vmatpush3.bf16.msra.mxu1 %v4165_v1 }
0x191d   : > { %v5504_v44 = vpop.eup %5503  ;;  %5515 = vpow2.f32 %v4015_v42 }
0x191e   : > { %v4019_v0 = vmul.f32 1.442695, %v4004_v43  ;;  %v4021_v46 = vsel %vm1572_vm3, %v5504_v44, 0.0 }
0x191f   : > { %4022 = vadd.xlane.f32.xlu0 %v4021_v46  ;;  %v4850_v46 = vld [vmem:[%s6513_s0] ss:$0 sm:$0xff] }
0x1920   : > { %5517 = vpow2.f32 %v4019_v0 }
0x1921   : > { %v5506_v47 = vpop.eup %5505 }
0x1922   : > { %v5508_v49 = vpop.eup %5507  ;;  %v4027_v50 = vsel %vm1572_vm3, %v5506_v47, 0.0 }
0x1923   : > { %4028 = vadd.xlane.f32.xlu0 %v4027_v50  ;;  %v4024_v51 = vsel %vm1572_vm3, %v5508_v49, 0.0 }
0x1924   : > { %4025 = vadd.xlane.f32.xlu1 %v4024_v51 }
0x1925   : > { %v5510_v52 = vpop.eup %5509 }
0x1926   : > { %v5512_v53 = vpop.eup %5511  ;;  %v4030_v8 = vsel %vm1572_vm3, %v5510_v52, 0.0 }
0x1927   : > { %v4033_v6 = vsel %vm1572_vm3, %v5512_v53, 0.0 }
0x1928   : > { %4034 = vadd.xlane.f32.xlu0 %v4033_v6  ;;  %4031 = vadd.xlane.f32.xlu1 %v4030_v8 }
0x1929   : > { %v5514_v54 = vpop.eup %5513 }
0x192a   : > { %v5516_v55 = vpop.eup %5515  ;;  %v4039_v29 = vsel %vm1572_vm3, %v5514_v54, 0.0 }
0x192b   : > { %v4036_v56 = vsel %vm1572_vm3, %v5516_v55, 0.0 }
0x192c   : > { %4040 = vadd.xlane.f32.xlu0 %v4039_v29  ;;  %4037 = vadd.xlane.f32.xlu1 %v4036_v56 }
0x192d   : > { %v5518_v57 = vpop.eup %5517 }
0x192e   : > { %v4042_v59 = vsel %vm1572_vm3, %v5518_v57, 0.0 }
0x1930   : > { %4043 = vadd.xlane.f32.xlu1 %v4042_v59 }
0x19a8   : > { %v4023_v58 = vpop.xlane.xlu0 %4022 }
0x19a9   : > { %5519 = vrcp.f32 %v4023_v58  ;;  %v5553_v58 = vld [vmem:[%s5957_s18] sm:$0xff] }
0x19ac   : > { %v4029_v61 = vpop.xlane.xlu0 %4028 }
0x19ad   : > { %v4026_v62 = vpop.xlane.xlu1 %4025 }
0x19ae   : > { %5521 = vrcp.f32 %v4026_v62 }
0x19af   : > { %5523 = vrcp.f32 %v4029_v61 }
0x19b1   : > { %v4035_v63 = vpop.xlane.xlu0 %4034  ;;  %v4032_v4 = vpop.xlane.xlu1 %4031 }
0x19b2   : > { %5525 = vrcp.f32 %v4032_v4 }
0x19b3   : > { %5527 = vrcp.f32 %v4035_v63 }
0x19b5   : > { %v4041_v7 = vpop.xlane.xlu0 %4040  ;;  %v4038_v12 = vpop.xlane.xlu1 %4037 }
0x19b6   : > { %5529 = vrcp.f32 %v4038_v12  ;;  %v5520_v13 = vpop.eup %5519 }
0x19b7   : > { %5531 = vrcp.f32 %v4041_v7  ;;  %v4053_v48 = vmul.f32 %v5520_v13, %v5504_v44  ;;  %v5554_v7 = vld [vmem:[%s5957_s18 + $0x18] sm:$0xff] }
0x19b9   : > { %v4044_v14 = vpop.xlane.xlu1 %4043 }
0x19ba   : > { %5533 = vrcp.f32 %v4044_v14 }
0x19bb   : > { %v5522_v15 = vpop.eup %5521 }
0x19bc   : > { %v4054_v16 = vmul.f32 %v5522_v15, %v5508_v49  ;;  %v5524_v21 = vpop.eup %5523 }
0x19bd   : > { %v4055_v30 = vmul.f32 %v5524_v21, %v5506_v47  ;;  %v5555_v21 = vld [vmem:[%s5957_s18 + $0x8] sm:$0xff] }
0x19be   : > { %v4061_v27 = vpack.c.bf16 %v4054_v16, %v4053_v48 }
0x19bf   : > { %v5526_v2 = vpop.eup %5525 }
0x19c0   : > { %5320 = vmatprep.mubr.msk.bf16.mxu0 %vm1572_vm3, %v4061_v27  ;;  %v4056_v32 = vmul.f32 %v5526_v2, %v5510_v52  ;;  %v5528_v33 = vpop.eup %5527 }
0x19c1   : > { %v4057_v36 = vmul.f32 %v5528_v33, %v5512_v53 }
0x19c2   : > { %v4062_v18 = vpack.c.bf16 %v4056_v32, %v4055_v30 }
0x19c3   : > { %v5530_v34 = vpop.eup %5529 }
0x19c4   : > { %v5532_v35 = vpop.eup %5531  ;;  %5321 = vmatmul.mubr.msk.bf16.vlgmr.msra.gmra.mxu0 %vm1572_vm3, %v4062_v18  ;;  %v4058_v37 = vmul.f32 %v5530_v34, %v5516_v55 }
0x19c5   : > { %5339 = vmatpush3.bf16.msra.mxu0 %v4245_v20  ;;  %v4059_v40 = vmul.f32 %v5532_v35, %v5514_v54  ;;  %v5552_v54 = vld [vmem:[%s5957_s18 + $0x10] sm:$0xff] }
0x19c6   : > { %v4063_v39 = vpack.c.bf16 %v4058_v37, %v4057_v36  ;;  %v5556_v36 = vld [vmem:[%s5957_s18 + $0x20] sm:$0xff] }
0x19c7   : > { %v5534_v38 = vpop.eup %5533 }
0x19c8   : > { %v4060_v11 = vmul.f32 %v5534_v38, %v5518_v57  ;;  %5324 = vmatprep.mubr.msk.bf16.mxu0 %vm1572_vm3, %v4063_v39 }
0x19ca   : > { %v4064_v41 = vpack.c.bf16 %v4060_v11, %v4059_v40  ;;  %v5557_v11 = vld [vmem:[%s5957_s18 + $0x30] sm:$0xff] }
0x19cc   : > { %5325 = vmatmul.mubr.msk.bf16.gmra.mxu0 %vm1572_vm3, %v4064_v41 }
0x19cd   : > { %5340 = vmatprep.mubr.msk.bf16.mxu0 %vm1572_vm3, %v3655_v26 }
0x19d4   : > { %5341 = vmatmul.mubr.msk.bf16.vlgmr.msra.gmra.mxu0 %vm1572_vm3, %v3656_v45 }
0x19d5   : > { %5344 = vmatprep.mubr.msk.bf16.mxu0 %vm1572_vm3, %v3657_v31 }
0x19dc   : > { %5345 = vmatmul.mubr.msk.bf16.gmra.mxu0 %vm1572_vm3, %v3658_v9 }
0x1a84   : > { %v5322_v24 = vpop.f32.mrf.mxu0 }
0x1a86   : > { %v4115_v22 = vpop.f32.mrf.mxu0 }
0x1a88   : > { %v5323_v23 = vpop.f32.mrf.mxu0 }
0x1a89   : > { %v4147_v19 = vpack.c.bf16 %v5323_v23, %v5322_v24  ;;  %v5559_v23 = vld [vmem:[%s5957_s18 + $0x38] sm:$0xff] }
0x1a8a   : > { %v4118_v45 = vpop.f32.mrf.mxu0 }
0x1a8b   : > { %v4146_v26 = vpack.c.bf16 %v4118_v45, %v4115_v22 }
0x1a8c   : > { %v5326_v60 = vpop.f32.mrf.mxu0 }
0x1a8d   : > { %5330 = vmatprep.mubr.msk.bf16.mxu1 %vm1572_vm3, %v4146_v26 }
0x1a8e   : > { %v4131_v10 = vpop.f32.mrf.mxu0  ;;  %5331 = vmatmul.mubr.msk.bf16.vlgmr.msra.gmra.mxu1 %vm1572_vm3, %v4147_v19 }
0x1a90   : > { %v5327_v28 = vpop.f32.mrf.mxu0 }
0x1a91   : > { %v4149_v31 = vpack.c.bf16 %v5327_v28, %v5326_v60 }
0x1a92   : > { %v4134_v3 = vpop.f32.mrf.mxu0 }
0x1a93   : > { %v4148_v9 = vpack.c.bf16 %v4134_v3, %v4131_v10 }
0x1a94   : > { %v5342_v42 = vpop.f32.mrf.mxu0 }
0x1a95   : > { %5334 = vmatprep.mubr.msk.bf16.mxu1 %vm1572_vm3, %v4148_v9 }
0x1a96   : > { %5335 = vmatmul.mubr.msk.bf16.gmra.mxu1 %vm1572_vm3, %v4149_v31  ;;  %v4281_v25 = vpop.f32.mrf.mxu0 }
0x1a98   : > { %v5343_v43 = vpop.f32.mrf.mxu0 }
0x1a9a   : > { %v4284_v44 = vpop.f32.mrf.mxu0 }
0x1a9c   : > { %v5346_v49 = vpop.f32.mrf.mxu0 }
0x1a9e   : > { %v4297_v29 = vpop.f32.mrf.mxu0 }
0x1aa0   : > { %v5347_v13 = vpop.f32.mrf.mxu0 }
0x1aa2   : > { %v4300_v18 = vpop.f32.mrf.mxu0 }
0x1b4e   : > { %v5332_v0 = vpop.f32.mrf.mxu1 }
0x1b4f   : > { %v4290_v47 = vadd.f32 %v5342_v42, %v5332_v0 }
0x1b50   : > { %v4201_v50 = vpop.f32.mrf.mxu1 }
0x1b51   : > { %v4321_v51 = vadd.f32 %v4850_v46, %v4290_v47  ;;  %v4282_v52 = vadd.f32 %v4281_v25, %v4201_v50 }
0x1b52   : > { %v5333_v53 = vpop.f32.mrf.mxu1 }
0x1b53   : > { %v4319_v8 = vadd.f32 %v4850_v46, %v4282_v52  ;;  %v4293_v6 = vadd.f32 %v5343_v43, %v5333_v53  ;;  %v4329_v55 = vadd.f32 %v5552_v54, %v4321_v51 }
0x1b54   : > { %v4204_v56 = vpop.f32.mrf.mxu1 }
0x1b55   : > { %v4322_v57 = vadd.f32 %v4850_v46, %v4293_v6  ;;  %v4285_v59 = vadd.f32 %v4284_v44, %v4204_v56  ;;  %v4341_v5 = vsel %vm1349_vm1, %v4329_v55, 0.0  ;;  %v4327_v61 = vadd.f32 %v5553_v58, %v4319_v8 }
0x1b56   : > { %4342 = vadd.xlane.f32.xlu0 %v4341_v5  ;;  %v5336_v62 = vpop.f32.mrf.mxu1 }
0x1b57   : > { %v4320_v63 = vadd.f32 %v4850_v46, %v4285_v59  ;;  %v4306_v4 = vadd.f32 %v5346_v49, %v5336_v62  ;;  %v4330_v12 = vadd.f32 %v5554_v7, %v4322_v57  ;;  %v4335_v16 = vsel %vm1349_vm1, %v4327_v61, 0.0 }
0x1b58   : > { %v4217_v14 = vpop.f32.mrf.mxu1 }
0x1b59   : > { %v4298_v15 = vadd.f32 %v4297_v29, %v4217_v14  ;;  %v4344_v48 = vsel %vm1349_vm1, %v4330_v12, 0.0  ;;  %v4328_v27 = vadd.f32 %v5555_v21, %v4320_v63  ;;  %v4325_v30 = vadd.f32 %v4850_v46, %v4306_v4 }
0x1b5a   : > { %4345 = vadd.xlane.f32.xlu1 %v4344_v48  ;;  %4336 = vadd.xlane.f32.xlu0 %v4335_v16  ;;  %v5337_v2 = vpop.f32.mrf.mxu1 }
0x1b5b   : > { %v4323_v32 = vadd.f32 %v4850_v46, %v4298_v15  ;;  %v4309_v33 = vadd.f32 %v5347_v13, %v5337_v2  ;;  %v4338_v35 = vsel %vm1349_vm1, %v4328_v27, 0.0  ;;  %v4333_v41 = vadd.f32 %v5557_v11, %v4325_v30 }
0x1b5c   : > { %v4220_v20 = vpop.f32.mrf.mxu1 }
0x1b5d   : > { %v4301_v34 = vadd.f32 %v4300_v18, %v4220_v20  ;;  %v4331_v37 = vadd.f32 %v5556_v36, %v4323_v32  ;;  %v4326_v38 = vadd.f32 %v4850_v46, %v4309_v33  ;;  %v4353_v22 = vsel %vm1349_vm1, %v4333_v41, 0.0 }
0x1b5e   : > { %4339 = vadd.xlane.f32.xlu1 %v4338_v35 }
0x1b5f   : > { %v4324_v39 = vadd.f32 %v4850_v46, %v4301_v34  ;;  %v4347_v40 = vsel %vm1349_vm1, %v4331_v37, 0.0  ;;  %v4334_v45 = vadd.f32 %v5559_v23, %v4326_v38 }
0x1b60   : > { %4348 = vadd.xlane.f32.xlu0 %v4347_v40 }
0x1b61   : > { %v4332_v1 = vadd.f32 %v5558_v17, %v4324_v39  ;;  %v4356_v26 = vsel %vm1349_vm1, %v4334_v45, 0.0 }
0x1b63   : > { %v4350_v24 = vsel %vm1349_vm1, %v4332_v1, 0.0 }
0x1b64   : > { %4351 = vadd.xlane.f32.xlu1 %v4350_v24  ;;  %4354 = vadd.xlane.f32.xlu0 %v4353_v22 }
0x1b68   : > { %4357 = vadd.xlane.f32.xlu1 %v4356_v26 }
0x1bdf   : > { %v4343_v19 = vpop.xlane.xlu0 %4342 }
0x1be0   : > { %v4361_v60 = vmul.f32 0.03125, %v4343_v19 }
0x1be2   : > { %v6366_v10 = vsub.f32 %v4329_v55, %v4361_v60 }
0x1be3   : > { %v4346_v28 = vpop.xlane.xlu1 %4345  ;;  %v4337_v3 = vpop.xlane.xlu0 %4336 }
0x1be4   : > { %v4362_v9 = vmul.f32 0.03125, %v4346_v28  ;;  %v4359_v31 = vmul.f32 0.03125, %v4337_v3  ;;  %v4377_v42 = vmul.f32 %v6366_v10, %v6366_v10  ;;  %v4852_v28 = vld [vmem:[%s5814_s20] ss:$0 sm:$0xff] }
0x1be6   : > { %v6370_v25 = vsub.f32 %v4330_v12, %v4362_v9  ;;  %v6372_v43 = vsub.f32 %v4327_v61, %v4359_v31  ;;  %v4389_v44 = vsel %vm1349_vm1, %v4377_v42, 0.0 }
0x1be7   : > { %v4340_v0 = vpop.xlane.xlu1 %4339  ;;  %4390 = vadd.xlane.f32.xlu0 %v4389_v44 }
0x1be8   : > { %v4360_v46 = vmul.f32 0.03125, %v4340_v0  ;;  %v4378_v47 = vmul.f32 %v6370_v25, %v6370_v25  ;;  %v4375_v49 = vmul.f32 %v6372_v43, %v6372_v43 }
0x1be9   : > { %v4349_v50 = vpop.xlane.xlu0 %4348 }
0x1bea   : > { %v6379_v51 = vsub.f32 %v4328_v27, %v4360_v46  ;;  %v4363_v52 = vmul.f32 0.03125, %v4349_v50  ;;  %v4392_v53 = vsel %vm1349_vm1, %v4378_v47, 0.0  ;;  %v4383_v8 = vsel %vm1349_vm1, %v4375_v49, 0.0 }
0x1beb   : > { %4393 = vadd.xlane.f32.xlu1 %v4392_v53  ;;  %4384 = vadd.xlane.f32.xlu0 %v4383_v8 }
0x1bec   : > { %v6383_v6 = vsub.f32 %v4331_v37, %v4363_v52  ;;  %v4376_v54 = vmul.f32 %v6379_v51, %v6379_v51 }
0x1bed   : > { %v4352_v55 = vpop.xlane.xlu1 %4351  ;;  %v4355_v29 = vpop.xlane.xlu0 %4354 }
0x1bee   : > { %v4364_v56 = vmul.f32 0.03125, %v4352_v55  ;;  %v4365_v57 = vmul.f32 0.03125, %v4355_v29  ;;  %v4386_v59 = vsel %vm1349_vm1, %v4376_v54, 0.0  ;;  %v4379_v5 = vmul.f32 %v6383_v6, %v6383_v6 }
0x1bef   : > { %4387 = vadd.xlane.f32.xlu1 %v4386_v59 }
0x1bf0   : > { %v6390_v58 = vsub.f32 %v4332_v1, %v4364_v56  ;;  %v6392_v61 = vsub.f32 %v4333_v41, %v4365_v57  ;;  %v4395_v62 = vsel %vm1349_vm1, %v4379_v5, 0.0 }
0x1bf1   : > { %v4358_v63 = vpop.xlane.xlu1 %4357  ;;  %4396 = vadd.xlane.f32.xlu0 %v4395_v62 }
0x1bf2   : > { %v4366_v4 = vmul.f32 0.03125, %v4358_v63  ;;  %v4380_v7 = vmul.f32 %v6390_v58, %v6390_v58  ;;  %v4381_v12 = vmul.f32 %v6392_v61, %v6392_v61 }
0x1bf4   : > { %v6399_v13 = vsub.f32 %v4334_v45, %v4366_v4  ;;  %v4398_v14 = vsel %vm1349_vm1, %v4380_v7, 0.0  ;;  %v4401_v15 = vsel %vm1349_vm1, %v4381_v12, 0.0  ;;  %v4851_v45 = vld [vmem:[%s5809_s6] ss:$0 sm:$0xff] }
0x1bf5   : > { %4399 = vadd.xlane.f32.xlu1 %v4398_v14  ;;  %4402 = vadd.xlane.f32.xlu0 %v4401_v15 }
0x1bf6   : > { %v4382_v48 = vmul.f32 %v6399_v13, %v6399_v13 }
0x1bf8   : > { %v4404_v16 = vsel %vm1349_vm1, %v4382_v48, 0.0 }
0x1bf9   : > { %4405 = vadd.xlane.f32.xlu1 %v4404_v16 }
0x1c70   : > { %v4391_v21 = vpop.xlane.xlu0 %4390 }
0x1c71   : > { %v4409_v27 = vmul.f32 0.03125, %v4391_v21 }
0x1c73   : > { %v4417_v2 = vadd.f32 1e-05, %v4409_v27 }
0x1c74   : > { %v4394_v30 = vpop.xlane.xlu1 %4393  ;;  %v4385_v32 = vpop.xlane.xlu0 %4384 }
0x1c75   : > { %5535 = vrsqrt.f32 %v4417_v2  ;;  %v4410_v33 = vmul.f32 0.03125, %v4394_v30  ;;  %v4407_v18 = vmul.f32 0.03125, %v4385_v32 }
0x1c77   : > { %v4418_v20 = vadd.f32 1e-05, %v4410_v33  ;;  %v4415_v34 = vadd.f32 1e-05, %v4407_v18 }
0x1c78   : > { %v4388_v35 = vpop.xlane.xlu1 %4387 }
0x1c79   : > { %5537 = vrsqrt.f32 %v4418_v20  ;;  %v4408_v36 = vmul.f32 0.03125, %v4388_v35 }
0x1c7a   : > { %5539 = vrsqrt.f32 %v4415_v34  ;;  %v4397_v37 = vpop.xlane.xlu0 %4396 }
0x1c7b   : > { %v4416_v38 = vadd.f32 1e-05, %v4408_v36  ;;  %v4411_v39 = vmul.f32 0.03125, %v4397_v37 }
0x1c7d   : > { %5541 = vrsqrt.f32 %v4416_v38  ;;  %v4419_v40 = vadd.f32 1e-05, %v4411_v39 }
0x1c7e   : > { %v4400_v11 = vpop.xlane.xlu1 %4399  ;;  %v4403_v41 = vpop.xlane.xlu0 %4402 }
0x1c7f   : > { %5543 = vrsqrt.f32 %v4419_v40  ;;  %v4412_v17 = vmul.f32 0.03125, %v4400_v11  ;;  %v4413_v1 = vmul.f32 0.03125, %v4403_v41 }
0x1c81   : > { %v4420_v24 = vadd.f32 1e-05, %v4412_v17  ;;  %v4421_v22 = vadd.f32 1e-05, %v4413_v1 }
0x1c82   : > { %v5536_v23 = vpop.eup %5535  ;;  %v4406_v26 = vpop.xlane.xlu1 %4405 }
0x1c83   : > { %v4433_v19 = vmul.f32 %v5536_v23, %v6366_v10  ;;  %5545 = vrsqrt.f32 %v4420_v24  ;;  %v4414_v60 = vmul.f32 0.03125, %v4406_v26 }
0x1c84   : > { %5547 = vrsqrt.f32 %v4421_v22 }
0x1c85   : > { %v4448_v3 = vmul.f32 %v4851_v45, %v4433_v19  ;;  %v4422_v9 = vadd.f32 1e-05, %v4414_v60 }
0x1c86   : > { %v5538_v31 = vpop.eup %5537 }
0x1c87   : > { %v5540_v42 = vpop.eup %5539  ;;  %v4463_v44 = vadd.f32 %v4852_v28, %v4448_v3  ;;  %v4434_v0 = vmul.f32 %v5538_v31, %v6370_v25  ;;  %5549 = vrsqrt.f32 %v4422_v9 }
0x1c88   : > { %v4431_v46 = vmul.f32 %v5540_v42, %v6372_v43 }
0x1c89   : > { %4472 = vst.msk [vmem:[%s6411_s15 + $0x10] sm:$0xff] %vm1349_vm1, %v4463_v44  ;;  %v4449_v10 = vmul.f32 %v4851_v45, %v4434_v0 }
0x1c8a   : > { %v5542_v47 = vpop.eup %5541  ;;  %v4446_v49 = vmul.f32 %v4851_v45, %v4431_v46 }
0x1c8b   : > { %v4464_v50 = vadd.f32 %v4852_v28, %v4449_v10  ;;  %v4432_v52 = vmul.f32 %v5542_v47, %v6379_v51 }
0x1c8c   : > { %v5544_v53 = vpop.eup %5543  ;;  %v4461_v8 = vadd.f32 %v4852_v28, %v4446_v49 }
0x1c8d   : > { %4473 = vst.msk [vmem:[%s6411_s15 + $0x18] sm:$0xff] %vm1349_vm1, %v4464_v50  ;;  %v4447_v54 = vmul.f32 %v4851_v45, %v4432_v52  ;;  %v4435_v25 = vmul.f32 %v5544_v53, %v6383_v6 }
0x1c8e   : > { %4470 = vst.msk [vmem:[%s6411_s15] sm:$0xff] %vm1349_vm1, %v4461_v8 }
0x1c8f   : > { %v4462_v43 = vadd.f32 %v4852_v28, %v4447_v54  ;;  %v4450_v55 = vmul.f32 %v4851_v45, %v4435_v25 }
0x1c90   : > { %v5546_v29 = vpop.eup %5545 }
0x1c91   : > { %v5548_v56 = vpop.eup %5547  ;;  %4471 = vst.msk [vmem:[%s6411_s15 + $0x8] sm:$0xff] %vm1349_vm1, %v4462_v43  ;;  %v4465_v57 = vadd.f32 %v4852_v28, %v4450_v55  ;;  %v4436_v51 = vmul.f32 %v5546_v29, %v6390_v58 }
0x1c92   : > { %v4437_v59 = vmul.f32 %v5548_v56, %v6392_v61 }
0x1c93   : > { %4474 = vst.msk [vmem:[%s6411_s15 + $0x20] sm:$0xff] %vm1349_vm1, %v4465_v57  ;;  %v4451_v5 = vmul.f32 %v4851_v45, %v4436_v51 }
0x1c94   : > { %v5550_v6 = vpop.eup %5549  ;;  %v4452_v62 = vmul.f32 %v4851_v45, %v4437_v59 }
0x1c95   : > { %v4466_v63 = vadd.f32 %v4852_v28, %v4451_v5  ;;  %v4438_v4 = vmul.f32 %v5550_v6, %v6399_v13 }
0x1c96   : > { %v4467_v7 = vadd.f32 %v4852_v28, %v4452_v62 }
0x1c97   : > { %4475 = vst.msk [vmem:[%s6411_s15 + $0x28] sm:$0xff] %vm1349_vm1, %v4466_v63  ;;  %v4453_v12 = vmul.f32 %v4851_v45, %v4438_v4 }
0x1c98   : > { %4476 = vst.msk [vmem:[%s6411_s15 + $0x30] sm:$0xff] %vm1349_vm1, %v4467_v7 }
0x1c99   : > { %v4468_v14 = vadd.f32 %v4852_v28, %v4453_v12 }
0x1c9b   : > { %4477 = vst.msk [vmem:[%s6411_s15 + $0x38] sm:$0xff] %vm1349_vm1, %v4468_v14 }
0x1c9c PF: > { %s94_s7 = sadd.s32 1, %s5566_s7  }
0x1c9d   : > { %p91_p4 = scmp.ge.s32.totalorder %s94_s7, 4  }
0x1c9f   :  { %93 = sbr.rel (!%p91_p4) target bundleno = 76 (0x4c), region = 293 }

</bundles_post_ra>
